<compile_context>
chip_gen: v6e
topology: v6e:2x2x1
jax: 0.10.0
libtpu: 0.0.40
codegen_flags: <defaults>
</compile_context>

<pallas_src>
import jax
import jax.numpy as jnp
from jax.experimental import pallas as pl
from jax.experimental.pallas import tpu as pltpu

N = 9              # SPD matrix size (BiMap(9, 9))
NN = N * N         # 81 flattened features
LANE = 128         # lane-padded output width for the K1 matmul (unmasked stores)
EPS = 1e-4         # ReEig threshold (matches ReEigFunction.apply(x, 0.0001))
LOG_FLOOR = 1e-12  # safety floor before LogEig


# ------------------------------------------------------------------ Pallas kernels

def _bimap_flat_kernel(x_ref, k_ref, o_ref):
    # vec_r(W^T X W) = vec_r(X) @ kron(W, W): the whole batched congruence is ONE
    # (TB, 81) @ (81, 128) MXU matmul.  The weight's lanes 81..127 are zero, so the
    # output block is full-vreg wide and every store is an unmasked vst.
    o_ref[...] = jnp.dot(x_ref[...], k_ref[...], preferred_element_type=jnp.float32)


def _recon_body(p_ref, d, o_ref):
    # Batch-on-lane (SoA) symmetric reconstruction:
    #   o[i, k, :] = sum_j p[j, i, :] * d[j, :] * p[j, k, :]
    # Every term is a full-lane VPU multiply-add over TB samples (no per-sample 9x9 MXU
    # pushes, no 9-wide masked lane stores).  i/j loops are Python-unrolled (81 rank-1
    # terms); live vregs stay small (one (9, TB) accumulator + one (9, TB) column slab).
    kdim, tb = o_ref.shape[1], o_ref.shape[2]
    for i in range(N):
        acc = jnp.zeros((kdim, tb), dtype=jnp.float32)
        for j in range(N):
            pj = p_ref[j]                                    # (9, TB) contiguous tile group
            acc = acc + (pj[i:i + 1, :] * d[j:j + 1, :]) * pj
        o_ref[i] = acc


def _reeig_bimap_kernel(p_ref, s_ref, o_ref):
    # Y_b = P_b diag(max(s_b, eps)) P_b^T with P_b = W^T U_b (the following BiMap weight is
    # folded into the eigenvector matrix by the wrapper) == ReEig reconstruct + next BiMap.
    _recon_body(p_ref, jnp.maximum(s_ref[...], EPS), o_ref)


def _logeig_kernel(p_ref, s_ref, o_ref):
    # L_b = U_b diag(log s_b) U_b^T.  Flatten + Linear(81->2) + bias stay in XLA so the
    # kernel never emits a 2-lane (masked) output store.
    _recon_body(p_ref, jnp.log(jnp.maximum(s_ref[...], LOG_FLOOR)), o_ref)


# ------------------------------------------------------------------ tiling helpers

def _round_up(x, m):
    return ((x + m - 1) // m) * m


def _k1_tile(b):
    # A (tb, 81->128) f32 block is tiny vs VMEM, so take big tiles (amortize ~0.35us/step),
    # but keep >=2 "parallel" blocks once B is large enough so v7x's 2 TensorCores both work.
    if b <= 64:
        return b                                    # single full-extent block at tiny B
    return min(1024, _round_up(pl.cdiv(b, 2), 8))   # multiple-of-8 sublanes, >=2 blocks


def _soa_tile(b):
    # Lane-dense batch tiles for the SoA kernels: multiples of 128 lanes (unmasked stores)
    # and >=2 parallel blocks for large B; a single full-extent block for small B.
    if b <= 256:
        return b
    return min(512, _round_up(pl.cdiv(b, 2), 128))


def _parallel():
    return pltpu.CompilerParams(dimension_semantics=("parallel",))


# ------------------------------------------------------------------ pallas_call wrappers

def bimap_flat(x_flat, k_pad):
    b = x_flat.shape[0]
    tb = _k1_tile(b)
    bp = _round_up(b, tb)
    if bp != b:   # pad batch to a tile multiple: bounded VMEM, even grid, no fallback blob
        x_flat = jnp.pad(x_flat, ((0, bp - b), (0, 0)))
    out = pl.pallas_call(
        _bimap_flat_kernel,
        grid=(bp // tb,),
        in_specs=[pl.BlockSpec((tb, NN), lambda i: (i, 0)),
                  pl.BlockSpec((NN, LANE), lambda i: (0, 0))],
        out_specs=pl.BlockSpec((tb, LANE), lambda i: (i, 0)),
        out_shape=jax.ShapeDtypeStruct((bp, LANE), jnp.float32),
        compiler_params=_parallel(),
    )(x_flat, k_pad)
    return out[:b, :NN]


def _recon_call(kernel_fn, p_soa, s_soa):
    # p_soa: (9_eig, 9_row, B)  [p_soa[j, i, b] = P_b[i, j]];  s_soa: (9_eig, B)
    b = p_soa.shape[-1]
    tb = _soa_tile(b)
    bp = _round_up(b, tb)
    if bp != b:
        p_soa = jnp.pad(p_soa, ((0, 0), (0, 0), (0, bp - b)))
        s_soa = jnp.pad(s_soa, ((0, 0), (0, bp - b)), constant_values=1.0)
    out = pl.pallas_call(
        kernel_fn,
        grid=(bp // tb,),
        in_specs=[pl.BlockSpec((N, N, tb), lambda i: (0, 0, i)),
                  pl.BlockSpec((N, tb), lambda i: (0, i))],
        out_specs=pl.BlockSpec((N, N, tb), lambda i: (0, 0, i)),
        out_shape=jax.ShapeDtypeStruct((N, N, bp), jnp.float32),
        compiler_params=_parallel(),
    )(p_soa, s_soa)
    return out if bp == b else out[:, :, :b]


def reeig_bimap(p_soa, s_soa):
    return _recon_call(_reeig_bimap_kernel, p_soa, s_soa)


def logeig_recon(p_soa, s_soa):
    return _recon_call(_logeig_kernel, p_soa, s_soa)


# ------------------------------------------------------------------ plain-JAX glue (eigh / inv / Karcher mean)

def _sym_matrix_func(x, fn):
    s, u = jnp.linalg.eigh(x)
    return (u * fn(s)[..., None, :]) @ jnp.swapaxes(u, -1, -2)


def riemann_mean_classes(mats, weights, iters=15):
    # Per-class Karcher / Riemannian mean (pyriemann mean_covariance(metric='riemann')),
    # fixed number of fixed-point iterations, batched over classes via mask weights.
    # mats: (B, N, N) SPD;  weights: (C, B) {0,1} class masks  ->  (C, N, N) centroids.
    cnt = jnp.sum(weights, axis=1)
    wn = weights / jnp.maximum(cnt, 1.0)[:, None]
    eye = jnp.eye(N, dtype=mats.dtype)
    nonempty = (cnt > 0.0)[:, None, None]
    c = jnp.einsum('cb,bij->cij', wn, mats)
    c = jnp.where(nonempty, c, eye)
    for _ in range(iters):
        c_sqrt = _sym_matrix_func(c, jnp.sqrt)
        c_isqrt = _sym_matrix_func(c, lambda v: 1.0 / jnp.sqrt(v))
        inner = jnp.einsum('cij,bjk,ckl->cbil', c_isqrt, mats, c_isqrt)
        logs = _sym_matrix_func(inner, jnp.log)
        j = jnp.einsum('cb,cbij->cij', wn, logs)
        c = c_sqrt @ _sym_matrix_func(j, jnp.exp) @ c_sqrt
        c = jnp.where(nonempty, c, eye)
    return c


def compute_center_loss(x, y, num_classes=2):
    # Mirrors SRLN.compute_centerLoss: per-class Riemannian centroid + summed Jeffrey
    # divergences, normalized by batch size.  Class grouping uses masks (num_classes is a
    # static parameter) so there is no host sync / per-class Python loop; jit-safe.
    b = x.shape[0]
    weights = (y[None, :] == jnp.arange(num_classes, dtype=y.dtype)[:, None]).astype(x.dtype)
    cent = riemann_mean_classes(x, weights)                 # (C, N, N)
    c_per = cent[y]                                         # (B, N, N)
    # TODO(synk): 9x9 SPD eigh / inverse have no clean Pallas primitive; kept in XLA.
    x_inv = jnp.linalg.inv(x)
    c_inv = jnp.linalg.inv(cent)[y]
    # J(A, C) = 0.5*tr(C^{-1}A) + 0.5*tr(A^{-1}C) - n ; tr(AB) = sum(A*B) for symmetric A, B.
    total = 0.5 * (jnp.sum(c_inv * x) + jnp.sum(x_inv * c_per)) - jnp.float32(b * N)
    return total / b


def init_params(key):
    ks = jax.random.split(key, 5)

    def stiefel(k):  # semi-orthogonal BiMap weight (deterministic QR init)
        q, _ = jnp.linalg.qr(jax.random.normal(k, (N, N), dtype=jnp.float32))
        return q.astype(jnp.float32)

    w1, w2, w3 = stiefel(ks[0]), stiefel(ks[1]), stiefel(ks[2])
    # TODO(synk): __init__ declares nn.Linear(9, 2) but forward flattens 9x9 SPD matrices
    # to 81 features; in_features = 81 is used so the forward is actually runnable.
    wl = 0.05 * jax.random.normal(ks[3], (NN, 2), dtype=jnp.float32)
    bl = 0.05 * jax.random.normal(ks[4], (1, 2), dtype=jnp.float32)
    return w1, w2, w3, wl, bl


# ------------------------------------------------------------------ forward

def srln_forward(params, x, y, num_classes=2):
    w1, w2, w3, wl, bl = params
    b = x.shape[0]

    # K1: bimap1 as one flat MXU matmul (kron trick); kron weight zero-padded to 128 lanes.
    k1 = jnp.pad(jnp.kron(w1, w1), ((0, 0), (0, LANE - NN)))
    y1 = bimap_flat(x.reshape(b, NN), k1).reshape(b, N, N)

    # ReEig eigh in XLA; fold bimap2's weight into the eigenvectors (P = W^T U) and emit it
    # directly in batch-on-lane (SoA) order for the Pallas reconstruct kernel.
    s1, u1 = jnp.linalg.eigh(y1)            # TODO(synk): no Pallas eigensolver; eigh in XLA
    p2 = jnp.einsum('mi,bmj->jib', w2, u1)  # p2[j, i, b] = (W2^T U1)[b, i, j]
    y2 = jnp.transpose(reeig_bimap(p2, s1.T), (2, 0, 1))    # ReEig + bimap2 (fused kernel)

    s2, u2 = jnp.linalg.eigh(y2)
    p3 = jnp.einsum('mi,bmj->jib', w3, u2)
    y3 = jnp.transpose(reeig_bimap(p3, s2.T), (2, 0, 1))    # ReEig + bimap3 (fused kernel)

    cl = compute_center_loss(y3, y, num_classes)            # center loss on pre-LogEig feats

    s3, u3 = jnp.linalg.eigh(y3)
    l_soa = logeig_recon(jnp.transpose(u3, (2, 1, 0)), s3.T)  # (9, 9, B): L_b[i, k]
    # Row-major flatten + Linear in XLA: the 81x2 matmul and bias fuse for free, and the
    # Pallas kernel never emits a 2-lane (masked) store.
    feats = jnp.transpose(l_soa, (2, 0, 1)).reshape(b, NN)
    logits = feats @ wl + bl
    return logits, cl


# ------------------------------------------------------------------ main

if __name__ == "__main__":
    key = jax.random.PRNGKey(0)
    kx, kp = jax.random.split(key)

    B = 8
    a = jax.random.normal(kx, (B, N, N), dtype=jnp.float32)
    # deterministic batch of SPD matrices
    x = jnp.einsum('bij,bkj->bik', a, a) / N + 0.5 * jnp.eye(N, dtype=jnp.float32)
    y = jnp.array([0, 0, 1, 1, 0, 1, 0, 1], dtype=jnp.int32)

    params = init_params(kp)
    fwd = jax.jit(srln_forward, static_argnames=("num_classes",))
    logits, cl = fwd(params, x, y, num_classes=2)
    jax.block_until_ready((logits, cl))

    assert logits.shape == (B, 2)
    assert bool(jnp.isfinite(cl)) and bool(jnp.all(jnp.isfinite(logits)))
    print("KERNEL_OK")
</pallas_src>

<mosaic_0001>
module attributes {stable_mosaic.version = 11 : i64} {
  func.func @_bimap_flat_kernel(%arg0: i32, %arg1: memref<8x81xf32, #tpu.memory_space<vmem>>, %arg2: memref<81x128xf32, #tpu.memory_space<vmem>>, %arg3: memref<8x128xf32, #tpu.memory_space<vmem>>) attributes {dimension_semantics = [#tpu.dimension_semantics<parallel>], iteration_bounds = array<i64: 1>, scalar_prefetch = 0 : i64, scratch_operands = 0 : i64, tpu.core_type = #tpu.core_type<tc>, window_params = [{transform_indices = @transform_0, window_bounds = array<i64: 8, 81>}, {pipeline_mode = #tpu.pipeline_mode<synchronous>, transform_indices = @transform_1, window_bounds = array<i64: 81, 128>}, {transform_indices = @transform_2, window_bounds = array<i64: 8, 128>}]} {
    %c0 = arith.constant 0 : index
    %c0_0 = arith.constant 0 : index
    %0 = vector.load %arg1[%c0, %c0_0] : memref<8x81xf32, #tpu.memory_space<vmem>>, vector<8x81xf32>
    %c0_1 = arith.constant 0 : index
    %c0_2 = arith.constant 0 : index
    %1 = vector.load %arg2[%c0_1, %c0_2] : memref<81x128xf32, #tpu.memory_space<vmem>>, vector<81x128xf32>
    %cst = arith.constant dense<0.000000e+00> : vector<8x128xf32>
    %2 = tpu.matmul %0, %1, %cst {dimension_numbers = #tpu.dot_dimension_numbers<[1], [0], [0], [1], [0, 0, 1, 1], [], []>} : vector<8x81xf32>, vector<81x128xf32>, vector<8x128xf32> -> vector<8x128xf32>
    %c0_3 = arith.constant 0 : index
    %c0_4 = arith.constant 0 : index
    %3 = vector.load %arg3[%c0_3, %c0_4] : memref<8x128xf32, #tpu.memory_space<vmem>>, vector<8x128xf32>
    tpu.vector_store %arg3[%c0_3, %c0_4], %2 {strides = array<i32>} : memref<8x128xf32, #tpu.memory_space<vmem>>, vector<8x128xf32>,
    return
  }
  func.func @transform_0(%arg0: i32) -> (i32, i32) {
    %c0_i32 = arith.constant 0 : i32
    %c0_i32_0 = arith.constant 0 : i32
    return %arg0, %c0_i32 : i32, i32
  }
  func.func @transform_1(%arg0: i32) -> (i32, i32) {
    %c0_i32 = arith.constant 0 : i32
    %c0_i32_0 = arith.constant 0 : i32
    %c0_i32_1 = arith.constant 0 : i32
    return %c0_i32, %c0_i32_0 : i32, i32
  }
  func.func @transform_2(%arg0: i32) -> (i32, i32) {
    %c0_i32 = arith.constant 0 : i32
    %c0_i32_0 = arith.constant 0 : i32
    return %arg0, %c0_i32 : i32, i32
  }
}

module attributes {stable_mosaic.version = 11 : i64} {
  func.func @_reeig_bimap_kernel(%arg0: i32, %arg1: memref<9x9x8xf32, #tpu.memory_space<vmem>>, %arg2: memref<9x8xf32, #tpu.memory_space<vmem>>, %arg3: memref<9x9x8xf32, #tpu.memory_space<vmem>>) attributes {dimension_semantics = [#tpu.dimension_semantics<parallel>], iteration_bounds = array<i64: 1>, scalar_prefetch = 0 : i64, scratch_operands = 0 : i64, tpu.core_type = #tpu.core_type<tc>, window_params = [{transform_indices = @transform_0, window_bounds = array<i64: 9, 9, 8>}, {transform_indices = @transform_1, window_bounds = array<i64: 9, 8>}, {transform_indices = @transform_2, window_bounds = array<i64: 9, 9, 8>}]} {
    %c0 = arith.constant 0 : index
    %c0_0 = arith.constant 0 : index
    %0 = vector.load %arg2[%c0, %c0_0] : memref<9x8xf32, #tpu.memory_space<vmem>>, vector<9x8xf32>
    %cst = arith.constant 9.99999974E-5 : f32
    %1 = vector.broadcast %cst : f32 to vector<9x8xf32>
    %2 = arith.maximumf %0, %1 : vector<9x8xf32>
    %cst_1 = arith.constant 0.000000e+00 : f32
    %3 = vector.broadcast %cst_1 : f32 to vector<9x8xf32>
    %c0_2 = arith.constant 0 : index
    %c0_3 = arith.constant 0 : index
    %c0_4 = arith.constant 0 : index
    %4 = vector.load %arg1[%c0_2, %c0_3, %c0_4] : memref<9x9x8xf32, #tpu.memory_space<vmem>>, vector<1x9x8xf32>
    %5 = vector.shape_cast %4 : vector<1x9x8xf32> to vector<9x8xf32>
    %6 = vector.extract_strided_slice %5 {offsets = [0, 0], sizes = [1, 8], strides = [1, 1]} : vector<9x8xf32> to vector<1x8xf32>
    %7 = vector.extract_strided_slice %2 {offsets = [0, 0], sizes = [1, 8], strides = [1, 1]} : vector<9x8xf32> to vector<1x8xf32>
    %8 = arith.mulf %6, %7 : vector<1x8xf32>
    %9 = vector.broadcast %8 : vector<1x8xf32> to vector<9x8xf32>
    %10 = arith.mulf %9, %5 : vector<9x8xf32>
    %11 = arith.addf %3, %10 : vector<9x8xf32>
    %c1 = arith.constant 1 : index
    %c0_5 = arith.constant 0 : index
    %c0_6 = arith.constant 0 : index
    %12 = vector.load %arg1[%c1, %c0_5, %c0_6] : memref<9x9x8xf32, #tpu.memory_space<vmem>>, vector<1x9x8xf32>
    %13 = vector.shape_cast %12 : vector<1x9x8xf32> to vector<9x8xf32>
    %14 = vector.extract_strided_slice %13 {offsets = [0, 0], sizes = [1, 8], strides = [1, 1]} : vector<9x8xf32> to vector<1x8xf32>
    %15 = vector.extract_strided_slice %2 {offsets = [1, 0], sizes = [1, 8], strides = [1, 1]} : vector<9x8xf32> to vector<1x8xf32>
    %16 = arith.mulf %14, %15 : vector<1x8xf32>
    %17 = vector.broadcast %16 : vector<1x8xf32> to vector<9x8xf32>
    %18 = arith.mulf %17, %13 : vector<9x8xf32>
    %19 = arith.addf %11, %18 : vector<9x8xf32>
    %c2 = arith.constant 2 : index
    %c0_7 = arith.constant 0 : index
    %c0_8 = arith.constant 0 : index
    %20 = vector.load %arg1[%c2, %c0_7, %c0_8] : memref<9x9x8xf32, #tpu.memory_space<vmem>>, vector<1x9x8xf32>
    %21 = vector.shape_cast %20 : vector<1x9x8xf32> to vector<9x8xf32>
    %22 = vector.extract_strided_slice %21 {offsets = [0, 0], sizes = [1, 8], strides = [1, 1]} : vector<9x8xf32> to vector<1x8xf32>
    %23 = vector.extract_strided_slice %2 {offsets = [2, 0], sizes = [1, 8], strides = [1, 1]} : vector<9x8xf32> to vector<1x8xf32>
    %24 = arith.mulf %22, %23 : vector<1x8xf32>
    %25 = vector.broadcast %24 : vector<1x8xf32> to vector<9x8xf32>
    %26 = arith.mulf %25, %21 : vector<9x8xf32>
    %27 = arith.addf %19, %26 : vector<9x8xf32>
    %c3 = arith.constant 3 : index
    %c0_9 = arith.constant 0 : index
    %c0_10 = arith.constant 0 : index
    %28 = vector.load %arg1[%c3, %c0_9, %c0_10] : memref<9x9x8xf32, #tpu.memory_space<vmem>>, vector<1x9x8xf32>
    %29 = vector.shape_cast %28 : vector<1x9x8xf32> to vector<9x8xf32>
    %30 = vector.extract_strided_slice %29 {offsets = [0, 0], sizes = [1, 8], strides = [1, 1]} : vector<9x8xf32> to vector<1x8xf32>
    %31 = vector.extract_strided_slice %2 {offsets = [3, 0], sizes = [1, 8], strides = [1, 1]} : vector<9x8xf32> to vector<1x8xf32>
    %32 = arith.mulf %30, %31 : vector<1x8xf32>
    %33 = vector.broadcast %32 : vector<1x8xf32> to vector<9x8xf32>
    %34 = arith.mulf %33, %29 : vector<9x8xf32>
    %35 = arith.addf %27, %34 : vector<9x8xf32>
    %c4 = arith.constant 4 : index
    %c0_11 = arith.constant 0 : index
    %c0_12 = arith.constant 0 : index
    %36 = vector.load %arg1[%c4, %c0_11, %c0_12] : memref<9x9x8xf32, #tpu.memory_space<vmem>>, vector<1x9x8xf32>
    %37 = vector.shape_cast %36 : vector<1x9x8xf32> to vector<9x8xf32>
    %38 = vector.extract_strided_slice %37 {offsets = [0, 0], sizes = [1, 8], strides = [1, 1]} : vector<9x8xf32> to vector<1x8xf32>
    %39 = vector.extract_strided_slice %2 {offsets = [4, 0], sizes = [1, 8], strides = [1, 1]} : vector<9x8xf32> to vector<1x8xf32>
    %40 = arith.mulf %38, %39 : vector<1x8xf32>
    %41 = vector.broadcast %40 : vector<1x8xf32> to vector<9x8xf32>
    %42 = arith.mulf %41, %37 : vector<9x8xf32>
    %43 = arith.addf %35, %42 : vector<9x8xf32>
    %c5 = arith.constant 5 : index
    %c0_13 = arith.constant 0 : index
    %c0_14 = arith.constant 0 : index
    %44 = vector.load %arg1[%c5, %c0_13, %c0_14] : memref<9x9x8xf32, #tpu.memory_space<vmem>>, vector<1x9x8xf32>
    %45 = vector.shape_cast %44 : vector<1x9x8xf32> to vector<9x8xf32>
    %46 = vector.extract_strided_slice %45 {offsets = [0, 0], sizes = [1, 8], strides = [1, 1]} : vector<9x8xf32> to vector<1x8xf32>
    %47 = vector.extract_strided_slice %2 {offsets = [5, 0], sizes = [1, 8], strides = [1, 1]} : vector<9x8xf32> to vector<1x8xf32>
    %48 = arith.mulf %46, %47 : vector<1x8xf32>
    %49 = vector.broadcast %48 : vector<1x8xf32> to vector<9x8xf32>
    %50 = arith.mulf %49, %45 : vector<9x8xf32>
    %51 = arith.addf %43, %50 : vector<9x8xf32>
    %c6 = arith.constant 6 : index
    %c0_15 = arith.constant 0 : index
    %c0_16 = arith.constant 0 : index
    %52 = vector.load %arg1[%c6, %c0_15, %c0_16] : memref<9x9x8xf32, #tpu.memory_space<vmem>>, vector<1x9x8xf32>
    %53 = vector.shape_cast %52 : vector<1x9x8xf32> to vector<9x8xf32>
    %54 = vector.extract_strided_slice %53 {offsets = [0, 0], sizes = [1, 8], strides = [1, 1]} : vector<9x8xf32> to vector<1x8xf32>
    %55 = vector.extract_strided_slice %2 {offsets = [6, 0], sizes = [1, 8], strides = [1, 1]} : vector<9x8xf32> to vector<1x8xf32>
    %56 = arith.mulf %54, %55 : vector<1x8xf32>
    %57 = vector.broadcast %56 : vector<1x8xf32> to vector<9x8xf32>
    %58 = arith.mulf %57, %53 : vector<9x8xf32>
    %59 = arith.addf %51, %58 : vector<9x8xf32>
    %c7 = arith.constant 7 : index
    %c0_17 = arith.constant 0 : index
    %c0_18 = arith.constant 0 : index
    %60 = vector.load %arg1[%c7, %c0_17, %c0_18] : memref<9x9x8xf32, #tpu.memory_space<vmem>>, vector<1x9x8xf32>
    %61 = vector.shape_cast %60 : vector<1x9x8xf32> to vector<9x8xf32>
    %62 = vector.extract_strided_slice %61 {offsets = [0, 0], sizes = [1, 8], strides = [1, 1]} : vector<9x8xf32> to vector<1x8xf32>
    %63 = vector.extract_strided_slice %2 {offsets = [7, 0], sizes = [1, 8], strides = [1, 1]} : vector<9x8xf32> to vector<1x8xf32>
    %64 = arith.mulf %62, %63 : vector<1x8xf32>
    %65 = vector.broadcast %64 : vector<1x8xf32> to vector<9x8xf32>
    %66 = arith.mulf %65, %61 : vector<9x8xf32>
    %67 = arith.addf %59, %66 : vector<9x8xf32>
    %c8 = arith.constant 8 : index
    %c0_19 = arith.constant 0 : index
    %c0_20 = arith.constant 0 : index
    %68 = vector.load %arg1[%c8, %c0_19, %c0_20] : memref<9x9x8xf32, #tpu.memory_space<vmem>>, vector<1x9x8xf32>
    %69 = vector.shape_cast %68 : vector<1x9x8xf32> to vector<9x8xf32>
    %70 = vector.extract_strided_slice %69 {offsets = [0, 0], sizes = [1, 8], strides = [1, 1]} : vector<9x8xf32> to vector<1x8xf32>
    %71 = vector.extract_strided_slice %2 {offsets = [8, 0], sizes = [1, 8], strides = [1, 1]} : vector<9x8xf32> to vector<1x8xf32>
    %72 = arith.mulf %70, %71 : vector<1x8xf32>
    %73 = vector.broadcast %72 : vector<1x8xf32> to vector<9x8xf32>
    %74 = arith.mulf %73, %69 : vector<9x8xf32>
    %75 = arith.addf %67, %74 : vector<9x8xf32>
    %c0_21 = arith.constant 0 : index
    %c0_22 = arith.constant 0 : index
    %c0_23 = arith.constant 0 : index
    %76 = vector.load %arg3[%c0_21, %c0_22, %c0_23] : memref<9x9x8xf32, #tpu.memory_space<vmem>>, vector<1x9x8xf32>
    %77 = vector.shape_cast %76 : vector<1x9x8xf32> to vector<9x8xf32>
    %78 = vector.shape_cast %75 : vector<9x8xf32> to vector<1x9x8xf32>
    tpu.vector_store %arg3[%c0_21, %c0_22, %c0_23], %78 {strides = array<i32>} : memref<9x9x8xf32, #tpu.memory_space<vmem>>, vector<1x9x8xf32>,
    %cst_24 = arith.constant 0.000000e+00 : f32
    %79 = vector.broadcast %cst_24 : f32 to vector<9x8xf32>
    %c0_25 = arith.constant 0 : index
    %c0_26 = arith.constant 0 : index
    %c0_27 = arith.constant 0 : index
    %80 = vector.load %arg1[%c0_25, %c0_26, %c0_27] : memref<9x9x8xf32, #tpu.memory_space<vmem>>, vector<1x9x8xf32>
    %81 = vector.shape_cast %80 : vector<1x9x8xf32> to vector<9x8xf32>
    %82 = vector.extract_strided_slice %81 {offsets = [1, 0], sizes = [1, 8], strides = [1, 1]} : vector<9x8xf32> to vector<1x8xf32>
    %83 = vector.extract_strided_slice %2 {offsets = [0, 0], sizes = [1, 8], strides = [1, 1]} : vector<9x8xf32> to vector<1x8xf32>
    %84 = arith.mulf %82, %83 : vector<1x8xf32>
    %85 = vector.broadcast %84 : vector<1x8xf32> to vector<9x8xf32>
    %86 = arith.mulf %85, %81 : vector<9x8xf32>
    %87 = arith.addf %79, %86 : vector<9x8xf32>
    %c1_28 = arith.constant 1 : index
    %c0_29 = arith.constant 0 : index
    %c0_30 = arith.constant 0 : index
    %88 = vector.load %arg1[%c1_28, %c0_29, %c0_30] : memref<9x9x8xf32, #tpu.memory_space<vmem>>, vector<1x9x8xf32>
    %89 = vector.shape_cast %88 : vector<1x9x8xf32> to vector<9x8xf32>
    %90 = vector.extract_strided_slice %89 {offsets = [1, 0], sizes = [1, 8], strides = [1, 1]} : vector<9x8xf32> to vector<1x8xf32>
    %91 = vector.extract_strided_slice %2 {offsets = [1, 0], sizes = [1, 8], strides = [1, 1]} : vector<9x8xf32> to vector<1x8xf32>
    %92 = arith.mulf %90, %91 : vector<1x8xf32>
    %93 = vector.broadcast %92 : vector<1x8xf32> to vector<9x8xf32>
    %94 = arith.mulf %93, %89 : vector<9x8xf32>
    %95 = arith.addf %87, %94 : vector<9x8xf32>
    %c2_31 = arith.constant 2 : index
    %c0_32 = arith.constant 0 : index
    %c0_33 = arith.constant 0 : index
    %96 = vector.load %arg1[%c2_31, %c0_32, %c0_33] : memref<9x9x8xf32, #tpu.memory_space<vmem>>, vector<1x9x8xf32>
    %97 = vector.shape_cast %96 : vector<1x9x8xf32> to vector<9x8xf32>
    %98 = vector.extract_strided_slice %97 {offsets = [1, 0], sizes = [1, 8], strides = [1, 1]} : vector<9x8xf32> to vector<1x8xf32>
    %99 = vector.extract_strided_slice %2 {offsets = [2, 0], sizes = [1, 8], strides = [1, 1]} : vector<9x8xf32> to vector<1x8xf32>
    %100 = arith.mulf %98, %99 : vector<1x8xf32>
    %101 = vector.broadcast %100 : vector<1x8xf32> to vector<9x8xf32>
    %102 = arith.mulf %101, %97 : vector<9x8xf32>
    %103 = arith.addf %95, %102 : vector<9x8xf32>
    %c3_34 = arith.constant 3 : index
    %c0_35 = arith.constant 0 : index
    %c0_36 = arith.constant 0 : index
    %104 = vector.load %arg1[%c3_34, %c0_35, %c0_36] : memref<9x9x8xf32, #tpu.memory_space<vmem>>, vector<1x9x8xf32>
    %105 = vector.shape_cast %104 : vector<1x9x8xf32> to vector<9x8xf32>
    %106 = vector.extract_strided_slice %105 {offsets = [1, 0], sizes = [1, 8], strides = [1, 1]} : vector<9x8xf32> to vector<1x8xf32>
    %107 = vector.extract_strided_slice %2 {offsets = [3, 0], sizes = [1, 8], strides = [1, 1]} : vector<9x8xf32> to vector<1x8xf32>
    %108 = arith.mulf %106, %107 : vector<1x8xf32>
    %109 = vector.broadcast %108 : vector<1x8xf32> to vector<9x8xf32>
    %110 = arith.mulf %109, %105 : vector<9x8xf32>
    %111 = arith.addf %103, %110 : vector<9x8xf32>
    %c4_37 = arith.constant 4 : index
    %c0_38 = arith.constant 0 : index
    %c0_39 = arith.constant 0 : index
    %112 = vector.load %arg1[%c4_37, %c0_38, %c0_39] : memref<9x9x8xf32, #tpu.memory_space<vmem>>, vector<1x9x8xf32>
    %113 = vector.shape_cast %112 : vector<1x9x8xf32> to vector<9x8xf32>
    %114 = vector.extract_strided_slice %113 {offsets = [1, 0], sizes = [1, 8], strides = [1, 1]} : vector<9x8xf32> to vector<1x8xf32>
    %115 = vector.extract_strided_slice %2 {offsets = [4, 0], sizes = [1, 8], strides = [1, 1]} : vector<9x8xf32> to vector<1x8xf32>
    %116 = arith.mulf %114, %115 : vector<1x8xf32>
    %117 = vector.broadcast %116 : vector<1x8xf32> to vector<9x8xf32>
    %118 = arith.mulf %117, %113 : vector<9x8xf32>
    %119 = arith.addf %111, %118 : vector<9x8xf32>
    %c5_40 = arith.constant 5 : index
    %c0_41 = arith.constant 0 : index
    %c0_42 = arith.constant 0 : index
    %120 = vector.load %arg1[%c5_40, %c0_41, %c0_42] : memref<9x9x8xf32, #tpu.memory_space<vmem>>, vector<1x9x8xf32>
    %121 = vector.shape_cast %120 : vector<1x9x8xf32> to vector<9x8xf32>
    %122 = vector.extract_strided_slice %121 {offsets = [1, 0], sizes = [1, 8], strides = [1, 1]} : vector<9x8xf32> to vector<1x8xf32>
    %123 = vector.extract_strided_slice %2 {offsets = [5, 0], sizes = [1, 8], strides = [1, 1]} : vector<9x8xf32> to vector<1x8xf32>
    %124 = arith.mulf %122, %123 : vector<1x8xf32>
    %125 = vector.broadcast %124 : vector<1x8xf32> to vector<9x8xf32>
    %126 = arith.mulf %125, %121 : vector<9x8xf32>
    %127 = arith.addf %119, %126 : vector<9x8xf32>
    %c6_43 = arith.constant 6 : index
    %c0_44 = arith.constant 0 : index
    %c0_45 = arith.constant 0 : index
    %128 = vector.load %arg1[%c6_43, %c0_44, %c0_45] : memref<9x9x8xf32, #tpu.memory_space<vmem>>, vector<1x9x8xf32>
    %129 = vector.shape_cast %128 : vector<1x9x8xf32> to vector<9x8xf32>
    %130 = vector.extract_strided_slice %129 {offsets = [1, 0], sizes = [1, 8], strides = [1, 1]} : vector<9x8xf32> to vector<1x8xf32>
    %131 = vector.extract_strided_slice %2 {offsets = [6, 0], sizes = [1, 8], strides = [1, 1]} : vector<9x8xf32> to vector<1x8xf32>
    %132 = arith.mulf %130, %131 : vector<1x8xf32>
    %133 = vector.broadcast %132 : vector<1x8xf32> to vector<9x8xf32>
    %134 = arith.mulf %133, %129 : vector<9x8xf32>
    %135 = arith.addf %127, %134 : vector<9x8xf32>
    %c7_46 = arith.constant 7 : index
    %c0_47 = arith.constant 0 : index
    %c0_48 = arith.constant 0 : index
    %136 = vector.load %arg1[%c7_46, %c0_47, %c0_48] : memref<9x9x8xf32, #tpu.memory_space<vmem>>, vector<1x9x8xf32>
    %137 = vector.shape_cast %136 : vector<1x9x8xf32> to vector<9x8xf32>
    %138 = vector.extract_strided_slice %137 {offsets = [1, 0], sizes = [1, 8], strides = [1, 1]} : vector<9x8xf32> to vector<1x8xf32>
    %139 = vector.extract_strided_slice %2 {offsets = [7, 0], sizes = [1, 8], strides = [1, 1]} : vector<9x8xf32> to vector<1x8xf32>
    %140 = arith.mulf %138, %139 : vector<1x8xf32>
    %141 = vector.broadcast %140 : vector<1x8xf32> to vector<9x8xf32>
    %142 = arith.mulf %141, %137 : vector<9x8xf32>
    %143 = arith.addf %135, %142 : vector<9x8xf32>
    %c8_49 = arith.constant 8 : index
    %c0_50 = arith.constant 0 : index
    %c0_51 = arith.constant 0 : index
    %144 = vector.load %arg1[%c8_49, %c0_50, %c0_51] : memref<9x9x8xf32, #tpu.memory_space<vmem>>, vector<1x9x8xf32>
    %145 = vector.shape_cast %144 : vector<1x9x8xf32> to vector<9x8xf32>
    %146 = vector.extract_strided_slice %145 {offsets = [1, 0], sizes = [1, 8], strides = [1, 1]} : vector<9x8xf32> to vector<1x8xf32>
    %147 = vector.extract_strided_slice %2 {offsets = [8, 0], sizes = [1, 8], strides = [1, 1]} : vector<9x8xf32> to vector<1x8xf32>
    %148 = arith.mulf %146, %147 : vector<1x8xf32>
    %149 = vector.broadcast %148 : vector<1x8xf32> to vector<9x8xf32>
    %150 = arith.mulf %149, %145 : vector<9x8xf32>
    %151 = arith.addf %143, %150 : vector<9x8xf32>
    %c1_52 = arith.constant 1 : index
    %c0_53 = arith.constant 0 : index
    %c0_54 = arith.constant 0 : index
    %152 = vector.load %arg3[%c1_52, %c0_53, %c0_54] : memref<9x9x8xf32, #tpu.memory_space<vmem>>, vector<1x9x8xf32>
    %153 = vector.shape_cast %152 : vector<1x9x8xf32> to vector<9x8xf32>
    %154 = vector.shape_cast %151 : vector<9x8xf32> to vector<1x9x8xf32>
    tpu.vector_store %arg3[%c1_52, %c0_53, %c0_54], %154 {strides = array<i32>} : memref<9x9x8xf32, #tpu.memory_space<vmem>>, vector<1x9x8xf32>,
    %cst_55 = arith.constant 0.000000e+00 : f32
    %155 = vector.broadcast %cst_55 : f32 to vector<9x8xf32>
    %c0_56 = arith.constant 0 : index
    %c0_57 = arith.constant 0 : index
    %c0_58 = arith.constant 0 : index
    %156 = vector.load %arg1[%c0_56, %c0_57, %c0_58] : memref<9x9x8xf32, #tpu.memory_space<vmem>>, vector<1x9x8xf32>
    %157 = vector.shape_cast %156 : vector<1x9x8xf32> to vector<9x8xf32>
    %158 = vector.extract_strided_slice %157 {offsets = [2, 0], sizes = [1, 8], strides = [1, 1]} : vector<9x8xf32> to vector<1x8xf32>
    %159 = vector.extract_strided_slice %2 {offsets = [0, 0], sizes = [1, 8], strides = [1, 1]} : vector<9x8xf32> to vector<1x8xf32>
    %160 = arith.mulf %158, %159 : vector<1x8xf32>
    %161 = vector.broadcast %160 : vector<1x8xf32> to vector<9x8xf32>
    %162 = arith.mulf %161, %157 : vector<9x8xf32>
    %163 = arith.addf %155, %162 : vector<9x8xf32>
    %c1_59 = arith.constant 1 : index
    %c0_60 = arith.constant 0 : index
    %c0_61 = arith.constant 0 : index
    %164 = vector.load %arg1[%c1_59, %c0_60, %c0_61] : memref<9x9x8xf32, #tpu.memory_space<vmem>>, vector<1x9x8xf32>
    %165 = vector.shape_cast %164 : vector<1x9x8xf32> to vector<9x8xf32>
    %166 = vector.extract_strided_slice %165 {offsets = [2, 0], sizes = [1, 8], strides = [1, 1]} : vector<9x8xf32> to vector<1x8xf32>
    %167 = vector.extract_strided_slice %2 {offsets = [1, 0], sizes = [1, 8], strides = [1, 1]} : vector<9x8xf32> to vector<1x8xf32>
    %168 = arith.mulf %166, %167 : vector<1x8xf32>
    %169 = vector.broadcast %168 : vector<1x8xf32> to vector<9x8xf32>
    %170 = arith.mulf %169, %165 : vector<9x8xf32>
    %171 = arith.addf %163, %170 : vector<9x8xf32>
    %c2_62 = arith.constant 2 : index
    %c0_63 = arith.constant 0 : index
    %c0_64 = arith.constant 0 : index
    %172 = vector.load %arg1[%c2_62, %c0_63, %c0_64] : memref<9x9x8xf32, #tpu.memory_space<vmem>>, vector<1x9x8xf32>
    %173 = vector.shape_cast %172 : vector<1x9x8xf32> to vector<9x8xf32>
    %174 = vector.extract_strided_slice %173 {offsets = [2, 0], sizes = [1, 8], strides = [1, 1]} : vector<9x8xf32> to vector<1x8xf32>
    %175 = vector.extract_strided_slice %2 {offsets = [2, 0], sizes = [1, 8], strides = [1, 1]} : vector<9x8xf32> to vector<1x8xf32>
    %176 = arith.mulf %174, %175 : vector<1x8xf32>
    %177 = vector.broadcast %176 : vector<1x8xf32> to vector<9x8xf32>
    %178 = arith.mulf %177, %173 : vector<9x8xf32>
    %179 = arith.addf %171, %178 : vector<9x8xf32>
    %c3_65 = arith.constant 3 : index
    %c0_66 = arith.constant 0 : index
    %c0_67 = arith.constant 0 : index
    %180 = vector.load %arg1[%c3_65, %c0_66, %c0_67] : memref<9x9x8xf32, #tpu.memory_space<vmem>>, vector<1x9x8xf32>
    %181 = vector.shape_cast %180 : vector<1x9x8xf32> to vector<9x8xf32>
    %182 = vector.extract_strided_slice %181 {offsets = [2, 0], sizes = [1, 8], strides = [1, 1]} : vector<9x8xf32> to vector<1x8xf32>
    %183 = vector.extract_strided_slice %2 {offsets = [3, 0], sizes = [1, 8], strides = [1, 1]} : vector<9x8xf32> to vector<1x8xf32>
    %184 = arith.mulf %182, %183 : vector<1x8xf32>
    %185 = vector.broadcast %184 : vector<1x8xf32> to vector<9x8xf32>
    %186 = arith.mulf %185, %181 : vector<9x8xf32>
    %187 = arith.addf %179, %186 : vector<9x8xf32>
    %c4_68 = arith.constant 4 : index
    %c0_69 = arith.constant 0 : index
    %c0_70 = arith.constant 0 : index
    %188 = vector.load %arg1[%c4_68, %c0_69, %c0_70] : memref<9x9x8xf32, #tpu.memory_space<vmem>>, vector<1x9x8xf32>
    %189 = vector.shape_cast %188 : vector<1x9x8xf32> to vector<9x8xf32>
    %190 = vector.extract_strided_slice %189 {offsets = [2, 0], sizes = [1, 8], strides = [1, 1]} : vector<9x8xf32> to vector<1x8xf32>
    %191 = vector.extract_strided_slice %2 {offsets = [4, 0], sizes = [1, 8], strides = [1, 1]} : vector<9x8xf32> to vector<1x8xf32>
    %192 = arith.mulf %190, %191 : vector<1x8xf32>
    %193 = vector.broadcast %192 : vector<1x8xf32> to vector<9x8xf32>
    %194 = arith.mulf %193, %189 : vector<9x8xf32>
    %195 = arith.addf %187, %194 : vector<9x8xf32>
    %c5_71 = arith.constant 5 : index
    %c0_72 = arith.constant 0 : index
    %c0_73 = arith.constant 0 : index
    %196 = vector.load %arg1[%c5_71, %c0_72, %c0_73] : memref<9x9x8xf32, #tpu.memory_space<vmem>>, vector<1x9x8xf32>
    %197 = vector.shape_cast %196 : vector<1x9x8xf32> to vector<9x8xf32>
    %198 = vector.extract_strided_slice %197 {offsets = [2, 0], sizes = [1, 8], strides = [1, 1]} : vector<9x8xf32> to vector<1x8xf32>
    %199 = vector.extract_strided_slice %2 {offsets = [5, 0], sizes = [1, 8], strides = [1, 1]} : vector<9x8xf32> to vector<1x8xf32>
    %200 = arith.mulf %198, %199 : vector<1x8xf32>
    %201 = vector.broadcast %200 : vector<1x8xf32> to vector<9x8xf32>
    %202 = arith.mulf %201, %197 : vector<9x8xf32>
    %203 = arith.addf %195, %202 : vector<9x8xf32>
    %c6_74 = arith.constant 6 : index
    %c0_75 = arith.constant 0 : index
    %c0_76 = arith.constant 0 : index
    %204 = vector.load %arg1[%c6_74, %c0_75, %c0_76] : memref<9x9x8xf32, #tpu.memory_space<vmem>>, vector<1x9x8xf32>
    %205 = vector.shape_cast %204 : vector<1x9x8xf32> to vector<9x8xf32>
    %206 = vector.extract_strided_slice %205 {offsets = [2, 0], sizes = [1, 8], strides = [1, 1]} : vector<9x8xf32> to vector<1x8xf32>
    %207 = vector.extract_strided_slice %2 {offsets = [6, 0], sizes = [1, 8], strides = [1, 1]} : vector<9x8xf32> to vector<1x8xf32>
    %208 = arith.mulf %206, %207 : vector<1x8xf32>
    %209 = vector.broadcast %208 : vector<1x8xf32> to vector<9x8xf32>
    %210 = arith.mulf %209, %205 : vector<9x8xf32>
    %211 = arith.addf %203, %210 : vector<9x8xf32>
    %c7_77 = arith.constant 7 : index
    %c0_78 = arith.constant 0 : index
    %c0_79 = arith.constant 0 : index
    %212 = vector.load %arg1[%c7_77, %c0_78, %c0_79] : memref<9x9x8xf32, #tpu.memory_space<vmem>>, vector<1x9x8xf32>
    %213 = vector.shape_cast %212 : vector<1x9x8xf32> to vector<9x8xf32>
    %214 = vector.extract_strided_slice %213 {offsets = [2, 0], sizes = [1, 8], strides = [1, 1]} : vector<9x8xf32> to vector<1x8xf32>
    %215 = vector.extract_strided_slice %2 {offsets = [7, 0], sizes = [1, 8], strides = [1, 1]} : vector<9x8xf32> to vector<1x8xf32>
    %216 = arith.mulf %214, %215 : vector<1x8xf32>
    %217 = vector.broadcast %216 : vector<1x8xf32> to vector<9x8xf32>
    %218 = arith.mulf %217, %213 : vector<9x8xf32>
    %219 = arith.addf %211, %218 : vector<9x8xf32>
    %c8_80 = arith.constant 8 : index
    %c0_81 = arith.constant 0 : index
    %c0_82 = arith.constant 0 : index
    %220 = vector.load %arg1[%c8_80, %c0_81, %c0_82] : memref<9x9x8xf32, #tpu.memory_space<vmem>>, vector<1x9x8xf32>
    %221 = vector.shape_cast %220 : vector<1x9x8xf32> to vector<9x8xf32>
    %222 = vector.extract_strided_slice %221 {offsets = [2, 0], sizes = [1, 8], strides = [1, 1]} : vector<9x8xf32> to vector<1x8xf32>
    %223 = vector.extract_strided_slice %2 {offsets = [8, 0], sizes = [1, 8], strides = [1, 1]} : vector<9x8xf32> to vector<1x8xf32>
    %224 = arith.mulf %222, %223 : vector<1x8xf32>
    %225 = vector.broadcast %224 : vector<1x8xf32> to vector<9x8xf32>
    %226 = arith.mulf %225, %221 : vector<9x8xf32>
    %227 = arith.addf %219, %226 : vector<9x8xf32>
    %c2_83 = arith.constant 2 : index
    %c0_84 = arith.constant 0 : index
    %c0_85 = arith.constant 0 : index
    %228 = vector.load %arg3[%c2_83, %c0_84, %c0_85] : memref<9x9x8xf32, #tpu.memory_space<vmem>>, vector<1x9x8xf32>
    %229 = vector.shape_cast %228 : vector<1x9x8xf32> to vector<9x8xf32>
    %230 = vector.shape_cast %227 : vector<9x8xf32> to vector<1x9x8xf32>
    tpu.vector_store %arg3[%c2_83, %c0_84, %c0_85], %230 {strides = array<i32>} : memref<9x9x8xf32, #tpu.memory_space<vmem>>, vector<1x9x8xf32>,
    %cst_86 = arith.constant 0.000000e+00 : f32
    %231 = vector.broadcast %cst_86 : f32 to vector<9x8xf32>
    %c0_87 = arith.constant 0 : index
    %c0_88 = arith.constant 0 : index
    %c0_89 = arith.constant 0 : index
    %232 = vector.load %arg1[%c0_87, %c0_88, %c0_89] : memref<9x9x8xf32, #tpu.memory_space<vmem>>, vector<1x9x8xf32>
    %233 = vector.shape_cast %232 : vector<1x9x8xf32> to vector<9x8xf32>
    %234 = vector.extract_strided_slice %233 {offsets = [3, 0], sizes = [1, 8], strides = [1, 1]} : vector<9x8xf32> to vector<1x8xf32>
    %235 = vector.extract_strided_slice %2 {offsets = [0, 0], sizes = [1, 8], strides = [1, 1]} : vector<9x8xf32> to vector<1x8xf32>
    %236 = arith.mulf %234, %235 : vector<1x8xf32>
    %237 = vector.broadcast %236 : vector<1x8xf32> to vector<9x8xf32>
    %238 = arith.mulf %237, %233 : vector<9x8xf32>
    %239 = arith.addf %231, %238 : vector<9x8xf32>
    %c1_90 = arith.constant 1 : index
    %c0_91 = arith.constant 0 : index
    %c0_92 = arith.constant 0 : index
    %240 = vector.load %arg1[%c1_90, %c0_91, %c0_92] : memref<9x9x8xf32, #tpu.memory_space<vmem>>, vector<1x9x8xf32>
    %241 = vector.shape_cast %240 : vector<1x9x8xf32> to vector<9x8xf32>
    %242 = vector.extract_strided_slice %241 {offsets = [3, 0], sizes = [1, 8], strides = [1, 1]} : vector<9x8xf32> to vector<1x8xf32>
    %243 = vector.extract_strided_slice %2 {offsets = [1, 0], sizes = [1, 8], strides = [1, 1]} : vector<9x8xf32> to vector<1x8xf32>
    %244 = arith.mulf %242, %243 : vector<1x8xf32>
    %245 = vector.broadcast %244 : vector<1x8xf32> to vector<9x8xf32>
    %246 = arith.mulf %245, %241 : vector<9x8xf32>
    %247 = arith.addf %239, %246 : vector<9x8xf32>
    %c2_93 = arith.constant 2 : index
    %c0_94 = arith.constant 0 : index
    %c0_95 = arith.constant 0 : index
    %248 = vector.load %arg1[%c2_93, %c0_94, %c0_95] : memref<9x9x8xf32, #tpu.memory_space<vmem>>, vector<1x9x8xf32>
    %249 = vector.shape_cast %248 : vector<1x9x8xf32> to vector<9x8xf32>
    %250 = vector.extract_strided_slice %249 {offsets = [3, 0], sizes = [1, 8], strides = [1, 1]} : vector<9x8xf32> to vector<1x8xf32>
    %251 = vector.extract_strided_slice %2 {offsets = [2, 0], sizes = [1, 8], strides = [1, 1]} : vector<9x8xf32> to vector<1x8xf32>
    %252 = arith.mulf %250, %251 : vector<1x8xf32>
    %253 = vector.broadcast %252 : vector<1x8xf32> to vector<9x8xf32>
    %254 = arith.mulf %253, %249 : vector<9x8xf32>
    %255 = arith.addf %247, %254 : vector<9x8xf32>
    %c3_96 = arith.constant 3 : index
    %c0_97 = arith.constant 0 : index
    %c0_98 = arith.constant 0 : index
    %256 = vector.load %arg1[%c3_96, %c0_97, %c0_98] : memref<9x9x8xf32, #tpu.memory_space<vmem>>, vector<1x9x8xf32>
    %257 = vector.shape_cast %256 : vector<1x9x8xf32> to vector<9x8xf32>
    %258 = vector.extract_strided_slice %257 {offsets = [3, 0], sizes = [1, 8], strides = [1, 1]} : vector<9x8xf32> to vector<1x8xf32>
    %259 = vector.extract_strided_slice %2 {offsets = [3, 0], sizes = [1, 8], strides = [1, 1]} : vector<9x8xf32> to vector<1x8xf32>
    %260 = arith.mulf %258, %259 : vector<1x8xf32>
    %261 = vector.broadcast %260 : vector<1x8xf32> to vector<9x8xf32>
    %262 = arith.mulf %261, %257 : vector<9x8xf32>
    %263 = arith.addf %255, %262 : vector<9x8xf32>
    %c4_99 = arith.constant 4 : index
    %c0_100 = arith.constant 0 : index
    %c0_101 = arith.constant 0 : index
    %264 = vector.load %arg1[%c4_99, %c0_100, %c0_101] : memref<9x9x8xf32, #tpu.memory_space<vmem>>, vector<1x9x8xf32>
    %265 = vector.shape_cast %264 : vector<1x9x8xf32> to vector<9x8xf32>
    %266 = vector.extract_strided_slice %265 {offsets = [3, 0], sizes = [1, 8], strides = [1, 1]} : vector<9x8xf32> to vector<1x8xf32>
    %267 = vector.extract_strided_slice %2 {offsets = [4, 0], sizes = [1, 8], strides = [1, 1]} : vector<9x8xf32> to vector<1x8xf32>
    %268 = arith.mulf %266, %267 : vector<1x8xf32>
    %269 = vector.broadcast %268 : vector<1x8xf32> to vector<9x8xf32>
    %270 = arith.mulf %269, %265 : vector<9x8xf32>
    %271 = arith.addf %263, %270 : vector<9x8xf32>
    %c5_102 = arith.constant 5 : index
    %c0_103 = arith.constant 0 : index
    %c0_104 = arith.constant 0 : index
    %272 = vector.load %arg1[%c5_102, %c0_103, %c0_104] : memref<9x9x8xf32, #tpu.memory_space<vmem>>, vector<1x9x8xf32>
    %273 = vector.shape_cast %272 : vector<1x9x8xf32> to vector<9x8xf32>
    %274 = vector.extract_strided_slice %273 {offsets = [3, 0], sizes = [1, 8], strides = [1, 1]} : vector<9x8xf32> to vector<1x8xf32>
    %275 = vector.extract_strided_slice %2 {offsets = [5, 0], sizes = [1, 8], strides = [1, 1]} : vector<9x8xf32> to vector<1x8xf32>
    %276 = arith.mulf %274, %275 : vector<1x8xf32>
    %277 = vector.broadcast %276 : vector<1x8xf32> to vector<9x8xf32>
    %278 = arith.mulf %277, %273 : vector<9x8xf32>
    %279 = arith.addf %271, %278 : vector<9x8xf32>
    %c6_105 = arith.constant 6 : index
    %c0_106 = arith.constant 0 : index
    %c0_107 = arith.constant 0 : index
    %280 = vector.load %arg1[%c6_105, %c0_106, %c0_107] : memref<9x9x8xf32, #tpu.memory_space<vmem>>, vector<1x9x8xf32>
    %281 = vector.shape_cast %280 : vector<1x9x8xf32> to vector<9x8xf32>
    %282 = vector.extract_strided_slice %281 {offsets = [3, 0], sizes = [1, 8], strides = [1, 1]} : vector<9x8xf32> to vector<1x8xf32>
    %283 = vector.extract_strided_slice %2 {offsets = [6, 0], sizes = [1, 8], strides = [1, 1]} : vector<9x8xf32> to vector<1x8xf32>
    %284 = arith.mulf %282, %283 : vector<1x8xf32>
    %285 = vector.broadcast %284 : vector<1x8xf32> to vector<9x8xf32>
    %286 = arith.mulf %285, %281 : vector<9x8xf32>
    %287 = arith.addf %279, %286 : vector<9x8xf32>
    %c7_108 = arith.constant 7 : index
    %c0_109 = arith.constant 0 : index
    %c0_110 = arith.constant 0 : index
    %288 = vector.load %arg1[%c7_108, %c0_109, %c0_110] : memref<9x9x8xf32, #tpu.memory_space<vmem>>, vector<1x9x8xf32>
    %289 = vector.shape_cast %288 : vector<1x9x8xf32> to vector<9x8xf32>
    %290 = vector.extract_strided_slice %289 {offsets = [3, 0], sizes = [1, 8], strides = [1, 1]} : vector<9x8xf32> to vector<1x8xf32>
    %291 = vector.extract_strided_slice %2 {offsets = [7, 0], sizes = [1, 8], strides = [1, 1]} : vector<9x8xf32> to vector<1x8xf32>
    %292 = arith.mulf %290, %291 : vector<1x8xf32>
    %293 = vector.broadcast %292 : vector<1x8xf32> to vector<9x8xf32>
    %294 = arith.mulf %293, %289 : vector<9x8xf32>
    %295 = arith.addf %287, %294 : vector<9x8xf32>
    %c8_111 = arith.constant 8 : index
    %c0_112 = arith.constant 0 : index
    %c0_113 = arith.constant 0 : index
    %296 = vector.load %arg1[%c8_111, %c0_112, %c0_113] : memref<9x9x8xf32, #tpu.memory_space<vmem>>, vector<1x9x8xf32>
    %297 = vector.shape_cast %296 : vector<1x9x8xf32> to vector<9x8xf32>
    %298 = vector.extract_strided_slice %297 {offsets = [3, 0], sizes = [1, 8], strides = [1, 1]} : vector<9x8xf32> to vector<1x8xf32>
    %299 = vector.extract_strided_slice %2 {offsets = [8, 0], sizes = [1, 8], strides = [1, 1]} : vector<9x8xf32> to vector<1x8xf32>
    %300 = arith.mulf %298, %299 : vector<1x8xf32>
    %301 = vector.broadcast %300 : vector<1x8xf32> to vector<9x8xf32>
    %302 = arith.mulf %301, %297 : vector<9x8xf32>
    %303 = arith.addf %295, %302 : vector<9x8xf32>
    %c3_114 = arith.constant 3 : index
    %c0_115 = arith.constant 0 : index
    %c0_116 = arith.constant 0 : index
    %304 = vector.load %arg3[%c3_114, %c0_115, %c0_116] : memref<9x9x8xf32, #tpu.memory_space<vmem>>, vector<1x9x8xf32>
    %305 = vector.shape_cast %304 : vector<1x9x8xf32> to vector<9x8xf32>
    %306 = vector.shape_cast %303 : vector<9x8xf32> to vector<1x9x8xf32>
    tpu.vector_store %arg3[%c3_114, %c0_115, %c0_116], %306 {strides = array<i32>} : memref<9x9x8xf32, #tpu.memory_space<vmem>>, vector<1x9x8xf32>,
    %cst_117 = arith.constant 0.000000e+00 : f32
    %307 = vector.broadcast %cst_117 : f32 to vector<9x8xf32>
    %c0_118 = arith.constant 0 : index
    %c0_119 = arith.constant 0 : index
    %c0_120 = arith.constant 0 : index
    %308 = vector.load %arg1[%c0_118, %c0_119, %c0_120] : memref<9x9x8xf32, #tpu.memory_space<vmem>>, vector<1x9x8xf32>
    %309 = vector.shape_cast %308 : vector<1x9x8xf32> to vector<9x8xf32>
    %310 = vector.extract_strided_slice %309 {offsets = [4, 0], sizes = [1, 8], strides = [1, 1]} : vector<9x8xf32> to vector<1x8xf32>
    %311 = vector.extract_strided_slice %2 {offsets = [0, 0], sizes = [1, 8], strides = [1, 1]} : vector<9x8xf32> to vector<1x8xf32>
    %312 = arith.mulf %310, %311 : vector<1x8xf32>
    %313 = vector.broadcast %312 : vector<1x8xf32> to vector<9x8xf32>
    %314 = arith.mulf %313, %309 : vector<9x8xf32>
    %315 = arith.addf %307, %314 : vector<9x8xf32>
    %c1_121 = arith.constant 1 : index
    %c0_122 = arith.constant 0 : index
    %c0_123 = arith.constant 0 : index
    %316 = vector.load %arg1[%c1_121, %c0_122, %c0_123] : memref<9x9x8xf32, #tpu.memory_space<vmem>>, vector<1x9x8xf32>
    %317 = vector.shape_cast %316 : vector<1x9x8xf32> to vector<9x8xf32>
    %318 = vector.extract_strided_slice %317 {offsets = [4, 0], sizes = [1, 8], strides = [1, 1]} : vector<9x8xf32> to vector<1x8xf32>
    %319 = vector.extract_strided_slice %2 {offsets = [1, 0], sizes = [1, 8], strides = [1, 1]} : vector<9x8xf32> to vector<1x8xf32>
    %320 = arith.mulf %318, %319 : vector<1x8xf32>
    %321 = vector.broadcast %320 : vector<1x8xf32> to vector<9x8xf32>
    %322 = arith.mulf %321, %317 : vector<9x8xf32>
    %323 = arith.addf %315, %322 : vector<9x8xf32>
    %c2_124 = arith.constant 2 : index
    %c0_125 = arith.constant 0 : index
    %c0_126 = arith.constant 0 : index
    %324 = vector.load %arg1[%c2_124, %c0_125, %c0_126] : memref<9x9x8xf32, #tpu.memory_space<vmem>>, vector<1x9x8xf32>
    %325 = vector.shape_cast %324 : vector<1x9x8xf32> to vector<9x8xf32>
    %326 = vector.extract_strided_slice %325 {offsets = [4, 0], sizes = [1, 8], strides = [1, 1]} : vector<9x8xf32> to vector<1x8xf32>
    %327 = vector.extract_strided_slice %2 {offsets = [2, 0], sizes = [1, 8], strides = [1, 1]} : vector<9x8xf32> to vector<1x8xf32>
    %328 = arith.mulf %326, %327 : vector<1x8xf32>
    %329 = vector.broadcast %328 : vector<1x8xf32> to vector<9x8xf32>
    %330 = arith.mulf %329, %325 : vector<9x8xf32>
    %331 = arith.addf %323, %330 : vector<9x8xf32>
    %c3_127 = arith.constant 3 : index
    %c0_128 = arith.constant 0 : index
    %c0_129 = arith.constant 0 : index
    %332 = vector.load %arg1[%c3_127, %c0_128, %c0_129] : memref<9x9x8xf32, #tpu.memory_space<vmem>>, vector<1x9x8xf32>
    %333 = vector.shape_cast %332 : vector<1x9x8xf32> to vector<9x8xf32>
    %334 = vector.extract_strided_slice %333 {offsets = [4, 0], sizes = [1, 8], strides = [1, 1]} : vector<9x8xf32> to vector<1x8xf32>
    %335 = vector.extract_strided_slice %2 {offsets = [3, 0], sizes = [1, 8], strides = [1, 1]} : vector<9x8xf32> to vector<1x8xf32>
    %336 = arith.mulf %334, %335 : vector<1x8xf32>
    %337 = vector.broadcast %336 : vector<1x8xf32> to vector<9x8xf32>
    %338 = arith.mulf %337, %333 : vector<9x8xf32>
    %339 = arith.addf %331, %338 : vector<9x8xf32>
    %c4_130 = arith.constant 4 : index
    %c0_131 = arith.constant 0 : index
    %c0_132 = arith.constant 0 : index
    %340 = vector.load %arg1[%c4_130, %c0_131, %c0_132] : memref<9x9x8xf32, #tpu.memory_space<vmem>>, vector<1x9x8xf32>
    %341 = vector.shape_cast %340 : vector<1x9x8xf32> to vector<9x8xf32>
    %342 = vector.extract_strided_slice %341 {offsets = [4, 0], sizes = [1, 8], strides = [1, 1]} : vector<9x8xf32> to vector<1x8xf32>
    %343 = vector.extract_strided_slice %2 {offsets = [4, 0], sizes = [1, 8], strides = [1, 1]} : vector<9x8xf32> to vector<1x8xf32>
    %344 = arith.mulf %342, %343 : vector<1x8xf32>
    %345 = vector.broadcast %344 : vector<1x8xf32> to vector<9x8xf32>
    %346 = arith.mulf %345, %341 : vector<9x8xf32>
    %347 = arith.addf %339, %346 : vector<9x8xf32>
    %c5_133 = arith.constant 5 : index
    %c0_134 = arith.constant 0 : index
    %c0_135 = arith.constant 0 : index
    %348 = vector.load %arg1[%c5_133, %c0_134, %c0_135] : memref<9x9x8xf32, #tpu.memory_space<vmem>>, vector<1x9x8xf32>
    %349 = vector.shape_cast %348 : vector<1x9x8xf32> to vector<9x8xf32>
    %350 = vector.extract_strided_slice %349 {offsets = [4, 0], sizes = [1, 8], strides = [1, 1]} : vector<9x8xf32> to vector<1x8xf32>
    %351 = vector.extract_strided_slice %2 {offsets = [5, 0], sizes = [1, 8], strides = [1, 1]} : vector<9x8xf32> to vector<1x8xf32>
    %352 = arith.mulf %350, %351 : vector<1x8xf32>
    %353 = vector.broadcast %352 : vector<1x8xf32> to vector<9x8xf32>
    %354 = arith.mulf %353, %349 : vector<9x8xf32>
    %355 = arith.addf %347, %354 : vector<9x8xf32>
    %c6_136 = arith.constant 6 : index
    %c0_137 = arith.constant 0 : index
    %c0_138 = arith.constant 0 : index
    %356 = vector.load %arg1[%c6_136, %c0_137, %c0_138] : memref<9x9x8xf32, #tpu.memory_space<vmem>>, vector<1x9x8xf32>
    %357 = vector.shape_cast %356 : vector<1x9x8xf32> to vector<9x8xf32>
    %358 = vector.extract_strided_slice %357 {offsets = [4, 0], sizes = [1, 8], strides = [1, 1]} : vector<9x8xf32> to vector<1x8xf32>
    %359 = vector.extract_strided_slice %2 {offsets = [6, 0], sizes = [1, 8], strides = [1, 1]} : vector<9x8xf32> to vector<1x8xf32>
    %360 = arith.mulf %358, %359 : vector<1x8xf32>
    %361 = vector.broadcast %360 : vector<1x8xf32> to vector<9x8xf32>
    %362 = arith.mulf %361, %357 : vector<9x8xf32>
    %363 = arith.addf %355, %362 : vector<9x8xf32>
    %c7_139 = arith.constant 7 : index
    %c0_140 = arith.constant 0 : index
    %c0_141 = arith.constant 0 : index
    %364 = vector.load %arg1[%c7_139, %c0_140, %c0_141] : memref<9x9x8xf32, #tpu.memory_space<vmem>>, vector<1x9x8xf32>
    %365 = vector.shape_cast %364 : vector<1x9x8xf32> to vector<9x8xf32>
    %366 = vector.extract_strided_slice %365 {offsets = [4, 0], sizes = [1, 8], strides = [1, 1]} : vector<9x8xf32> to vector<1x8xf32>
    %367 = vector.extract_strided_slice %2 {offsets = [7, 0], sizes = [1, 8], strides = [1, 1]} : vector<9x8xf32> to vector<1x8xf32>
    %368 = arith.mulf %366, %367 : vector<1x8xf32>
    %369 = vector.broadcast %368 : vector<1x8xf32> to vector<9x8xf32>
    %370 = arith.mulf %369, %365 : vector<9x8xf32>
    %371 = arith.addf %363, %370 : vector<9x8xf32>
    %c8_142 = arith.constant 8 : index
    %c0_143 = arith.constant 0 : index
    %c0_144 = arith.constant 0 : index
    %372 = vector.load %arg1[%c8_142, %c0_143, %c0_144] : memref<9x9x8xf32, #tpu.memory_space<vmem>>, vector<1x9x8xf32>
    %373 = vector.shape_cast %372 : vector<1x9x8xf32> to vector<9x8xf32>
    %374 = vector.extract_strided_slice %373 {offsets = [4, 0], sizes = [1, 8], strides = [1, 1]} : vector<9x8xf32> to vector<1x8xf32>
    %375 = vector.extract_strided_slice %2 {offsets = [8, 0], sizes = [1, 8], strides = [1, 1]} : vector<9x8xf32> to vector<1x8xf32>
    %376 = arith.mulf %374, %375 : vector<1x8xf32>
    %377 = vector.broadcast %376 : vector<1x8xf32> to vector<9x8xf32>
    %378 = arith.mulf %377, %373 : vector<9x8xf32>
    %379 = arith.addf %371, %378 : vector<9x8xf32>
    %c4_145 = arith.constant 4 : index
    %c0_146 = arith.constant 0 : index
    %c0_147 = arith.constant 0 : index
    %380 = vector.load %arg3[%c4_145, %c0_146, %c0_147] : memref<9x9x8xf32, #tpu.memory_space<vmem>>, vector<1x9x8xf32>
    %381 = vector.shape_cast %380 : vector<1x9x8xf32> to vector<9x8xf32>
    %382 = vector.shape_cast %379 : vector<9x8xf32> to vector<1x9x8xf32>
    tpu.vector_store %arg3[%c4_145, %c0_146, %c0_147], %382 {strides = array<i32>} : memref<9x9x8xf32, #tpu.memory_space<vmem>>, vector<1x9x8xf32>,
    %cst_148 = arith.constant 0.000000e+00 : f32
    %383 = vector.broadcast %cst_148 : f32 to vector<9x8xf32>
    %c0_149 = arith.constant 0 : index
    %c0_150 = arith.constant 0 : index
    %c0_151 = arith.constant 0 : index
    %384 = vector.load %arg1[%c0_149, %c0_150, %c0_151] : memref<9x9x8xf32, #tpu.memory_space<vmem>>, vector<1x9x8xf32>
    %385 = vector.shape_cast %384 : vector<1x9x8xf32> to vector<9x8xf32>
    %386 = vector.extract_strided_slice %385 {offsets = [5, 0], sizes = [1, 8], strides = [1, 1]} : vector<9x8xf32> to vector<1x8xf32>
    %387 = vector.extract_strided_slice %2 {offsets = [0, 0], sizes = [1, 8], strides = [1, 1]} : vector<9x8xf32> to vector<1x8xf32>
    %388 = arith.mulf %386, %387 : vector<1x8xf32>
    %389 = vector.broadcast %388 : vector<1x8xf32> to vector<9x8xf32>
    %390 = arith.mulf %389, %385 : vector<9x8xf32>
    %391 = arith.addf %383, %390 : vector<9x8xf32>
    %c1_152 = arith.constant 1 : index
    %c0_153 = arith.constant 0 : index
    %c0_154 = arith.constant 0 : index
    %392 = vector.load %arg1[%c1_152, %c0_153, %c0_154] : memref<9x9x8xf32, #tpu.memory_space<vmem>>, vector<1x9x8xf32>
    %393 = vector.shape_cast %392 : vector<1x9x8xf32> to vector<9x8xf32>
    %394 = vector.extract_strided_slice %393 {offsets = [5, 0], sizes = [1, 8], strides = [1, 1]} : vector<9x8xf32> to vector<1x8xf32>
    %395 = vector.extract_strided_slice %2 {offsets = [1, 0], sizes = [1, 8], strides = [1, 1]} : vector<9x8xf32> to vector<1x8xf32>
    %396 = arith.mulf %394, %395 : vector<1x8xf32>
    %397 = vector.broadcast %396 : vector<1x8xf32> to vector<9x8xf32>
    %398 = arith.mulf %397, %393 : vector<9x8xf32>
    %399 = arith.addf %391, %398 : vector<9x8xf32>
    %c2_155 = arith.constant 2 : index
    %c0_156 = arith.constant 0 : index
    %c0_157 = arith.constant 0 : index
    %400 = vector.load %arg1[%c2_155, %c0_156, %c0_157] : memref<9x9x8xf32, #tpu.memory_space<vmem>>, vector<1x9x8xf32>
    %401 = vector.shape_cast %400 : vector<1x9x8xf32> to vector<9x8xf32>
    %402 = vector.extract_strided_slice %401 {offsets = [5, 0], sizes = [1, 8], strides = [1, 1]} : vector<9x8xf32> to vector<1x8xf32>
    %403 = vector.extract_strided_slice %2 {offsets = [2, 0], sizes = [1, 8], strides = [1, 1]} : vector<9x8xf32> to vector<1x8xf32>
    %404 = arith.mulf %402, %403 : vector<1x8xf32>
    %405 = vector.broadcast %404 : vector<1x8xf32> to vector<9x8xf32>
    %406 = arith.mulf %405, %401 : vector<9x8xf32>
    %407 = arith.addf %399, %406 : vector<9x8xf32>
    %c3_158 = arith.constant 3 : index
    %c0_159 = arith.constant 0 : index
    %c0_160 = arith.constant 0 : index
    %408 = vector.load %arg1[%c3_158, %c0_159, %c0_160] : memref<9x9x8xf32, #tpu.memory_space<vmem>>, vector<1x9x8xf32>
    %409 = vector.shape_cast %408 : vector<1x9x8xf32> to vector<9x8xf32>
    %410 = vector.extract_strided_slice %409 {offsets = [5, 0], sizes = [1, 8], strides = [1, 1]} : vector<9x8xf32> to vector<1x8xf32>
    %411 = vector.extract_strided_slice %2 {offsets = [3, 0], sizes = [1, 8], strides = [1, 1]} : vector<9x8xf32> to vector<1x8xf32>
    %412 = arith.mulf %410, %411 : vector<1x8xf32>
    %413 = vector.broadcast %412 : vector<1x8xf32> to vector<9x8xf32>
    %414 = arith.mulf %413, %409 : vector<9x8xf32>
    %415 = arith.addf %407, %414 : vector<9x8xf32>
    %c4_161 = arith.constant 4 : index
    %c0_162 = arith.constant 0 : index
    %c0_163 = arith.constant 0 : index
    %416 = vector.load %arg1[%c4_161, %c0_162, %c0_163] : memref<9x9x8xf32, #tpu.memory_space<vmem>>, vector<1x9x8xf32>
    %417 = vector.shape_cast %416 : vector<1x9x8xf32> to vector<9x8xf32>
    %418 = vector.extract_strided_slice %417 {offsets = [5, 0], sizes = [1, 8], strides = [1, 1]} : vector<9x8xf32> to vector<1x8xf32>
    %419 = vector.extract_strided_slice %2 {offsets = [4, 0], sizes = [1, 8], strides = [1, 1]} : vector<9x8xf32> to vector<1x8xf32>
    %420 = arith.mulf %418, %419 : vector<1x8xf32>
    %421 = vector.broadcast %420 : vector<1x8xf32> to vector<9x8xf32>
    %422 = arith.mulf %421, %417 : vector<9x8xf32>
    %423 = arith.addf %415, %422 : vector<9x8xf32>
    %c5_164 = arith.constant 5 : index
    %c0_165 = arith.constant 0 : index
    %c0_166 = arith.constant 0 : index
    %424 = vector.load %arg1[%c5_164, %c0_165, %c0_166] : memref<9x9x8xf32, #tpu.memory_space<vmem>>, vector<1x9x8xf32>
    %425 = vector.shape_cast %424 : vector<1x9x8xf32> to vector<9x8xf32>
    %426 = vector.extract_strided_slice %425 {offsets = [5, 0], sizes = [1, 8], strides = [1, 1]} : vector<9x8xf32> to vector<1x8xf32>
    %427 = vector.extract_strided_slice %2 {offsets = [5, 0], sizes = [1, 8], strides = [1, 1]} : vector<9x8xf32> to vector<1x8xf32>
    %428 = arith.mulf %426, %427 : vector<1x8xf32>
    %429 = vector.broadcast %428 : vector<1x8xf32> to vector<9x8xf32>
    %430 = arith.mulf %429, %425 : vector<9x8xf32>
    %431 = arith.addf %423, %430 : vector<9x8xf32>
    %c6_167 = arith.constant 6 : index
    %c0_168 = arith.constant 0 : index
    %c0_169 = arith.constant 0 : index
    %432 = vector.load %arg1[%c6_167, %c0_168, %c0_169] : memref<9x9x8xf32, #tpu.memory_space<vmem>>, vector<1x9x8xf32>
    %433 = vector.shape_cast %432 : vector<1x9x8xf32> to vector<9x8xf32>
    %434 = vector.extract_strided_slice %433 {offsets = [5, 0], sizes = [1, 8], strides = [1, 1]} : vector<9x8xf32> to vector<1x8xf32>
    %435 = vector.extract_strided_slice %2 {offsets = [6, 0], sizes = [1, 8], strides = [1, 1]} : vector<9x8xf32> to vector<1x8xf32>
    %436 = arith.mulf %434, %435 : vector<1x8xf32>
    %437 = vector.broadcast %436 : vector<1x8xf32> to vector<9x8xf32>
    %438 = arith.mulf %437, %433 : vector<9x8xf32>
    %439 = arith.addf %431, %438 : vector<9x8xf32>
    %c7_170 = arith.constant 7 : index
    %c0_171 = arith.constant 0 : index
    %c0_172 = arith.constant 0 : index
    %440 = vector.load %arg1[%c7_170, %c0_171, %c0_172] : memref<9x9x8xf32, #tpu.memory_space<vmem>>, vector<1x9x8xf32>
    %441 = vector.shape_cast %440 : vector<1x9x8xf32> to vector<9x8xf32>
    %442 = vector.extract_strided_slice %441 {offsets = [5, 0], sizes = [1, 8], strides = [1, 1]} : vector<9x8xf32> to vector<1x8xf32>
    %443 = vector.extract_strided_slice %2 {offsets = [7, 0], sizes = [1, 8], strides = [1, 1]} : vector<9x8xf32> to vector<1x8xf32>
    %444 = arith.mulf %442, %443 : vector<1x8xf32>
    %445 = vector.broadcast %444 : vector<1x8xf32> to vector<9x8xf32>
    %446 = arith.mulf %445, %441 : vector<9x8xf32>
    %447 = arith.addf %439, %446 : vector<9x8xf32>
    %c8_173 = arith.constant 8 : index
    %c0_174 = arith.constant 0 : index
    %c0_175 = arith.constant 0 : index
    %448 = vector.load %arg1[%c8_173, %c0_174, %c0_175] : memref<9x9x8xf32, #tpu.memory_space<vmem>>, vector<1x9x8xf32>
    %449 = vector.shape_cast %448 : vector<1x9x8xf32> to vector<9x8xf32>
    %450 = vector.extract_strided_slice %449 {offsets = [5, 0], sizes = [1, 8], strides = [1, 1]} : vector<9x8xf32> to vector<1x8xf32>
    %451 = vector.extract_strided_slice %2 {offsets = [8, 0], sizes = [1, 8], strides = [1, 1]} : vector<9x8xf32> to vector<1x8xf32>
    %452 = arith.mulf %450, %451 : vector<1x8xf32>
    %453 = vector.broadcast %452 : vector<1x8xf32> to vector<9x8xf32>
    %454 = arith.mulf %453, %449 : vector<9x8xf32>
    %455 = arith.addf %447, %454 : vector<9x8xf32>
    %c5_176 = arith.constant 5 : index
    %c0_177 = arith.constant 0 : index
    %c0_178 = arith.constant 0 : index
    %456 = vector.load %arg3[%c5_176, %c0_177, %c0_178] : memref<9x9x8xf32, #tpu.memory_space<vmem>>, vector<1x9x8xf32>
    %457 = vector.shape_cast %456 : vector<1x9x8xf32> to vector<9x8xf32>
    %458 = vector.shape_cast %455 : vector<9x8xf32> to vector<1x9x8xf32>
    tpu.vector_store %arg3[%c5_176, %c0_177, %c0_178], %458 {strides = array<i32>} : memref<9x9x8xf32, #tpu.memory_space<vmem>>, vector<1x9x8xf32>,
    %cst_179 = arith.constant 0.000000e+00 : f32
    %459 = vector.broadcast %cst_179 : f32 to vector<9x8xf32>
    %c0_180 = arith.constant 0 : index
    %c0_181 = arith.constant 0 : index
    %c0_182 = arith.constant 0 : index
    %460 = vector.load %arg1[%c0_180, %c0_181, %c0_182] : memref<9x9x8xf32, #tpu.memory_space<vmem>>, vector<1x9x8xf32>
    %461 = vector.shape_cast %460 : vector<1x9x8xf32> to vector<9x8xf32>
    %462 = vector.extract_strided_slice %461 {offsets = [6, 0], sizes = [1, 8], strides = [1, 1]} : vector<9x8xf32> to vector<1x8xf32>
    %463 = vector.extract_strided_slice %2 {offsets = [0, 0], sizes = [1, 8], strides = [1, 1]} : vector<9x8xf32> to vector<1x8xf32>
    %464 = arith.mulf %462, %463 : vector<1x8xf32>
    %465 = vector.broadcast %464 : vector<1x8xf32> to vector<9x8xf32>
    %466 = arith.mulf %465, %461 : vector<9x8xf32>
    %467 = arith.addf %459, %466 : vector<9x8xf32>
    %c1_183 = arith.constant 1 : index
    %c0_184 = arith.constant 0 : index
    %c0_185 = arith.constant 0 : index
    %468 = vector.load %arg1[%c1_183, %c0_184, %c0_185] : memref<9x9x8xf32, #tpu.memory_space<vmem>>, vector<1x9x8xf32>
    %469 = vector.shape_cast %468 : vector<1x9x8xf32> to vector<9x8xf32>
    %470 = vector.extract_strided_slice %469 {offsets = [6, 0], sizes = [1, 8], strides = [1, 1]} : vector<9x8xf32> to vector<1x8xf32>
    %471 = vector.extract_strided_slice %2 {offsets = [1, 0], sizes = [1, 8], strides = [1, 1]} : vector<9x8xf32> to vector<1x8xf32>
    %472 = arith.mulf %470, %471 : vector<1x8xf32>
    %473 = vector.broadcast %472 : vector<1x8xf32> to vector<9x8xf32>
    %474 = arith.mulf %473, %469 : vector<9x8xf32>
    %475 = arith.addf %467, %474 : vector<9x8xf32>
    %c2_186 = arith.constant 2 : index
    %c0_187 = arith.constant 0 : index
    %c0_188 = arith.constant 0 : index
    %476 = vector.load %arg1[%c2_186, %c0_187, %c0_188] : memref<9x9x8xf32, #tpu.memory_space<vmem>>, vector<1x9x8xf32>
    %477 = vector.shape_cast %476 : vector<1x9x8xf32> to vector<9x8xf32>
    %478 = vector.extract_strided_slice %477 {offsets = [6, 0], sizes = [1, 8], strides = [1, 1]} : vector<9x8xf32> to vector<1x8xf32>
    %479 = vector.extract_strided_slice %2 {offsets = [2, 0], sizes = [1, 8], strides = [1, 1]} : vector<9x8xf32> to vector<1x8xf32>
    %480 = arith.mulf %478, %479 : vector<1x8xf32>
    %481 = vector.broadcast %480 : vector<1x8xf32> to vector<9x8xf32>
    %482 = arith.mulf %481, %477 : vector<9x8xf32>
    %483 = arith.addf %475, %482 : vector<9x8xf32>
    %c3_189 = arith.constant 3 : index
    %c0_190 = arith.constant 0 : index
    %c0_191 = arith.constant 0 : index
    %484 = vector.load %arg1[%c3_189, %c0_190, %c0_191] : memref<9x9x8xf32, #tpu.memory_space<vmem>>, vector<1x9x8xf32>
    %485 = vector.shape_cast %484 : vector<1x9x8xf32> to vector<9x8xf32>
    %486 = vector.extract_strided_slice %485 {offsets = [6, 0], sizes = [1, 8], strides = [1, 1]} : vector<9x8xf32> to vector<1x8xf32>
    %487 = vector.extract_strided_slice %2 {offsets = [3, 0], sizes = [1, 8], strides = [1, 1]} : vector<9x8xf32> to vector<1x8xf32>
    %488 = arith.mulf %486, %487 : vector<1x8xf32>
    %489 = vector.broadcast %488 : vector<1x8xf32> to vector<9x8xf32>
    %490 = arith.mulf %489, %485 : vector<9x8xf32>
    %491 = arith.addf %483, %490 : vector<9x8xf32>
    %c4_192 = arith.constant 4 : index
    %c0_193 = arith.constant 0 : index
    %c0_194 = arith.constant 0 : index
    %492 = vector.load %arg1[%c4_192, %c0_193, %c0_194] : memref<9x9x8xf32, #tpu.memory_space<vmem>>, vector<1x9x8xf32>
    %493 = vector.shape_cast %492 : vector<1x9x8xf32> to vector<9x8xf32>
    %494 = vector.extract_strided_slice %493 {offsets = [6, 0], sizes = [1, 8], strides = [1, 1]} : vector<9x8xf32> to vector<1x8xf32>
    %495 = vector.extract_strided_slice %2 {offsets = [4, 0], sizes = [1, 8], strides = [1, 1]} : vector<9x8xf32> to vector<1x8xf32>
    %496 = arith.mulf %494, %495 : vector<1x8xf32>
    %497 = vector.broadcast %496 : vector<1x8xf32> to vector<9x8xf32>
    %498 = arith.mulf %497, %493 : vector<9x8xf32>
    %499 = arith.addf %491, %498 : vector<9x8xf32>
    %c5_195 = arith.constant 5 : index
    %c0_196 = arith.constant 0 : index
    %c0_197 = arith.constant 0 : index
    %500 = vector.load %arg1[%c5_195, %c0_196, %c0_197] : memref<9x9x8xf32, #tpu.memory_space<vmem>>, vector<1x9x8xf32>
    %501 = vector.shape_cast %500 : vector<1x9x8xf32> to vector<9x8xf32>
    %502 = vector.extract_strided_slice %501 {offsets = [6, 0], sizes = [1, 8], strides = [1, 1]} : vector<9x8xf32> to vector<1x8xf32>
    %503 = vector.extract_strided_slice %2 {offsets = [5, 0], sizes = [1, 8], strides = [1, 1]} : vector<9x8xf32> to vector<1x8xf32>
    %504 = arith.mulf %502, %503 : vector<1x8xf32>
    %505 = vector.broadcast %504 : vector<1x8xf32> to vector<9x8xf32>
    %506 = arith.mulf %505, %501 : vector<9x8xf32>
    %507 = arith.addf %499, %506 : vector<9x8xf32>
    %c6_198 = arith.constant 6 : index
    %c0_199 = arith.constant 0 : index
    %c0_200 = arith.constant 0 : index
    %508 = vector.load %arg1[%c6_198, %c0_199, %c0_200] : memref<9x9x8xf32, #tpu.memory_space<vmem>>, vector<1x9x8xf32>
    %509 = vector.shape_cast %508 : vector<1x9x8xf32> to vector<9x8xf32>
    %510 = vector.extract_strided_slice %509 {offsets = [6, 0], sizes = [1, 8], strides = [1, 1]} : vector<9x8xf32> to vector<1x8xf32>
    %511 = vector.extract_strided_slice %2 {offsets = [6, 0], sizes = [1, 8], strides = [1, 1]} : vector<9x8xf32> to vector<1x8xf32>
    %512 = arith.mulf %510, %511 : vector<1x8xf32>
    %513 = vector.broadcast %512 : vector<1x8xf32> to vector<9x8xf32>
    %514 = arith.mulf %513, %509 : vector<9x8xf32>
    %515 = arith.addf %507, %514 : vector<9x8xf32>
    %c7_201 = arith.constant 7 : index
    %c0_202 = arith.constant 0 : index
    %c0_203 = arith.constant 0 : index
    %516 = vector.load %arg1[%c7_201, %c0_202, %c0_203] : memref<9x9x8xf32, #tpu.memory_space<vmem>>, vector<1x9x8xf32>
    %517 = vector.shape_cast %516 : vector<1x9x8xf32> to vector<9x8xf32>
    %518 = vector.extract_strided_slice %517 {offsets = [6, 0], sizes = [1, 8], strides = [1, 1]} : vector<9x8xf32> to vector<1x8xf32>
    %519 = vector.extract_strided_slice %2 {offsets = [7, 0], sizes = [1, 8], strides = [1, 1]} : vector<9x8xf32> to vector<1x8xf32>
    %520 = arith.mulf %518, %519 : vector<1x8xf32>
    %521 = vector.broadcast %520 : vector<1x8xf32> to vector<9x8xf32>
    %522 = arith.mulf %521, %517 : vector<9x8xf32>
    %523 = arith.addf %515, %522 : vector<9x8xf32>
    %c8_204 = arith.constant 8 : index
    %c0_205 = arith.constant 0 : index
    %c0_206 = arith.constant 0 : index
    %524 = vector.load %arg1[%c8_204, %c0_205, %c0_206] : memref<9x9x8xf32, #tpu.memory_space<vmem>>, vector<1x9x8xf32>
    %525 = vector.shape_cast %524 : vector<1x9x8xf32> to vector<9x8xf32>
    %526 = vector.extract_strided_slice %525 {offsets = [6, 0], sizes = [1, 8], strides = [1, 1]} : vector<9x8xf32> to vector<1x8xf32>
    %527 = vector.extract_strided_slice %2 {offsets = [8, 0], sizes = [1, 8], strides = [1, 1]} : vector<9x8xf32> to vector<1x8xf32>
    %528 = arith.mulf %526, %527 : vector<1x8xf32>
    %529 = vector.broadcast %528 : vector<1x8xf32> to vector<9x8xf32>
    %530 = arith.mulf %529, %525 : vector<9x8xf32>
    %531 = arith.addf %523, %530 : vector<9x8xf32>
    %c6_207 = arith.constant 6 : index
    %c0_208 = arith.constant 0 : index
    %c0_209 = arith.constant 0 : index
    %532 = vector.load %arg3[%c6_207, %c0_208, %c0_209] : memref<9x9x8xf32, #tpu.memory_space<vmem>>, vector<1x9x8xf32>
    %533 = vector.shape_cast %532 : vector<1x9x8xf32> to vector<9x8xf32>
    %534 = vector.shape_cast %531 : vector<9x8xf32> to vector<1x9x8xf32>
    tpu.vector_store %arg3[%c6_207, %c0_208, %c0_209], %534 {strides = array<i32>} : memref<9x9x8xf32, #tpu.memory_space<vmem>>, vector<1x9x8xf32>,
    %cst_210 = arith.constant 0.000000e+00 : f32
    %535 = vector.broadcast %cst_210 : f32 to vector<9x8xf32>
    %c0_211 = arith.constant 0 : index
    %c0_212 = arith.constant 0 : index
    %c0_213 = arith.constant 0 : index
    %536 = vector.load %arg1[%c0_211, %c0_212, %c0_213] : memref<9x9x8xf32, #tpu.memory_space<vmem>>, vector<1x9x8xf32>
    %537 = vector.shape_cast %536 : vector<1x9x8xf32> to vector<9x8xf32>
    %538 = vector.extract_strided_slice %537 {offsets = [7, 0], sizes = [1, 8], strides = [1, 1]} : vector<9x8xf32> to vector<1x8xf32>
    %539 = vector.extract_strided_slice %2 {offsets = [0, 0], sizes = [1, 8], strides = [1, 1]} : vector<9x8xf32> to vector<1x8xf32>
    %540 = arith.mulf %538, %539 : vector<1x8xf32>
    %541 = vector.broadcast %540 : vector<1x8xf32> to vector<9x8xf32>
    %542 = arith.mulf %541, %537 : vector<9x8xf32>
    %543 = arith.addf %535, %542 : vector<9x8xf32>
    %c1_214 = arith.constant 1 : index
    %c0_215 = arith.constant 0 : index
    %c0_216 = arith.constant 0 : index
    %544 = vector.load %arg1[%c1_214, %c0_215, %c0_216] : memref<9x9x8xf32, #tpu.memory_space<vmem>>, vector<1x9x8xf32>
    %545 = vector.shape_cast %544 : vector<1x9x8xf32> to vector<9x8xf32>
    %546 = vector.extract_strided_slice %545 {offsets = [7, 0], sizes = [1, 8], strides = [1, 1]} : vector<9x8xf32> to vector<1x8xf32>
    %547 = vector.extract_strided_slice %2 {offsets = [1, 0], sizes = [1, 8], strides = [1, 1]} : vector<9x8xf32> to vector<1x8xf32>
    %548 = arith.mulf %546, %547 : vector<1x8xf32>
    %549 = vector.broadcast %548 : vector<1x8xf32> to vector<9x8xf32>
    %550 = arith.mulf %549, %545 : vector<9x8xf32>
    %551 = arith.addf %543, %550 : vector<9x8xf32>
    %c2_217 = arith.constant 2 : index
    %c0_218 = arith.constant 0 : index
    %c0_219 = arith.constant 0 : index
    %552 = vector.load %arg1[%c2_217, %c0_218, %c0_219] : memref<9x9x8xf32, #tpu.memory_space<vmem>>, vector<1x9x8xf32>
    %553 = vector.shape_cast %552 : vector<1x9x8xf32> to vector<9x8xf32>
    %554 = vector.extract_strided_slice %553 {offsets = [7, 0], sizes = [1, 8], strides = [1, 1]} : vector<9x8xf32> to vector<1x8xf32>
    %555 = vector.extract_strided_slice %2 {offsets = [2, 0], sizes = [1, 8], strides = [1, 1]} : vector<9x8xf32> to vector<1x8xf32>
    %556 = arith.mulf %554, %555 : vector<1x8xf32>
    %557 = vector.broadcast %556 : vector<1x8xf32> to vector<9x8xf32>
    %558 = arith.mulf %557, %553 : vector<9x8xf32>
    %559 = arith.addf %551, %558 : vector<9x8xf32>
    %c3_220 = arith.constant 3 : index
    %c0_221 = arith.constant 0 : index
    %c0_222 = arith.constant 0 : index
    %560 = vector.load %arg1[%c3_220, %c0_221, %c0_222] : memref<9x9x8xf32, #tpu.memory_space<vmem>>, vector<1x9x8xf32>
    %561 = vector.shape_cast %560 : vector<1x9x8xf32> to vector<9x8xf32>
    %562 = vector.extract_strided_slice %561 {offsets = [7, 0], sizes = [1, 8], strides = [1, 1]} : vector<9x8xf32> to vector<1x8xf32>
    %563 = vector.extract_strided_slice %2 {offsets = [3, 0], sizes = [1, 8], strides = [1, 1]} : vector<9x8xf32> to vector<1x8xf32>
    %564 = arith.mulf %562, %563 : vector<1x8xf32>
    %565 = vector.broadcast %564 : vector<1x8xf32> to vector<9x8xf32>
    %566 = arith.mulf %565, %561 : vector<9x8xf32>
    %567 = arith.addf %559, %566 : vector<9x8xf32>
    %c4_223 = arith.constant 4 : index
    %c0_224 = arith.constant 0 : index
    %c0_225 = arith.constant 0 : index
    %568 = vector.load %arg1[%c4_223, %c0_224, %c0_225] : memref<9x9x8xf32, #tpu.memory_space<vmem>>, vector<1x9x8xf32>
    %569 = vector.shape_cast %568 : vector<1x9x8xf32> to vector<9x8xf32>
    %570 = vector.extract_strided_slice %569 {offsets = [7, 0], sizes = [1, 8], strides = [1, 1]} : vector<9x8xf32> to vector<1x8xf32>
    %571 = vector.extract_strided_slice %2 {offsets = [4, 0], sizes = [1, 8], strides = [1, 1]} : vector<9x8xf32> to vector<1x8xf32>
    %572 = arith.mulf %570, %571 : vector<1x8xf32>
    %573 = vector.broadcast %572 : vector<1x8xf32> to vector<9x8xf32>
    %574 = arith.mulf %573, %569 : vector<9x8xf32>
    %575 = arith.addf %567, %574 : vector<9x8xf32>
    %c5_226 = arith.constant 5 : index
    %c0_227 = arith.constant 0 : index
    %c0_228 = arith.constant 0 : index
    %576 = vector.load %arg1[%c5_226, %c0_227, %c0_228] : memref<9x9x8xf32, #tpu.memory_space<vmem>>, vector<1x9x8xf32>
    %577 = vector.shape_cast %576 : vector<1x9x8xf32> to vector<9x8xf32>
    %578 = vector.extract_strided_slice %577 {offsets = [7, 0], sizes = [1, 8], strides = [1, 1]} : vector<9x8xf32> to vector<1x8xf32>
    %579 = vector.extract_strided_slice %2 {offsets = [5, 0], sizes = [1, 8], strides = [1, 1]} : vector<9x8xf32> to vector<1x8xf32>
    %580 = arith.mulf %578, %579 : vector<1x8xf32>
    %581 = vector.broadcast %580 : vector<1x8xf32> to vector<9x8xf32>
    %582 = arith.mulf %581, %577 : vector<9x8xf32>
    %583 = arith.addf %575, %582 : vector<9x8xf32>
    %c6_229 = arith.constant 6 : index
    %c0_230 = arith.constant 0 : index
    %c0_231 = arith.constant 0 : index
    %584 = vector.load %arg1[%c6_229, %c0_230, %c0_231] : memref<9x9x8xf32, #tpu.memory_space<vmem>>, vector<1x9x8xf32>
    %585 = vector.shape_cast %584 : vector<1x9x8xf32> to vector<9x8xf32>
    %586 = vector.extract_strided_slice %585 {offsets = [7, 0], sizes = [1, 8], strides = [1, 1]} : vector<9x8xf32> to vector<1x8xf32>
    %587 = vector.extract_strided_slice %2 {offsets = [6, 0], sizes = [1, 8], strides = [1, 1]} : vector<9x8xf32> to vector<1x8xf32>
    %588 = arith.mulf %586, %587 : vector<1x8xf32>
    %589 = vector.broadcast %588 : vector<1x8xf32> to vector<9x8xf32>
    %590 = arith.mulf %589, %585 : vector<9x8xf32>
    %591 = arith.addf %583, %590 : vector<9x8xf32>
    %c7_232 = arith.constant 7 : index
    %c0_233 = arith.constant 0 : index
    %c0_234 = arith.constant 0 : index
    %592 = vector.load %arg1[%c7_232, %c0_233, %c0_234] : memref<9x9x8xf32, #tpu.memory_space<vmem>>, vector<1x9x8xf32>
    %593 = vector.shape_cast %592 : vector<1x9x8xf32> to vector<9x8xf32>
    %594 = vector.extract_strided_slice %593 {offsets = [7, 0], sizes = [1, 8], strides = [1, 1]} : vector<9x8xf32> to vector<1x8xf32>
    %595 = vector.extract_strided_slice %2 {offsets = [7, 0], sizes = [1, 8], strides = [1, 1]} : vector<9x8xf32> to vector<1x8xf32>
    %596 = arith.mulf %594, %595 : vector<1x8xf32>
    %597 = vector.broadcast %596 : vector<1x8xf32> to vector<9x8xf32>
    %598 = arith.mulf %597, %593 : vector<9x8xf32>
    %599 = arith.addf %591, %598 : vector<9x8xf32>
    %c8_235 = arith.constant 8 : index
    %c0_236 = arith.constant 0 : index
    %c0_237 = arith.constant 0 : index
    %600 = vector.load %arg1[%c8_235, %c0_236, %c0_237] : memref<9x9x8xf32, #tpu.memory_space<vmem>>, vector<1x9x8xf32>
    %601 = vector.shape_cast %600 : vector<1x9x8xf32> to vector<9x8xf32>
    %602 = vector.extract_strided_slice %601 {offsets = [7, 0], sizes = [1, 8], strides = [1, 1]} : vector<9x8xf32> to vector<1x8xf32>
    %603 = vector.extract_strided_slice %2 {offsets = [8, 0], sizes = [1, 8], strides = [1, 1]} : vector<9x8xf32> to vector<1x8xf32>
    %604 = arith.mulf %602, %603 : vector<1x8xf32>
    %605 = vector.broadcast %604 : vector<1x8xf32> to vector<9x8xf32>
    %606 = arith.mulf %605, %601 : vector<9x8xf32>
    %607 = arith.addf %599, %606 : vector<9x8xf32>
    %c7_238 = arith.constant 7 : index
    %c0_239 = arith.constant 0 : index
    %c0_240 = arith.constant 0 : index
    %608 = vector.load %arg3[%c7_238, %c0_239, %c0_240] : memref<9x9x8xf32, #tpu.memory_space<vmem>>, vector<1x9x8xf32>
    %609 = vector.shape_cast %608 : vector<1x9x8xf32> to vector<9x8xf32>
    %610 = vector.shape_cast %607 : vector<9x8xf32> to vector<1x9x8xf32>
    tpu.vector_store %arg3[%c7_238, %c0_239, %c0_240], %610 {strides = array<i32>} : memref<9x9x8xf32, #tpu.memory_space<vmem>>, vector<1x9x8xf32>,
    %cst_241 = arith.constant 0.000000e+00 : f32
    %611 = vector.broadcast %cst_241 : f32 to vector<9x8xf32>
    %c0_242 = arith.constant 0 : index
    %c0_243 = arith.constant 0 : index
    %c0_244 = arith.constant 0 : index
    %612 = vector.load %arg1[%c0_242, %c0_243, %c0_244] : memref<9x9x8xf32, #tpu.memory_space<vmem>>, vector<1x9x8xf32>
    %613 = vector.shape_cast %612 : vector<1x9x8xf32> to vector<9x8xf32>
    %614 = vector.extract_strided_slice %613 {offsets = [8, 0], sizes = [1, 8], strides = [1, 1]} : vector<9x8xf32> to vector<1x8xf32>
    %615 = vector.extract_strided_slice %2 {offsets = [0, 0], sizes = [1, 8], strides = [1, 1]} : vector<9x8xf32> to vector<1x8xf32>
    %616 = arith.mulf %614, %615 : vector<1x8xf32>
    %617 = vector.broadcast %616 : vector<1x8xf32> to vector<9x8xf32>
    %618 = arith.mulf %617, %613 : vector<9x8xf32>
    %619 = arith.addf %611, %618 : vector<9x8xf32>
    %c1_245 = arith.constant 1 : index
    %c0_246 = arith.constant 0 : index
    %c0_247 = arith.constant 0 : index
    %620 = vector.load %arg1[%c1_245, %c0_246, %c0_247] : memref<9x9x8xf32, #tpu.memory_space<vmem>>, vector<1x9x8xf32>
    %621 = vector.shape_cast %620 : vector<1x9x8xf32> to vector<9x8xf32>
    %622 = vector.extract_strided_slice %621 {offsets = [8, 0], sizes = [1, 8], strides = [1, 1]} : vector<9x8xf32> to vector<1x8xf32>
    %623 = vector.extract_strided_slice %2 {offsets = [1, 0], sizes = [1, 8], strides = [1, 1]} : vector<9x8xf32> to vector<1x8xf32>
    %624 = arith.mulf %622, %623 : vector<1x8xf32>
    %625 = vector.broadcast %624 : vector<1x8xf32> to vector<9x8xf32>
    %626 = arith.mulf %625, %621 : vector<9x8xf32>
    %627 = arith.addf %619, %626 : vector<9x8xf32>
    %c2_248 = arith.constant 2 : index
    %c0_249 = arith.constant 0 : index
    %c0_250 = arith.constant 0 : index
    %628 = vector.load %arg1[%c2_248, %c0_249, %c0_250] : memref<9x9x8xf32, #tpu.memory_space<vmem>>, vector<1x9x8xf32>
    %629 = vector.shape_cast %628 : vector<1x9x8xf32> to vector<9x8xf32>
    %630 = vector.extract_strided_slice %629 {offsets = [8, 0], sizes = [1, 8], strides = [1, 1]} : vector<9x8xf32> to vector<1x8xf32>
    %631 = vector.extract_strided_slice %2 {offsets = [2, 0], sizes = [1, 8], strides = [1, 1]} : vector<9x8xf32> to vector<1x8xf32>
    %632 = arith.mulf %630, %631 : vector<1x8xf32>
    %633 = vector.broadcast %632 : vector<1x8xf32> to vector<9x8xf32>
    %634 = arith.mulf %633, %629 : vector<9x8xf32>
    %635 = arith.addf %627, %634 : vector<9x8xf32>
    %c3_251 = arith.constant 3 : index
    %c0_252 = arith.constant 0 : index
    %c0_253 = arith.constant 0 : index
    %636 = vector.load %arg1[%c3_251, %c0_252, %c0_253] : memref<9x9x8xf32, #tpu.memory_space<vmem>>, vector<1x9x8xf32>
    %637 = vector.shape_cast %636 : vector<1x9x8xf32> to vector<9x8xf32>
    %638 = vector.extract_strided_slice %637 {offsets = [8, 0], sizes = [1, 8], strides = [1, 1]} : vector<9x8xf32> to vector<1x8xf32>
    %639 = vector.extract_strided_slice %2 {offsets = [3, 0], sizes = [1, 8], strides = [1, 1]} : vector<9x8xf32> to vector<1x8xf32>
    %640 = arith.mulf %638, %639 : vector<1x8xf32>
    %641 = vector.broadcast %640 : vector<1x8xf32> to vector<9x8xf32>
    %642 = arith.mulf %641, %637 : vector<9x8xf32>
    %643 = arith.addf %635, %642 : vector<9x8xf32>
    %c4_254 = arith.constant 4 : index
    %c0_255 = arith.constant 0 : index
    %c0_256 = arith.constant 0 : index
    %644 = vector.load %arg1[%c4_254, %c0_255, %c0_256] : memref<9x9x8xf32, #tpu.memory_space<vmem>>, vector<1x9x8xf32>
    %645 = vector.shape_cast %644 : vector<1x9x8xf32> to vector<9x8xf32>
    %646 = vector.extract_strided_slice %645 {offsets = [8, 0], sizes = [1, 8], strides = [1, 1]} : vector<9x8xf32> to vector<1x8xf32>
    %647 = vector.extract_strided_slice %2 {offsets = [4, 0], sizes = [1, 8], strides = [1, 1]} : vector<9x8xf32> to vector<1x8xf32>
    %648 = arith.mulf %646, %647 : vector<1x8xf32>
    %649 = vector.broadcast %648 : vector<1x8xf32> to vector<9x8xf32>
    %650 = arith.mulf %649, %645 : vector<9x8xf32>
    %651 = arith.addf %643, %650 : vector<9x8xf32>
    %c5_257 = arith.constant 5 : index
    %c0_258 = arith.constant 0 : index
    %c0_259 = arith.constant 0 : index
    %652 = vector.load %arg1[%c5_257, %c0_258, %c0_259] : memref<9x9x8xf32, #tpu.memory_space<vmem>>, vector<1x9x8xf32>
    %653 = vector.shape_cast %652 : vector<1x9x8xf32> to vector<9x8xf32>
    %654 = vector.extract_strided_slice %653 {offsets = [8, 0], sizes = [1, 8], strides = [1, 1]} : vector<9x8xf32> to vector<1x8xf32>
    %655 = vector.extract_strided_slice %2 {offsets = [5, 0], sizes = [1, 8], strides = [1, 1]} : vector<9x8xf32> to vector<1x8xf32>
    %656 = arith.mulf %654, %655 : vector<1x8xf32>
    %657 = vector.broadcast %656 : vector<1x8xf32> to vector<9x8xf32>
    %658 = arith.mulf %657, %653 : vector<9x8xf32>
    %659 = arith.addf %651, %658 : vector<9x8xf32>
    %c6_260 = arith.constant 6 : index
    %c0_261 = arith.constant 0 : index
    %c0_262 = arith.constant 0 : index
    %660 = vector.load %arg1[%c6_260, %c0_261, %c0_262] : memref<9x9x8xf32, #tpu.memory_space<vmem>>, vector<1x9x8xf32>
    %661 = vector.shape_cast %660 : vector<1x9x8xf32> to vector<9x8xf32>
    %662 = vector.extract_strided_slice %661 {offsets = [8, 0], sizes = [1, 8], strides = [1, 1]} : vector<9x8xf32> to vector<1x8xf32>
    %663 = vector.extract_strided_slice %2 {offsets = [6, 0], sizes = [1, 8], strides = [1, 1]} : vector<9x8xf32> to vector<1x8xf32>
    %664 = arith.mulf %662, %663 : vector<1x8xf32>
    %665 = vector.broadcast %664 : vector<1x8xf32> to vector<9x8xf32>
    %666 = arith.mulf %665, %661 : vector<9x8xf32>
    %667 = arith.addf %659, %666 : vector<9x8xf32>
    %c7_263 = arith.constant 7 : index
    %c0_264 = arith.constant 0 : index
    %c0_265 = arith.constant 0 : index
    %668 = vector.load %arg1[%c7_263, %c0_264, %c0_265] : memref<9x9x8xf32, #tpu.memory_space<vmem>>, vector<1x9x8xf32>
    %669 = vector.shape_cast %668 : vector<1x9x8xf32> to vector<9x8xf32>
    %670 = vector.extract_strided_slice %669 {offsets = [8, 0], sizes = [1, 8], strides = [1, 1]} : vector<9x8xf32> to vector<1x8xf32>
    %671 = vector.extract_strided_slice %2 {offsets = [7, 0], sizes = [1, 8], strides = [1, 1]} : vector<9x8xf32> to vector<1x8xf32>
    %672 = arith.mulf %670, %671 : vector<1x8xf32>
    %673 = vector.broadcast %672 : vector<1x8xf32> to vector<9x8xf32>
    %674 = arith.mulf %673, %669 : vector<9x8xf32>
    %675 = arith.addf %667, %674 : vector<9x8xf32>
    %c8_266 = arith.constant 8 : index
    %c0_267 = arith.constant 0 : index
    %c0_268 = arith.constant 0 : index
    %676 = vector.load %arg1[%c8_266, %c0_267, %c0_268] : memref<9x9x8xf32, #tpu.memory_space<vmem>>, vector<1x9x8xf32>
    %677 = vector.shape_cast %676 : vector<1x9x8xf32> to vector<9x8xf32>
    %678 = vector.extract_strided_slice %677 {offsets = [8, 0], sizes = [1, 8], strides = [1, 1]} : vector<9x8xf32> to vector<1x8xf32>
    %679 = vector.extract_strided_slice %2 {offsets = [8, 0], sizes = [1, 8], strides = [1, 1]} : vector<9x8xf32> to vector<1x8xf32>
    %680 = arith.mulf %678, %679 : vector<1x8xf32>
    %681 = vector.broadcast %680 : vector<1x8xf32> to vector<9x8xf32>
    %682 = arith.mulf %681, %677 : vector<9x8xf32>
    %683 = arith.addf %675, %682 : vector<9x8xf32>
    %c8_269 = arith.constant 8 : index
    %c0_270 = arith.constant 0 : index
    %c0_271 = arith.constant 0 : index
    %684 = vector.load %arg3[%c8_269, %c0_270, %c0_271] : memref<9x9x8xf32, #tpu.memory_space<vmem>>, vector<1x9x8xf32>
    %685 = vector.shape_cast %684 : vector<1x9x8xf32> to vector<9x8xf32>
    %686 = vector.shape_cast %683 : vector<9x8xf32> to vector<1x9x8xf32>
    tpu.vector_store %arg3[%c8_269, %c0_270, %c0_271], %686 {strides = array<i32>} : memref<9x9x8xf32, #tpu.memory_space<vmem>>, vector<1x9x8xf32>,
    return
  }
  func.func @transform_0(%arg0: i32) -> (i32, i32, i32) {
    %c0_i32 = arith.constant 0 : i32
    %c0_i32_0 = arith.constant 0 : i32
    %c0_i32_1 = arith.constant 0 : i32
    return %c0_i32, %c0_i32_0, %arg0 : i32, i32, i32
  }
  func.func @transform_1(%arg0: i32) -> (i32, i32) {
    %c0_i32 = arith.constant 0 : i32
    %c0_i32_0 = arith.constant 0 : i32
    return %c0_i32, %arg0 : i32, i32
  }
  func.func @transform_2(%arg0: i32) -> (i32, i32, i32) {
    %c0_i32 = arith.constant 0 : i32
    %c0_i32_0 = arith.constant 0 : i32
    %c0_i32_1 = arith.constant 0 : i32
    return %c0_i32, %c0_i32_0, %arg0 : i32, i32, i32
  }
}

module attributes {stable_mosaic.version = 11 : i64} {
  func.func @_logeig_kernel(%arg0: i32, %arg1: memref<9x9x8xf32, #tpu.memory_space<vmem>>, %arg2: memref<9x8xf32, #tpu.memory_space<vmem>>, %arg3: memref<9x9x8xf32, #tpu.memory_space<vmem>>) attributes {dimension_semantics = [#tpu.dimension_semantics<parallel>], iteration_bounds = array<i64: 1>, scalar_prefetch = 0 : i64, scratch_operands = 0 : i64, tpu.core_type = #tpu.core_type<tc>, window_params = [{transform_indices = @transform_0, window_bounds = array<i64: 9, 9, 8>}, {transform_indices = @transform_1, window_bounds = array<i64: 9, 8>}, {transform_indices = @transform_2, window_bounds = array<i64: 9, 9, 8>}]} {
    %c0 = arith.constant 0 : index
    %c0_0 = arith.constant 0 : index
    %0 = vector.load %arg2[%c0, %c0_0] : memref<9x8xf32, #tpu.memory_space<vmem>>, vector<9x8xf32>
    %cst = arith.constant 9.99999996E-13 : f32
    %1 = vector.broadcast %cst : f32 to vector<9x8xf32>
    %2 = arith.maximumf %0, %1 : vector<9x8xf32>
    %3 = math.log %2 : vector<9x8xf32>
    %cst_1 = arith.constant 0.000000e+00 : f32
    %4 = vector.broadcast %cst_1 : f32 to vector<9x8xf32>
    %c0_2 = arith.constant 0 : index
    %c0_3 = arith.constant 0 : index
    %c0_4 = arith.constant 0 : index
    %5 = vector.load %arg1[%c0_2, %c0_3, %c0_4] : memref<9x9x8xf32, #tpu.memory_space<vmem>>, vector<1x9x8xf32>
    %6 = vector.shape_cast %5 : vector<1x9x8xf32> to vector<9x8xf32>
    %7 = vector.extract_strided_slice %6 {offsets = [0, 0], sizes = [1, 8], strides = [1, 1]} : vector<9x8xf32> to vector<1x8xf32>
    %8 = vector.extract_strided_slice %3 {offsets = [0, 0], sizes = [1, 8], strides = [1, 1]} : vector<9x8xf32> to vector<1x8xf32>
    %9 = arith.mulf %7, %8 : vector<1x8xf32>
    %10 = vector.broadcast %9 : vector<1x8xf32> to vector<9x8xf32>
    %11 = arith.mulf %10, %6 : vector<9x8xf32>
    %12 = arith.addf %4, %11 : vector<9x8xf32>
    %c1 = arith.constant 1 : index
    %c0_5 = arith.constant 0 : index
    %c0_6 = arith.constant 0 : index
    %13 = vector.load %arg1[%c1, %c0_5, %c0_6] : memref<9x9x8xf32, #tpu.memory_space<vmem>>, vector<1x9x8xf32>
    %14 = vector.shape_cast %13 : vector<1x9x8xf32> to vector<9x8xf32>
    %15 = vector.extract_strided_slice %14 {offsets = [0, 0], sizes = [1, 8], strides = [1, 1]} : vector<9x8xf32> to vector<1x8xf32>
    %16 = vector.extract_strided_slice %3 {offsets = [1, 0], sizes = [1, 8], strides = [1, 1]} : vector<9x8xf32> to vector<1x8xf32>
    %17 = arith.mulf %15, %16 : vector<1x8xf32>
    %18 = vector.broadcast %17 : vector<1x8xf32> to vector<9x8xf32>
    %19 = arith.mulf %18, %14 : vector<9x8xf32>
    %20 = arith.addf %12, %19 : vector<9x8xf32>
    %c2 = arith.constant 2 : index
    %c0_7 = arith.constant 0 : index
    %c0_8 = arith.constant 0 : index
    %21 = vector.load %arg1[%c2, %c0_7, %c0_8] : memref<9x9x8xf32, #tpu.memory_space<vmem>>, vector<1x9x8xf32>
    %22 = vector.shape_cast %21 : vector<1x9x8xf32> to vector<9x8xf32>
    %23 = vector.extract_strided_slice %22 {offsets = [0, 0], sizes = [1, 8], strides = [1, 1]} : vector<9x8xf32> to vector<1x8xf32>
    %24 = vector.extract_strided_slice %3 {offsets = [2, 0], sizes = [1, 8], strides = [1, 1]} : vector<9x8xf32> to vector<1x8xf32>
    %25 = arith.mulf %23, %24 : vector<1x8xf32>
    %26 = vector.broadcast %25 : vector<1x8xf32> to vector<9x8xf32>
    %27 = arith.mulf %26, %22 : vector<9x8xf32>
    %28 = arith.addf %20, %27 : vector<9x8xf32>
    %c3 = arith.constant 3 : index
    %c0_9 = arith.constant 0 : index
    %c0_10 = arith.constant 0 : index
    %29 = vector.load %arg1[%c3, %c0_9, %c0_10] : memref<9x9x8xf32, #tpu.memory_space<vmem>>, vector<1x9x8xf32>
    %30 = vector.shape_cast %29 : vector<1x9x8xf32> to vector<9x8xf32>
    %31 = vector.extract_strided_slice %30 {offsets = [0, 0], sizes = [1, 8], strides = [1, 1]} : vector<9x8xf32> to vector<1x8xf32>
    %32 = vector.extract_strided_slice %3 {offsets = [3, 0], sizes = [1, 8], strides = [1, 1]} : vector<9x8xf32> to vector<1x8xf32>
    %33 = arith.mulf %31, %32 : vector<1x8xf32>
    %34 = vector.broadcast %33 : vector<1x8xf32> to vector<9x8xf32>
    %35 = arith.mulf %34, %30 : vector<9x8xf32>
    %36 = arith.addf %28, %35 : vector<9x8xf32>
    %c4 = arith.constant 4 : index
    %c0_11 = arith.constant 0 : index
    %c0_12 = arith.constant 0 : index
    %37 = vector.load %arg1[%c4, %c0_11, %c0_12] : memref<9x9x8xf32, #tpu.memory_space<vmem>>, vector<1x9x8xf32>
    %38 = vector.shape_cast %37 : vector<1x9x8xf32> to vector<9x8xf32>
    %39 = vector.extract_strided_slice %38 {offsets = [0, 0], sizes = [1, 8], strides = [1, 1]} : vector<9x8xf32> to vector<1x8xf32>
    %40 = vector.extract_strided_slice %3 {offsets = [4, 0], sizes = [1, 8], strides = [1, 1]} : vector<9x8xf32> to vector<1x8xf32>
    %41 = arith.mulf %39, %40 : vector<1x8xf32>
    %42 = vector.broadcast %41 : vector<1x8xf32> to vector<9x8xf32>
    %43 = arith.mulf %42, %38 : vector<9x8xf32>
    %44 = arith.addf %36, %43 : vector<9x8xf32>
    %c5 = arith.constant 5 : index
    %c0_13 = arith.constant 0 : index
    %c0_14 = arith.constant 0 : index
    %45 = vector.load %arg1[%c5, %c0_13, %c0_14] : memref<9x9x8xf32, #tpu.memory_space<vmem>>, vector<1x9x8xf32>
    %46 = vector.shape_cast %45 : vector<1x9x8xf32> to vector<9x8xf32>
    %47 = vector.extract_strided_slice %46 {offsets = [0, 0], sizes = [1, 8], strides = [1, 1]} : vector<9x8xf32> to vector<1x8xf32>
    %48 = vector.extract_strided_slice %3 {offsets = [5, 0], sizes = [1, 8], strides = [1, 1]} : vector<9x8xf32> to vector<1x8xf32>
    %49 = arith.mulf %47, %48 : vector<1x8xf32>
    %50 = vector.broadcast %49 : vector<1x8xf32> to vector<9x8xf32>
    %51 = arith.mulf %50, %46 : vector<9x8xf32>
    %52 = arith.addf %44, %51 : vector<9x8xf32>
    %c6 = arith.constant 6 : index
    %c0_15 = arith.constant 0 : index
    %c0_16 = arith.constant 0 : index
    %53 = vector.load %arg1[%c6, %c0_15, %c0_16] : memref<9x9x8xf32, #tpu.memory_space<vmem>>, vector<1x9x8xf32>
    %54 = vector.shape_cast %53 : vector<1x9x8xf32> to vector<9x8xf32>
    %55 = vector.extract_strided_slice %54 {offsets = [0, 0], sizes = [1, 8], strides = [1, 1]} : vector<9x8xf32> to vector<1x8xf32>
    %56 = vector.extract_strided_slice %3 {offsets = [6, 0], sizes = [1, 8], strides = [1, 1]} : vector<9x8xf32> to vector<1x8xf32>
    %57 = arith.mulf %55, %56 : vector<1x8xf32>
    %58 = vector.broadcast %57 : vector<1x8xf32> to vector<9x8xf32>
    %59 = arith.mulf %58, %54 : vector<9x8xf32>
    %60 = arith.addf %52, %59 : vector<9x8xf32>
    %c7 = arith.constant 7 : index
    %c0_17 = arith.constant 0 : index
    %c0_18 = arith.constant 0 : index
    %61 = vector.load %arg1[%c7, %c0_17, %c0_18] : memref<9x9x8xf32, #tpu.memory_space<vmem>>, vector<1x9x8xf32>
    %62 = vector.shape_cast %61 : vector<1x9x8xf32> to vector<9x8xf32>
    %63 = vector.extract_strided_slice %62 {offsets = [0, 0], sizes = [1, 8], strides = [1, 1]} : vector<9x8xf32> to vector<1x8xf32>
    %64 = vector.extract_strided_slice %3 {offsets = [7, 0], sizes = [1, 8], strides = [1, 1]} : vector<9x8xf32> to vector<1x8xf32>
    %65 = arith.mulf %63, %64 : vector<1x8xf32>
    %66 = vector.broadcast %65 : vector<1x8xf32> to vector<9x8xf32>
    %67 = arith.mulf %66, %62 : vector<9x8xf32>
    %68 = arith.addf %60, %67 : vector<9x8xf32>
    %c8 = arith.constant 8 : index
    %c0_19 = arith.constant 0 : index
    %c0_20 = arith.constant 0 : index
    %69 = vector.load %arg1[%c8, %c0_19, %c0_20] : memref<9x9x8xf32, #tpu.memory_space<vmem>>, vector<1x9x8xf32>
    %70 = vector.shape_cast %69 : vector<1x9x8xf32> to vector<9x8xf32>
    %71 = vector.extract_strided_slice %70 {offsets = [0, 0], sizes = [1, 8], strides = [1, 1]} : vector<9x8xf32> to vector<1x8xf32>
    %72 = vector.extract_strided_slice %3 {offsets = [8, 0], sizes = [1, 8], strides = [1, 1]} : vector<9x8xf32> to vector<1x8xf32>
    %73 = arith.mulf %71, %72 : vector<1x8xf32>
    %74 = vector.broadcast %73 : vector<1x8xf32> to vector<9x8xf32>
    %75 = arith.mulf %74, %70 : vector<9x8xf32>
    %76 = arith.addf %68, %75 : vector<9x8xf32>
    %c0_21 = arith.constant 0 : index
    %c0_22 = arith.constant 0 : index
    %c0_23 = arith.constant 0 : index
    %77 = vector.load %arg3[%c0_21, %c0_22, %c0_23] : memref<9x9x8xf32, #tpu.memory_space<vmem>>, vector<1x9x8xf32>
    %78 = vector.shape_cast %77 : vector<1x9x8xf32> to vector<9x8xf32>
    %79 = vector.shape_cast %76 : vector<9x8xf32> to vector<1x9x8xf32>
    tpu.vector_store %arg3[%c0_21, %c0_22, %c0_23], %79 {strides = array<i32>} : memref<9x9x8xf32, #tpu.memory_space<vmem>>, vector<1x9x8xf32>,
    %cst_24 = arith.constant 0.000000e+00 : f32
    %80 = vector.broadcast %cst_24 : f32 to vector<9x8xf32>
    %c0_25 = arith.constant 0 : index
    %c0_26 = arith.constant 0 : index
    %c0_27 = arith.constant 0 : index
    %81 = vector.load %arg1[%c0_25, %c0_26, %c0_27] : memref<9x9x8xf32, #tpu.memory_space<vmem>>, vector<1x9x8xf32>
    %82 = vector.shape_cast %81 : vector<1x9x8xf32> to vector<9x8xf32>
    %83 = vector.extract_strided_slice %82 {offsets = [1, 0], sizes = [1, 8], strides = [1, 1]} : vector<9x8xf32> to vector<1x8xf32>
    %84 = vector.extract_strided_slice %3 {offsets = [0, 0], sizes = [1, 8], strides = [1, 1]} : vector<9x8xf32> to vector<1x8xf32>
    %85 = arith.mulf %83, %84 : vector<1x8xf32>
    %86 = vector.broadcast %85 : vector<1x8xf32> to vector<9x8xf32>
    %87 = arith.mulf %86, %82 : vector<9x8xf32>
    %88 = arith.addf %80, %87 : vector<9x8xf32>
    %c1_28 = arith.constant 1 : index
    %c0_29 = arith.constant 0 : index
    %c0_30 = arith.constant 0 : index
    %89 = vector.load %arg1[%c1_28, %c0_29, %c0_30] : memref<9x9x8xf32, #tpu.memory_space<vmem>>, vector<1x9x8xf32>
    %90 = vector.shape_cast %89 : vector<1x9x8xf32> to vector<9x8xf32>
    %91 = vector.extract_strided_slice %90 {offsets = [1, 0], sizes = [1, 8], strides = [1, 1]} : vector<9x8xf32> to vector<1x8xf32>
    %92 = vector.extract_strided_slice %3 {offsets = [1, 0], sizes = [1, 8], strides = [1, 1]} : vector<9x8xf32> to vector<1x8xf32>
    %93 = arith.mulf %91, %92 : vector<1x8xf32>
    %94 = vector.broadcast %93 : vector<1x8xf32> to vector<9x8xf32>
    %95 = arith.mulf %94, %90 : vector<9x8xf32>
    %96 = arith.addf %88, %95 : vector<9x8xf32>
    %c2_31 = arith.constant 2 : index
    %c0_32 = arith.constant 0 : index
    %c0_33 = arith.constant 0 : index
    %97 = vector.load %arg1[%c2_31, %c0_32, %c0_33] : memref<9x9x8xf32, #tpu.memory_space<vmem>>, vector<1x9x8xf32>
    %98 = vector.shape_cast %97 : vector<1x9x8xf32> to vector<9x8xf32>
    %99 = vector.extract_strided_slice %98 {offsets = [1, 0], sizes = [1, 8], strides = [1, 1]} : vector<9x8xf32> to vector<1x8xf32>
    %100 = vector.extract_strided_slice %3 {offsets = [2, 0], sizes = [1, 8], strides = [1, 1]} : vector<9x8xf32> to vector<1x8xf32>
    %101 = arith.mulf %99, %100 : vector<1x8xf32>
    %102 = vector.broadcast %101 : vector<1x8xf32> to vector<9x8xf32>
    %103 = arith.mulf %102, %98 : vector<9x8xf32>
    %104 = arith.addf %96, %103 : vector<9x8xf32>
    %c3_34 = arith.constant 3 : index
    %c0_35 = arith.constant 0 : index
    %c0_36 = arith.constant 0 : index
    %105 = vector.load %arg1[%c3_34, %c0_35, %c0_36] : memref<9x9x8xf32, #tpu.memory_space<vmem>>, vector<1x9x8xf32>
    %106 = vector.shape_cast %105 : vector<1x9x8xf32> to vector<9x8xf32>
    %107 = vector.extract_strided_slice %106 {offsets = [1, 0], sizes = [1, 8], strides = [1, 1]} : vector<9x8xf32> to vector<1x8xf32>
    %108 = vector.extract_strided_slice %3 {offsets = [3, 0], sizes = [1, 8], strides = [1, 1]} : vector<9x8xf32> to vector<1x8xf32>
    %109 = arith.mulf %107, %108 : vector<1x8xf32>
    %110 = vector.broadcast %109 : vector<1x8xf32> to vector<9x8xf32>
    %111 = arith.mulf %110, %106 : vector<9x8xf32>
    %112 = arith.addf %104, %111 : vector<9x8xf32>
    %c4_37 = arith.constant 4 : index
    %c0_38 = arith.constant 0 : index
    %c0_39 = arith.constant 0 : index
    %113 = vector.load %arg1[%c4_37, %c0_38, %c0_39] : memref<9x9x8xf32, #tpu.memory_space<vmem>>, vector<1x9x8xf32>
    %114 = vector.shape_cast %113 : vector<1x9x8xf32> to vector<9x8xf32>
    %115 = vector.extract_strided_slice %114 {offsets = [1, 0], sizes = [1, 8], strides = [1, 1]} : vector<9x8xf32> to vector<1x8xf32>
    %116 = vector.extract_strided_slice %3 {offsets = [4, 0], sizes = [1, 8], strides = [1, 1]} : vector<9x8xf32> to vector<1x8xf32>
    %117 = arith.mulf %115, %116 : vector<1x8xf32>
    %118 = vector.broadcast %117 : vector<1x8xf32> to vector<9x8xf32>
    %119 = arith.mulf %118, %114 : vector<9x8xf32>
    %120 = arith.addf %112, %119 : vector<9x8xf32>
    %c5_40 = arith.constant 5 : index
    %c0_41 = arith.constant 0 : index
    %c0_42 = arith.constant 0 : index
    %121 = vector.load %arg1[%c5_40, %c0_41, %c0_42] : memref<9x9x8xf32, #tpu.memory_space<vmem>>, vector<1x9x8xf32>
    %122 = vector.shape_cast %121 : vector<1x9x8xf32> to vector<9x8xf32>
    %123 = vector.extract_strided_slice %122 {offsets = [1, 0], sizes = [1, 8], strides = [1, 1]} : vector<9x8xf32> to vector<1x8xf32>
    %124 = vector.extract_strided_slice %3 {offsets = [5, 0], sizes = [1, 8], strides = [1, 1]} : vector<9x8xf32> to vector<1x8xf32>
    %125 = arith.mulf %123, %124 : vector<1x8xf32>
    %126 = vector.broadcast %125 : vector<1x8xf32> to vector<9x8xf32>
    %127 = arith.mulf %126, %122 : vector<9x8xf32>
    %128 = arith.addf %120, %127 : vector<9x8xf32>
    %c6_43 = arith.constant 6 : index
    %c0_44 = arith.constant 0 : index
    %c0_45 = arith.constant 0 : index
    %129 = vector.load %arg1[%c6_43, %c0_44, %c0_45] : memref<9x9x8xf32, #tpu.memory_space<vmem>>, vector<1x9x8xf32>
    %130 = vector.shape_cast %129 : vector<1x9x8xf32> to vector<9x8xf32>
    %131 = vector.extract_strided_slice %130 {offsets = [1, 0], sizes = [1, 8], strides = [1, 1]} : vector<9x8xf32> to vector<1x8xf32>
    %132 = vector.extract_strided_slice %3 {offsets = [6, 0], sizes = [1, 8], strides = [1, 1]} : vector<9x8xf32> to vector<1x8xf32>
    %133 = arith.mulf %131, %132 : vector<1x8xf32>
    %134 = vector.broadcast %133 : vector<1x8xf32> to vector<9x8xf32>
    %135 = arith.mulf %134, %130 : vector<9x8xf32>
    %136 = arith.addf %128, %135 : vector<9x8xf32>
    %c7_46 = arith.constant 7 : index
    %c0_47 = arith.constant 0 : index
    %c0_48 = arith.constant 0 : index
    %137 = vector.load %arg1[%c7_46, %c0_47, %c0_48] : memref<9x9x8xf32, #tpu.memory_space<vmem>>, vector<1x9x8xf32>
    %138 = vector.shape_cast %137 : vector<1x9x8xf32> to vector<9x8xf32>
    %139 = vector.extract_strided_slice %138 {offsets = [1, 0], sizes = [1, 8], strides = [1, 1]} : vector<9x8xf32> to vector<1x8xf32>
    %140 = vector.extract_strided_slice %3 {offsets = [7, 0], sizes = [1, 8], strides = [1, 1]} : vector<9x8xf32> to vector<1x8xf32>
    %141 = arith.mulf %139, %140 : vector<1x8xf32>
    %142 = vector.broadcast %141 : vector<1x8xf32> to vector<9x8xf32>
    %143 = arith.mulf %142, %138 : vector<9x8xf32>
    %144 = arith.addf %136, %143 : vector<9x8xf32>
    %c8_49 = arith.constant 8 : index
    %c0_50 = arith.constant 0 : index
    %c0_51 = arith.constant 0 : index
    %145 = vector.load %arg1[%c8_49, %c0_50, %c0_51] : memref<9x9x8xf32, #tpu.memory_space<vmem>>, vector<1x9x8xf32>
    %146 = vector.shape_cast %145 : vector<1x9x8xf32> to vector<9x8xf32>
    %147 = vector.extract_strided_slice %146 {offsets = [1, 0], sizes = [1, 8], strides = [1, 1]} : vector<9x8xf32> to vector<1x8xf32>
    %148 = vector.extract_strided_slice %3 {offsets = [8, 0], sizes = [1, 8], strides = [1, 1]} : vector<9x8xf32> to vector<1x8xf32>
    %149 = arith.mulf %147, %148 : vector<1x8xf32>
    %150 = vector.broadcast %149 : vector<1x8xf32> to vector<9x8xf32>
    %151 = arith.mulf %150, %146 : vector<9x8xf32>
    %152 = arith.addf %144, %151 : vector<9x8xf32>
    %c1_52 = arith.constant 1 : index
    %c0_53 = arith.constant 0 : index
    %c0_54 = arith.constant 0 : index
    %153 = vector.load %arg3[%c1_52, %c0_53, %c0_54] : memref<9x9x8xf32, #tpu.memory_space<vmem>>, vector<1x9x8xf32>
    %154 = vector.shape_cast %153 : vector<1x9x8xf32> to vector<9x8xf32>
    %155 = vector.shape_cast %152 : vector<9x8xf32> to vector<1x9x8xf32>
    tpu.vector_store %arg3[%c1_52, %c0_53, %c0_54], %155 {strides = array<i32>} : memref<9x9x8xf32, #tpu.memory_space<vmem>>, vector<1x9x8xf32>,
    %cst_55 = arith.constant 0.000000e+00 : f32
    %156 = vector.broadcast %cst_55 : f32 to vector<9x8xf32>
    %c0_56 = arith.constant 0 : index
    %c0_57 = arith.constant 0 : index
    %c0_58 = arith.constant 0 : index
    %157 = vector.load %arg1[%c0_56, %c0_57, %c0_58] : memref<9x9x8xf32, #tpu.memory_space<vmem>>, vector<1x9x8xf32>
    %158 = vector.shape_cast %157 : vector<1x9x8xf32> to vector<9x8xf32>
    %159 = vector.extract_strided_slice %158 {offsets = [2, 0], sizes = [1, 8], strides = [1, 1]} : vector<9x8xf32> to vector<1x8xf32>
    %160 = vector.extract_strided_slice %3 {offsets = [0, 0], sizes = [1, 8], strides = [1, 1]} : vector<9x8xf32> to vector<1x8xf32>
    %161 = arith.mulf %159, %160 : vector<1x8xf32>
    %162 = vector.broadcast %161 : vector<1x8xf32> to vector<9x8xf32>
    %163 = arith.mulf %162, %158 : vector<9x8xf32>
    %164 = arith.addf %156, %163 : vector<9x8xf32>
    %c1_59 = arith.constant 1 : index
    %c0_60 = arith.constant 0 : index
    %c0_61 = arith.constant 0 : index
    %165 = vector.load %arg1[%c1_59, %c0_60, %c0_61] : memref<9x9x8xf32, #tpu.memory_space<vmem>>, vector<1x9x8xf32>
    %166 = vector.shape_cast %165 : vector<1x9x8xf32> to vector<9x8xf32>
    %167 = vector.extract_strided_slice %166 {offsets = [2, 0], sizes = [1, 8], strides = [1, 1]} : vector<9x8xf32> to vector<1x8xf32>
    %168 = vector.extract_strided_slice %3 {offsets = [1, 0], sizes = [1, 8], strides = [1, 1]} : vector<9x8xf32> to vector<1x8xf32>
    %169 = arith.mulf %167, %168 : vector<1x8xf32>
    %170 = vector.broadcast %169 : vector<1x8xf32> to vector<9x8xf32>
    %171 = arith.mulf %170, %166 : vector<9x8xf32>
    %172 = arith.addf %164, %171 : vector<9x8xf32>
    %c2_62 = arith.constant 2 : index
    %c0_63 = arith.constant 0 : index
    %c0_64 = arith.constant 0 : index
    %173 = vector.load %arg1[%c2_62, %c0_63, %c0_64] : memref<9x9x8xf32, #tpu.memory_space<vmem>>, vector<1x9x8xf32>
    %174 = vector.shape_cast %173 : vector<1x9x8xf32> to vector<9x8xf32>
    %175 = vector.extract_strided_slice %174 {offsets = [2, 0], sizes = [1, 8], strides = [1, 1]} : vector<9x8xf32> to vector<1x8xf32>
    %176 = vector.extract_strided_slice %3 {offsets = [2, 0], sizes = [1, 8], strides = [1, 1]} : vector<9x8xf32> to vector<1x8xf32>
    %177 = arith.mulf %175, %176 : vector<1x8xf32>
    %178 = vector.broadcast %177 : vector<1x8xf32> to vector<9x8xf32>
    %179 = arith.mulf %178, %174 : vector<9x8xf32>
    %180 = arith.addf %172, %179 : vector<9x8xf32>
    %c3_65 = arith.constant 3 : index
    %c0_66 = arith.constant 0 : index
    %c0_67 = arith.constant 0 : index
    %181 = vector.load %arg1[%c3_65, %c0_66, %c0_67] : memref<9x9x8xf32, #tpu.memory_space<vmem>>, vector<1x9x8xf32>
    %182 = vector.shape_cast %181 : vector<1x9x8xf32> to vector<9x8xf32>
    %183 = vector.extract_strided_slice %182 {offsets = [2, 0], sizes = [1, 8], strides = [1, 1]} : vector<9x8xf32> to vector<1x8xf32>
    %184 = vector.extract_strided_slice %3 {offsets = [3, 0], sizes = [1, 8], strides = [1, 1]} : vector<9x8xf32> to vector<1x8xf32>
    %185 = arith.mulf %183, %184 : vector<1x8xf32>
    %186 = vector.broadcast %185 : vector<1x8xf32> to vector<9x8xf32>
    %187 = arith.mulf %186, %182 : vector<9x8xf32>
    %188 = arith.addf %180, %187 : vector<9x8xf32>
    %c4_68 = arith.constant 4 : index
    %c0_69 = arith.constant 0 : index
    %c0_70 = arith.constant 0 : index
    %189 = vector.load %arg1[%c4_68, %c0_69, %c0_70] : memref<9x9x8xf32, #tpu.memory_space<vmem>>, vector<1x9x8xf32>
    %190 = vector.shape_cast %189 : vector<1x9x8xf32> to vector<9x8xf32>
    %191 = vector.extract_strided_slice %190 {offsets = [2, 0], sizes = [1, 8], strides = [1, 1]} : vector<9x8xf32> to vector<1x8xf32>
    %192 = vector.extract_strided_slice %3 {offsets = [4, 0], sizes = [1, 8], strides = [1, 1]} : vector<9x8xf32> to vector<1x8xf32>
    %193 = arith.mulf %191, %192 : vector<1x8xf32>
    %194 = vector.broadcast %193 : vector<1x8xf32> to vector<9x8xf32>
    %195 = arith.mulf %194, %190 : vector<9x8xf32>
    %196 = arith.addf %188, %195 : vector<9x8xf32>
    %c5_71 = arith.constant 5 : index
    %c0_72 = arith.constant 0 : index
    %c0_73 = arith.constant 0 : index
    %197 = vector.load %arg1[%c5_71, %c0_72, %c0_73] : memref<9x9x8xf32, #tpu.memory_space<vmem>>, vector<1x9x8xf32>
    %198 = vector.shape_cast %197 : vector<1x9x8xf32> to vector<9x8xf32>
    %199 = vector.extract_strided_slice %198 {offsets = [2, 0], sizes = [1, 8], strides = [1, 1]} : vector<9x8xf32> to vector<1x8xf32>
    %200 = vector.extract_strided_slice %3 {offsets = [5, 0], sizes = [1, 8], strides = [1, 1]} : vector<9x8xf32> to vector<1x8xf32>
    %201 = arith.mulf %199, %200 : vector<1x8xf32>
    %202 = vector.broadcast %201 : vector<1x8xf32> to vector<9x8xf32>
    %203 = arith.mulf %202, %198 : vector<9x8xf32>
    %204 = arith.addf %196, %203 : vector<9x8xf32>
    %c6_74 = arith.constant 6 : index
    %c0_75 = arith.constant 0 : index
    %c0_76 = arith.constant 0 : index
    %205 = vector.load %arg1[%c6_74, %c0_75, %c0_76] : memref<9x9x8xf32, #tpu.memory_space<vmem>>, vector<1x9x8xf32>
    %206 = vector.shape_cast %205 : vector<1x9x8xf32> to vector<9x8xf32>
    %207 = vector.extract_strided_slice %206 {offsets = [2, 0], sizes = [1, 8], strides = [1, 1]} : vector<9x8xf32> to vector<1x8xf32>
    %208 = vector.extract_strided_slice %3 {offsets = [6, 0], sizes = [1, 8], strides = [1, 1]} : vector<9x8xf32> to vector<1x8xf32>
    %209 = arith.mulf %207, %208 : vector<1x8xf32>
    %210 = vector.broadcast %209 : vector<1x8xf32> to vector<9x8xf32>
    %211 = arith.mulf %210, %206 : vector<9x8xf32>
    %212 = arith.addf %204, %211 : vector<9x8xf32>
    %c7_77 = arith.constant 7 : index
    %c0_78 = arith.constant 0 : index
    %c0_79 = arith.constant 0 : index
    %213 = vector.load %arg1[%c7_77, %c0_78, %c0_79] : memref<9x9x8xf32, #tpu.memory_space<vmem>>, vector<1x9x8xf32>
    %214 = vector.shape_cast %213 : vector<1x9x8xf32> to vector<9x8xf32>
    %215 = vector.extract_strided_slice %214 {offsets = [2, 0], sizes = [1, 8], strides = [1, 1]} : vector<9x8xf32> to vector<1x8xf32>
    %216 = vector.extract_strided_slice %3 {offsets = [7, 0], sizes = [1, 8], strides = [1, 1]} : vector<9x8xf32> to vector<1x8xf32>
    %217 = arith.mulf %215, %216 : vector<1x8xf32>
    %218 = vector.broadcast %217 : vector<1x8xf32> to vector<9x8xf32>
    %219 = arith.mulf %218, %214 : vector<9x8xf32>
    %220 = arith.addf %212, %219 : vector<9x8xf32>
    %c8_80 = arith.constant 8 : index
    %c0_81 = arith.constant 0 : index
    %c0_82 = arith.constant 0 : index
    %221 = vector.load %arg1[%c8_80, %c0_81, %c0_82] : memref<9x9x8xf32, #tpu.memory_space<vmem>>, vector<1x9x8xf32>
    %222 = vector.shape_cast %221 : vector<1x9x8xf32> to vector<9x8xf32>
    %223 = vector.extract_strided_slice %222 {offsets = [2, 0], sizes = [1, 8], strides = [1, 1]} : vector<9x8xf32> to vector<1x8xf32>
    %224 = vector.extract_strided_slice %3 {offsets = [8, 0], sizes = [1, 8], strides = [1, 1]} : vector<9x8xf32> to vector<1x8xf32>
    %225 = arith.mulf %223, %224 : vector<1x8xf32>
    %226 = vector.broadcast %225 : vector<1x8xf32> to vector<9x8xf32>
    %227 = arith.mulf %226, %222 : vector<9x8xf32>
    %228 = arith.addf %220, %227 : vector<9x8xf32>
    %c2_83 = arith.constant 2 : index
    %c0_84 = arith.constant 0 : index
    %c0_85 = arith.constant 0 : index
    %229 = vector.load %arg3[%c2_83, %c0_84, %c0_85] : memref<9x9x8xf32, #tpu.memory_space<vmem>>, vector<1x9x8xf32>
    %230 = vector.shape_cast %229 : vector<1x9x8xf32> to vector<9x8xf32>
    %231 = vector.shape_cast %228 : vector<9x8xf32> to vector<1x9x8xf32>
    tpu.vector_store %arg3[%c2_83, %c0_84, %c0_85], %231 {strides = array<i32>} : memref<9x9x8xf32, #tpu.memory_space<vmem>>, vector<1x9x8xf32>,
    %cst_86 = arith.constant 0.000000e+00 : f32
    %232 = vector.broadcast %cst_86 : f32 to vector<9x8xf32>
    %c0_87 = arith.constant 0 : index
    %c0_88 = arith.constant 0 : index
    %c0_89 = arith.constant 0 : index
    %233 = vector.load %arg1[%c0_87, %c0_88, %c0_89] : memref<9x9x8xf32, #tpu.memory_space<vmem>>, vector<1x9x8xf32>
    %234 = vector.shape_cast %233 : vector<1x9x8xf32> to vector<9x8xf32>
    %235 = vector.extract_strided_slice %234 {offsets = [3, 0], sizes = [1, 8], strides = [1, 1]} : vector<9x8xf32> to vector<1x8xf32>
    %236 = vector.extract_strided_slice %3 {offsets = [0, 0], sizes = [1, 8], strides = [1, 1]} : vector<9x8xf32> to vector<1x8xf32>
    %237 = arith.mulf %235, %236 : vector<1x8xf32>
    %238 = vector.broadcast %237 : vector<1x8xf32> to vector<9x8xf32>
    %239 = arith.mulf %238, %234 : vector<9x8xf32>
    %240 = arith.addf %232, %239 : vector<9x8xf32>
    %c1_90 = arith.constant 1 : index
    %c0_91 = arith.constant 0 : index
    %c0_92 = arith.constant 0 : index
    %241 = vector.load %arg1[%c1_90, %c0_91, %c0_92] : memref<9x9x8xf32, #tpu.memory_space<vmem>>, vector<1x9x8xf32>
    %242 = vector.shape_cast %241 : vector<1x9x8xf32> to vector<9x8xf32>
    %243 = vector.extract_strided_slice %242 {offsets = [3, 0], sizes = [1, 8], strides = [1, 1]} : vector<9x8xf32> to vector<1x8xf32>
    %244 = vector.extract_strided_slice %3 {offsets = [1, 0], sizes = [1, 8], strides = [1, 1]} : vector<9x8xf32> to vector<1x8xf32>
    %245 = arith.mulf %243, %244 : vector<1x8xf32>
    %246 = vector.broadcast %245 : vector<1x8xf32> to vector<9x8xf32>
    %247 = arith.mulf %246, %242 : vector<9x8xf32>
    %248 = arith.addf %240, %247 : vector<9x8xf32>
    %c2_93 = arith.constant 2 : index
    %c0_94 = arith.constant 0 : index
    %c0_95 = arith.constant 0 : index
    %249 = vector.load %arg1[%c2_93, %c0_94, %c0_95] : memref<9x9x8xf32, #tpu.memory_space<vmem>>, vector<1x9x8xf32>
    %250 = vector.shape_cast %249 : vector<1x9x8xf32> to vector<9x8xf32>
    %251 = vector.extract_strided_slice %250 {offsets = [3, 0], sizes = [1, 8], strides = [1, 1]} : vector<9x8xf32> to vector<1x8xf32>
    %252 = vector.extract_strided_slice %3 {offsets = [2, 0], sizes = [1, 8], strides = [1, 1]} : vector<9x8xf32> to vector<1x8xf32>
    %253 = arith.mulf %251, %252 : vector<1x8xf32>
    %254 = vector.broadcast %253 : vector<1x8xf32> to vector<9x8xf32>
    %255 = arith.mulf %254, %250 : vector<9x8xf32>
    %256 = arith.addf %248, %255 : vector<9x8xf32>
    %c3_96 = arith.constant 3 : index
    %c0_97 = arith.constant 0 : index
    %c0_98 = arith.constant 0 : index
    %257 = vector.load %arg1[%c3_96, %c0_97, %c0_98] : memref<9x9x8xf32, #tpu.memory_space<vmem>>, vector<1x9x8xf32>
    %258 = vector.shape_cast %257 : vector<1x9x8xf32> to vector<9x8xf32>
    %259 = vector.extract_strided_slice %258 {offsets = [3, 0], sizes = [1, 8], strides = [1, 1]} : vector<9x8xf32> to vector<1x8xf32>
    %260 = vector.extract_strided_slice %3 {offsets = [3, 0], sizes = [1, 8], strides = [1, 1]} : vector<9x8xf32> to vector<1x8xf32>
    %261 = arith.mulf %259, %260 : vector<1x8xf32>
    %262 = vector.broadcast %261 : vector<1x8xf32> to vector<9x8xf32>
    %263 = arith.mulf %262, %258 : vector<9x8xf32>
    %264 = arith.addf %256, %263 : vector<9x8xf32>
    %c4_99 = arith.constant 4 : index
    %c0_100 = arith.constant 0 : index
    %c0_101 = arith.constant 0 : index
    %265 = vector.load %arg1[%c4_99, %c0_100, %c0_101] : memref<9x9x8xf32, #tpu.memory_space<vmem>>, vector<1x9x8xf32>
    %266 = vector.shape_cast %265 : vector<1x9x8xf32> to vector<9x8xf32>
    %267 = vector.extract_strided_slice %266 {offsets = [3, 0], sizes = [1, 8], strides = [1, 1]} : vector<9x8xf32> to vector<1x8xf32>
    %268 = vector.extract_strided_slice %3 {offsets = [4, 0], sizes = [1, 8], strides = [1, 1]} : vector<9x8xf32> to vector<1x8xf32>
    %269 = arith.mulf %267, %268 : vector<1x8xf32>
    %270 = vector.broadcast %269 : vector<1x8xf32> to vector<9x8xf32>
    %271 = arith.mulf %270, %266 : vector<9x8xf32>
    %272 = arith.addf %264, %271 : vector<9x8xf32>
    %c5_102 = arith.constant 5 : index
    %c0_103 = arith.constant 0 : index
    %c0_104 = arith.constant 0 : index
    %273 = vector.load %arg1[%c5_102, %c0_103, %c0_104] : memref<9x9x8xf32, #tpu.memory_space<vmem>>, vector<1x9x8xf32>
    %274 = vector.shape_cast %273 : vector<1x9x8xf32> to vector<9x8xf32>
    %275 = vector.extract_strided_slice %274 {offsets = [3, 0], sizes = [1, 8], strides = [1, 1]} : vector<9x8xf32> to vector<1x8xf32>
    %276 = vector.extract_strided_slice %3 {offsets = [5, 0], sizes = [1, 8], strides = [1, 1]} : vector<9x8xf32> to vector<1x8xf32>
    %277 = arith.mulf %275, %276 : vector<1x8xf32>
    %278 = vector.broadcast %277 : vector<1x8xf32> to vector<9x8xf32>
    %279 = arith.mulf %278, %274 : vector<9x8xf32>
    %280 = arith.addf %272, %279 : vector<9x8xf32>
    %c6_105 = arith.constant 6 : index
    %c0_106 = arith.constant 0 : index
    %c0_107 = arith.constant 0 : index
    %281 = vector.load %arg1[%c6_105, %c0_106, %c0_107] : memref<9x9x8xf32, #tpu.memory_space<vmem>>, vector<1x9x8xf32>
    %282 = vector.shape_cast %281 : vector<1x9x8xf32> to vector<9x8xf32>
    %283 = vector.extract_strided_slice %282 {offsets = [3, 0], sizes = [1, 8], strides = [1, 1]} : vector<9x8xf32> to vector<1x8xf32>
    %284 = vector.extract_strided_slice %3 {offsets = [6, 0], sizes = [1, 8], strides = [1, 1]} : vector<9x8xf32> to vector<1x8xf32>
    %285 = arith.mulf %283, %284 : vector<1x8xf32>
    %286 = vector.broadcast %285 : vector<1x8xf32> to vector<9x8xf32>
    %287 = arith.mulf %286, %282 : vector<9x8xf32>
    %288 = arith.addf %280, %287 : vector<9x8xf32>
    %c7_108 = arith.constant 7 : index
    %c0_109 = arith.constant 0 : index
    %c0_110 = arith.constant 0 : index
    %289 = vector.load %arg1[%c7_108, %c0_109, %c0_110] : memref<9x9x8xf32, #tpu.memory_space<vmem>>, vector<1x9x8xf32>
    %290 = vector.shape_cast %289 : vector<1x9x8xf32> to vector<9x8xf32>
    %291 = vector.extract_strided_slice %290 {offsets = [3, 0], sizes = [1, 8], strides = [1, 1]} : vector<9x8xf32> to vector<1x8xf32>
    %292 = vector.extract_strided_slice %3 {offsets = [7, 0], sizes = [1, 8], strides = [1, 1]} : vector<9x8xf32> to vector<1x8xf32>
    %293 = arith.mulf %291, %292 : vector<1x8xf32>
    %294 = vector.broadcast %293 : vector<1x8xf32> to vector<9x8xf32>
    %295 = arith.mulf %294, %290 : vector<9x8xf32>
    %296 = arith.addf %288, %295 : vector<9x8xf32>
    %c8_111 = arith.constant 8 : index
    %c0_112 = arith.constant 0 : index
    %c0_113 = arith.constant 0 : index
    %297 = vector.load %arg1[%c8_111, %c0_112, %c0_113] : memref<9x9x8xf32, #tpu.memory_space<vmem>>, vector<1x9x8xf32>
    %298 = vector.shape_cast %297 : vector<1x9x8xf32> to vector<9x8xf32>
    %299 = vector.extract_strided_slice %298 {offsets = [3, 0], sizes = [1, 8], strides = [1, 1]} : vector<9x8xf32> to vector<1x8xf32>
    %300 = vector.extract_strided_slice %3 {offsets = [8, 0], sizes = [1, 8], strides = [1, 1]} : vector<9x8xf32> to vector<1x8xf32>
    %301 = arith.mulf %299, %300 : vector<1x8xf32>
    %302 = vector.broadcast %301 : vector<1x8xf32> to vector<9x8xf32>
    %303 = arith.mulf %302, %298 : vector<9x8xf32>
    %304 = arith.addf %296, %303 : vector<9x8xf32>
    %c3_114 = arith.constant 3 : index
    %c0_115 = arith.constant 0 : index
    %c0_116 = arith.constant 0 : index
    %305 = vector.load %arg3[%c3_114, %c0_115, %c0_116] : memref<9x9x8xf32, #tpu.memory_space<vmem>>, vector<1x9x8xf32>
    %306 = vector.shape_cast %305 : vector<1x9x8xf32> to vector<9x8xf32>
    %307 = vector.shape_cast %304 : vector<9x8xf32> to vector<1x9x8xf32>
    tpu.vector_store %arg3[%c3_114, %c0_115, %c0_116], %307 {strides = array<i32>} : memref<9x9x8xf32, #tpu.memory_space<vmem>>, vector<1x9x8xf32>,
    %cst_117 = arith.constant 0.000000e+00 : f32
    %308 = vector.broadcast %cst_117 : f32 to vector<9x8xf32>
    %c0_118 = arith.constant 0 : index
    %c0_119 = arith.constant 0 : index
    %c0_120 = arith.constant 0 : index
    %309 = vector.load %arg1[%c0_118, %c0_119, %c0_120] : memref<9x9x8xf32, #tpu.memory_space<vmem>>, vector<1x9x8xf32>
    %310 = vector.shape_cast %309 : vector<1x9x8xf32> to vector<9x8xf32>
    %311 = vector.extract_strided_slice %310 {offsets = [4, 0], sizes = [1, 8], strides = [1, 1]} : vector<9x8xf32> to vector<1x8xf32>
    %312 = vector.extract_strided_slice %3 {offsets = [0, 0], sizes = [1, 8], strides = [1, 1]} : vector<9x8xf32> to vector<1x8xf32>
    %313 = arith.mulf %311, %312 : vector<1x8xf32>
    %314 = vector.broadcast %313 : vector<1x8xf32> to vector<9x8xf32>
    %315 = arith.mulf %314, %310 : vector<9x8xf32>
    %316 = arith.addf %308, %315 : vector<9x8xf32>
    %c1_121 = arith.constant 1 : index
    %c0_122 = arith.constant 0 : index
    %c0_123 = arith.constant 0 : index
    %317 = vector.load %arg1[%c1_121, %c0_122, %c0_123] : memref<9x9x8xf32, #tpu.memory_space<vmem>>, vector<1x9x8xf32>
    %318 = vector.shape_cast %317 : vector<1x9x8xf32> to vector<9x8xf32>
    %319 = vector.extract_strided_slice %318 {offsets = [4, 0], sizes = [1, 8], strides = [1, 1]} : vector<9x8xf32> to vector<1x8xf32>
    %320 = vector.extract_strided_slice %3 {offsets = [1, 0], sizes = [1, 8], strides = [1, 1]} : vector<9x8xf32> to vector<1x8xf32>
    %321 = arith.mulf %319, %320 : vector<1x8xf32>
    %322 = vector.broadcast %321 : vector<1x8xf32> to vector<9x8xf32>
    %323 = arith.mulf %322, %318 : vector<9x8xf32>
    %324 = arith.addf %316, %323 : vector<9x8xf32>
    %c2_124 = arith.constant 2 : index
    %c0_125 = arith.constant 0 : index
    %c0_126 = arith.constant 0 : index
    %325 = vector.load %arg1[%c2_124, %c0_125, %c0_126] : memref<9x9x8xf32, #tpu.memory_space<vmem>>, vector<1x9x8xf32>
    %326 = vector.shape_cast %325 : vector<1x9x8xf32> to vector<9x8xf32>
    %327 = vector.extract_strided_slice %326 {offsets = [4, 0], sizes = [1, 8], strides = [1, 1]} : vector<9x8xf32> to vector<1x8xf32>
    %328 = vector.extract_strided_slice %3 {offsets = [2, 0], sizes = [1, 8], strides = [1, 1]} : vector<9x8xf32> to vector<1x8xf32>
    %329 = arith.mulf %327, %328 : vector<1x8xf32>
    %330 = vector.broadcast %329 : vector<1x8xf32> to vector<9x8xf32>
    %331 = arith.mulf %330, %326 : vector<9x8xf32>
    %332 = arith.addf %324, %331 : vector<9x8xf32>
    %c3_127 = arith.constant 3 : index
    %c0_128 = arith.constant 0 : index
    %c0_129 = arith.constant 0 : index
    %333 = vector.load %arg1[%c3_127, %c0_128, %c0_129] : memref<9x9x8xf32, #tpu.memory_space<vmem>>, vector<1x9x8xf32>
    %334 = vector.shape_cast %333 : vector<1x9x8xf32> to vector<9x8xf32>
    %335 = vector.extract_strided_slice %334 {offsets = [4, 0], sizes = [1, 8], strides = [1, 1]} : vector<9x8xf32> to vector<1x8xf32>
    %336 = vector.extract_strided_slice %3 {offsets = [3, 0], sizes = [1, 8], strides = [1, 1]} : vector<9x8xf32> to vector<1x8xf32>
    %337 = arith.mulf %335, %336 : vector<1x8xf32>
    %338 = vector.broadcast %337 : vector<1x8xf32> to vector<9x8xf32>
    %339 = arith.mulf %338, %334 : vector<9x8xf32>
    %340 = arith.addf %332, %339 : vector<9x8xf32>
    %c4_130 = arith.constant 4 : index
    %c0_131 = arith.constant 0 : index
    %c0_132 = arith.constant 0 : index
    %341 = vector.load %arg1[%c4_130, %c0_131, %c0_132] : memref<9x9x8xf32, #tpu.memory_space<vmem>>, vector<1x9x8xf32>
    %342 = vector.shape_cast %341 : vector<1x9x8xf32> to vector<9x8xf32>
    %343 = vector.extract_strided_slice %342 {offsets = [4, 0], sizes = [1, 8], strides = [1, 1]} : vector<9x8xf32> to vector<1x8xf32>
    %344 = vector.extract_strided_slice %3 {offsets = [4, 0], sizes = [1, 8], strides = [1, 1]} : vector<9x8xf32> to vector<1x8xf32>
    %345 = arith.mulf %343, %344 : vector<1x8xf32>
    %346 = vector.broadcast %345 : vector<1x8xf32> to vector<9x8xf32>
    %347 = arith.mulf %346, %342 : vector<9x8xf32>
    %348 = arith.addf %340, %347 : vector<9x8xf32>
    %c5_133 = arith.constant 5 : index
    %c0_134 = arith.constant 0 : index
    %c0_135 = arith.constant 0 : index
    %349 = vector.load %arg1[%c5_133, %c0_134, %c0_135] : memref<9x9x8xf32, #tpu.memory_space<vmem>>, vector<1x9x8xf32>
    %350 = vector.shape_cast %349 : vector<1x9x8xf32> to vector<9x8xf32>
    %351 = vector.extract_strided_slice %350 {offsets = [4, 0], sizes = [1, 8], strides = [1, 1]} : vector<9x8xf32> to vector<1x8xf32>
    %352 = vector.extract_strided_slice %3 {offsets = [5, 0], sizes = [1, 8], strides = [1, 1]} : vector<9x8xf32> to vector<1x8xf32>
    %353 = arith.mulf %351, %352 : vector<1x8xf32>
    %354 = vector.broadcast %353 : vector<1x8xf32> to vector<9x8xf32>
    %355 = arith.mulf %354, %350 : vector<9x8xf32>
    %356 = arith.addf %348, %355 : vector<9x8xf32>
    %c6_136 = arith.constant 6 : index
    %c0_137 = arith.constant 0 : index
    %c0_138 = arith.constant 0 : index
    %357 = vector.load %arg1[%c6_136, %c0_137, %c0_138] : memref<9x9x8xf32, #tpu.memory_space<vmem>>, vector<1x9x8xf32>
    %358 = vector.shape_cast %357 : vector<1x9x8xf32> to vector<9x8xf32>
    %359 = vector.extract_strided_slice %358 {offsets = [4, 0], sizes = [1, 8], strides = [1, 1]} : vector<9x8xf32> to vector<1x8xf32>
    %360 = vector.extract_strided_slice %3 {offsets = [6, 0], sizes = [1, 8], strides = [1, 1]} : vector<9x8xf32> to vector<1x8xf32>
    %361 = arith.mulf %359, %360 : vector<1x8xf32>
    %362 = vector.broadcast %361 : vector<1x8xf32> to vector<9x8xf32>
    %363 = arith.mulf %362, %358 : vector<9x8xf32>
    %364 = arith.addf %356, %363 : vector<9x8xf32>
    %c7_139 = arith.constant 7 : index
    %c0_140 = arith.constant 0 : index
    %c0_141 = arith.constant 0 : index
    %365 = vector.load %arg1[%c7_139, %c0_140, %c0_141] : memref<9x9x8xf32, #tpu.memory_space<vmem>>, vector<1x9x8xf32>
    %366 = vector.shape_cast %365 : vector<1x9x8xf32> to vector<9x8xf32>
    %367 = vector.extract_strided_slice %366 {offsets = [4, 0], sizes = [1, 8], strides = [1, 1]} : vector<9x8xf32> to vector<1x8xf32>
    %368 = vector.extract_strided_slice %3 {offsets = [7, 0], sizes = [1, 8], strides = [1, 1]} : vector<9x8xf32> to vector<1x8xf32>
    %369 = arith.mulf %367, %368 : vector<1x8xf32>
    %370 = vector.broadcast %369 : vector<1x8xf32> to vector<9x8xf32>
    %371 = arith.mulf %370, %366 : vector<9x8xf32>
    %372 = arith.addf %364, %371 : vector<9x8xf32>
    %c8_142 = arith.constant 8 : index
    %c0_143 = arith.constant 0 : index
    %c0_144 = arith.constant 0 : index
    %373 = vector.load %arg1[%c8_142, %c0_143, %c0_144] : memref<9x9x8xf32, #tpu.memory_space<vmem>>, vector<1x9x8xf32>
    %374 = vector.shape_cast %373 : vector<1x9x8xf32> to vector<9x8xf32>
    %375 = vector.extract_strided_slice %374 {offsets = [4, 0], sizes = [1, 8], strides = [1, 1]} : vector<9x8xf32> to vector<1x8xf32>
    %376 = vector.extract_strided_slice %3 {offsets = [8, 0], sizes = [1, 8], strides = [1, 1]} : vector<9x8xf32> to vector<1x8xf32>
    %377 = arith.mulf %375, %376 : vector<1x8xf32>
    %378 = vector.broadcast %377 : vector<1x8xf32> to vector<9x8xf32>
    %379 = arith.mulf %378, %374 : vector<9x8xf32>
    %380 = arith.addf %372, %379 : vector<9x8xf32>
    %c4_145 = arith.constant 4 : index
    %c0_146 = arith.constant 0 : index
    %c0_147 = arith.constant 0 : index
    %381 = vector.load %arg3[%c4_145, %c0_146, %c0_147] : memref<9x9x8xf32, #tpu.memory_space<vmem>>, vector<1x9x8xf32>
    %382 = vector.shape_cast %381 : vector<1x9x8xf32> to vector<9x8xf32>
    %383 = vector.shape_cast %380 : vector<9x8xf32> to vector<1x9x8xf32>
    tpu.vector_store %arg3[%c4_145, %c0_146, %c0_147], %383 {strides = array<i32>} : memref<9x9x8xf32, #tpu.memory_space<vmem>>, vector<1x9x8xf32>,
    %cst_148 = arith.constant 0.000000e+00 : f32
    %384 = vector.broadcast %cst_148 : f32 to vector<9x8xf32>
    %c0_149 = arith.constant 0 : index
    %c0_150 = arith.constant 0 : index
    %c0_151 = arith.constant 0 : index
    %385 = vector.load %arg1[%c0_149, %c0_150, %c0_151] : memref<9x9x8xf32, #tpu.memory_space<vmem>>, vector<1x9x8xf32>
    %386 = vector.shape_cast %385 : vector<1x9x8xf32> to vector<9x8xf32>
    %387 = vector.extract_strided_slice %386 {offsets = [5, 0], sizes = [1, 8], strides = [1, 1]} : vector<9x8xf32> to vector<1x8xf32>
    %388 = vector.extract_strided_slice %3 {offsets = [0, 0], sizes = [1, 8], strides = [1, 1]} : vector<9x8xf32> to vector<1x8xf32>
    %389 = arith.mulf %387, %388 : vector<1x8xf32>
    %390 = vector.broadcast %389 : vector<1x8xf32> to vector<9x8xf32>
    %391 = arith.mulf %390, %386 : vector<9x8xf32>
    %392 = arith.addf %384, %391 : vector<9x8xf32>
    %c1_152 = arith.constant 1 : index
    %c0_153 = arith.constant 0 : index
    %c0_154 = arith.constant 0 : index
    %393 = vector.load %arg1[%c1_152, %c0_153, %c0_154] : memref<9x9x8xf32, #tpu.memory_space<vmem>>, vector<1x9x8xf32>
    %394 = vector.shape_cast %393 : vector<1x9x8xf32> to vector<9x8xf32>
    %395 = vector.extract_strided_slice %394 {offsets = [5, 0], sizes = [1, 8], strides = [1, 1]} : vector<9x8xf32> to vector<1x8xf32>
    %396 = vector.extract_strided_slice %3 {offsets = [1, 0], sizes = [1, 8], strides = [1, 1]} : vector<9x8xf32> to vector<1x8xf32>
    %397 = arith.mulf %395, %396 : vector<1x8xf32>
    %398 = vector.broadcast %397 : vector<1x8xf32> to vector<9x8xf32>
    %399 = arith.mulf %398, %394 : vector<9x8xf32>
    %400 = arith.addf %392, %399 : vector<9x8xf32>
    %c2_155 = arith.constant 2 : index
    %c0_156 = arith.constant 0 : index
    %c0_157 = arith.constant 0 : index
    %401 = vector.load %arg1[%c2_155, %c0_156, %c0_157] : memref<9x9x8xf32, #tpu.memory_space<vmem>>, vector<1x9x8xf32>
    %402 = vector.shape_cast %401 : vector<1x9x8xf32> to vector<9x8xf32>
    %403 = vector.extract_strided_slice %402 {offsets = [5, 0], sizes = [1, 8], strides = [1, 1]} : vector<9x8xf32> to vector<1x8xf32>
    %404 = vector.extract_strided_slice %3 {offsets = [2, 0], sizes = [1, 8], strides = [1, 1]} : vector<9x8xf32> to vector<1x8xf32>
    %405 = arith.mulf %403, %404 : vector<1x8xf32>
    %406 = vector.broadcast %405 : vector<1x8xf32> to vector<9x8xf32>
    %407 = arith.mulf %406, %402 : vector<9x8xf32>
    %408 = arith.addf %400, %407 : vector<9x8xf32>
    %c3_158 = arith.constant 3 : index
    %c0_159 = arith.constant 0 : index
    %c0_160 = arith.constant 0 : index
    %409 = vector.load %arg1[%c3_158, %c0_159, %c0_160] : memref<9x9x8xf32, #tpu.memory_space<vmem>>, vector<1x9x8xf32>
    %410 = vector.shape_cast %409 : vector<1x9x8xf32> to vector<9x8xf32>
    %411 = vector.extract_strided_slice %410 {offsets = [5, 0], sizes = [1, 8], strides = [1, 1]} : vector<9x8xf32> to vector<1x8xf32>
    %412 = vector.extract_strided_slice %3 {offsets = [3, 0], sizes = [1, 8], strides = [1, 1]} : vector<9x8xf32> to vector<1x8xf32>
    %413 = arith.mulf %411, %412 : vector<1x8xf32>
    %414 = vector.broadcast %413 : vector<1x8xf32> to vector<9x8xf32>
    %415 = arith.mulf %414, %410 : vector<9x8xf32>
    %416 = arith.addf %408, %415 : vector<9x8xf32>
    %c4_161 = arith.constant 4 : index
    %c0_162 = arith.constant 0 : index
    %c0_163 = arith.constant 0 : index
    %417 = vector.load %arg1[%c4_161, %c0_162, %c0_163] : memref<9x9x8xf32, #tpu.memory_space<vmem>>, vector<1x9x8xf32>
    %418 = vector.shape_cast %417 : vector<1x9x8xf32> to vector<9x8xf32>
    %419 = vector.extract_strided_slice %418 {offsets = [5, 0], sizes = [1, 8], strides = [1, 1]} : vector<9x8xf32> to vector<1x8xf32>
    %420 = vector.extract_strided_slice %3 {offsets = [4, 0], sizes = [1, 8], strides = [1, 1]} : vector<9x8xf32> to vector<1x8xf32>
    %421 = arith.mulf %419, %420 : vector<1x8xf32>
    %422 = vector.broadcast %421 : vector<1x8xf32> to vector<9x8xf32>
    %423 = arith.mulf %422, %418 : vector<9x8xf32>
    %424 = arith.addf %416, %423 : vector<9x8xf32>
    %c5_164 = arith.constant 5 : index
    %c0_165 = arith.constant 0 : index
    %c0_166 = arith.constant 0 : index
    %425 = vector.load %arg1[%c5_164, %c0_165, %c0_166] : memref<9x9x8xf32, #tpu.memory_space<vmem>>, vector<1x9x8xf32>
    %426 = vector.shape_cast %425 : vector<1x9x8xf32> to vector<9x8xf32>
    %427 = vector.extract_strided_slice %426 {offsets = [5, 0], sizes = [1, 8], strides = [1, 1]} : vector<9x8xf32> to vector<1x8xf32>
    %428 = vector.extract_strided_slice %3 {offsets = [5, 0], sizes = [1, 8], strides = [1, 1]} : vector<9x8xf32> to vector<1x8xf32>
    %429 = arith.mulf %427, %428 : vector<1x8xf32>
    %430 = vector.broadcast %429 : vector<1x8xf32> to vector<9x8xf32>
    %431 = arith.mulf %430, %426 : vector<9x8xf32>
    %432 = arith.addf %424, %431 : vector<9x8xf32>
    %c6_167 = arith.constant 6 : index
    %c0_168 = arith.constant 0 : index
    %c0_169 = arith.constant 0 : index
    %433 = vector.load %arg1[%c6_167, %c0_168, %c0_169] : memref<9x9x8xf32, #tpu.memory_space<vmem>>, vector<1x9x8xf32>
    %434 = vector.shape_cast %433 : vector<1x9x8xf32> to vector<9x8xf32>
    %435 = vector.extract_strided_slice %434 {offsets = [5, 0], sizes = [1, 8], strides = [1, 1]} : vector<9x8xf32> to vector<1x8xf32>
    %436 = vector.extract_strided_slice %3 {offsets = [6, 0], sizes = [1, 8], strides = [1, 1]} : vector<9x8xf32> to vector<1x8xf32>
    %437 = arith.mulf %435, %436 : vector<1x8xf32>
    %438 = vector.broadcast %437 : vector<1x8xf32> to vector<9x8xf32>
    %439 = arith.mulf %438, %434 : vector<9x8xf32>
    %440 = arith.addf %432, %439 : vector<9x8xf32>
    %c7_170 = arith.constant 7 : index
    %c0_171 = arith.constant 0 : index
    %c0_172 = arith.constant 0 : index
    %441 = vector.load %arg1[%c7_170, %c0_171, %c0_172] : memref<9x9x8xf32, #tpu.memory_space<vmem>>, vector<1x9x8xf32>
    %442 = vector.shape_cast %441 : vector<1x9x8xf32> to vector<9x8xf32>
    %443 = vector.extract_strided_slice %442 {offsets = [5, 0], sizes = [1, 8], strides = [1, 1]} : vector<9x8xf32> to vector<1x8xf32>
    %444 = vector.extract_strided_slice %3 {offsets = [7, 0], sizes = [1, 8], strides = [1, 1]} : vector<9x8xf32> to vector<1x8xf32>
    %445 = arith.mulf %443, %444 : vector<1x8xf32>
    %446 = vector.broadcast %445 : vector<1x8xf32> to vector<9x8xf32>
    %447 = arith.mulf %446, %442 : vector<9x8xf32>
    %448 = arith.addf %440, %447 : vector<9x8xf32>
    %c8_173 = arith.constant 8 : index
    %c0_174 = arith.constant 0 : index
    %c0_175 = arith.constant 0 : index
    %449 = vector.load %arg1[%c8_173, %c0_174, %c0_175] : memref<9x9x8xf32, #tpu.memory_space<vmem>>, vector<1x9x8xf32>
    %450 = vector.shape_cast %449 : vector<1x9x8xf32> to vector<9x8xf32>
    %451 = vector.extract_strided_slice %450 {offsets = [5, 0], sizes = [1, 8], strides = [1, 1]} : vector<9x8xf32> to vector<1x8xf32>
    %452 = vector.extract_strided_slice %3 {offsets = [8, 0], sizes = [1, 8], strides = [1, 1]} : vector<9x8xf32> to vector<1x8xf32>
    %453 = arith.mulf %451, %452 : vector<1x8xf32>
    %454 = vector.broadcast %453 : vector<1x8xf32> to vector<9x8xf32>
    %455 = arith.mulf %454, %450 : vector<9x8xf32>
    %456 = arith.addf %448, %455 : vector<9x8xf32>
    %c5_176 = arith.constant 5 : index
    %c0_177 = arith.constant 0 : index
    %c0_178 = arith.constant 0 : index
    %457 = vector.load %arg3[%c5_176, %c0_177, %c0_178] : memref<9x9x8xf32, #tpu.memory_space<vmem>>, vector<1x9x8xf32>
    %458 = vector.shape_cast %457 : vector<1x9x8xf32> to vector<9x8xf32>
    %459 = vector.shape_cast %456 : vector<9x8xf32> to vector<1x9x8xf32>
    tpu.vector_store %arg3[%c5_176, %c0_177, %c0_178], %459 {strides = array<i32>} : memref<9x9x8xf32, #tpu.memory_space<vmem>>, vector<1x9x8xf32>,
    %cst_179 = arith.constant 0.000000e+00 : f32
    %460 = vector.broadcast %cst_179 : f32 to vector<9x8xf32>
    %c0_180 = arith.constant 0 : index
    %c0_181 = arith.constant 0 : index
    %c0_182 = arith.constant 0 : index
    %461 = vector.load %arg1[%c0_180, %c0_181, %c0_182] : memref<9x9x8xf32, #tpu.memory_space<vmem>>, vector<1x9x8xf32>
    %462 = vector.shape_cast %461 : vector<1x9x8xf32> to vector<9x8xf32>
    %463 = vector.extract_strided_slice %462 {offsets = [6, 0], sizes = [1, 8], strides = [1, 1]} : vector<9x8xf32> to vector<1x8xf32>
    %464 = vector.extract_strided_slice %3 {offsets = [0, 0], sizes = [1, 8], strides = [1, 1]} : vector<9x8xf32> to vector<1x8xf32>
    %465 = arith.mulf %463, %464 : vector<1x8xf32>
    %466 = vector.broadcast %465 : vector<1x8xf32> to vector<9x8xf32>
    %467 = arith.mulf %466, %462 : vector<9x8xf32>
    %468 = arith.addf %460, %467 : vector<9x8xf32>
    %c1_183 = arith.constant 1 : index
    %c0_184 = arith.constant 0 : index
    %c0_185 = arith.constant 0 : index
    %469 = vector.load %arg1[%c1_183, %c0_184, %c0_185] : memref<9x9x8xf32, #tpu.memory_space<vmem>>, vector<1x9x8xf32>
    %470 = vector.shape_cast %469 : vector<1x9x8xf32> to vector<9x8xf32>
    %471 = vector.extract_strided_slice %470 {offsets = [6, 0], sizes = [1, 8], strides = [1, 1]} : vector<9x8xf32> to vector<1x8xf32>
    %472 = vector.extract_strided_slice %3 {offsets = [1, 0], sizes = [1, 8], strides = [1, 1]} : vector<9x8xf32> to vector<1x8xf32>
    %473 = arith.mulf %471, %472 : vector<1x8xf32>
    %474 = vector.broadcast %473 : vector<1x8xf32> to vector<9x8xf32>
    %475 = arith.mulf %474, %470 : vector<9x8xf32>
    %476 = arith.addf %468, %475 : vector<9x8xf32>
    %c2_186 = arith.constant 2 : index
    %c0_187 = arith.constant 0 : index
    %c0_188 = arith.constant 0 : index
    %477 = vector.load %arg1[%c2_186, %c0_187, %c0_188] : memref<9x9x8xf32, #tpu.memory_space<vmem>>, vector<1x9x8xf32>
    %478 = vector.shape_cast %477 : vector<1x9x8xf32> to vector<9x8xf32>
    %479 = vector.extract_strided_slice %478 {offsets = [6, 0], sizes = [1, 8], strides = [1, 1]} : vector<9x8xf32> to vector<1x8xf32>
    %480 = vector.extract_strided_slice %3 {offsets = [2, 0], sizes = [1, 8], strides = [1, 1]} : vector<9x8xf32> to vector<1x8xf32>
    %481 = arith.mulf %479, %480 : vector<1x8xf32>
    %482 = vector.broadcast %481 : vector<1x8xf32> to vector<9x8xf32>
    %483 = arith.mulf %482, %478 : vector<9x8xf32>
    %484 = arith.addf %476, %483 : vector<9x8xf32>
    %c3_189 = arith.constant 3 : index
    %c0_190 = arith.constant 0 : index
    %c0_191 = arith.constant 0 : index
    %485 = vector.load %arg1[%c3_189, %c0_190, %c0_191] : memref<9x9x8xf32, #tpu.memory_space<vmem>>, vector<1x9x8xf32>
    %486 = vector.shape_cast %485 : vector<1x9x8xf32> to vector<9x8xf32>
    %487 = vector.extract_strided_slice %486 {offsets = [6, 0], sizes = [1, 8], strides = [1, 1]} : vector<9x8xf32> to vector<1x8xf32>
    %488 = vector.extract_strided_slice %3 {offsets = [3, 0], sizes = [1, 8], strides = [1, 1]} : vector<9x8xf32> to vector<1x8xf32>
    %489 = arith.mulf %487, %488 : vector<1x8xf32>
    %490 = vector.broadcast %489 : vector<1x8xf32> to vector<9x8xf32>
    %491 = arith.mulf %490, %486 : vector<9x8xf32>
    %492 = arith.addf %484, %491 : vector<9x8xf32>
    %c4_192 = arith.constant 4 : index
    %c0_193 = arith.constant 0 : index
    %c0_194 = arith.constant 0 : index
    %493 = vector.load %arg1[%c4_192, %c0_193, %c0_194] : memref<9x9x8xf32, #tpu.memory_space<vmem>>, vector<1x9x8xf32>
    %494 = vector.shape_cast %493 : vector<1x9x8xf32> to vector<9x8xf32>
    %495 = vector.extract_strided_slice %494 {offsets = [6, 0], sizes = [1, 8], strides = [1, 1]} : vector<9x8xf32> to vector<1x8xf32>
    %496 = vector.extract_strided_slice %3 {offsets = [4, 0], sizes = [1, 8], strides = [1, 1]} : vector<9x8xf32> to vector<1x8xf32>
    %497 = arith.mulf %495, %496 : vector<1x8xf32>
    %498 = vector.broadcast %497 : vector<1x8xf32> to vector<9x8xf32>
    %499 = arith.mulf %498, %494 : vector<9x8xf32>
    %500 = arith.addf %492, %499 : vector<9x8xf32>
    %c5_195 = arith.constant 5 : index
    %c0_196 = arith.constant 0 : index
    %c0_197 = arith.constant 0 : index
    %501 = vector.load %arg1[%c5_195, %c0_196, %c0_197] : memref<9x9x8xf32, #tpu.memory_space<vmem>>, vector<1x9x8xf32>
    %502 = vector.shape_cast %501 : vector<1x9x8xf32> to vector<9x8xf32>
    %503 = vector.extract_strided_slice %502 {offsets = [6, 0], sizes = [1, 8], strides = [1, 1]} : vector<9x8xf32> to vector<1x8xf32>
    %504 = vector.extract_strided_slice %3 {offsets = [5, 0], sizes = [1, 8], strides = [1, 1]} : vector<9x8xf32> to vector<1x8xf32>
    %505 = arith.mulf %503, %504 : vector<1x8xf32>
    %506 = vector.broadcast %505 : vector<1x8xf32> to vector<9x8xf32>
    %507 = arith.mulf %506, %502 : vector<9x8xf32>
    %508 = arith.addf %500, %507 : vector<9x8xf32>
    %c6_198 = arith.constant 6 : index
    %c0_199 = arith.constant 0 : index
    %c0_200 = arith.constant 0 : index
    %509 = vector.load %arg1[%c6_198, %c0_199, %c0_200] : memref<9x9x8xf32, #tpu.memory_space<vmem>>, vector<1x9x8xf32>
    %510 = vector.shape_cast %509 : vector<1x9x8xf32> to vector<9x8xf32>
    %511 = vector.extract_strided_slice %510 {offsets = [6, 0], sizes = [1, 8], strides = [1, 1]} : vector<9x8xf32> to vector<1x8xf32>
    %512 = vector.extract_strided_slice %3 {offsets = [6, 0], sizes = [1, 8], strides = [1, 1]} : vector<9x8xf32> to vector<1x8xf32>
    %513 = arith.mulf %511, %512 : vector<1x8xf32>
    %514 = vector.broadcast %513 : vector<1x8xf32> to vector<9x8xf32>
    %515 = arith.mulf %514, %510 : vector<9x8xf32>
    %516 = arith.addf %508, %515 : vector<9x8xf32>
    %c7_201 = arith.constant 7 : index
    %c0_202 = arith.constant 0 : index
    %c0_203 = arith.constant 0 : index
    %517 = vector.load %arg1[%c7_201, %c0_202, %c0_203] : memref<9x9x8xf32, #tpu.memory_space<vmem>>, vector<1x9x8xf32>
    %518 = vector.shape_cast %517 : vector<1x9x8xf32> to vector<9x8xf32>
    %519 = vector.extract_strided_slice %518 {offsets = [6, 0], sizes = [1, 8], strides = [1, 1]} : vector<9x8xf32> to vector<1x8xf32>
    %520 = vector.extract_strided_slice %3 {offsets = [7, 0], sizes = [1, 8], strides = [1, 1]} : vector<9x8xf32> to vector<1x8xf32>
    %521 = arith.mulf %519, %520 : vector<1x8xf32>
    %522 = vector.broadcast %521 : vector<1x8xf32> to vector<9x8xf32>
    %523 = arith.mulf %522, %518 : vector<9x8xf32>
    %524 = arith.addf %516, %523 : vector<9x8xf32>
    %c8_204 = arith.constant 8 : index
    %c0_205 = arith.constant 0 : index
    %c0_206 = arith.constant 0 : index
    %525 = vector.load %arg1[%c8_204, %c0_205, %c0_206] : memref<9x9x8xf32, #tpu.memory_space<vmem>>, vector<1x9x8xf32>
    %526 = vector.shape_cast %525 : vector<1x9x8xf32> to vector<9x8xf32>
    %527 = vector.extract_strided_slice %526 {offsets = [6, 0], sizes = [1, 8], strides = [1, 1]} : vector<9x8xf32> to vector<1x8xf32>
    %528 = vector.extract_strided_slice %3 {offsets = [8, 0], sizes = [1, 8], strides = [1, 1]} : vector<9x8xf32> to vector<1x8xf32>
    %529 = arith.mulf %527, %528 : vector<1x8xf32>
    %530 = vector.broadcast %529 : vector<1x8xf32> to vector<9x8xf32>
    %531 = arith.mulf %530, %526 : vector<9x8xf32>
    %532 = arith.addf %524, %531 : vector<9x8xf32>
    %c6_207 = arith.constant 6 : index
    %c0_208 = arith.constant 0 : index
    %c0_209 = arith.constant 0 : index
    %533 = vector.load %arg3[%c6_207, %c0_208, %c0_209] : memref<9x9x8xf32, #tpu.memory_space<vmem>>, vector<1x9x8xf32>
    %534 = vector.shape_cast %533 : vector<1x9x8xf32> to vector<9x8xf32>
    %535 = vector.shape_cast %532 : vector<9x8xf32> to vector<1x9x8xf32>
    tpu.vector_store %arg3[%c6_207, %c0_208, %c0_209], %535 {strides = array<i32>} : memref<9x9x8xf32, #tpu.memory_space<vmem>>, vector<1x9x8xf32>,
    %cst_210 = arith.constant 0.000000e+00 : f32
    %536 = vector.broadcast %cst_210 : f32 to vector<9x8xf32>
    %c0_211 = arith.constant 0 : index
    %c0_212 = arith.constant 0 : index
    %c0_213 = arith.constant 0 : index
    %537 = vector.load %arg1[%c0_211, %c0_212, %c0_213] : memref<9x9x8xf32, #tpu.memory_space<vmem>>, vector<1x9x8xf32>
    %538 = vector.shape_cast %537 : vector<1x9x8xf32> to vector<9x8xf32>
    %539 = vector.extract_strided_slice %538 {offsets = [7, 0], sizes = [1, 8], strides = [1, 1]} : vector<9x8xf32> to vector<1x8xf32>
    %540 = vector.extract_strided_slice %3 {offsets = [0, 0], sizes = [1, 8], strides = [1, 1]} : vector<9x8xf32> to vector<1x8xf32>
    %541 = arith.mulf %539, %540 : vector<1x8xf32>
    %542 = vector.broadcast %541 : vector<1x8xf32> to vector<9x8xf32>
    %543 = arith.mulf %542, %538 : vector<9x8xf32>
    %544 = arith.addf %536, %543 : vector<9x8xf32>
    %c1_214 = arith.constant 1 : index
    %c0_215 = arith.constant 0 : index
    %c0_216 = arith.constant 0 : index
    %545 = vector.load %arg1[%c1_214, %c0_215, %c0_216] : memref<9x9x8xf32, #tpu.memory_space<vmem>>, vector<1x9x8xf32>
    %546 = vector.shape_cast %545 : vector<1x9x8xf32> to vector<9x8xf32>
    %547 = vector.extract_strided_slice %546 {offsets = [7, 0], sizes = [1, 8], strides = [1, 1]} : vector<9x8xf32> to vector<1x8xf32>
    %548 = vector.extract_strided_slice %3 {offsets = [1, 0], sizes = [1, 8], strides = [1, 1]} : vector<9x8xf32> to vector<1x8xf32>
    %549 = arith.mulf %547, %548 : vector<1x8xf32>
    %550 = vector.broadcast %549 : vector<1x8xf32> to vector<9x8xf32>
    %551 = arith.mulf %550, %546 : vector<9x8xf32>
    %552 = arith.addf %544, %551 : vector<9x8xf32>
    %c2_217 = arith.constant 2 : index
    %c0_218 = arith.constant 0 : index
    %c0_219 = arith.constant 0 : index
    %553 = vector.load %arg1[%c2_217, %c0_218, %c0_219] : memref<9x9x8xf32, #tpu.memory_space<vmem>>, vector<1x9x8xf32>
    %554 = vector.shape_cast %553 : vector<1x9x8xf32> to vector<9x8xf32>
    %555 = vector.extract_strided_slice %554 {offsets = [7, 0], sizes = [1, 8], strides = [1, 1]} : vector<9x8xf32> to vector<1x8xf32>
    %556 = vector.extract_strided_slice %3 {offsets = [2, 0], sizes = [1, 8], strides = [1, 1]} : vector<9x8xf32> to vector<1x8xf32>
    %557 = arith.mulf %555, %556 : vector<1x8xf32>
    %558 = vector.broadcast %557 : vector<1x8xf32> to vector<9x8xf32>
    %559 = arith.mulf %558, %554 : vector<9x8xf32>
    %560 = arith.addf %552, %559 : vector<9x8xf32>
    %c3_220 = arith.constant 3 : index
    %c0_221 = arith.constant 0 : index
    %c0_222 = arith.constant 0 : index
    %561 = vector.load %arg1[%c3_220, %c0_221, %c0_222] : memref<9x9x8xf32, #tpu.memory_space<vmem>>, vector<1x9x8xf32>
    %562 = vector.shape_cast %561 : vector<1x9x8xf32> to vector<9x8xf32>
    %563 = vector.extract_strided_slice %562 {offsets = [7, 0], sizes = [1, 8], strides = [1, 1]} : vector<9x8xf32> to vector<1x8xf32>
    %564 = vector.extract_strided_slice %3 {offsets = [3, 0], sizes = [1, 8], strides = [1, 1]} : vector<9x8xf32> to vector<1x8xf32>
    %565 = arith.mulf %563, %564 : vector<1x8xf32>
    %566 = vector.broadcast %565 : vector<1x8xf32> to vector<9x8xf32>
    %567 = arith.mulf %566, %562 : vector<9x8xf32>
    %568 = arith.addf %560, %567 : vector<9x8xf32>
    %c4_223 = arith.constant 4 : index
    %c0_224 = arith.constant 0 : index
    %c0_225 = arith.constant 0 : index
    %569 = vector.load %arg1[%c4_223, %c0_224, %c0_225] : memref<9x9x8xf32, #tpu.memory_space<vmem>>, vector<1x9x8xf32>
    %570 = vector.shape_cast %569 : vector<1x9x8xf32> to vector<9x8xf32>
    %571 = vector.extract_strided_slice %570 {offsets = [7, 0], sizes = [1, 8], strides = [1, 1]} : vector<9x8xf32> to vector<1x8xf32>
    %572 = vector.extract_strided_slice %3 {offsets = [4, 0], sizes = [1, 8], strides = [1, 1]} : vector<9x8xf32> to vector<1x8xf32>
    %573 = arith.mulf %571, %572 : vector<1x8xf32>
    %574 = vector.broadcast %573 : vector<1x8xf32> to vector<9x8xf32>
    %575 = arith.mulf %574, %570 : vector<9x8xf32>
    %576 = arith.addf %568, %575 : vector<9x8xf32>
    %c5_226 = arith.constant 5 : index
    %c0_227 = arith.constant 0 : index
    %c0_228 = arith.constant 0 : index
    %577 = vector.load %arg1[%c5_226, %c0_227, %c0_228] : memref<9x9x8xf32, #tpu.memory_space<vmem>>, vector<1x9x8xf32>
    %578 = vector.shape_cast %577 : vector<1x9x8xf32> to vector<9x8xf32>
    %579 = vector.extract_strided_slice %578 {offsets = [7, 0], sizes = [1, 8], strides = [1, 1]} : vector<9x8xf32> to vector<1x8xf32>
    %580 = vector.extract_strided_slice %3 {offsets = [5, 0], sizes = [1, 8], strides = [1, 1]} : vector<9x8xf32> to vector<1x8xf32>
    %581 = arith.mulf %579, %580 : vector<1x8xf32>
    %582 = vector.broadcast %581 : vector<1x8xf32> to vector<9x8xf32>
    %583 = arith.mulf %582, %578 : vector<9x8xf32>
    %584 = arith.addf %576, %583 : vector<9x8xf32>
    %c6_229 = arith.constant 6 : index
    %c0_230 = arith.constant 0 : index
    %c0_231 = arith.constant 0 : index
    %585 = vector.load %arg1[%c6_229, %c0_230, %c0_231] : memref<9x9x8xf32, #tpu.memory_space<vmem>>, vector<1x9x8xf32>
    %586 = vector.shape_cast %585 : vector<1x9x8xf32> to vector<9x8xf32>
    %587 = vector.extract_strided_slice %586 {offsets = [7, 0], sizes = [1, 8], strides = [1, 1]} : vector<9x8xf32> to vector<1x8xf32>
    %588 = vector.extract_strided_slice %3 {offsets = [6, 0], sizes = [1, 8], strides = [1, 1]} : vector<9x8xf32> to vector<1x8xf32>
    %589 = arith.mulf %587, %588 : vector<1x8xf32>
    %590 = vector.broadcast %589 : vector<1x8xf32> to vector<9x8xf32>
    %591 = arith.mulf %590, %586 : vector<9x8xf32>
    %592 = arith.addf %584, %591 : vector<9x8xf32>
    %c7_232 = arith.constant 7 : index
    %c0_233 = arith.constant 0 : index
    %c0_234 = arith.constant 0 : index
    %593 = vector.load %arg1[%c7_232, %c0_233, %c0_234] : memref<9x9x8xf32, #tpu.memory_space<vmem>>, vector<1x9x8xf32>
    %594 = vector.shape_cast %593 : vector<1x9x8xf32> to vector<9x8xf32>
    %595 = vector.extract_strided_slice %594 {offsets = [7, 0], sizes = [1, 8], strides = [1, 1]} : vector<9x8xf32> to vector<1x8xf32>
    %596 = vector.extract_strided_slice %3 {offsets = [7, 0], sizes = [1, 8], strides = [1, 1]} : vector<9x8xf32> to vector<1x8xf32>
    %597 = arith.mulf %595, %596 : vector<1x8xf32>
    %598 = vector.broadcast %597 : vector<1x8xf32> to vector<9x8xf32>
    %599 = arith.mulf %598, %594 : vector<9x8xf32>
    %600 = arith.addf %592, %599 : vector<9x8xf32>
    %c8_235 = arith.constant 8 : index
    %c0_236 = arith.constant 0 : index
    %c0_237 = arith.constant 0 : index
    %601 = vector.load %arg1[%c8_235, %c0_236, %c0_237] : memref<9x9x8xf32, #tpu.memory_space<vmem>>, vector<1x9x8xf32>
    %602 = vector.shape_cast %601 : vector<1x9x8xf32> to vector<9x8xf32>
    %603 = vector.extract_strided_slice %602 {offsets = [7, 0], sizes = [1, 8], strides = [1, 1]} : vector<9x8xf32> to vector<1x8xf32>
    %604 = vector.extract_strided_slice %3 {offsets = [8, 0], sizes = [1, 8], strides = [1, 1]} : vector<9x8xf32> to vector<1x8xf32>
    %605 = arith.mulf %603, %604 : vector<1x8xf32>
    %606 = vector.broadcast %605 : vector<1x8xf32> to vector<9x8xf32>
    %607 = arith.mulf %606, %602 : vector<9x8xf32>
    %608 = arith.addf %600, %607 : vector<9x8xf32>
    %c7_238 = arith.constant 7 : index
    %c0_239 = arith.constant 0 : index
    %c0_240 = arith.constant 0 : index
    %609 = vector.load %arg3[%c7_238, %c0_239, %c0_240] : memref<9x9x8xf32, #tpu.memory_space<vmem>>, vector<1x9x8xf32>
    %610 = vector.shape_cast %609 : vector<1x9x8xf32> to vector<9x8xf32>
    %611 = vector.shape_cast %608 : vector<9x8xf32> to vector<1x9x8xf32>
    tpu.vector_store %arg3[%c7_238, %c0_239, %c0_240], %611 {strides = array<i32>} : memref<9x9x8xf32, #tpu.memory_space<vmem>>, vector<1x9x8xf32>,
    %cst_241 = arith.constant 0.000000e+00 : f32
    %612 = vector.broadcast %cst_241 : f32 to vector<9x8xf32>
    %c0_242 = arith.constant 0 : index
    %c0_243 = arith.constant 0 : index
    %c0_244 = arith.constant 0 : index
    %613 = vector.load %arg1[%c0_242, %c0_243, %c0_244] : memref<9x9x8xf32, #tpu.memory_space<vmem>>, vector<1x9x8xf32>
    %614 = vector.shape_cast %613 : vector<1x9x8xf32> to vector<9x8xf32>
    %615 = vector.extract_strided_slice %614 {offsets = [8, 0], sizes = [1, 8], strides = [1, 1]} : vector<9x8xf32> to vector<1x8xf32>
    %616 = vector.extract_strided_slice %3 {offsets = [0, 0], sizes = [1, 8], strides = [1, 1]} : vector<9x8xf32> to vector<1x8xf32>
    %617 = arith.mulf %615, %616 : vector<1x8xf32>
    %618 = vector.broadcast %617 : vector<1x8xf32> to vector<9x8xf32>
    %619 = arith.mulf %618, %614 : vector<9x8xf32>
    %620 = arith.addf %612, %619 : vector<9x8xf32>
    %c1_245 = arith.constant 1 : index
    %c0_246 = arith.constant 0 : index
    %c0_247 = arith.constant 0 : index
    %621 = vector.load %arg1[%c1_245, %c0_246, %c0_247] : memref<9x9x8xf32, #tpu.memory_space<vmem>>, vector<1x9x8xf32>
    %622 = vector.shape_cast %621 : vector<1x9x8xf32> to vector<9x8xf32>
    %623 = vector.extract_strided_slice %622 {offsets = [8, 0], sizes = [1, 8], strides = [1, 1]} : vector<9x8xf32> to vector<1x8xf32>
    %624 = vector.extract_strided_slice %3 {offsets = [1, 0], sizes = [1, 8], strides = [1, 1]} : vector<9x8xf32> to vector<1x8xf32>
    %625 = arith.mulf %623, %624 : vector<1x8xf32>
    %626 = vector.broadcast %625 : vector<1x8xf32> to vector<9x8xf32>
    %627 = arith.mulf %626, %622 : vector<9x8xf32>
    %628 = arith.addf %620, %627 : vector<9x8xf32>
    %c2_248 = arith.constant 2 : index
    %c0_249 = arith.constant 0 : index
    %c0_250 = arith.constant 0 : index
    %629 = vector.load %arg1[%c2_248, %c0_249, %c0_250] : memref<9x9x8xf32, #tpu.memory_space<vmem>>, vector<1x9x8xf32>
    %630 = vector.shape_cast %629 : vector<1x9x8xf32> to vector<9x8xf32>
    %631 = vector.extract_strided_slice %630 {offsets = [8, 0], sizes = [1, 8], strides = [1, 1]} : vector<9x8xf32> to vector<1x8xf32>
    %632 = vector.extract_strided_slice %3 {offsets = [2, 0], sizes = [1, 8], strides = [1, 1]} : vector<9x8xf32> to vector<1x8xf32>
    %633 = arith.mulf %631, %632 : vector<1x8xf32>
    %634 = vector.broadcast %633 : vector<1x8xf32> to vector<9x8xf32>
    %635 = arith.mulf %634, %630 : vector<9x8xf32>
    %636 = arith.addf %628, %635 : vector<9x8xf32>
    %c3_251 = arith.constant 3 : index
    %c0_252 = arith.constant 0 : index
    %c0_253 = arith.constant 0 : index
    %637 = vector.load %arg1[%c3_251, %c0_252, %c0_253] : memref<9x9x8xf32, #tpu.memory_space<vmem>>, vector<1x9x8xf32>
    %638 = vector.shape_cast %637 : vector<1x9x8xf32> to vector<9x8xf32>
    %639 = vector.extract_strided_slice %638 {offsets = [8, 0], sizes = [1, 8], strides = [1, 1]} : vector<9x8xf32> to vector<1x8xf32>
    %640 = vector.extract_strided_slice %3 {offsets = [3, 0], sizes = [1, 8], strides = [1, 1]} : vector<9x8xf32> to vector<1x8xf32>
    %641 = arith.mulf %639, %640 : vector<1x8xf32>
    %642 = vector.broadcast %641 : vector<1x8xf32> to vector<9x8xf32>
    %643 = arith.mulf %642, %638 : vector<9x8xf32>
    %644 = arith.addf %636, %643 : vector<9x8xf32>
    %c4_254 = arith.constant 4 : index
    %c0_255 = arith.constant 0 : index
    %c0_256 = arith.constant 0 : index
    %645 = vector.load %arg1[%c4_254, %c0_255, %c0_256] : memref<9x9x8xf32, #tpu.memory_space<vmem>>, vector<1x9x8xf32>
    %646 = vector.shape_cast %645 : vector<1x9x8xf32> to vector<9x8xf32>
    %647 = vector.extract_strided_slice %646 {offsets = [8, 0], sizes = [1, 8], strides = [1, 1]} : vector<9x8xf32> to vector<1x8xf32>
    %648 = vector.extract_strided_slice %3 {offsets = [4, 0], sizes = [1, 8], strides = [1, 1]} : vector<9x8xf32> to vector<1x8xf32>
    %649 = arith.mulf %647, %648 : vector<1x8xf32>
    %650 = vector.broadcast %649 : vector<1x8xf32> to vector<9x8xf32>
    %651 = arith.mulf %650, %646 : vector<9x8xf32>
    %652 = arith.addf %644, %651 : vector<9x8xf32>
    %c5_257 = arith.constant 5 : index
    %c0_258 = arith.constant 0 : index
    %c0_259 = arith.constant 0 : index
    %653 = vector.load %arg1[%c5_257, %c0_258, %c0_259] : memref<9x9x8xf32, #tpu.memory_space<vmem>>, vector<1x9x8xf32>
    %654 = vector.shape_cast %653 : vector<1x9x8xf32> to vector<9x8xf32>
    %655 = vector.extract_strided_slice %654 {offsets = [8, 0], sizes = [1, 8], strides = [1, 1]} : vector<9x8xf32> to vector<1x8xf32>
    %656 = vector.extract_strided_slice %3 {offsets = [5, 0], sizes = [1, 8], strides = [1, 1]} : vector<9x8xf32> to vector<1x8xf32>
    %657 = arith.mulf %655, %656 : vector<1x8xf32>
    %658 = vector.broadcast %657 : vector<1x8xf32> to vector<9x8xf32>
    %659 = arith.mulf %658, %654 : vector<9x8xf32>
    %660 = arith.addf %652, %659 : vector<9x8xf32>
    %c6_260 = arith.constant 6 : index
    %c0_261 = arith.constant 0 : index
    %c0_262 = arith.constant 0 : index
    %661 = vector.load %arg1[%c6_260, %c0_261, %c0_262] : memref<9x9x8xf32, #tpu.memory_space<vmem>>, vector<1x9x8xf32>
    %662 = vector.shape_cast %661 : vector<1x9x8xf32> to vector<9x8xf32>
    %663 = vector.extract_strided_slice %662 {offsets = [8, 0], sizes = [1, 8], strides = [1, 1]} : vector<9x8xf32> to vector<1x8xf32>
    %664 = vector.extract_strided_slice %3 {offsets = [6, 0], sizes = [1, 8], strides = [1, 1]} : vector<9x8xf32> to vector<1x8xf32>
    %665 = arith.mulf %663, %664 : vector<1x8xf32>
    %666 = vector.broadcast %665 : vector<1x8xf32> to vector<9x8xf32>
    %667 = arith.mulf %666, %662 : vector<9x8xf32>
    %668 = arith.addf %660, %667 : vector<9x8xf32>
    %c7_263 = arith.constant 7 : index
    %c0_264 = arith.constant 0 : index
    %c0_265 = arith.constant 0 : index
    %669 = vector.load %arg1[%c7_263, %c0_264, %c0_265] : memref<9x9x8xf32, #tpu.memory_space<vmem>>, vector<1x9x8xf32>
    %670 = vector.shape_cast %669 : vector<1x9x8xf32> to vector<9x8xf32>
    %671 = vector.extract_strided_slice %670 {offsets = [8, 0], sizes = [1, 8], strides = [1, 1]} : vector<9x8xf32> to vector<1x8xf32>
    %672 = vector.extract_strided_slice %3 {offsets = [7, 0], sizes = [1, 8], strides = [1, 1]} : vector<9x8xf32> to vector<1x8xf32>
    %673 = arith.mulf %671, %672 : vector<1x8xf32>
    %674 = vector.broadcast %673 : vector<1x8xf32> to vector<9x8xf32>
    %675 = arith.mulf %674, %670 : vector<9x8xf32>
    %676 = arith.addf %668, %675 : vector<9x8xf32>
    %c8_266 = arith.constant 8 : index
    %c0_267 = arith.constant 0 : index
    %c0_268 = arith.constant 0 : index
    %677 = vector.load %arg1[%c8_266, %c0_267, %c0_268] : memref<9x9x8xf32, #tpu.memory_space<vmem>>, vector<1x9x8xf32>
    %678 = vector.shape_cast %677 : vector<1x9x8xf32> to vector<9x8xf32>
    %679 = vector.extract_strided_slice %678 {offsets = [8, 0], sizes = [1, 8], strides = [1, 1]} : vector<9x8xf32> to vector<1x8xf32>
    %680 = vector.extract_strided_slice %3 {offsets = [8, 0], sizes = [1, 8], strides = [1, 1]} : vector<9x8xf32> to vector<1x8xf32>
    %681 = arith.mulf %679, %680 : vector<1x8xf32>
    %682 = vector.broadcast %681 : vector<1x8xf32> to vector<9x8xf32>
    %683 = arith.mulf %682, %678 : vector<9x8xf32>
    %684 = arith.addf %676, %683 : vector<9x8xf32>
    %c8_269 = arith.constant 8 : index
    %c0_270 = arith.constant 0 : index
    %c0_271 = arith.constant 0 : index
    %685 = vector.load %arg3[%c8_269, %c0_270, %c0_271] : memref<9x9x8xf32, #tpu.memory_space<vmem>>, vector<1x9x8xf32>
    %686 = vector.shape_cast %685 : vector<1x9x8xf32> to vector<9x8xf32>
    %687 = vector.shape_cast %684 : vector<9x8xf32> to vector<1x9x8xf32>
    tpu.vector_store %arg3[%c8_269, %c0_270, %c0_271], %687 {strides = array<i32>} : memref<9x9x8xf32, #tpu.memory_space<vmem>>, vector<1x9x8xf32>,
    return
  }
  func.func @transform_0(%arg0: i32) -> (i32, i32, i32) {
    %c0_i32 = arith.constant 0 : i32
    %c0_i32_0 = arith.constant 0 : i32
    %c0_i32_1 = arith.constant 0 : i32
    return %c0_i32, %c0_i32_0, %arg0 : i32, i32, i32
  }
  func.func @transform_1(%arg0: i32) -> (i32, i32) {
    %c0_i32 = arith.constant 0 : i32
    %c0_i32_0 = arith.constant 0 : i32
    return %c0_i32, %arg0 : i32, i32
  }
  func.func @transform_2(%arg0: i32) -> (i32, i32, i32) {
    %c0_i32 = arith.constant 0 : i32
    %c0_i32_0 = arith.constant 0 : i32
    %c0_i32_1 = arith.constant 0 : i32
    return %c0_i32, %c0_i32_0, %arg0 : i32, i32, i32
  }
}

</mosaic_0001>

<bundles_post_ra>
// kernel: custom-call.87
= control target key start
LH: loop header
LB: loop body
LE: loop exit
PB: predicated region body
PF: predicated region fallthrough
CT: control target
= control target key end

     0   :  { %s1672_s30 = smov 0   ;;  %s1674_s10 = smov 0   ;;  %s1999_s0 = inlined_call_operand.vmem [shape: f32[8,5,5], index: 0, kind: input, shape index: {}]   ;;  %s2000_s1 = inlined_call_operand.vmem [shape: f32[8,5,5], index: 1, kind: input, shape index: {}]   ;;  %s2001_s2 = inlined_call_operand.vmem [shape: f32[8,5,5], index: 2, kind: input, shape index: {}]   ;;  %s2002_s3 = inlined_call_operand.vmem [shape: f32[8,5,5], index: 3, kind: input, shape index: {}]   ;;  %s2003_s4 = inlined_call_operand.vmem [shape: f32[8,5], index: 4, kind: output, shape index: {0}]   ;;  %s2004_s5 = inlined_call_operand.vmem [shape: f32[8,5], index: 5, kind: output, shape index: {1}]   ;;  %s2005_s6 = inlined_call_operand.vmem [shape: f32[8,5,5], index: 6, kind: output, shape index: {2}]   ;;  %s2006_s7 = inlined_call_operand.vmem [shape: f32[8,5,5], index: 7, kind: output, shape index: {3}]   ;;  %s2007_s8 = inlined_call_operand.vmem [shape: f32[8,5,5], index: 8, kind: output, shape index: {4}]   ;;  %s2008_s9 = inlined_call_operand.vmem [shape: f32[8,5,5], index: 9, kind: output, shape index: {5}]  }
   0x1   :  { %s1676_s11 = smov 0  }
   0x2 LB: > { %s1688_s12 = sadd.s32 4294967295, %s1609_s11   ;;  %s1691_s13 = sadd.s32 1, %s1609_s11   ;;  %s1609_s11 = sphi %s1676_s11, %s2017_s11   ;;  %s1605_s10 = sphi %s1674_s10, %s2016_s10   ;;  %s1601_s30 = sphi %s1672_s30, %s2015_s30  }
   0x3   : > { %s20_s14 = sshrl.u32 %s1609_s11, 3  ;;  %s21_s15 = sshrl.u32 %s1691_s13, 3 }
   0x4   : > { %s22_s16 = ssub.s32 %s20_s14, %s21_s15  ;;  %s25_s17 = sadd.s32 1, %s1605_s10 }
   0x5   : > { %p23_p0 = scmp.eq.s32.totalorder %s22_s16, 0  ;;  %p35_p1 = scmp.ne.s32.totalorder %s1605_s10, %s1601_s30 }
   0x6   : > { %p36_p2 = scmp.eq.s32.totalorder %s1688_s12, 7  ;;  %p1470_p4 = scmp.ge.s32.totalorder %s1609_s11, 8 }
   0x7   : > { %s1700_s18 = scalar_select %p23_p0, %s1605_s10, %s25_s17  }
   0x8   : > { %p1702_p3 = por %p36_p2, %p35_p1  ;;  %86 = sbr.rel (%p1470_p4) target bundleno = 18 (0x12), region = 16 }
   0x9   : > { %2009 = sst [smem:[#allocation23_spill]] %s1700_s18  ;;  %s88_s20 = sand.u32 (!%p1470_p4), 1, %s1609_s11  }
   0xa   : > { %s1472_s21 = sshll.u32 (!%p1470_p4), %s1609_s11, 3  ;;  %s1471_s22 = sshll.u32 (!%p1470_p4), %s88_s20, 3 }
   0xb   : > { %s92_s25 = scalar_lea.vmem (!%p1470_p4), %s1999_s0, %s1472_s21  ;;  %s90_s26 = scalar_lea.vmem (!%p1470_p4), [#allocation0], %s1471_s22 }
   0xc   : > { %s131_s29 = scalar_lea.vmem (!%p1470_p4), %s2000_s1, %s1472_s21  ;;  %s170_s16 = scalar_lea.vmem (!%p1470_p4), %s2001_s2, %s1472_s21 }
   0xd   : > { %v121_v0 = vld [vmem:[%s92_s25] sm:$0xff]  ;;  %s129_s17 = scalar_lea.vmem [#allocation1], %s1471_s22  ;;  %s209_s23 = scalar_lea.vmem %s2002_s3, %s1472_s21 }
   0xe   : > { %122 = vst [vmem:[%s90_s26] sm:$0xff] %v121_v0  ;;  %v160_v1 = vld [vmem:[%s131_s29] sm:$0xff]  ;;  %s168_s24 = scalar_lea.vmem [#allocation2], %s1471_s22  ;;  %s207_s25 = scalar_lea.vmem [#allocation3], %s1471_s22 }
   0xf   : > { %161 = vst [vmem:[%s129_s17] sm:$0xff] %v160_v1  ;;  %v199_v2 = vld [vmem:[%s170_s16] sm:$0xff] }
  0x10   : > { %200 = vst [vmem:[%s168_s24] sm:$0xff] %v199_v2  ;;  %v238_v3 = vld [vmem:[%s209_s23] sm:$0xff] }
  0x11   : > { %239 = vst [vmem:[%s207_s25] sm:$0xff] %v238_v3 }
  0x12 PF: > { %p1479_p5 = scmp.ge.s32.totalorder %s1609_s11, 1  ;;  %p244_p6 = scmp.lt.s32.totalorder %s1609_s11, 9 }
  0x14   : > { %p245_p7 = pnand %p1479_p5, %p244_p6 }
  0x16   : > { %248 = sbr.rel (%p245_p7) target bundleno = 979 (0x3d3), region = 156 }
  0x1b   : > { %s251_s26 = sand.u32 1, %s1688_s12   ;;  %s285_s27 = sand.u32 1, %s1601_s30   ;;  %v329_v4 = vlaneseq  ;;  %v1619_v11 = vmov 0.0  }
  0x1c   : > { %s1480_s28 = sshll.u32 %s251_s26, 3  ;;  %s1725_s18 = sshll.u32 %s285_s27, 3 }
  0x1d   : > { %v1727_v5 = vand.u32 127, %v329_v4  ;;  %v1729_v6 = vshrl.u32 %v329_v4, 7  ;;  %s253_s21 = scalar_lea.vmem [#allocation0], %s1480_s28  ;;  %s257_s22 = scalar_lea.vmem [#allocation1], %s1480_s28 }
  0x1e   : > { %v313_v7 = vld [vmem:[%s253_s21] sm:$0xff]  ;;  %v316_v8 = vld [vmem:[%s257_s22] sm:$0xff]  ;;  %s261_s29 = scalar_lea.vmem [#allocation2], %s1480_s28  ;;  %s265_s11 = scalar_lea.vmem [#allocation3], %s1480_s28 }
  0x1f   : > { %v319_v9 = vld [vmem:[%s261_s29] sm:$0xff]  ;;  %v322_v10 = vld [vmem:[%s265_s11] sm:$0xff]  ;;  %s1731_s14 = scalar_lea.vmem [#allocation6], %s1480_s28  ;;  %s1734_s30 = scalar_lea.vmem [#allocation7], %s1480_s28  ;;  %v331_v5 = vmov %v1727_v5  ;;  %v334_v6 = vmov %v1729_v6  ;;  %vm1359_vm2 = vcmp.lt.s32.totalorder %v1727_v5, 5 }
  0x20   : > { %324 = vst [vmem:[%s1731_s14] sm:$0xff] %v1619_v11  ;;  %325 = vst [vmem:[%s1734_s30] sm:$0xff] %v1619_v11  ;;  %s312_s15 = smov [#allocation10]  ;;  %s315_s16 = smov [#allocation11]  ;;  %v344_v5 = vmov %v1727_v5  ;;  %v347_v6 = vmov %v1729_v6  ;;  %vm338_vm0 = vcmp.eq.s32.totalorder %v334_v6, %v331_v5 }
  0x21   : > { %s1737_s17 = scalar_lea.vmem [#allocation8], %s1480_s28  ;;  %s1740_s20 = scalar_lea.vmem [#allocation9], %s1480_s28  ;;  %314 = vst [vmem:[%s312_s15] sm:$0xff] %v313_v7  ;;  %317 = vst [vmem:[%s315_s16] sm:$0xff] %v316_v8  ;;  %vm351_vm1 = vcmp.eq.s32.totalorder %v347_v6, %v344_v5  ;;  %v1351_v5 = vmov %v1727_v5  ;;  %v1354_v6 = vmov %v1729_v6 }
  0x22   : > { %326 = vst [vmem:[%s1737_s17] sm:$0xff] %v1619_v11  ;;  %327 = vst [vmem:[%s1740_s20] sm:$0xff] %v1619_v11  ;;  %s318_s23 = smov [#allocation12]  ;;  %s321_s24 = smov [#allocation13]  ;;  %vm1364_vm3 = vcmp.eq.s32.totalorder %v1354_v6, %v1351_v5  ;;  %v1402_v5 = vmov %v1727_v5  ;;  %v1371_v6 = vmov %v1729_v6 }
  0x23   : > { %320 = vst [vmem:[%s318_s23] sm:$0xff] %v319_v9  ;;  %323 = vst [vmem:[%s321_s24] sm:$0xff] %v322_v10  ;;  %s328_s14 = smov %s1731_s14  ;;  %s341_s20 = smov %s1740_s20  ;;  %v1368_v5 = vmov %v1727_v5  ;;  %v1405_v6 = vmov %v1729_v6 }
  0x24   : > { %s287_s25 = scalar_lea.vmem [#allocation4], %s1725_s18  ;;  %s1355_s27 = smov [#allocation10]  ;;  %v1385_v5 = vmov %v1727_v5  ;;  %v1388_v6 = vmov %v1729_v6  ;;  %vm1415_vm4 = vcmp.eq.s32.totalorder %v1405_v6, %v1402_v5 }
  0x25   : > { %s1372_s28 = smov [#allocation11]  ;;  %s1389_s21 = smov [#allocation12] }
  0x26   : > { %s1406_s22 = smov [#allocation13] }
  0x27   : > { %v335_v12 = vld [vmem:[%s328_s14] sm:$0x1f] }
  0x28   : > { %v339_v13 = vsel %vm338_vm0, 1.0, %v335_v12  ;;  %v1361_v16 = vld [vmem:[%s1355_s27] sm:$0x1f] }
  0x29   : > { %v348_v14 = vld [vmem:[%s341_s20] sm:$0x1f]  ;;  %340 = vst [vmem:[%s328_s14] sm:$0x1f] %v339_v13  ;;  %v1362_v18 = vsel %vm1359_vm2, %v1361_v16, 0.0 }
  0x2a   : > { %v352_v15 = vsel %vm351_vm1, 1.0, %v348_v14  ;;  %v1378_v17 = vld [vmem:[%s1372_s28] sm:$0x1f]  ;;  %v1363_v22 = vmul.f32 %v1362_v18, %v1362_v18 }
  0x2b   : > { %353 = vst [vmem:[%s341_s20] sm:$0x1f] %v352_v15  ;;  %v1379_v19 = vsel %vm1359_vm2, %v1378_v17, 0.0  ;;  %v1395_v20 = vld [vmem:[%s1389_s21] sm:$0x1f] }
  0x2c   : > { %v1412_v21 = vld [vmem:[%s1406_s22] sm:$0x1f]  ;;  %v1380_v23 = vmul.f32 %v1379_v19, %v1379_v19  ;;  %v1396_v24 = vsel %vm1359_vm2, %v1395_v20, 0.0  ;;  %v1365_v29 = vsel %vm1364_vm3, 0.0, %v1363_v22 }
  0x2d   : > { %v1413_v25 = vsel %vm1359_vm2, %v1412_v21, 0.0  ;;  %v1397_v26 = vmul.f32 %v1396_v24, %v1396_v24 }
  0x2e   : > { %v1382_v27 = vadd.f32 %v1380_v23, %v1363_v22  ;;  %v1414_v28 = vmul.f32 %v1413_v25, %v1413_v25  ;;  %v1381_v30 = vadd.f32 %v1380_v23, %v1365_v29 }
  0x30   : > { %v1399_v31 = vadd.f32 %v1397_v26, %v1382_v27  ;;  %v1398_v32 = vadd.f32 %v1397_v26, %v1381_v30  ;;  %v1416_v33 = vsel %vm1415_vm4, 0.0, %v1414_v28 }
  0x32   : > { %v1418_v34 = vadd.f32 %v1414_v28, %v1399_v31  ;;  %v1417_v35 = vadd.f32 %v1416_v33, %v1398_v32 }
  0x34   : > { %1419 = vadd.xlane.f32.xlu0 %v1418_v34 }
  0x38   : > { %1427 = vadd.xlane.f32.xlu0 %v1417_v35 }
  0xbd   : > { %v1420_v36 = vpop.xlane.xlu0 %1419 }
  0xbe   : > { %v1421_v37 = vrot.slane %v1420_v36, 4 }
  0xc0   : > { %v1422_v38 = vadd.f32 %v1421_v37, %v1420_v36 }
  0xc1   : > { %v1428_v39 = vpop.xlane.xlu0 %1427 }
  0xc2   : > { %v1423_v40 = vrot.slane %v1422_v38, 2  ;;  %v1429_v41 = vrot.slane %v1428_v39, 4 }
  0xc4   : > { %v1430_v42 = vadd.f32 %v1429_v41, %v1428_v39  ;;  %v1424_v43 = vadd.f32 %v1423_v40, %v1422_v38 }
  0xc6   : > { %v1431_v44 = vrot.slane %v1430_v42, 2  ;;  %v1425_v46 = vrot.slane %v1424_v43, 1 }
  0xc8   : > { %v1432_v45 = vadd.f32 %v1431_v44, %v1430_v42  ;;  %v1426_v49 = vadd.f32 %v1425_v46, %v1424_v43 }
  0xca   : > { %v1433_v47 = vrot.slane %v1432_v45, 1 }
  0xcc   : > { %v1434_v48 = vadd.f32 %v1433_v47, %v1432_v45 }
  0xce   : > { %1520 = vpush %v1434_v48 }
  0xcf   : > { %1522 = vpush %v1426_v49 }
  0xff   : > { %s1521_s29 = spop %1520 }
 0x100   : > { %s1523_s11 = spop %1522 }
 0x101   : > { %s1437_s15 = smul.f32 1e-10, %s1523_s11 }
 0x103   : > { %p1438_p8 = scmp.le.f32.partialorder %s1521_s29, %s1437_s15 }
 0x104   : > { %s1769_s16 = smov (!%p1438_p8), 0  }
 0x105   : > { %1441 = sbr.rel (%p1438_p8) target bundleno = 943 (0x3af), region = 507 }
 0x10a LB: >> { %s1774_s23 = smov 0   ;;  %s1613_s16 = sphi %s1769_s16, %s2011_s16  }
 0x10b LB: >>> { %s458_s24 = smov [#allocation10]  ;;  %v462_v5 = vmov %v1727_v5  ;;  %v465_v6 = vmov %v1729_v6  ;;  %s478_s27 = smov [#allocation11]  ;;  %vm781_vm14 = vcmp.eq.s32.totalorder %v1729_v6, 0  ;;  %vm793_vm15 = vcmp.eq.s32.totalorder %v1729_v6, 4  ;;  %s1617_s23 = sphi %s1774_s23, %s457_s23  }
 0x10c   : >>> { %v482_v5 = vmov %v1727_v5  ;;  %v485_v6 = vmov %v1729_v6  ;;  %v466_v50 = vld [vmem:[%s458_s24] sm:$0x1f]  ;;  %vm469_vm5 = vcmp.eq.s32.totalorder %v465_v6, %v462_v5  ;;  %s498_s28 = smov [#allocation13]  ;;  %s459_s21 = smov [#allocation14] }
 0x10d   : >>> { %vm489_vm6 = vcmp.eq.s32.totalorder %v485_v6, %v482_v5  ;;  %v502_v5 = vmov %v1727_v5  ;;  %v505_v6 = vmov %v1729_v6  ;;  %v470_v51 = vsel %vm469_vm5, %v466_v50, 0.0  ;;  %v486_v52 = vld [vmem:[%s478_s27] sm:$0x1f]  ;;  %s479_s22 = smov [#allocation15]  ;;  %s499_s29 = smov [#allocation16] }
 0x10e   : >>> { %vm509_vm7 = vcmp.eq.s32.totalorder %v505_v6, %v502_v5  ;;  %v471_v53 = vrot.slane %v470_v51, 4  ;;  %v490_v54 = vsel %vm489_vm6, %v486_v52, 0.0  ;;  %v506_v55 = vld [vmem:[%s498_s28] sm:$0x1f]  ;;  %s522_s11 = smov [#allocation15]  ;;  %s520_s15 = smov [#allocation14]  ;;  %v571_v5 = vmov %v1727_v5 }
 0x10f   : >>> { %v491_v56 = vrot.slane %v490_v54, 4  ;;  %v510_v57 = vsel %vm509_vm7, %v506_v55, 0.0  ;;  %s524_s24 = smov [#allocation16]  ;;  %s559_s27 = smov [#allocation17]  ;;  %v574_v6 = vmov %v1729_v6  ;;  %v586_v5 = vmov %v1727_v5 }
 0x110   : >>> { %v472_v58 = vadd.f32 %v471_v53, %v470_v51  ;;  %v511_v59 = vrot.slane %v510_v57, 4  ;;  %s561_s28 = smov [#allocation18]  ;;  %v589_v6 = vmov %v1729_v6  ;;  %vm576_vm12 = vcmp.eq.s32.totalorder %v574_v6, %v571_v5  ;;  %s1798_s14 = smov %s1731_s14 }
 0x111   : >>> { %v492_v60 = vadd.f32 %v491_v56, %v490_v54  ;;  %vm591_vm13 = vcmp.eq.s32.totalorder %v589_v6, %v586_v5  ;;  %s1801_s30 = smov %s1734_s30  ;;  %s1804_s17 = smov %s1737_s17  ;;  %v829_v53 = vld [vmem:[%s1798_s14] sm:$0x1f]  ;;  %v684_v5 = vmov %v1727_v5  ;;  %v687_v6 = vmov %v1729_v6 }
 0x112   : >>> { %v473_v61 = vrot.slane %v472_v58, 2  ;;  %v512_v62 = vadd.f32 %v511_v59, %v510_v57  ;;  %s1809_s20 = smov %s1740_s20  ;;  %v830_v54 = vld [vmem:[%s1801_s30] sm:$0x1f]  ;;  %s823_s26 = smov [#allocation22]  ;;  %v698_v5 = vmov %v1727_v5  ;;  %v701_v6 = vmov %v1729_v6 }
 0x113   : >>> { %v493_v63 = vrot.slane %v492_v60, 2  ;;  %v831_v55 = vld [vmem:[%s1804_s17] sm:$0x1f]  ;;  %vm691_vm0 = vcmp.eq.s32.totalorder %v687_v6, %v684_v5  ;;  %v657_v5 = vmov %v1727_v5  ;;  %v660_v6 = vmov %v1729_v6  ;;  %s457_s23 = sadd.s32 1, %s1617_s23  }
 0x114   : >>> { %v474_v0 = vadd.f32 %v473_v61, %v472_v58  ;;  %v513_v1 = vrot.slane %v512_v62, 2  ;;  %v832_v57 = vld [vmem:[%s1809_s20] sm:$0x1f]  ;;  %v671_v5 = vmov %v1727_v5  ;;  %v674_v6 = vmov %v1729_v6  ;;  %p454_p9 = scmp.ge.s32.totalorder %s457_s23, 9  }
 0x115   : >>> { %v494_v2 = vadd.f32 %v493_v63, %v492_v60  ;;  %vm706_vm1 = vcmp.eq.s32.totalorder %v701_v6, %v698_v5  ;;  %vm665_vm3 = vcmp.eq.s32.totalorder %v660_v6, %v657_v5  ;;  %vm678_vm4 = vcmp.eq.s32.totalorder %v674_v6, %v671_v5 }
 0x116   : >>> { %v475_v3 = vrot.slane %v474_v0, 1  ;;  %v514_v4 = vadd.f32 %v513_v1, %v512_v62  ;;  %vm720_vm5 = vcmp.eq.s32.totalorder %v1727_v5, 0  ;;  %vm724_vm6 = vcmp.eq.s32.totalorder %v1727_v5, 1 }
 0x117   : >>> { %v495_v7 = vrot.slane %v494_v2, 1  ;;  %vm737_vm7 = vcmp.eq.s32.totalorder %v1727_v5, 4  ;;  %v358_v5 = vmov (%p454_p9), %v1727_v5  ;;  %v361_v6 = vmov (%p454_p9), %v1729_v6 }
 0x118   : >>> { %v476_v8 = vadd.f32 %v475_v3, %v474_v0  ;;  %v515_v9 = vrot.slane %v514_v4, 1  ;;  %v411_v5 = vmov (%p454_p9), %v1727_v5 }
 0x119   : >>> { %v496_v10 = vadd.f32 %v495_v7, %v494_v2 }
 0x11a   : >>> { %477 = vst [vmem:[%s459_s21] sm:$0x1] %v476_v8  ;;  %v516_v11 = vadd.f32 %v515_v9, %v514_v4  ;;  %s518_s21 = smov [#allocation19] }
 0x11b   : >>> { %497 = vst [vmem:[%s479_s22] sm:$0x1] %v496_v10  ;;  %s519_s22 = smov [#allocation20]  ;;  %s563_s21 = smov %s518_s21 }
 0x11c   : >>> { %517 = vst [vmem:[%s499_s29] sm:$0x1] %v516_v11  ;;  %s565_s22 = smov %s519_s22  ;;  %s567_s29 = smov [#allocation19] }
 0x121   : >>> { %v521_v14 = vld [vmem:[%s520_s15] sm:$0xff]  ;;  %s580_s15 = smov [#allocation21] }
 0x122   : >>> { %v523_v12 = vld [vmem:[%s522_s11] sm:$0xff]  ;;  %v544_v29 = vand.u32 2147483647, %v521_v14  ;;  %s582_s11 = smov [#allocation20] }
 0x123   : >>> { %v527_v13 = vmul.f32 2.0, %v523_v12  ;;  %v525_v15 = vld [vmem:[%s524_s24] sm:$0xff]  ;;  %v545_v32 = vand.u32 2147483647, %v523_v12  ;;  %s597_s24 = smov [#allocation21] }
 0x124   : >>> { %v526_v16 = vsub.f32 %v525_v15, %v521_v14  ;;  %v546_v30 = vand.u32 2147483647, %v525_v15 }
 0x125   : >>> { %1571 = vrcp.f32 %v527_v13 }
 0x126   : >>> { %v547_v31 = vmin.f32 %v544_v29, %v546_v30 }
 0x128   : >>> { %v548_v33 = vmul.f32 1.1920929e-08, %v547_v31 }
 0x12a   : >>> { %vm549_vm11 = vcmp.le.f32.partialorder %v545_v32, %v548_v33 }
 0x132   : >>> { %v1572_v17 = vpop.eup %1571 }
 0x133   : >>> { %v529_v18 = vmul.f32 %v1572_v17, %v526_v16 }
 0x135   : >>> { %v531_v19 = vmul.f32 %v529_v18, %v529_v18  ;;  %vm530_vm10 = vcmp.ge.f32.partialorder %v529_v18, 0.0 }
 0x137   : >>> { %v532_v20 = vadd.f32 1.0, %v531_v19 }
 0x139   : >>> { %1573 = vrsqrt.f32 %v532_v20  ;;  %vm535_vm8 = vcmp.eq.f32.partialorder %v532_v20, inf  ;;  %v538_v22 = vand.u32 2147483648, %v532_v20  ;;  %vm537_vm9 = vcmp.eq.f32.partialorder %v532_v20, 0.0 }
 0x146   : >>> { %v1574_v21 = vpop.eup %1573 }
 0x147   : >>> { %v534_v23 = vmul.f32 %v1574_v21, %v532_v20 }
 0x149   : >>> { %v536_v24 = vsel %vm535_vm8, %v532_v20, %v534_v23  ;;  %vm373_vm8 = vcmp.eq.s32.totalorder (%p454_p9), %v361_v6, %v358_v5  ;;  %v414_v6 = vmov (%p454_p9), %v1729_v6  ;;  %v377_v5 = vmov (%p454_p9), %v1727_v5 }
 0x14a   : >>> { %v539_v25 = vsel %vm537_vm9, %v538_v22, %v536_v24  ;;  %v380_v6 = vmov (%p454_p9), %v1729_v6  ;;  %v394_v5 = vmov (%p454_p9), %v1727_v5  ;;  %vm426_vm9 = vcmp.eq.s32.totalorder (%p454_p9), %v414_v6, %v411_v5 }
 0x14b   : >>> { %v540_v26 = vxor.u32 2147483648, %v539_v25  ;;  %v397_v6 = vmov (%p454_p9), %v1729_v6 }
 0x14d   : >>> { %v541_v27 = vsel %vm530_vm10, %v539_v25, %v540_v26 }
 0x14e   : >>> { %v542_v28 = vadd.f32 %v541_v27, %v529_v18 }
 0x150   : >>> { %1575 = vrcp.f32 %v542_v28 }
 0x15d   : >>> { %v1576_v34 = vpop.eup %1575 }
 0x15e   : >>> { %v550_v35 = vsel %vm549_vm11, 0.0, %v1576_v34 }
 0x15f   : >>> { %v551_v36 = vmul.f32 %v550_v35, %v550_v35  ;;  %v555_v37 = vmul.f32 %v550_v35, %v523_v12 }
 0x161   : >>> { %v552_v38 = vadd.f32 1.0, %v551_v36  ;;  %v556_v39 = vsub.f32 %v521_v14, %v555_v37  ;;  %v558_v40 = vadd.f32 %v555_v37, %v525_v15 }
 0x163   : >>> { %1577 = vrsqrt.f32 %v552_v38  ;;  %560 = vst [vmem:[%s559_s27] sm:$0xff] %v556_v39  ;;  %562 = vst [vmem:[%s561_s28] sm:$0xff] %v558_v40  ;;  %s1789_s27 = smov [#allocation10]  ;;  %s595_s28 = smov [#allocation22] }
 0x164   : >>> { %v605_v49 = vld [vmem:[%s1789_s27] sm:$0x1f] }
 0x170   : >>> { %v1578_v41 = vpop.eup %1577 }
 0x171   : >>> { %564 = vst [vmem:[%s563_s21] sm:$0xff] %v1578_v41  ;;  %v554_v42 = vmul.f32 %v1578_v41, %v550_v35  ;;  %s1791_s21 = smov [#allocation11] }
 0x172   : >>> { %v606_v50 = vld [vmem:[%s1791_s21] sm:$0x1f] }
 0x173   : >>> { %566 = vst [vmem:[%s565_s22] sm:$0xff] %v554_v42  ;;  %s1793_s22 = smov [#allocation12] }
 0x174   : >>> { %v607_v51 = vld [vmem:[%s1793_s22] sm:$0x1f] }
 0x178   : >>> { %v568_v43 = vld [vmem:[%s567_s29] ss:$0 sm:$0xff]  ;;  %s1795_s29 = smov [#allocation13] }
 0x179   : >>> { %v577_v44 = vsel %vm576_vm12, %v568_v43, 0.0  ;;  %v608_v52 = vld [vmem:[%s1795_s29] sm:$0x1f] }
 0x17a   : >>> { %578 = vadd.xlane.f32.xlu0 %v577_v44  ;;  %v583_v45 = vld [vmem:[%s582_s11] ss:$0 sm:$0xff]  ;;  %s821_s11 = smov [#allocation21] }
 0x17b   : >>> { %v592_v46 = vsel %vm591_vm13, %v583_v45, 0.0 }
 0x17e   : >>> { %593 = vadd.xlane.f32.xlu0 %v592_v46 }
 0x203   : >>> { %v579_v47 = vpop.xlane.xlu0 %578 }
 0x204   : >>> { %581 = vst [vmem:[%s580_s15] sm:$0xff] %v579_v47  ;;  %s599_s15 = smov [#allocation22] }
 0x207   : >>> { %v594_v48 = vpop.xlane.xlu0 %593 }
 0x208   : >>> { %596 = vst [vmem:[%s595_s28] sm:$0xff] %v594_v48  ;;  %s1825_s28 = smov [#allocation12] }
 0x20b   : >>> { %v598_v56 = vld [vmem:[%s597_s24] sm:$0xff]  ;;  %s627_s24 = smov [#allocation20] }
 0x20c   : >>> { %v822_v58 = vld [vmem:[%s821_s11] sm:$0xff]  ;;  %v609_v59 = vmul.f32 %v605_v49, %v598_v56  ;;  %v612_v60 = vmul.f32 %v606_v50, %v598_v56  ;;  %v616_v61 = vmul.f32 %v607_v51, %v598_v56  ;;  %v619_v62 = vmul.f32 %v608_v52, %v598_v56  ;;  %s1827_s11 = smov [#allocation13] }
 0x20d   : >>> { %v833_v63 = vmul.f32 %v829_v53, %v822_v58  ;;  %v836_v0 = vmul.f32 %v830_v54, %v822_v58  ;;  %v840_v1 = vmul.f32 %v831_v55, %v822_v58  ;;  %v843_v2 = vmul.f32 %v832_v57, %v822_v58  ;;  %v628_v24 = vld [vmem:[%s627_s24] ss:$0 sm:$0xff]  ;;  %s653_s24 = smov [#allocation10] }
 0x20f   : >>> { %v600_v3 = vld [vmem:[%s599_s15] sm:$0xff]  ;;  %s1829_s15 = smov [#allocation10] }
 0x210   : >>> { %v824_v4 = vld [vmem:[%s823_s26] sm:$0xff]  ;;  %v610_v7 = vmul.f32 %v607_v51, %v600_v3  ;;  %v613_v8 = vmul.f32 %v608_v52, %v600_v3  ;;  %v615_v9 = vmul.f32 %v605_v49, %v600_v3  ;;  %v618_v10 = vmul.f32 %v606_v50, %v600_v3  ;;  %s625_s26 = smov [#allocation19] }
 0x211   : >>> { %v834_v11 = vmul.f32 %v831_v55, %v824_v4  ;;  %v837_v12 = vmul.f32 %v832_v57, %v824_v4  ;;  %v839_v13 = vmul.f32 %v829_v53, %v824_v4  ;;  %v842_v14 = vmul.f32 %v830_v54, %v824_v4  ;;  %v626_v23 = vld [vmem:[%s625_s26] ss:$0 sm:$0xff]  ;;  %s654_s26 = smov [#allocation17] }
 0x212   : >>> { %v611_v15 = vsub.f32 %v609_v59, %v610_v7  ;;  %v614_v16 = vsub.f32 %v612_v60, %v613_v8  ;;  %v617_v17 = vadd.f32 %v616_v61, %v615_v9  ;;  %v620_v18 = vadd.f32 %v619_v62, %v618_v10  ;;  %v661_v59 = vld [vmem:[%s654_s26] ss:$0 sm:$0xff]  ;;  %s773_s26 = smov [#allocation10] }
 0x213   : >>> { %v835_v19 = vsub.f32 %v833_v63, %v834_v11  ;;  %v838_v20 = vsub.f32 %v836_v0, %v837_v12  ;;  %v841_v21 = vadd.f32 %v840_v1, %v839_v13  ;;  %v844_v22 = vadd.f32 %v843_v2, %v842_v14 }
 0x214   : >>> { %622 = vst [vmem:[%s1791_s21] sm:$0x1f] %v614_v16  ;;  %624 = vst [vmem:[%s1795_s29] sm:$0x1f] %v620_v18  ;;  %s695_s21 = smov [#allocation18]  ;;  %s694_s29 = smov [#allocation13] }
 0x215   : >>> { %621 = vst [vmem:[%s1789_s27] sm:$0x1f] %v611_v15  ;;  %623 = vst [vmem:[%s1793_s22] sm:$0x1f] %v617_v17  ;;  %s1842_s27 = smov [#allocation11]  ;;  %s681_s22 = smov [#allocation12]  ;;  %v702_v55 = vld [vmem:[%s695_s21] ss:$0 sm:$0xff] }
 0x216   : >>> { %845 = vst [vmem:[%s1798_s14] sm:$0x1f] %v835_v19  ;;  %846 = vst [vmem:[%s1801_s30] sm:$0x1f] %v838_v20  ;;  %s1832_s14 = smov %s1731_s14  ;;  %s1840_s30 = smov %s1734_s30 }
 0x217   : >>> { %847 = vst [vmem:[%s1804_s17] sm:$0x1f] %v841_v21  ;;  %848 = vst [vmem:[%s1809_s20] sm:$0x1f] %v844_v22  ;;  %s1835_s17 = smov %s1737_s17  ;;  %s1845_s20 = smov %s1740_s20 }
 0x218   : >>> { %s710_s21 = smov [#allocation11] }
 0x21b   : >>> { %v636_v26 = vld [vmem:[%s1827_s11] sm:$0x1f] }
 0x21c   : >>> { %v635_v25 = vld [vmem:[%s1825_s28] sm:$0x1f]  ;;  %v644_v32 = vmul.f32 %v636_v26, %v628_v24  ;;  %v647_v38 = vmul.f32 %v636_v26, %v626_v23 }
 0x21d   : >>> { %v633_v27 = vld [vmem:[%s1829_s15] sm:$0x1f]  ;;  %v643_v31 = vmul.f32 %v635_v25, %v626_v23  ;;  %v646_v33 = vmul.f32 %v635_v25, %v628_v24 }
 0x21e   : >>> { %v851_v28 = vld [vmem:[%s1832_s14] ss:$0 sm:$0xff]  ;;  %v1499_v30 = vld [vmem:[%s1832_s14 + $0x4] ss:$0 sm:$0xff]  ;;  %v637_v44 = vmul.f32 %v633_v27, %v626_v23  ;;  %v640_v45 = vmul.f32 %v633_v27, %v628_v24 }
 0x21f   : >>> { %v1498_v29 = vld [vmem:[%s1832_s14 - $0x1] sm:$0x1e]  ;;  %v1503_v41 = vld [vmem:[%s1840_s30 + $0x4] ss:$0 sm:$0xff]  ;;  %v645_v43 = vsub.f32 %v643_v31, %v644_v32  ;;  %v648_v49 = vadd.f32 %v647_v38, %v646_v33 }
 0x220   : >>> { %v858_v34 = vsel %vm781_vm14, %v851_v28, %v1498_v29  ;;  %v862_v35 = vld [vmem:[%s1835_s17] ss:$0 sm:$0xff]  ;;  %v1501_v36 = vld [vmem:[%s1835_s17 + $0x1] sm:$0xf] }
 0x221   : >>> { %v875_v37 = vld [vmem:[%s1840_s30] ss:$0 sm:$0xff]  ;;  %861 = vst [vmem:[%s1832_s14] sm:$0x1f] %v858_v34  ;;  %v870_v39 = vsel %vm793_vm15, %v1499_v30, %v1501_v36  ;;  %v1505_v47 = vld [vmem:[%s1845_s20 + $0x1] sm:$0xf]  ;;  %651 = vst [vmem:[%s1825_s28] sm:$0x1f] %v645_v43 }
 0x222   : >>> { %v1502_v40 = vld [vmem:[%s1840_s30 - $0x1] sm:$0x1e]  ;;  %1500 = vst [vmem:[%s1832_s14 + $0x1] sm:$0x1] %v862_v35  ;;  %872 = vst [vmem:[%s1835_s17] sm:$0x1f] %v870_v39  ;;  %v894_v50 = vsel %vm793_vm15, %v1503_v41, %v1505_v47  ;;  %s668_s28 = smov [#allocation11] }
 0x223   : >>> { %v886_v42 = vld [vmem:[%s1845_s20] ss:$0 sm:$0xff]  ;;  %v882_v46 = vsel %vm781_vm14, %v875_v37, %v1502_v40  ;;  %652 = vst [vmem:[%s1827_s11] sm:$0x1f] %v648_v49  ;;  %s1887_s11 = smov [#allocation12] }
 0x224   : >>> { %v634_v48 = vld [vmem:[%s1842_s27] sm:$0x1f]  ;;  %885 = vst [vmem:[%s1840_s30] sm:$0x1f] %v882_v46  ;;  %896 = vst [vmem:[%s1845_s20] sm:$0x1f] %v894_v50 }
 0x225   : >>> { %v638_v51 = vmul.f32 %v634_v48, %v628_v24  ;;  %v641_v52 = vmul.f32 %v634_v48, %v626_v23  ;;  %1504 = vst [vmem:[%s1840_s30 + $0x1] sm:$0x1] %v886_v42 }
 0x227   : >>> { %v639_v53 = vsub.f32 %v637_v44, %v638_v51  ;;  %v642_v54 = vadd.f32 %v641_v52, %v640_v45 }
 0x228   : >>> { %v688_v56 = vld [vmem:[%s681_s22] sm:$0x1f] }
 0x229   : >>> { %649 = vst [vmem:[%s1829_s15] sm:$0x1f] %v639_v53  ;;  %650 = vst [vmem:[%s1842_s27] sm:$0x1f] %v642_v54  ;;  %v692_v57 = vsel %vm691_vm0, 0.0, %v688_v56  ;;  %s1620_s15 = smov 1   ;;  %s709_s27 = smov [#allocation10] }
 0x22a   : >>> { %v703_v58 = vld [vmem:[%s694_s29] sm:$0x1f]  ;;  %693 = vst [vmem:[%s681_s22] sm:$0x1f] %v692_v57  ;;  %s1621_s22 = smov 127  }
 0x22b   : >>> { %v707_v60 = vsel %vm706_vm1, %v702_v55, %v703_v58 }
 0x22c   : >>> { %708 = vst [vmem:[%s694_s29] sm:$0x1f] %v707_v60  ;;  %s1890_s29 = smov [#allocation13] }
 0x230   : >>> { %v662_v61 = vld [vmem:[%s653_s24] sm:$0x1f] }
 0x231   : >>> { %v675_v62 = vld [vmem:[%s668_s28] sm:$0x1f]  ;;  %v666_v63 = vsel %vm665_vm3, %v661_v59, %v662_v61 }
 0x232   : >>> { %v679_v0 = vsel %vm678_vm4, 0.0, %v675_v62  ;;  %667 = vst [vmem:[%s653_s24] sm:$0x1f] %v666_v63  ;;  %v747_v1 = vld [vmem:[%s1887_s11] sm:$0x1f]  ;;  %s797_s24 = smov [#allocation11] }
 0x233   : >>> { %680 = vst [vmem:[%s668_s28] sm:$0x1f] %v679_v0  ;;  %748 = vrot.lane.b32.xlu0 %v747_v1, %s1620_s15  ;;  %v743_v7 = vld [vmem:[%s1890_s29] sm:$0x1f]  ;;  %s774_s28 = smov [#allocation12] }
 0x234   : >>> { %v764_v8 = vld [vmem:[%s1890_s29] sm:$0x1f] }
 0x235   : >>> { %v746_v26 = vld [vmem:[%s1887_s11] sm:$0x1f] }
 0x239   : >>> { %v715_v2 = vld [vmem:[%s709_s27] sm:$0x1f] }
 0x23a   : >>> { %716 = vrot.lane.b32.xlu1 %v715_v2, %s1620_s15  ;;  %v711_v3 = vld [vmem:[%s710_s21] sm:$0x1f] }
 0x23b   : >>> { %v732_v4 = vld [vmem:[%s710_s21] sm:$0x1f] }
 0x23c   : >>> { %v714_v14 = vld [vmem:[%s709_s27] sm:$0x1f] }
 0x23e   : >>> { %712 = vrot.lane.b32.xlu1 %v711_v3, %s1620_s15 }
 0x242   : >>> { %733 = vrot.lane.b32.xlu1 %v732_v4, %s1621_s22 }
 0x246   : >>> { %744 = vrot.lane.b32.xlu1 %v743_v7, %s1620_s15  ;;  %s798_s15 = smov [#allocation13] }
 0x24a   : >>> { %765 = vrot.lane.b32.xlu1 %v764_v8, %s1621_s22  ;;  %s398_s22 = smov (%p454_p9), [#allocation12] }
 0x2a5   : >>> { %v749_v16 = vpop.permute.xlu0 %748 }
 0x2a6   : >>> { %v753_v18 = vsel %vm720_vm5, %v747_v1, %v749_v16 }
 0x2ac   : >>> { %v717_v9 = vpop.permute.xlu1 %716 }
 0x2ad   : >>> { %v721_v10 = vsel %vm720_vm5, %v715_v2, %v717_v9 }
 0x2b0   : >>> { %v713_v11 = vpop.permute.xlu1 %712 }
 0x2b1   : >>> { %v725_v12 = vsel %vm724_vm6, %v713_v11, %v721_v10 }
 0x2b2   : >>> { %v731_v13 = vsel %vm1359_vm2, %v725_v12, 0.0 }
 0x2b3   : >>> { %739 = vst [vmem:[%s709_s27] sm:$0x1f] %v731_v13  ;;  %s362_s27 = smov (%p454_p9), [#allocation10] }
 0x2b4   : >>> { %v734_v15 = vpop.permute.xlu1 %733 }
 0x2b5   : >>> { %v738_v17 = vsel %vm737_vm7, %v714_v14, %v734_v15 }
 0x2b6   : >>> { %740 = vst [vmem:[%s710_s21] sm:$0x1f] %v738_v17  ;;  %s381_s21 = smov (%p454_p9), [#allocation11] }
 0x2b8   : >>> { %v745_v19 = vpop.permute.xlu1 %744 }
 0x2b9   : >>> { %v757_v20 = vsel %vm724_vm6, %v745_v19, %v753_v18 }
 0x2ba   : >>> { %v775_v21 = vld [vmem:[%s773_s26] ss:$0 sm:$0xff]  ;;  %v1491_v23 = vld [vmem:[%s773_s26 + $0x4] ss:$0 sm:$0xff]  ;;  %v763_v25 = vsel %vm1359_vm2, %v757_v20, 0.0 }
 0x2bb   : >>> { %v1490_v22 = vld [vmem:[%s773_s26 - $0x1] sm:$0x1e]  ;;  %771 = vst [vmem:[%s1887_s11] sm:$0x1f] %v763_v25  ;;  %s897_s11 = sadd.s32 (%p454_p9), 1, %s1613_s16  }
 0x2bc   : >>> { %v782_v24 = vsel %vm781_vm14, %v775_v21, %v1490_v22  ;;  %v766_v27 = vpop.permute.xlu1 %765  ;;  %p450_p10 = scmp.ge.s32.totalorder (%p454_p9), %s897_s11, 15  ;;  %s2011_s16 = smov (%p454_p9), %s897_s11 }
 0x2bd   : >>> { %785 = vst [vmem:[%s773_s26] sm:$0x1f] %v782_v24  ;;  %v799_v28 = vld [vmem:[%s797_s24] ss:$0 sm:$0xff]  ;;  %v1495_v30 = vld [vmem:[%s797_s24 + $0x4] ss:$0 sm:$0xff]  ;;  %v770_v31 = vsel %vm737_vm7, %v746_v26, %v766_v27 }
 0x2be   : >>> { %v1494_v29 = vld [vmem:[%s797_s24 - $0x1] sm:$0x1e]  ;;  %772 = vst [vmem:[%s1890_s29] sm:$0x1f] %v770_v31  ;;  %s415_s29 = smov (%p454_p9), [#allocation13] }
 0x2bf   : >>> { %v806_v32 = vsel %vm781_vm14, %v799_v28, %v1494_v29 }
 0x2c0   : >>> { %809 = vst [vmem:[%s797_s24] sm:$0x1f] %v806_v32 }
 0x2c2   : >>> { %v786_v33 = vld [vmem:[%s774_s28] ss:$0 sm:$0xff]  ;;  %v1493_v34 = vld [vmem:[%s774_s28 + $0x1] sm:$0xf] }
 0x2c3   : >>> { %1492 = vst [vmem:[%s773_s26 + $0x1] sm:$0x1] %v786_v33  ;;  %v794_v35 = vsel %vm793_vm15, %v1491_v23, %v1493_v34 }
 0x2c4   : >>> { %796 = vst [vmem:[%s774_s28] sm:$0x1f] %v794_v35 }
 0x2c5   : >>> { %v810_v36 = vld [vmem:[%s798_s15] ss:$0 sm:$0xff]  ;;  %v1497_v37 = vld [vmem:[%s798_s15 + $0x1] sm:$0xf] }
 0x2c6   : >>> { %1496 = vst [vmem:[%s797_s24 + $0x1] sm:$0x1] %v810_v36  ;;  %v818_v38 = vsel %vm793_vm15, %v1495_v30, %v1497_v37 }
 0x2c7   : >>> { %820 = vst [vmem:[%s798_s15] sm:$0x1f] %v818_v38  ;;  %456 = sbr.rel (!%p454_p9) target bundleno = 267 (0x10b), region = 502 }
 0x2ca   : >> { %v368_v39 = vld [vmem:[%s362_s27] sm:$0x1f] (%p454_p9) }
 0x2cb   : >> { %v369_v41 = vsel (%p454_p9), %vm1359_vm2, %v368_v39, 0.0  ;;  %v404_v43 = vld [vmem:[%s398_s22] sm:$0x1f] (%p454_p9) }
 0x2cc   : >> { %v370_v45 = vmul.f32 %v369_v41, %v369_v41  ;;  %v405_v47 = vsel %vm1359_vm2, %v404_v43, 0.0 }
 0x2cd   : >> { %v387_v40 = vld [vmem:[%s381_s21] sm:$0x1f]  ;;  %v406_v49 = vmul.f32 %v405_v47, %v405_v47 }
 0x2ce   : >> { %v388_v42 = vsel %vm1359_vm2, %v387_v40, 0.0  ;;  %v421_v44 = vld [vmem:[%s415_s29] sm:$0x1f]  ;;  %v374_v52 = vsel %vm373_vm8, 0.0, %v370_v45 }
 0x2cf   : >> { %v389_v46 = vmul.f32 %v388_v42, %v388_v42  ;;  %v422_v48 = vsel %vm1359_vm2, %v421_v44, 0.0 }
 0x2d0   : >> { %v423_v51 = vmul.f32 %v422_v48, %v422_v48 }
 0x2d1   : >> { %v391_v50 = vadd.f32 %v389_v46, %v370_v45  ;;  %v390_v53 = vadd.f32 %v389_v46, %v374_v52 }
 0x2d2   : >> { %v427_v56 = vsel %vm426_vm9, 0.0, %v423_v51 }
 0x2d3   : >> { %v408_v54 = vadd.f32 %v406_v49, %v391_v50  ;;  %v407_v55 = vadd.f32 %v406_v49, %v390_v53 }
 0x2d5   : >> { %v429_v57 = vadd.f32 %v423_v51, %v408_v54  ;;  %v428_v58 = vadd.f32 %v427_v56, %v407_v55 }
 0x2d7   : >> { %430 = vadd.xlane.f32.xlu0 %v429_v57 }
 0x2db   : >> { %438 = vadd.xlane.f32.xlu0 %v428_v58 }
 0x360   : >> { %v431_v59 = vpop.xlane.xlu0 %430 }
 0x361   : >> { %v432_v60 = vrot.slane %v431_v59, 4 }
 0x363   : >> { %v433_v61 = vadd.f32 %v432_v60, %v431_v59 }
 0x364   : >> { %v439_v62 = vpop.xlane.xlu0 %438 }
 0x365   : >> { %v434_v63 = vrot.slane %v433_v61, 2  ;;  %v440_v0 = vrot.slane %v439_v62, 4 }
 0x367   : >> { %v441_v1 = vadd.f32 %v440_v0, %v439_v62  ;;  %v435_v2 = vadd.f32 %v434_v63, %v433_v61 }
 0x369   : >> { %v442_v3 = vrot.slane %v441_v1, 2  ;;  %v436_v7 = vrot.slane %v435_v2, 1 }
 0x36b   : >> { %v443_v4 = vadd.f32 %v442_v3, %v441_v1  ;;  %v437_v10 = vadd.f32 %v436_v7, %v435_v2 }
 0x36d   : >> { %v444_v8 = vrot.slane %v443_v4, 1 }
 0x36f   : >> { %v445_v9 = vadd.f32 %v444_v8, %v443_v4 }
 0x371   : >> { %1524 = vpush %v445_v9 }
 0x372   : >> { %1526 = vpush %v437_v10 }
 0x3a2   : >> { %s1525_s23 = spop %1524 }
 0x3a3   : >> { %s1527_s26 = spop %1526 }
 0x3a4   : >> { %s448_s24 = smul.f32 1e-10, %s1527_s26 }
 0x3a6   : >> { %p449_p11 = scmp.le.f32.partialorder %s1525_s23, %s448_s24 }
 0x3a8   : >> { %p451_p12 = por %p450_p10, %p449_p11 }
 0x3aa   : > { %899 = sbr.rel (!%p451_p12) target bundleno = 266 (0x10a), region = 513 }
 0x3af PF: > { %s904_s28 = smov [#allocation10]  ;;  %v908_v5 = vmov %v1727_v5  ;;  %v911_v6 = vmov %v1729_v6  ;;  %s924_s16 = smov [#allocation13] }
 0x3b0   : > { %v928_v5 = vmov %v1727_v5  ;;  %v931_v6 = vmov %v1729_v6  ;;  %v912_v11 = vld [vmem:[%s904_s28] sm:$0x1f]  ;;  %vm915_vm10 = vcmp.eq.s32.totalorder %v911_v6, %v908_v5  ;;  %s900_s15 = sand.u32 7, %s1688_s12   ;;  %s2012_s27 = scalar_lea.vmem [#allocation5], %s1725_s18 }
 0x3b1   : > { %vm935_vm11 = vcmp.eq.s32.totalorder %v931_v6, %v928_v5  ;;  %v916_v12 = vsel %vm915_vm10, %v912_v11, 0.0  ;;  %v932_v14 = vld [vmem:[%s924_s16] sm:$0x1f]  ;;  %s901_s11 = scalar_lea.vmem %s287_s25, %s900_s15 [#allocation4]  ;;  %s903_s21 = scalar_lea.vmem %s2012_s27, %s900_s15 [#allocation5] }
 0x3b2   : > { %v917_v13 = vrot.slane %v916_v12, 4  ;;  %v936_v15 = vsel %vm935_vm11, %v932_v14, 0.0  ;;  %s905_s11 = smov %s901_s11  ;;  %s925_s21 = smov %s903_s21 }
 0x3b3   : > { %v937_v17 = vrot.slane %v936_v15, 4  ;;  %s971_s22 = sshrl.u32 (%p1702_p3), %s1688_s12, 3 }
 0x3b4   : > { %v918_v16 = vadd.f32 %v917_v13, %v916_v12  ;;  %s1512_s29 = sshll.u32 (%p1702_p3), %s971_s22, 3 }
 0x3b5   : > { %v938_v19 = vadd.f32 %v937_v17, %v936_v15  ;;  %s973_s24 = scalar_lea.vmem (%p1702_p3), %s2003_s4, %s1512_s29 }
 0x3b6   : > { %v919_v18 = vrot.slane %v918_v16, 2 }
 0x3b7   : > { %v939_v21 = vrot.slane %v938_v19, 2 }
 0x3b8   : > { %v920_v20 = vadd.f32 %v919_v18, %v918_v16 }
 0x3b9   : > { %v940_v23 = vadd.f32 %v939_v21, %v938_v19 }
 0x3ba   : > { %v921_v22 = vrot.slane %v920_v20, 1 }
 0x3bb   : > { %v941_v6 = vrot.slane %v940_v23, 1  ;;  %970 = sbr.rel (!%p1702_p3) target bundleno = 967 (0x3c7), region = 174 }
 0x3bc   : > { %v922_v5 = vadd.f32 %v921_v22, %v920_v20 }
 0x3bd   : > { %v942_v24 = vadd.f32 %v941_v6, %v940_v23 }
 0x3be   : > { %923 = vst [vmem:[%s905_s11] sm:$0x1] %v922_v5 }
 0x3bf   : > { %943 = vst [vmem:[%s925_s21] sm:$0x1] %v942_v24 }
 0x3c5   : > { %v1002_v25 = vld [vmem:[%s287_s25] sm:$0xff] }
 0x3c6   : > { %1003 = vst [vmem:[%s973_s24] sm:$0xff] %v1002_v25 }
 0x3c7 PF: > { %1009 = sbr.rel (!%p1702_p3) target bundleno = 975 (0x3cf), region = 212  ;;  %s1010_s28 = sshrl.u32 (%p1702_p3), %s1688_s12, 3 }
 0x3c8   : > { %s2013_s16 = scalar_lea.vmem (%p1702_p3), [#allocation5], %s1725_s18  ;;  %s1513_s15 = sshll.u32 (%p1702_p3), %s1010_s28, 3 }
 0x3c9   : > { %s1012_s25 = scalar_lea.vmem (%p1702_p3), %s2004_s5, %s1513_s15 }
 0x3cd   : > { %v1041_v26 = vld [vmem:[%s2013_s16] sm:$0xff] }
 0x3ce   : > { %1042 = vst [vmem:[%s1012_s25] sm:$0xff] %v1041_v26 }
 0x3cf PF: > { %s1514_s21 = sshll.u32 %s1688_s12, 3  ;;  %v1076_v27 = vld [vmem:[%s1731_s14] sm:$0xff]  ;;  %v1111_v28 = vld [vmem:[%s1734_s30] sm:$0xff] }
 0x3d0   : > { %v1146_v29 = vld [vmem:[%s1737_s17] sm:$0xff]  ;;  %s1047_s18 = scalar_lea.vmem %s2005_s6, %s1514_s21  ;;  %s1082_s26 = scalar_lea.vmem %s2006_s7, %s1514_s21  ;;  %v1181_v30 = vld [vmem:[%s1740_s20] sm:$0xff] }
 0x3d1   : > { %1077 = vst [vmem:[%s1047_s18] sm:$0xff] %v1076_v27  ;;  %1112 = vst [vmem:[%s1082_s26] sm:$0xff] %v1111_v28  ;;  %s1117_s16 = scalar_lea.vmem %s2007_s8, %s1514_s21  ;;  %s1152_s14 = scalar_lea.vmem %s2008_s9, %s1514_s21 }
 0x3d2   : > { %1147 = vst [vmem:[%s1117_s16] sm:$0xff] %v1146_v29  ;;  %1182 = vst [vmem:[%s1152_s14] sm:$0xff] %v1181_v30 }
 0x3d3 PF: > { %s2014_s17 = sld [smem:[#allocation23_spill]]  ;;  %p13_p13 = scmp.ge.s32.totalorder %s1691_s13, 10  }
 0x3d4   : > { %s2015_s30 = smov %s1605_s10  ;;  %s2017_s11 = smov %s1691_s13 }
 0x3d5   :  { %15 = sbr.rel (!%p13_p13) target bundleno = 2 (0x2), region = 524 }
 0x3d9   : > { %s2016_s10 = smov %s2014_s17 }

// kernel: srln_forward.4
= control target key start
LH: loop header
LB: loop body
LE: loop exit
PB: predicated region body
PF: predicated region fallthrough
CT: control target
= control target key end

     0   :  { %vm27_vm0 = vcmask 1040384   ;;  %v147_v0 = vmov 0.0   ;;  %vm148_vm1 = vmmov 0   ;;  %vm23_vm2 = vcmask 662528   ;;  %s203_s1 = inlined_call_operand.vmem [shape: f32[81,128], index: 1, kind: input, shape index: {}]   ;;  %s204_s0 = inlined_call_operand.vmem [shape: f32[8,81], index: 0, kind: input, shape index: {}]   ;;  %s205_s2 = inlined_call_operand.vmem [shape: f32[8,128], index: 2, kind: output, shape index: {}]  }
   0x1   :  { %120 = vmatprep.subr.mxu0 %v147_v0  ;;  %v22_v1 = vld [vmem:[%s203_s1 + $0x50] sm:$0x1]  ;;  %v21_v2 = vld [vmem:[%s203_s1 + $0x48] sm:$0xff]  ;;  %142 = vmatprep.mubr.msk.f32.mxu0 %vm148_vm1, %v147_v0  ;;  %v20_v3 = vld [vmem:[%s203_s1 + $0x40] sm:$0xff] }
   0x2   :  { %121 = vmatpush3.msk.msra.mxu0 %vm27_vm0, %v22_v1  ;;  %v19_v4 = vld [vmem:[%s203_s1 + $0x38] sm:$0xff]  ;;  %v18_v5 = vld [vmem:[%s203_s1 + $0x30] sm:$0xff]  ;;  %v17_v6 = vld [vmem:[%s203_s1 + $0x28] sm:$0xff] }
   0x3   :  { %122 = vmatprep.subr.mxu0 %v147_v0  ;;  %v16_v7 = vld [vmem:[%s203_s1 + $0x20] sm:$0xff]  ;;  %v15_v8 = vld [vmem:[%s203_s1 + $0x18] sm:$0xff]  ;;  %v14_v9 = vld [vmem:[%s203_s1 + $0x10] sm:$0xff] }
   0x4   :  { %123 = vmatpush3.msra.mxu0 %v21_v2  ;;  %v13_v10 = vld [vmem:[%s203_s1 + $0x8] sm:$0xff]  ;;  %v12_v11 = vld [vmem:[%s203_s1] sm:$0xff] }
   0x5   :  { %124 = vmatprep.subr.mxu0 %v147_v0  ;;  %v11_v12 = vld [vmem:[%s204_s0] sm:$0xff] }
   0x6   :  { %125 = vmatpush3.msra.mxu0 %v20_v3 }
   0x7   :  { %126 = vmatprep.subr.mxu0 %v147_v0 }
   0x8   :  { %127 = vmatpush3.msra.mxu0 %v19_v4 }
   0x9   :  { %128 = vmatprep.subr.mxu0 %v147_v0 }
   0xa   :  { %129 = vmatpush3.msra.mxu0 %v18_v5 }
   0xb   :  { %130 = vmatprep.subr.mxu0 %v147_v0 }
   0xc   :  { %131 = vmatpush3.msra.mxu0 %v17_v6 }
   0xd   :  { %132 = vmatprep.subr.mxu0 %v147_v0 }
   0xe   :  { %133 = vmatpush3.msra.mxu0 %v16_v7 }
   0xf   :  { %134 = vmatprep.subr.mxu0 %v147_v0 }
  0x10   :  { %135 = vmatpush3.msra.mxu0 %v15_v8 }
  0x11   :  { %136 = vmatprep.subr.mxu0 %v147_v0 }
  0x12   :  { %137 = vmatpush3.msra.mxu0 %v14_v9 }
  0x13   :  { %138 = vmatprep.subr.mxu0 %v147_v0 }
  0x14   :  { %139 = vmatpush3.msra.mxu0 %v13_v10 }
  0x15   :  { %140 = vmatprep.subr.mxu0 %v147_v0 }
  0x16   :  { %141 = vmatpush3.msra.mxu0 %v12_v11 }
  0x17   :  { %143 = vmatmul.mubr.msk.f32.vlgmr.msra.gmra.mxu0 %vm23_vm2, %v11_v12 }
  0xd7   :  { %v97_v13 = vpop.f32.mrf.mxu0 }
  0xd8   :  { %101 = vst [vmem:[%s205_s2] sm:$0xff] %v97_v13 }
  0xd9   :  { %v144_v14 = vpop.f32.mrf.mxu0 }

// kernel: custom-call.90
= control target key start
LH: loop header
LB: loop body
LE: loop exit
PB: predicated region body
PF: predicated region fallthrough
CT: control target
= control target key end

     0   :  { %s1688_s30 = smov 0   ;;  %s1690_s10 = smov 0   ;;  %s2015_s0 = inlined_call_operand.vmem [shape: f32[2,5,5], index: 0, kind: input, shape index: {}]   ;;  %s2016_s1 = inlined_call_operand.vmem [shape: f32[2,5,5], index: 1, kind: input, shape index: {}]   ;;  %s2017_s2 = inlined_call_operand.vmem [shape: f32[2,5,5], index: 2, kind: input, shape index: {}]   ;;  %s2018_s3 = inlined_call_operand.vmem [shape: f32[2,5,5], index: 3, kind: input, shape index: {}]   ;;  %s2019_s4 = inlined_call_operand.vmem [shape: f32[2,5], index: 4, kind: output, shape index: {0}]   ;;  %s2020_s5 = inlined_call_operand.vmem [shape: f32[2,5], index: 5, kind: output, shape index: {1}]   ;;  %s2021_s6 = inlined_call_operand.vmem [shape: f32[2,5,5], index: 6, kind: output, shape index: {2}]   ;;  %s2022_s7 = inlined_call_operand.vmem [shape: f32[2,5,5], index: 7, kind: output, shape index: {3}]   ;;  %s2023_s8 = inlined_call_operand.vmem [shape: f32[2,5,5], index: 8, kind: output, shape index: {4}]   ;;  %s2024_s9 = inlined_call_operand.vmem [shape: f32[2,5,5], index: 9, kind: output, shape index: {5}]  }
   0x1   :  { %s1692_s11 = smov 0  }
   0x2 LB: > { %s1704_s12 = sadd.s32 4294967295, %s1625_s11   ;;  %s1707_s13 = sadd.s32 1, %s1625_s11   ;;  %s1625_s11 = sphi %s1692_s11, %s2033_s11   ;;  %s1621_s10 = sphi %s1690_s10, %s2032_s10   ;;  %s1617_s30 = sphi %s1688_s30, %s2031_s30  }
   0x3   : > { %s20_s14 = sshrl.u32 %s1625_s11, 3  ;;  %s21_s15 = sshrl.u32 %s1707_s13, 3 }
   0x4   : > { %s22_s16 = ssub.s32 %s20_s14, %s21_s15  ;;  %s25_s17 = sadd.s32 1, %s1621_s10 }
   0x5   : > { %p23_p0 = scmp.eq.s32.totalorder %s22_s16, 0  ;;  %p35_p1 = scmp.ne.s32.totalorder %s1621_s10, %s1617_s30 }
   0x6   : > { %p36_p2 = scmp.eq.s32.totalorder %s1704_s12, 1  ;;  %p1486_p4 = scmp.ge.s32.totalorder %s1625_s11, 2 }
   0x7   : > { %s1716_s18 = scalar_select %p23_p0, %s1621_s10, %s25_s17  }
   0x8   : > { %p1718_p3 = por %p36_p2, %p35_p1  ;;  %86 = sbr.rel (%p1486_p4) target bundleno = 18 (0x12), region = 16 }
   0x9   : > { %2025 = sst [smem:[#allocation25_spill]] %s1716_s18  ;;  %s88_s20 = sand.u32 (!%p1486_p4), 1, %s1625_s11  }
   0xa   : > { %s1488_s21 = sshll.u32 (!%p1486_p4), %s1625_s11, 3  ;;  %s1487_s22 = sshll.u32 (!%p1486_p4), %s88_s20, 3 }
   0xb   : > { %s92_s25 = scalar_lea.vmem (!%p1486_p4), %s2015_s0, %s1488_s21  ;;  %s90_s26 = scalar_lea.vmem (!%p1486_p4), [#allocation0], %s1487_s22 }
   0xc   : > { %s131_s29 = scalar_lea.vmem (!%p1486_p4), %s2016_s1, %s1488_s21  ;;  %s170_s16 = scalar_lea.vmem (!%p1486_p4), %s2017_s2, %s1488_s21 }
   0xd   : > { %v121_v0 = vld [vmem:[%s92_s25] sm:$0xff]  ;;  %s129_s17 = scalar_lea.vmem [#allocation1], %s1487_s22  ;;  %s209_s23 = scalar_lea.vmem %s2018_s3, %s1488_s21 }
   0xe   : > { %122 = vst [vmem:[%s90_s26] sm:$0xff] %v121_v0  ;;  %v160_v1 = vld [vmem:[%s131_s29] sm:$0xff]  ;;  %s168_s24 = scalar_lea.vmem [#allocation2], %s1487_s22  ;;  %s207_s25 = scalar_lea.vmem [#allocation3], %s1487_s22 }
   0xf   : > { %161 = vst [vmem:[%s129_s17] sm:$0xff] %v160_v1  ;;  %v199_v2 = vld [vmem:[%s170_s16] sm:$0xff] }
  0x10   : > { %200 = vst [vmem:[%s168_s24] sm:$0xff] %v199_v2  ;;  %v238_v3 = vld [vmem:[%s209_s23] sm:$0xff] }
  0x11   : > { %239 = vst [vmem:[%s207_s25] sm:$0xff] %v238_v3 }
  0x12 PF: > { %p1495_p5 = scmp.ge.s32.totalorder %s1625_s11, 1  ;;  %p244_p6 = scmp.lt.s32.totalorder %s1625_s11, 3 }
  0x14   : > { %p245_p7 = pnand %p1495_p5, %p244_p6 }
  0x16   : > { %248 = sbr.rel (%p245_p7) target bundleno = 987 (0x3db), region = 156 }
  0x1b   : > { %s251_s26 = sand.u32 1, %s1704_s12   ;;  %s285_s27 = sand.u32 1, %s1617_s30   ;;  %v329_v4 = vlaneseq  ;;  %v1635_v11 = vmov 0.0  }
  0x1c   : > { %s1496_s28 = sshll.u32 %s251_s26, 3  ;;  %s1741_s18 = sshll.u32 %s285_s27, 1 }
  0x1d   : > { %v1743_v5 = vand.u32 127, %v329_v4  ;;  %v1745_v6 = vshrl.u32 %v329_v4, 7  ;;  %s253_s21 = scalar_lea.vmem [#allocation0], %s1496_s28  ;;  %s257_s22 = scalar_lea.vmem [#allocation1], %s1496_s28 }
  0x1e   : > { %v313_v7 = vld [vmem:[%s253_s21] sm:$0xff]  ;;  %v316_v8 = vld [vmem:[%s257_s22] sm:$0xff]  ;;  %s261_s29 = scalar_lea.vmem [#allocation2], %s1496_s28  ;;  %s265_s11 = scalar_lea.vmem [#allocation3], %s1496_s28 }
  0x1f   : > { %v319_v9 = vld [vmem:[%s261_s29] sm:$0xff]  ;;  %v322_v10 = vld [vmem:[%s265_s11] sm:$0xff]  ;;  %s1747_s14 = scalar_lea.vmem [#allocation8], %s1496_s28  ;;  %s1750_s30 = scalar_lea.vmem [#allocation9], %s1496_s28  ;;  %v331_v5 = vmov %v1743_v5  ;;  %v334_v6 = vmov %v1745_v6  ;;  %vm1375_vm2 = vcmp.lt.s32.totalorder %v1743_v5, 5 }
  0x20   : > { %324 = vst [vmem:[%s1747_s14] sm:$0xff] %v1635_v11  ;;  %325 = vst [vmem:[%s1750_s30] sm:$0xff] %v1635_v11  ;;  %s312_s15 = smov [#allocation12]  ;;  %s315_s16 = smov [#allocation13]  ;;  %v344_v5 = vmov %v1743_v5  ;;  %v347_v6 = vmov %v1745_v6  ;;  %vm338_vm0 = vcmp.eq.s32.totalorder %v334_v6, %v331_v5 }
  0x21   : > { %s1753_s17 = scalar_lea.vmem [#allocation10], %s1496_s28  ;;  %s1756_s20 = scalar_lea.vmem [#allocation11], %s1496_s28  ;;  %314 = vst [vmem:[%s312_s15] sm:$0xff] %v313_v7  ;;  %317 = vst [vmem:[%s315_s16] sm:$0xff] %v316_v8  ;;  %vm351_vm1 = vcmp.eq.s32.totalorder %v347_v6, %v344_v5  ;;  %v1367_v5 = vmov %v1743_v5  ;;  %v1370_v6 = vmov %v1745_v6 }
  0x22   : > { %326 = vst [vmem:[%s1753_s17] sm:$0xff] %v1635_v11  ;;  %327 = vst [vmem:[%s1756_s20] sm:$0xff] %v1635_v11  ;;  %s318_s23 = smov [#allocation14]  ;;  %s321_s24 = smov [#allocation15]  ;;  %vm1380_vm3 = vcmp.eq.s32.totalorder %v1370_v6, %v1367_v5  ;;  %v1418_v5 = vmov %v1743_v5  ;;  %v1387_v6 = vmov %v1745_v6 }
  0x23   : > { %320 = vst [vmem:[%s318_s23] sm:$0xff] %v319_v9  ;;  %323 = vst [vmem:[%s321_s24] sm:$0xff] %v322_v10  ;;  %s328_s14 = smov %s1747_s14  ;;  %s341_s20 = smov %s1756_s20  ;;  %v1384_v5 = vmov %v1743_v5  ;;  %v1421_v6 = vmov %v1745_v6 }
  0x24   : > { %s287_s25 = scalar_lea.vmem [#allocation5], %s1741_s18  ;;  %s1371_s27 = smov [#allocation12]  ;;  %v1401_v5 = vmov %v1743_v5  ;;  %v1404_v6 = vmov %v1745_v6  ;;  %vm1431_vm4 = vcmp.eq.s32.totalorder %v1421_v6, %v1418_v5 }
  0x25   : > { %s1388_s28 = smov [#allocation13]  ;;  %s1405_s21 = smov [#allocation14] }
  0x26   : > { %s1422_s22 = smov [#allocation15] }
  0x27   : > { %v335_v12 = vld [vmem:[%s328_s14] sm:$0x1f] }
  0x28   : > { %v339_v13 = vsel %vm338_vm0, 1.0, %v335_v12  ;;  %v1377_v16 = vld [vmem:[%s1371_s27] sm:$0x1f] }
  0x29   : > { %v348_v14 = vld [vmem:[%s341_s20] sm:$0x1f]  ;;  %340 = vst [vmem:[%s328_s14] sm:$0x1f] %v339_v13  ;;  %v1378_v18 = vsel %vm1375_vm2, %v1377_v16, 0.0 }
  0x2a   : > { %v352_v15 = vsel %vm351_vm1, 1.0, %v348_v14  ;;  %v1394_v17 = vld [vmem:[%s1388_s28] sm:$0x1f]  ;;  %v1379_v22 = vmul.f32 %v1378_v18, %v1378_v18 }
  0x2b   : > { %353 = vst [vmem:[%s341_s20] sm:$0x1f] %v352_v15  ;;  %v1395_v19 = vsel %vm1375_vm2, %v1394_v17, 0.0  ;;  %v1411_v20 = vld [vmem:[%s1405_s21] sm:$0x1f] }
  0x2c   : > { %v1428_v21 = vld [vmem:[%s1422_s22] sm:$0x1f]  ;;  %v1396_v23 = vmul.f32 %v1395_v19, %v1395_v19  ;;  %v1412_v24 = vsel %vm1375_vm2, %v1411_v20, 0.0  ;;  %v1381_v29 = vsel %vm1380_vm3, 0.0, %v1379_v22 }
  0x2d   : > { %v1429_v25 = vsel %vm1375_vm2, %v1428_v21, 0.0  ;;  %v1413_v26 = vmul.f32 %v1412_v24, %v1412_v24 }
  0x2e   : > { %v1398_v27 = vadd.f32 %v1396_v23, %v1379_v22  ;;  %v1430_v28 = vmul.f32 %v1429_v25, %v1429_v25  ;;  %v1397_v30 = vadd.f32 %v1396_v23, %v1381_v29 }
  0x30   : > { %v1415_v31 = vadd.f32 %v1413_v26, %v1398_v27  ;;  %v1414_v32 = vadd.f32 %v1413_v26, %v1397_v30  ;;  %v1432_v33 = vsel %vm1431_vm4, 0.0, %v1430_v28 }
  0x32   : > { %v1434_v34 = vadd.f32 %v1430_v28, %v1415_v31  ;;  %v1433_v35 = vadd.f32 %v1432_v33, %v1414_v32 }
  0x34   : > { %1435 = vadd.xlane.f32.xlu0 %v1434_v34 }
  0x38   : > { %1443 = vadd.xlane.f32.xlu0 %v1433_v35 }
  0xbd   : > { %v1436_v36 = vpop.xlane.xlu0 %1435 }
  0xbe   : > { %v1437_v37 = vrot.slane %v1436_v36, 4 }
  0xc0   : > { %v1438_v38 = vadd.f32 %v1437_v37, %v1436_v36 }
  0xc1   : > { %v1444_v39 = vpop.xlane.xlu0 %1443 }
  0xc2   : > { %v1439_v40 = vrot.slane %v1438_v38, 2  ;;  %v1445_v41 = vrot.slane %v1444_v39, 4 }
  0xc4   : > { %v1446_v42 = vadd.f32 %v1445_v41, %v1444_v39  ;;  %v1440_v43 = vadd.f32 %v1439_v40, %v1438_v38 }
  0xc6   : > { %v1447_v44 = vrot.slane %v1446_v42, 2  ;;  %v1441_v46 = vrot.slane %v1440_v43, 1 }
  0xc8   : > { %v1448_v45 = vadd.f32 %v1447_v44, %v1446_v42  ;;  %v1442_v49 = vadd.f32 %v1441_v46, %v1440_v43 }
  0xca   : > { %v1449_v47 = vrot.slane %v1448_v45, 1 }
  0xcc   : > { %v1450_v48 = vadd.f32 %v1449_v47, %v1448_v45 }
  0xce   : > { %1536 = vpush %v1450_v48 }
  0xcf   : > { %1538 = vpush %v1442_v49 }
  0xff   : > { %s1537_s29 = spop %1536 }
 0x100   : > { %s1539_s11 = spop %1538 }
 0x101   : > { %s1453_s15 = smul.f32 1e-10, %s1539_s11 }
 0x103   : > { %p1454_p8 = scmp.le.f32.partialorder %s1537_s29, %s1453_s15 }
 0x104   : > { %s1785_s16 = smov (!%p1454_p8), 0  }
 0x105   : > { %1457 = sbr.rel (%p1454_p8) target bundleno = 943 (0x3af), region = 499 }
 0x10a LB: >> { %s1790_s23 = smov 0   ;;  %s1629_s16 = sphi %s1785_s16, %s2027_s16  }
 0x10b LB: >>> { %s458_s24 = smov [#allocation12]  ;;  %v462_v5 = vmov %v1743_v5  ;;  %v465_v6 = vmov %v1745_v6  ;;  %s478_s27 = smov [#allocation13]  ;;  %vm781_vm14 = vcmp.eq.s32.totalorder %v1745_v6, 0  ;;  %vm793_vm15 = vcmp.eq.s32.totalorder %v1745_v6, 4  ;;  %s1633_s23 = sphi %s1790_s23, %s457_s23  }
 0x10c   : >>> { %v482_v5 = vmov %v1743_v5  ;;  %v485_v6 = vmov %v1745_v6  ;;  %v466_v50 = vld [vmem:[%s458_s24] sm:$0x1f]  ;;  %vm469_vm5 = vcmp.eq.s32.totalorder %v465_v6, %v462_v5  ;;  %s498_s28 = smov [#allocation15]  ;;  %s459_s21 = smov [#allocation16] }
 0x10d   : >>> { %vm489_vm6 = vcmp.eq.s32.totalorder %v485_v6, %v482_v5  ;;  %v502_v5 = vmov %v1743_v5  ;;  %v505_v6 = vmov %v1745_v6  ;;  %v470_v51 = vsel %vm469_vm5, %v466_v50, 0.0  ;;  %v486_v52 = vld [vmem:[%s478_s27] sm:$0x1f]  ;;  %s479_s22 = smov [#allocation17]  ;;  %s499_s29 = smov [#allocation18] }
 0x10e   : >>> { %vm509_vm7 = vcmp.eq.s32.totalorder %v505_v6, %v502_v5  ;;  %v471_v53 = vrot.slane %v470_v51, 4  ;;  %v490_v54 = vsel %vm489_vm6, %v486_v52, 0.0  ;;  %v506_v55 = vld [vmem:[%s498_s28] sm:$0x1f]  ;;  %s522_s11 = smov [#allocation17]  ;;  %s520_s15 = smov [#allocation16]  ;;  %v571_v5 = vmov %v1743_v5 }
 0x10f   : >>> { %v491_v56 = vrot.slane %v490_v54, 4  ;;  %v510_v57 = vsel %vm509_vm7, %v506_v55, 0.0  ;;  %s524_s24 = smov [#allocation18]  ;;  %s559_s27 = smov [#allocation19]  ;;  %v574_v6 = vmov %v1745_v6  ;;  %v586_v5 = vmov %v1743_v5 }
 0x110   : >>> { %v472_v58 = vadd.f32 %v471_v53, %v470_v51  ;;  %v511_v59 = vrot.slane %v510_v57, 4  ;;  %s561_s28 = smov [#allocation20]  ;;  %v589_v6 = vmov %v1745_v6  ;;  %vm576_vm12 = vcmp.eq.s32.totalorder %v574_v6, %v571_v5  ;;  %s1814_s14 = smov %s1747_s14 }
 0x111   : >>> { %v492_v60 = vadd.f32 %v491_v56, %v490_v54  ;;  %vm591_vm13 = vcmp.eq.s32.totalorder %v589_v6, %v586_v5  ;;  %s1817_s30 = smov %s1750_s30  ;;  %s1820_s17 = smov %s1753_s17  ;;  %v829_v53 = vld [vmem:[%s1814_s14] sm:$0x1f]  ;;  %v684_v5 = vmov %v1743_v5  ;;  %v687_v6 = vmov %v1745_v6 }
 0x112   : >>> { %v473_v61 = vrot.slane %v472_v58, 2  ;;  %v512_v62 = vadd.f32 %v511_v59, %v510_v57  ;;  %s1825_s20 = smov %s1756_s20  ;;  %v830_v54 = vld [vmem:[%s1817_s30] sm:$0x1f]  ;;  %s823_s26 = smov [#allocation24]  ;;  %v698_v5 = vmov %v1743_v5  ;;  %v701_v6 = vmov %v1745_v6 }
 0x113   : >>> { %v493_v63 = vrot.slane %v492_v60, 2  ;;  %v831_v55 = vld [vmem:[%s1820_s17] sm:$0x1f]  ;;  %vm691_vm0 = vcmp.eq.s32.totalorder %v687_v6, %v684_v5  ;;  %v657_v5 = vmov %v1743_v5  ;;  %v660_v6 = vmov %v1745_v6  ;;  %s457_s23 = sadd.s32 1, %s1633_s23  }
 0x114   : >>> { %v474_v0 = vadd.f32 %v473_v61, %v472_v58  ;;  %v513_v1 = vrot.slane %v512_v62, 2  ;;  %v832_v57 = vld [vmem:[%s1825_s20] sm:$0x1f]  ;;  %v671_v5 = vmov %v1743_v5  ;;  %v674_v6 = vmov %v1745_v6  ;;  %p454_p9 = scmp.ge.s32.totalorder %s457_s23, 9  }
 0x115   : >>> { %v494_v2 = vadd.f32 %v493_v63, %v492_v60  ;;  %vm706_vm1 = vcmp.eq.s32.totalorder %v701_v6, %v698_v5  ;;  %vm665_vm3 = vcmp.eq.s32.totalorder %v660_v6, %v657_v5  ;;  %vm678_vm4 = vcmp.eq.s32.totalorder %v674_v6, %v671_v5 }
 0x116   : >>> { %v475_v3 = vrot.slane %v474_v0, 1  ;;  %v514_v4 = vadd.f32 %v513_v1, %v512_v62  ;;  %vm720_vm5 = vcmp.eq.s32.totalorder %v1743_v5, 0  ;;  %vm724_vm6 = vcmp.eq.s32.totalorder %v1743_v5, 1 }
 0x117   : >>> { %v495_v7 = vrot.slane %v494_v2, 1  ;;  %vm737_vm7 = vcmp.eq.s32.totalorder %v1743_v5, 4  ;;  %v358_v5 = vmov (%p454_p9), %v1743_v5  ;;  %v361_v6 = vmov (%p454_p9), %v1745_v6 }
 0x118   : >>> { %v476_v8 = vadd.f32 %v475_v3, %v474_v0  ;;  %v515_v9 = vrot.slane %v514_v4, 1  ;;  %v411_v5 = vmov (%p454_p9), %v1743_v5 }
 0x119   : >>> { %v496_v10 = vadd.f32 %v495_v7, %v494_v2 }
 0x11a   : >>> { %477 = vst [vmem:[%s459_s21] sm:$0x1] %v476_v8  ;;  %v516_v11 = vadd.f32 %v515_v9, %v514_v4  ;;  %s518_s21 = smov [#allocation21] }
 0x11b   : >>> { %497 = vst [vmem:[%s479_s22] sm:$0x1] %v496_v10  ;;  %s519_s22 = smov [#allocation22]  ;;  %s563_s21 = smov %s518_s21 }
 0x11c   : >>> { %517 = vst [vmem:[%s499_s29] sm:$0x1] %v516_v11  ;;  %s565_s22 = smov %s519_s22  ;;  %s567_s29 = smov [#allocation21] }
 0x121   : >>> { %v521_v14 = vld [vmem:[%s520_s15] sm:$0xff]  ;;  %s580_s15 = smov [#allocation23] }
 0x122   : >>> { %v523_v12 = vld [vmem:[%s522_s11] sm:$0xff]  ;;  %v544_v29 = vand.u32 2147483647, %v521_v14  ;;  %s582_s11 = smov [#allocation22] }
 0x123   : >>> { %v527_v13 = vmul.f32 2.0, %v523_v12  ;;  %v525_v15 = vld [vmem:[%s524_s24] sm:$0xff]  ;;  %v545_v32 = vand.u32 2147483647, %v523_v12  ;;  %s597_s24 = smov [#allocation23] }
 0x124   : >>> { %v526_v16 = vsub.f32 %v525_v15, %v521_v14  ;;  %v546_v30 = vand.u32 2147483647, %v525_v15 }
 0x125   : >>> { %1587 = vrcp.f32 %v527_v13 }
 0x126   : >>> { %v547_v31 = vmin.f32 %v544_v29, %v546_v30 }
 0x128   : >>> { %v548_v33 = vmul.f32 1.1920929e-08, %v547_v31 }
 0x12a   : >>> { %vm549_vm11 = vcmp.le.f32.partialorder %v545_v32, %v548_v33 }
 0x132   : >>> { %v1588_v17 = vpop.eup %1587 }
 0x133   : >>> { %v529_v18 = vmul.f32 %v1588_v17, %v526_v16 }
 0x135   : >>> { %v531_v19 = vmul.f32 %v529_v18, %v529_v18  ;;  %vm530_vm10 = vcmp.ge.f32.partialorder %v529_v18, 0.0 }
 0x137   : >>> { %v532_v20 = vadd.f32 1.0, %v531_v19 }
 0x139   : >>> { %1589 = vrsqrt.f32 %v532_v20  ;;  %vm535_vm8 = vcmp.eq.f32.partialorder %v532_v20, inf  ;;  %v538_v22 = vand.u32 2147483648, %v532_v20  ;;  %vm537_vm9 = vcmp.eq.f32.partialorder %v532_v20, 0.0 }
 0x146   : >>> { %v1590_v21 = vpop.eup %1589 }
 0x147   : >>> { %v534_v23 = vmul.f32 %v1590_v21, %v532_v20 }
 0x149   : >>> { %v536_v24 = vsel %vm535_vm8, %v532_v20, %v534_v23  ;;  %vm373_vm8 = vcmp.eq.s32.totalorder (%p454_p9), %v361_v6, %v358_v5  ;;  %v414_v6 = vmov (%p454_p9), %v1745_v6  ;;  %v377_v5 = vmov (%p454_p9), %v1743_v5 }
 0x14a   : >>> { %v539_v25 = vsel %vm537_vm9, %v538_v22, %v536_v24  ;;  %v380_v6 = vmov (%p454_p9), %v1745_v6  ;;  %v394_v5 = vmov (%p454_p9), %v1743_v5  ;;  %vm426_vm9 = vcmp.eq.s32.totalorder (%p454_p9), %v414_v6, %v411_v5 }
 0x14b   : >>> { %v540_v26 = vxor.u32 2147483648, %v539_v25  ;;  %v397_v6 = vmov (%p454_p9), %v1745_v6 }
 0x14d   : >>> { %v541_v27 = vsel %vm530_vm10, %v539_v25, %v540_v26 }
 0x14e   : >>> { %v542_v28 = vadd.f32 %v541_v27, %v529_v18 }
 0x150   : >>> { %1591 = vrcp.f32 %v542_v28 }
 0x15d   : >>> { %v1592_v34 = vpop.eup %1591 }
 0x15e   : >>> { %v550_v35 = vsel %vm549_vm11, 0.0, %v1592_v34 }
 0x15f   : >>> { %v551_v36 = vmul.f32 %v550_v35, %v550_v35  ;;  %v555_v37 = vmul.f32 %v550_v35, %v523_v12 }
 0x161   : >>> { %v552_v38 = vadd.f32 1.0, %v551_v36  ;;  %v556_v39 = vsub.f32 %v521_v14, %v555_v37  ;;  %v558_v40 = vadd.f32 %v555_v37, %v525_v15 }
 0x163   : >>> { %1593 = vrsqrt.f32 %v552_v38  ;;  %560 = vst [vmem:[%s559_s27] sm:$0xff] %v556_v39  ;;  %562 = vst [vmem:[%s561_s28] sm:$0xff] %v558_v40  ;;  %s1805_s27 = smov [#allocation12]  ;;  %s595_s28 = smov [#allocation24] }
 0x164   : >>> { %v605_v49 = vld [vmem:[%s1805_s27] sm:$0x1f] }
 0x170   : >>> { %v1594_v41 = vpop.eup %1593 }
 0x171   : >>> { %564 = vst [vmem:[%s563_s21] sm:$0xff] %v1594_v41  ;;  %v554_v42 = vmul.f32 %v1594_v41, %v550_v35  ;;  %s1807_s21 = smov [#allocation13] }
 0x172   : >>> { %v606_v50 = vld [vmem:[%s1807_s21] sm:$0x1f] }
 0x173   : >>> { %566 = vst [vmem:[%s565_s22] sm:$0xff] %v554_v42  ;;  %s1809_s22 = smov [#allocation14] }
 0x174   : >>> { %v607_v51 = vld [vmem:[%s1809_s22] sm:$0x1f] }
 0x178   : >>> { %v568_v43 = vld [vmem:[%s567_s29] ss:$0 sm:$0xff]  ;;  %s1811_s29 = smov [#allocation15] }
 0x179   : >>> { %v577_v44 = vsel %vm576_vm12, %v568_v43, 0.0  ;;  %v608_v52 = vld [vmem:[%s1811_s29] sm:$0x1f] }
 0x17a   : >>> { %578 = vadd.xlane.f32.xlu0 %v577_v44  ;;  %v583_v45 = vld [vmem:[%s582_s11] ss:$0 sm:$0xff]  ;;  %s821_s11 = smov [#allocation23] }
 0x17b   : >>> { %v592_v46 = vsel %vm591_vm13, %v583_v45, 0.0 }
 0x17e   : >>> { %593 = vadd.xlane.f32.xlu0 %v592_v46 }
 0x203   : >>> { %v579_v47 = vpop.xlane.xlu0 %578 }
 0x204   : >>> { %581 = vst [vmem:[%s580_s15] sm:$0xff] %v579_v47  ;;  %s599_s15 = smov [#allocation24] }
 0x207   : >>> { %v594_v48 = vpop.xlane.xlu0 %593 }
 0x208   : >>> { %596 = vst [vmem:[%s595_s28] sm:$0xff] %v594_v48  ;;  %s1841_s28 = smov [#allocation14] }
 0x20b   : >>> { %v598_v56 = vld [vmem:[%s597_s24] sm:$0xff]  ;;  %s627_s24 = smov [#allocation22] }
 0x20c   : >>> { %v822_v58 = vld [vmem:[%s821_s11] sm:$0xff]  ;;  %v609_v59 = vmul.f32 %v605_v49, %v598_v56  ;;  %v612_v60 = vmul.f32 %v606_v50, %v598_v56  ;;  %v616_v61 = vmul.f32 %v607_v51, %v598_v56  ;;  %v619_v62 = vmul.f32 %v608_v52, %v598_v56  ;;  %s1843_s11 = smov [#allocation15] }
 0x20d   : >>> { %v833_v63 = vmul.f32 %v829_v53, %v822_v58  ;;  %v836_v0 = vmul.f32 %v830_v54, %v822_v58  ;;  %v840_v1 = vmul.f32 %v831_v55, %v822_v58  ;;  %v843_v2 = vmul.f32 %v832_v57, %v822_v58  ;;  %v628_v24 = vld [vmem:[%s627_s24] ss:$0 sm:$0xff]  ;;  %s653_s24 = smov [#allocation12] }
 0x20f   : >>> { %v600_v3 = vld [vmem:[%s599_s15] sm:$0xff]  ;;  %s1845_s15 = smov [#allocation12] }
 0x210   : >>> { %v824_v4 = vld [vmem:[%s823_s26] sm:$0xff]  ;;  %v610_v7 = vmul.f32 %v607_v51, %v600_v3  ;;  %v613_v8 = vmul.f32 %v608_v52, %v600_v3  ;;  %v615_v9 = vmul.f32 %v605_v49, %v600_v3  ;;  %v618_v10 = vmul.f32 %v606_v50, %v600_v3  ;;  %s625_s26 = smov [#allocation21] }
 0x211   : >>> { %v834_v11 = vmul.f32 %v831_v55, %v824_v4  ;;  %v837_v12 = vmul.f32 %v832_v57, %v824_v4  ;;  %v839_v13 = vmul.f32 %v829_v53, %v824_v4  ;;  %v842_v14 = vmul.f32 %v830_v54, %v824_v4  ;;  %v626_v23 = vld [vmem:[%s625_s26] ss:$0 sm:$0xff]  ;;  %s654_s26 = smov [#allocation19] }
 0x212   : >>> { %v611_v15 = vsub.f32 %v609_v59, %v610_v7  ;;  %v614_v16 = vsub.f32 %v612_v60, %v613_v8  ;;  %v617_v17 = vadd.f32 %v616_v61, %v615_v9  ;;  %v620_v18 = vadd.f32 %v619_v62, %v618_v10  ;;  %v661_v59 = vld [vmem:[%s654_s26] ss:$0 sm:$0xff]  ;;  %s773_s26 = smov [#allocation12] }
 0x213   : >>> { %v835_v19 = vsub.f32 %v833_v63, %v834_v11  ;;  %v838_v20 = vsub.f32 %v836_v0, %v837_v12  ;;  %v841_v21 = vadd.f32 %v840_v1, %v839_v13  ;;  %v844_v22 = vadd.f32 %v843_v2, %v842_v14 }
 0x214   : >>> { %622 = vst [vmem:[%s1807_s21] sm:$0x1f] %v614_v16  ;;  %624 = vst [vmem:[%s1811_s29] sm:$0x1f] %v620_v18  ;;  %s695_s21 = smov [#allocation20]  ;;  %s694_s29 = smov [#allocation15] }
 0x215   : >>> { %621 = vst [vmem:[%s1805_s27] sm:$0x1f] %v611_v15  ;;  %623 = vst [vmem:[%s1809_s22] sm:$0x1f] %v617_v17  ;;  %s1858_s27 = smov [#allocation13]  ;;  %s681_s22 = smov [#allocation14]  ;;  %v702_v55 = vld [vmem:[%s695_s21] ss:$0 sm:$0xff] }
 0x216   : >>> { %845 = vst [vmem:[%s1814_s14] sm:$0x1f] %v835_v19  ;;  %846 = vst [vmem:[%s1817_s30] sm:$0x1f] %v838_v20  ;;  %s1848_s14 = smov %s1747_s14  ;;  %s1856_s30 = smov %s1750_s30 }
 0x217   : >>> { %847 = vst [vmem:[%s1820_s17] sm:$0x1f] %v841_v21  ;;  %848 = vst [vmem:[%s1825_s20] sm:$0x1f] %v844_v22  ;;  %s1851_s17 = smov %s1753_s17  ;;  %s1861_s20 = smov %s1756_s20 }
 0x218   : >>> { %s710_s21 = smov [#allocation13] }
 0x21b   : >>> { %v636_v26 = vld [vmem:[%s1843_s11] sm:$0x1f] }
 0x21c   : >>> { %v635_v25 = vld [vmem:[%s1841_s28] sm:$0x1f]  ;;  %v644_v32 = vmul.f32 %v636_v26, %v628_v24  ;;  %v647_v38 = vmul.f32 %v636_v26, %v626_v23 }
 0x21d   : >>> { %v633_v27 = vld [vmem:[%s1845_s15] sm:$0x1f]  ;;  %v643_v31 = vmul.f32 %v635_v25, %v626_v23  ;;  %v646_v33 = vmul.f32 %v635_v25, %v628_v24 }
 0x21e   : >>> { %v851_v28 = vld [vmem:[%s1848_s14] ss:$0 sm:$0xff]  ;;  %v1515_v30 = vld [vmem:[%s1848_s14 + $0x4] ss:$0 sm:$0xff]  ;;  %v637_v44 = vmul.f32 %v633_v27, %v626_v23  ;;  %v640_v45 = vmul.f32 %v633_v27, %v628_v24 }
 0x21f   : >>> { %v1514_v29 = vld [vmem:[%s1848_s14 - $0x1] sm:$0x1e]  ;;  %v1519_v41 = vld [vmem:[%s1856_s30 + $0x4] ss:$0 sm:$0xff]  ;;  %v645_v43 = vsub.f32 %v643_v31, %v644_v32  ;;  %v648_v49 = vadd.f32 %v647_v38, %v646_v33 }
 0x220   : >>> { %v858_v34 = vsel %vm781_vm14, %v851_v28, %v1514_v29  ;;  %v862_v35 = vld [vmem:[%s1851_s17] ss:$0 sm:$0xff]  ;;  %v1517_v36 = vld [vmem:[%s1851_s17 + $0x1] sm:$0xf] }
 0x221   : >>> { %v875_v37 = vld [vmem:[%s1856_s30] ss:$0 sm:$0xff]  ;;  %861 = vst [vmem:[%s1848_s14] sm:$0x1f] %v858_v34  ;;  %v870_v39 = vsel %vm793_vm15, %v1515_v30, %v1517_v36  ;;  %v1521_v47 = vld [vmem:[%s1861_s20 + $0x1] sm:$0xf]  ;;  %651 = vst [vmem:[%s1841_s28] sm:$0x1f] %v645_v43 }
 0x222   : >>> { %v1518_v40 = vld [vmem:[%s1856_s30 - $0x1] sm:$0x1e]  ;;  %1516 = vst [vmem:[%s1848_s14 + $0x1] sm:$0x1] %v862_v35  ;;  %872 = vst [vmem:[%s1851_s17] sm:$0x1f] %v870_v39  ;;  %v894_v50 = vsel %vm793_vm15, %v1519_v41, %v1521_v47  ;;  %s668_s28 = smov [#allocation13] }
 0x223   : >>> { %v886_v42 = vld [vmem:[%s1861_s20] ss:$0 sm:$0xff]  ;;  %v882_v46 = vsel %vm781_vm14, %v875_v37, %v1518_v40  ;;  %652 = vst [vmem:[%s1843_s11] sm:$0x1f] %v648_v49  ;;  %s1903_s11 = smov [#allocation14] }
 0x224   : >>> { %v634_v48 = vld [vmem:[%s1858_s27] sm:$0x1f]  ;;  %885 = vst [vmem:[%s1856_s30] sm:$0x1f] %v882_v46  ;;  %896 = vst [vmem:[%s1861_s20] sm:$0x1f] %v894_v50 }
 0x225   : >>> { %v638_v51 = vmul.f32 %v634_v48, %v628_v24  ;;  %v641_v52 = vmul.f32 %v634_v48, %v626_v23  ;;  %1520 = vst [vmem:[%s1856_s30 + $0x1] sm:$0x1] %v886_v42 }
 0x227   : >>> { %v639_v53 = vsub.f32 %v637_v44, %v638_v51  ;;  %v642_v54 = vadd.f32 %v641_v52, %v640_v45 }
 0x228   : >>> { %v688_v56 = vld [vmem:[%s681_s22] sm:$0x1f] }
 0x229   : >>> { %649 = vst [vmem:[%s1845_s15] sm:$0x1f] %v639_v53  ;;  %650 = vst [vmem:[%s1858_s27] sm:$0x1f] %v642_v54  ;;  %v692_v57 = vsel %vm691_vm0, 0.0, %v688_v56  ;;  %s1636_s15 = smov 1   ;;  %s709_s27 = smov [#allocation12] }
 0x22a   : >>> { %v703_v58 = vld [vmem:[%s694_s29] sm:$0x1f]  ;;  %693 = vst [vmem:[%s681_s22] sm:$0x1f] %v692_v57  ;;  %s1637_s22 = smov 127  }
 0x22b   : >>> { %v707_v60 = vsel %vm706_vm1, %v702_v55, %v703_v58 }
 0x22c   : >>> { %708 = vst [vmem:[%s694_s29] sm:$0x1f] %v707_v60  ;;  %s1906_s29 = smov [#allocation15] }
 0x230   : >>> { %v662_v61 = vld [vmem:[%s653_s24] sm:$0x1f] }
 0x231   : >>> { %v675_v62 = vld [vmem:[%s668_s28] sm:$0x1f]  ;;  %v666_v63 = vsel %vm665_vm3, %v661_v59, %v662_v61 }
 0x232   : >>> { %v679_v0 = vsel %vm678_vm4, 0.0, %v675_v62  ;;  %667 = vst [vmem:[%s653_s24] sm:$0x1f] %v666_v63  ;;  %v747_v1 = vld [vmem:[%s1903_s11] sm:$0x1f]  ;;  %s797_s24 = smov [#allocation13] }
 0x233   : >>> { %680 = vst [vmem:[%s668_s28] sm:$0x1f] %v679_v0  ;;  %748 = vrot.lane.b32.xlu0 %v747_v1, %s1636_s15  ;;  %v743_v7 = vld [vmem:[%s1906_s29] sm:$0x1f]  ;;  %s774_s28 = smov [#allocation14] }
 0x234   : >>> { %v764_v8 = vld [vmem:[%s1906_s29] sm:$0x1f] }
 0x235   : >>> { %v746_v26 = vld [vmem:[%s1903_s11] sm:$0x1f] }
 0x239   : >>> { %v715_v2 = vld [vmem:[%s709_s27] sm:$0x1f] }
 0x23a   : >>> { %716 = vrot.lane.b32.xlu1 %v715_v2, %s1636_s15  ;;  %v711_v3 = vld [vmem:[%s710_s21] sm:$0x1f] }
 0x23b   : >>> { %v732_v4 = vld [vmem:[%s710_s21] sm:$0x1f] }
 0x23c   : >>> { %v714_v14 = vld [vmem:[%s709_s27] sm:$0x1f] }
 0x23e   : >>> { %712 = vrot.lane.b32.xlu1 %v711_v3, %s1636_s15 }
 0x242   : >>> { %733 = vrot.lane.b32.xlu1 %v732_v4, %s1637_s22 }
 0x246   : >>> { %744 = vrot.lane.b32.xlu1 %v743_v7, %s1636_s15  ;;  %s798_s15 = smov [#allocation15] }
 0x24a   : >>> { %765 = vrot.lane.b32.xlu1 %v764_v8, %s1637_s22  ;;  %s398_s22 = smov (%p454_p9), [#allocation14] }
 0x2a5   : >>> { %v749_v16 = vpop.permute.xlu0 %748 }
 0x2a6   : >>> { %v753_v18 = vsel %vm720_vm5, %v747_v1, %v749_v16 }
 0x2ac   : >>> { %v717_v9 = vpop.permute.xlu1 %716 }
 0x2ad   : >>> { %v721_v10 = vsel %vm720_vm5, %v715_v2, %v717_v9 }
 0x2b0   : >>> { %v713_v11 = vpop.permute.xlu1 %712 }
 0x2b1   : >>> { %v725_v12 = vsel %vm724_vm6, %v713_v11, %v721_v10 }
 0x2b2   : >>> { %v731_v13 = vsel %vm1375_vm2, %v725_v12, 0.0 }
 0x2b3   : >>> { %739 = vst [vmem:[%s709_s27] sm:$0x1f] %v731_v13  ;;  %s362_s27 = smov (%p454_p9), [#allocation12] }
 0x2b4   : >>> { %v734_v15 = vpop.permute.xlu1 %733 }
 0x2b5   : >>> { %v738_v17 = vsel %vm737_vm7, %v714_v14, %v734_v15 }
 0x2b6   : >>> { %740 = vst [vmem:[%s710_s21] sm:$0x1f] %v738_v17  ;;  %s381_s21 = smov (%p454_p9), [#allocation13] }
 0x2b8   : >>> { %v745_v19 = vpop.permute.xlu1 %744 }
 0x2b9   : >>> { %v757_v20 = vsel %vm724_vm6, %v745_v19, %v753_v18 }
 0x2ba   : >>> { %v775_v21 = vld [vmem:[%s773_s26] ss:$0 sm:$0xff]  ;;  %v1507_v23 = vld [vmem:[%s773_s26 + $0x4] ss:$0 sm:$0xff]  ;;  %v763_v25 = vsel %vm1375_vm2, %v757_v20, 0.0 }
 0x2bb   : >>> { %v1506_v22 = vld [vmem:[%s773_s26 - $0x1] sm:$0x1e]  ;;  %771 = vst [vmem:[%s1903_s11] sm:$0x1f] %v763_v25  ;;  %s897_s11 = sadd.s32 (%p454_p9), 1, %s1629_s16  }
 0x2bc   : >>> { %v782_v24 = vsel %vm781_vm14, %v775_v21, %v1506_v22  ;;  %v766_v27 = vpop.permute.xlu1 %765  ;;  %p450_p10 = scmp.ge.s32.totalorder (%p454_p9), %s897_s11, 15  ;;  %s2027_s16 = smov (%p454_p9), %s897_s11 }
 0x2bd   : >>> { %785 = vst [vmem:[%s773_s26] sm:$0x1f] %v782_v24  ;;  %v799_v28 = vld [vmem:[%s797_s24] ss:$0 sm:$0xff]  ;;  %v1511_v30 = vld [vmem:[%s797_s24 + $0x4] ss:$0 sm:$0xff]  ;;  %v770_v31 = vsel %vm737_vm7, %v746_v26, %v766_v27 }
 0x2be   : >>> { %v1510_v29 = vld [vmem:[%s797_s24 - $0x1] sm:$0x1e]  ;;  %772 = vst [vmem:[%s1906_s29] sm:$0x1f] %v770_v31  ;;  %s415_s29 = smov (%p454_p9), [#allocation15] }
 0x2bf   : >>> { %v806_v32 = vsel %vm781_vm14, %v799_v28, %v1510_v29 }
 0x2c0   : >>> { %809 = vst [vmem:[%s797_s24] sm:$0x1f] %v806_v32 }
 0x2c2   : >>> { %v786_v33 = vld [vmem:[%s774_s28] ss:$0 sm:$0xff]  ;;  %v1509_v34 = vld [vmem:[%s774_s28 + $0x1] sm:$0xf] }
 0x2c3   : >>> { %1508 = vst [vmem:[%s773_s26 + $0x1] sm:$0x1] %v786_v33  ;;  %v794_v35 = vsel %vm793_vm15, %v1507_v23, %v1509_v34 }
 0x2c4   : >>> { %796 = vst [vmem:[%s774_s28] sm:$0x1f] %v794_v35 }
 0x2c5   : >>> { %v810_v36 = vld [vmem:[%s798_s15] ss:$0 sm:$0xff]  ;;  %v1513_v37 = vld [vmem:[%s798_s15 + $0x1] sm:$0xf] }
 0x2c6   : >>> { %1512 = vst [vmem:[%s797_s24 + $0x1] sm:$0x1] %v810_v36  ;;  %v818_v38 = vsel %vm793_vm15, %v1511_v30, %v1513_v37 }
 0x2c7   : >>> { %820 = vst [vmem:[%s798_s15] sm:$0x1f] %v818_v38  ;;  %456 = sbr.rel (!%p454_p9) target bundleno = 267 (0x10b), region = 494 }
 0x2ca   : >> { %v368_v39 = vld [vmem:[%s362_s27] sm:$0x1f] (%p454_p9) }
 0x2cb   : >> { %v369_v41 = vsel (%p454_p9), %vm1375_vm2, %v368_v39, 0.0  ;;  %v404_v43 = vld [vmem:[%s398_s22] sm:$0x1f] (%p454_p9) }
 0x2cc   : >> { %v370_v45 = vmul.f32 %v369_v41, %v369_v41  ;;  %v405_v47 = vsel %vm1375_vm2, %v404_v43, 0.0 }
 0x2cd   : >> { %v387_v40 = vld [vmem:[%s381_s21] sm:$0x1f]  ;;  %v406_v49 = vmul.f32 %v405_v47, %v405_v47 }
 0x2ce   : >> { %v388_v42 = vsel %vm1375_vm2, %v387_v40, 0.0  ;;  %v421_v44 = vld [vmem:[%s415_s29] sm:$0x1f]  ;;  %v374_v52 = vsel %vm373_vm8, 0.0, %v370_v45 }
 0x2cf   : >> { %v389_v46 = vmul.f32 %v388_v42, %v388_v42  ;;  %v422_v48 = vsel %vm1375_vm2, %v421_v44, 0.0 }
 0x2d0   : >> { %v423_v51 = vmul.f32 %v422_v48, %v422_v48 }
 0x2d1   : >> { %v391_v50 = vadd.f32 %v389_v46, %v370_v45  ;;  %v390_v53 = vadd.f32 %v389_v46, %v374_v52 }
 0x2d2   : >> { %v427_v56 = vsel %vm426_vm9, 0.0, %v423_v51 }
 0x2d3   : >> { %v408_v54 = vadd.f32 %v406_v49, %v391_v50  ;;  %v407_v55 = vadd.f32 %v406_v49, %v390_v53 }
 0x2d5   : >> { %v429_v57 = vadd.f32 %v423_v51, %v408_v54  ;;  %v428_v58 = vadd.f32 %v427_v56, %v407_v55 }
 0x2d7   : >> { %430 = vadd.xlane.f32.xlu0 %v429_v57 }
 0x2db   : >> { %438 = vadd.xlane.f32.xlu0 %v428_v58 }
 0x360   : >> { %v431_v59 = vpop.xlane.xlu0 %430 }
 0x361   : >> { %v432_v60 = vrot.slane %v431_v59, 4 }
 0x363   : >> { %v433_v61 = vadd.f32 %v432_v60, %v431_v59 }
 0x364   : >> { %v439_v62 = vpop.xlane.xlu0 %438 }
 0x365   : >> { %v434_v63 = vrot.slane %v433_v61, 2  ;;  %v440_v0 = vrot.slane %v439_v62, 4 }
 0x367   : >> { %v441_v1 = vadd.f32 %v440_v0, %v439_v62  ;;  %v435_v2 = vadd.f32 %v434_v63, %v433_v61 }
 0x369   : >> { %v442_v3 = vrot.slane %v441_v1, 2  ;;  %v436_v7 = vrot.slane %v435_v2, 1 }
 0x36b   : >> { %v443_v4 = vadd.f32 %v442_v3, %v441_v1  ;;  %v437_v10 = vadd.f32 %v436_v7, %v435_v2 }
 0x36d   : >> { %v444_v8 = vrot.slane %v443_v4, 1 }
 0x36f   : >> { %v445_v9 = vadd.f32 %v444_v8, %v443_v4 }
 0x371   : >> { %1540 = vpush %v445_v9 }
 0x372   : >> { %1542 = vpush %v437_v10 }
 0x3a2   : >> { %s1541_s23 = spop %1540 }
 0x3a3   : >> { %s1543_s26 = spop %1542 }
 0x3a4   : >> { %s448_s24 = smul.f32 1e-10, %s1543_s26 }
 0x3a6   : >> { %p449_p11 = scmp.le.f32.partialorder %s1541_s23, %s448_s24 }
 0x3a8   : >> { %p451_p12 = por %p450_p10, %p449_p11 }
 0x3aa   : > { %899 = sbr.rel (!%p451_p12) target bundleno = 266 (0x10a), region = 505 }
 0x3af PF: > { %s904_s28 = smov [#allocation12]  ;;  %v908_v5 = vmov %v1743_v5  ;;  %v911_v6 = vmov %v1745_v6  ;;  %s924_s15 = smov [#allocation15] }
 0x3b0   : > { %v928_v5 = vmov %v1743_v5  ;;  %v931_v6 = vmov %v1745_v6  ;;  %v912_v11 = vld [vmem:[%s904_s28] sm:$0x1f]  ;;  %vm915_vm10 = vcmp.eq.s32.totalorder %v911_v6, %v908_v5  ;;  %s900_s16 = sand.u32 7, %s1704_s12   ;;  %s2028_s21 = scalar_lea.vmem [#allocation7], %s1741_s18 }
 0x3b1   : > { %vm935_vm11 = vcmp.eq.s32.totalorder %v931_v6, %v928_v5  ;;  %v916_v12 = vsel %vm915_vm10, %v912_v11, 0.0  ;;  %v932_v14 = vld [vmem:[%s924_s15] sm:$0x1f]  ;;  %s901_s11 = scalar_lea.vmem [#allocation4], %s900_s16  ;;  %s903_s27 = scalar_lea.vmem [#allocation6], %s900_s16 }
 0x3b2   : > { %v917_v13 = vrot.slane %v916_v12, 4  ;;  %v936_v15 = vsel %vm935_vm11, %v932_v14, 0.0  ;;  %s905_s11 = smov %s901_s11  ;;  %s925_s27 = smov %s903_s27 }
 0x3b3   : > { %v937_v17 = vrot.slane %v936_v15, 4  ;;  %s987_s22 = sshrl.u32 (%p1718_p3), %s1704_s12, 3 }
 0x3b4   : > { %v918_v16 = vadd.f32 %v917_v13, %v916_v12  ;;  %s1528_s29 = sshll.u32 (%p1718_p3), %s987_s22, 1 }
 0x3b5   : > { %v938_v19 = vadd.f32 %v937_v17, %v936_v15  ;;  %s989_s24 = scalar_lea.vmem (%p1718_p3), %s2019_s4, %s1528_s29 }
 0x3b6   : > { %v919_v18 = vrot.slane %v918_v16, 2 }
 0x3b7   : > { %v939_v21 = vrot.slane %v938_v19, 2 }
 0x3b8   : > { %v920_v20 = vadd.f32 %v919_v18, %v918_v16 }
 0x3b9   : > { %v940_v23 = vadd.f32 %v939_v21, %v938_v19 }
 0x3ba   : > { %v921_v22 = vrot.slane %v920_v20, 1 }
 0x3bb   : > { %v941_v5 = vrot.slane %v940_v23, 1 }
 0x3bc   : > { %v922_v24 = vadd.f32 %v921_v22, %v920_v20 }
 0x3bd   : > { %v942_v6 = vadd.f32 %v941_v5, %v940_v23 }
 0x3be   : > { %923 = vst [vmem:[%s905_s11] sm:$0x1] %v922_v24 }
 0x3bf   : > { %943 = vst [vmem:[%s925_s27] sm:$0x1] %v942_v6 }
 0x3c3   : > { %986 = sbr.rel (!%p1718_p3) target bundleno = 975 (0x3cf), region = 174 }
 0x3c5   : > { %v948_v25 = vld [vmem:[#allocation4] sm:$0x3] }
 0x3c6   : > { %951 = vst [vmem:[%s287_s25] sm:$0x3] %v948_v25  ;;  %v956_v26 = vld [vmem:[#allocation6] sm:$0x3] }
 0x3c7   : > { %959 = vst [vmem:[%s2028_s21] sm:$0x3] %v956_v26 }
 0x3cd   : > { %v1006_v27 = vld [vmem:[%s287_s25] sm:$0x3] }
 0x3ce   : > { %1007 = vst [vmem:[%s989_s24] sm:$0x3] %v1006_v27 }
 0x3cf PF: > { %1025 = sbr.rel (!%p1718_p3) target bundleno = 983 (0x3d7), region = 208  ;;  %s1026_s28 = sshrl.u32 (%p1718_p3), %s1704_s12, 3 }
 0x3d0   : > { %s2029_s15 = scalar_lea.vmem (%p1718_p3), [#allocation7], %s1741_s18  ;;  %s1529_s16 = sshll.u32 (%p1718_p3), %s1026_s28, 1 }
 0x3d1   : > { %s1028_s25 = scalar_lea.vmem (%p1718_p3), %s2020_s5, %s1529_s16 }
 0x3d5   : > { %v1045_v28 = vld [vmem:[%s2029_s15] sm:$0x3] }
 0x3d6   : > { %1046 = vst [vmem:[%s1028_s25] sm:$0x3] %v1045_v28 }
 0x3d7 PF: > { %s1530_s21 = sshll.u32 %s1704_s12, 3  ;;  %v1092_v29 = vld [vmem:[%s1747_s14] sm:$0xff]  ;;  %v1127_v30 = vld [vmem:[%s1750_s30] sm:$0xff] }
 0x3d8   : > { %v1162_v31 = vld [vmem:[%s1753_s17] sm:$0xff]  ;;  %s1063_s18 = scalar_lea.vmem %s2021_s6, %s1530_s21  ;;  %s1098_s26 = scalar_lea.vmem %s2022_s7, %s1530_s21  ;;  %v1197_v32 = vld [vmem:[%s1756_s20] sm:$0xff] }
 0x3d9   : > { %1093 = vst [vmem:[%s1063_s18] sm:$0xff] %v1092_v29  ;;  %1128 = vst [vmem:[%s1098_s26] sm:$0xff] %v1127_v30  ;;  %s1133_s15 = scalar_lea.vmem %s2023_s8, %s1530_s21  ;;  %s1168_s14 = scalar_lea.vmem %s2024_s9, %s1530_s21 }
 0x3da   : > { %1163 = vst [vmem:[%s1133_s15] sm:$0xff] %v1162_v31  ;;  %1198 = vst [vmem:[%s1168_s14] sm:$0xff] %v1197_v32 }
 0x3db PF: > { %s2030_s17 = sld [smem:[#allocation25_spill]]  ;;  %p13_p13 = scmp.ge.s32.totalorder %s1707_s13, 4  }
 0x3dc   : > { %s2031_s30 = smov %s1621_s10  ;;  %s2033_s11 = smov %s1707_s13 }
 0x3dd   :  { %15 = sbr.rel (!%p13_p13) target bundleno = 2 (0x2), region = 516 }
 0x3e1   : > { %s2032_s10 = smov %s2030_s17 }

// kernel: custom-call.91
= control target key start
LH: loop header
LB: loop body
LE: loop exit
PB: predicated region body
PF: predicated region fallthrough
CT: control target
= control target key end

     0   :  { %s2176_s0 = inlined_call_operand.vmem [shape: f32[2,8,5,5], index: 0, kind: input, shape index: {}]   ;;  %s2177_s1 = inlined_call_operand.vmem [shape: f32[2,8,5,5], index: 1, kind: input, shape index: {}]   ;;  %s2178_s2 = inlined_call_operand.vmem [shape: f32[2,8,5,5], index: 2, kind: input, shape index: {}]   ;;  %s2179_s3 = inlined_call_operand.vmem [shape: f32[2,8,5,5], index: 3, kind: input, shape index: {}]   ;;  %s2180_s4 = inlined_call_operand.vmem [shape: f32[2,8,5], index: 4, kind: output, shape index: {0}]   ;;  %s2181_s5 = inlined_call_operand.vmem [shape: f32[2,8,5], index: 5, kind: output, shape index: {1}]   ;;  %s2182_s6 = inlined_call_operand.vmem [shape: f32[2,8,5,5], index: 6, kind: output, shape index: {2}]   ;;  %s2183_s7 = inlined_call_operand.vmem [shape: f32[2,8,5,5], index: 7, kind: output, shape index: {3}]   ;;  %s2184_s8 = inlined_call_operand.vmem [shape: f32[2,8,5,5], index: 8, kind: output, shape index: {4}]   ;;  %s2185_s9 = inlined_call_operand.vmem [shape: f32[2,8,5,5], index: 9, kind: output, shape index: {5}]  }
   0x1   :  { %2191 = sst [smem:[#allocation28_spill]] %s2185_s9 }
   0x2   :  { %s1808_s30 = smov 0   ;;  %s1810_s10 = smov 0  }
   0x3   :  { %s1812_s11 = smov 0   ;;  %s1814_s12 = smov 0  }
   0x4   :  { %s1816_s13 = smov 0   ;;  %s1818_s14 = smov 0  }
   0x5   :  { %s1820_s15 = smov 0  }
   0x6 LB: > { %2192 = sst [smem:[#allocation23_spill]] %s1725_s10  ;;  %s25_s16 = sadd.s32 1, %s1737_s13  ;;  %s1745_s15 = sphi %s1820_s15, %s16_s15   ;;  %s1741_s14 = sphi %s1818_s14, %s2207_s14   ;;  %s1737_s13 = sphi %s1816_s13, %s2209_s13   ;;  %s1733_s12 = sphi %s1814_s12, %s2205_s12   ;;  %s1729_s11 = sphi %s1812_s11, %s2208_s11   ;;  %s1725_s10 = sphi %s1810_s10, %s2204_s10   ;;  %s1721_s30 = sphi %s1808_s30, %s2203_s30  }
   0x7   : > { %2193 = sst [smem:[#allocation24_spill]] %s1741_s14  ;;  %p26_p0 = scmp.ge.s32.totalorder %s25_s16, 8 }
   0x8   : > { %s28_s17 = sadd.s32 1, %s1741_s14  ;;  %s2186_s18 = sadd.s32 4294967295, %s1745_s15  }
   0x9   : > { %s32_s19 = sshrl.u32 %s1737_s13, 3  ;;  %s2211_s16 = smov (%p26_p0, %s25_s16), 0 }
   0xa   : > { %2194 = sst [smem:[#allocation25_spill]] %s2211_s16  ;;  %s2213_s17 = smov (!%p26_p0, %s28_s17), %s1741_s14 }
   0xb   : > { %s33_s20 = sshrl.u32 %s2211_s16, 3  ;;  %p49_p1 = scmp.ne.s32.totalorder %s1725_s10, %s1721_s30 }
   0xc   : > { %p30_p2 = scmp.ge.s32.totalorder %s2213_s17, 2  ;;  %s35_s21 = ssub.s32 %s32_s19, %s33_s20 }
   0xd   : > { %p50_p3 = scmp.eq.s32.totalorder %s2186_s18, 15  ;;  %s39_s25 = sadd.s32 1, %s1725_s10 }
   0xe   : > { %s2215_s17 = smov (%p30_p2, %s2213_s17), 0  ;;  %p1534_p6 = scmp.ge.s32.totalorder %s1745_s15, 16 }
   0xf   : > { %2195 = sst [smem:[#allocation26_spill]] %s2215_s17  ;;  %p1857_p4 = por %p50_p3, %p49_p1 }
  0x10   : > { %s34_s23 = ssub.s32 %s1741_s14, %s2215_s17  ;;  %s104_s27 = sand.u32 (!%p1534_p6), 1, %s1745_s15  }
  0x11   : > { %s36_s24 = sor.u32 %s35_s21, %s34_s23  ;;  %s1536_s28 = sshll.u32 (!%p1534_p6), %s1741_s14, 3 }
  0x12   : > { %p37_p5 = scmp.eq.s32.totalorder %s36_s24, 0  ;;  %102 = sbr.rel (%p1534_p6) target bundleno = 28 (0x1c), region = 16 }
  0x13   : > { %s1535_s29 = sshll.u32 (!%p1534_p6), %s104_s27, 3  ;;  %s108_s19 = sadd.s32 (!%p1534_p6), %s1737_s13, %s1536_s28 }
  0x14   : > { %s1865_s26 = scalar_select %p37_p5, %s1725_s10, %s39_s25  }
  0x15   : > { %s1537_s20 = sshll.u32 (!%p1534_p6), %s108_s19, 3  ;;  %s106_s25 = scalar_lea.vmem (!%p1534_p6), [#allocation0], %s1535_s29 }
  0x16   : > { %2197 = sst [smem:[#allocation27_spill]] %s1865_s26  ;;  %s110_s17 = scalar_lea.vmem (!%p1534_p6), %s2176_s0, %s1537_s20 }
  0x17   : > { %v139_v0 = vld [vmem:[%s110_s17] sm:$0xff]  ;;  %s151_s24 = scalar_lea.vmem %s2177_s1, %s1537_s20  ;;  %s192_s9 = scalar_lea.vmem %s2178_s2, %s1537_s20 }
  0x18   : > { %140 = vst [vmem:[%s106_s25] sm:$0xff] %v139_v0  ;;  %v180_v1 = vld [vmem:[%s151_s24] sm:$0xff]  ;;  %s147_s14 = scalar_lea.vmem [#allocation1], %s1535_s29  ;;  %s233_s16 = scalar_lea.vmem %s2179_s3, %s1537_s20 }
  0x19   : > { %181 = vst [vmem:[%s147_s14] sm:$0xff] %v180_v1  ;;  %v221_v2 = vld [vmem:[%s192_s9] sm:$0xff]  ;;  %s188_s18 = scalar_lea.vmem [#allocation2], %s1535_s29  ;;  %s229_s17 = scalar_lea.vmem [#allocation3], %s1535_s29 }
  0x1a   : > { %222 = vst [vmem:[%s188_s18] sm:$0xff] %v221_v2  ;;  %v262_v3 = vld [vmem:[%s233_s16] sm:$0xff] }
  0x1b   : > { %263 = vst [vmem:[%s229_s17] sm:$0xff] %v262_v3 }
  0x1c PF: > { %p1547_p7 = scmp.ge.s32.totalorder %s1745_s15, 1  ;;  %p268_p8 = scmp.lt.s32.totalorder %s1745_s15, 17 }
  0x1e   : > { %p269_p9 = pnand %p1547_p7, %p268_p8 }
  0x20   : > { %272 = sbr.rel (%p269_p9) target bundleno = 992 (0x3e0), region = 156 }
  0x25   : > { %s2198_s10 = sadd.s32 4294967295, %s1745_s15   ;;  %s309_s14 = sand.u32 1, %s1721_s30   ;;  %v353_v4 = vlaneseq  ;;  %v1755_v11 = vmov 0.0  }
  0x26   : > { %s275_s9 = sand.u32 1, %s2198_s10   ;;  %s1888_s19 = sshll.u32 %s309_s14, 3 }
  0x27   : > { %s1548_s26 = sshll.u32 %s275_s9, 3  ;;  %v1890_v5 = vand.u32 127, %v353_v4  ;;  %v1892_v6 = vshrl.u32 %v353_v4, 7  ;;  %s336_s25 = smov [#allocation10] }
  0x28   : > { %s277_s29 = scalar_lea.vmem [#allocation0], %s1548_s26  ;;  %s281_s20 = scalar_lea.vmem [#allocation1], %s1548_s26 }
  0x29   : > { %v337_v7 = vld [vmem:[%s277_s29] sm:$0xff]  ;;  %v340_v8 = vld [vmem:[%s281_s20] sm:$0xff]  ;;  %s285_s21 = scalar_lea.vmem [#allocation2], %s1548_s26  ;;  %s289_s23 = scalar_lea.vmem [#allocation3], %s1548_s26  ;;  %v355_v5 = vmov %v1890_v5  ;;  %v358_v6 = vmov %v1892_v6  ;;  %vm1411_vm2 = vcmp.lt.s32.totalorder %v1890_v5, 5 }
  0x2a   : > { %v343_v9 = vld [vmem:[%s285_s21] sm:$0xff]  ;;  %v346_v10 = vld [vmem:[%s289_s23] sm:$0xff]  ;;  %s1894_s24 = scalar_lea.vmem [#allocation6], %s1548_s26  ;;  %s1897_s30 = scalar_lea.vmem [#allocation7], %s1548_s26  ;;  %338 = vst [vmem:[%s336_s25] sm:$0xff] %v337_v7  ;;  %v368_v5 = vmov %v1890_v5  ;;  %v371_v6 = vmov %v1892_v6  ;;  %vm362_vm0 = vcmp.eq.s32.totalorder %v358_v6, %v355_v5 }
  0x2b   : > { %348 = vst [vmem:[%s1894_s24] sm:$0xff] %v1755_v11  ;;  %349 = vst [vmem:[%s1897_s30] sm:$0xff] %v1755_v11  ;;  %s339_s27 = smov [#allocation11]  ;;  %s1900_s28 = scalar_lea.vmem [#allocation8], %s1548_s26  ;;  %vm375_vm1 = vcmp.eq.s32.totalorder %v371_v6, %v368_v5  ;;  %v1403_v5 = vmov %v1890_v5  ;;  %v1406_v6 = vmov %v1892_v6 }
  0x2c   : > { %350 = vst [vmem:[%s1900_s28] sm:$0xff] %v1755_v11  ;;  %s1903_s16 = scalar_lea.vmem [#allocation9], %s1548_s26  ;;  %341 = vst [vmem:[%s339_s27] sm:$0xff] %v340_v8  ;;  %s342_s18 = smov [#allocation12]  ;;  %vm1416_vm3 = vcmp.eq.s32.totalorder %v1406_v6, %v1403_v5  ;;  %v1454_v5 = vmov %v1890_v5  ;;  %v1423_v6 = vmov %v1892_v6 }
  0x2d   : > { %351 = vst [vmem:[%s1903_s16] sm:$0xff] %v1755_v11  ;;  %s345_s17 = smov [#allocation13]  ;;  %344 = vst [vmem:[%s342_s18] sm:$0xff] %v343_v9  ;;  %s352_s24 = smov %s1894_s24  ;;  %v1420_v5 = vmov %v1890_v5  ;;  %v1457_v6 = vmov %v1892_v6 }
  0x2e   : > { %347 = vst [vmem:[%s345_s17] sm:$0xff] %v346_v10  ;;  %s365_s16 = smov %s1903_s16  ;;  %s311_s10 = scalar_lea.vmem [#allocation4], %s1888_s19  ;;  %v1437_v5 = vmov %v1890_v5  ;;  %v1440_v6 = vmov %v1892_v6  ;;  %vm1467_vm4 = vcmp.eq.s32.totalorder %v1457_v6, %v1454_v5 }
  0x2f   : > { %s1407_s14 = smov [#allocation10]  ;;  %s1424_s26 = smov [#allocation11] }
  0x30   : > { %s1441_s29 = smov [#allocation12]  ;;  %s1458_s20 = smov [#allocation13] }
  0x31   : > { %v1413_v16 = vld [vmem:[%s1407_s14] sm:$0x1f] }
  0x32   : > { %v359_v12 = vld [vmem:[%s352_s24] sm:$0x1f]  ;;  %v1414_v18 = vsel %vm1411_vm2, %v1413_v16, 0.0 }
  0x33   : > { %v363_v13 = vsel %vm362_vm0, 1.0, %v359_v12  ;;  %v1430_v17 = vld [vmem:[%s1424_s26] sm:$0x1f]  ;;  %v1415_v22 = vmul.f32 %v1414_v18, %v1414_v18 }
  0x34   : > { %v372_v14 = vld [vmem:[%s365_s16] sm:$0x1f]  ;;  %364 = vst [vmem:[%s352_s24] sm:$0x1f] %v363_v13  ;;  %v1431_v19 = vsel %vm1411_vm2, %v1430_v17, 0.0 }
  0x35   : > { %v376_v15 = vsel %vm375_vm1, 1.0, %v372_v14  ;;  %v1447_v20 = vld [vmem:[%s1441_s29] sm:$0x1f]  ;;  %v1432_v23 = vmul.f32 %v1431_v19, %v1431_v19  ;;  %v1417_v29 = vsel %vm1416_vm3, 0.0, %v1415_v22 }
  0x36   : > { %377 = vst [vmem:[%s365_s16] sm:$0x1f] %v376_v15  ;;  %v1464_v21 = vld [vmem:[%s1458_s20] sm:$0x1f]  ;;  %v1448_v24 = vsel %vm1411_vm2, %v1447_v20, 0.0 }
  0x37   : > { %v1465_v25 = vsel %vm1411_vm2, %v1464_v21, 0.0  ;;  %v1449_v26 = vmul.f32 %v1448_v24, %v1448_v24  ;;  %v1434_v27 = vadd.f32 %v1432_v23, %v1415_v22  ;;  %v1433_v30 = vadd.f32 %v1432_v23, %v1417_v29 }
  0x38   : > { %v1466_v28 = vmul.f32 %v1465_v25, %v1465_v25 }
  0x39   : > { %v1451_v31 = vadd.f32 %v1449_v26, %v1434_v27  ;;  %v1450_v32 = vadd.f32 %v1449_v26, %v1433_v30 }
  0x3a   : > { %v1468_v33 = vsel %vm1467_vm4, 0.0, %v1466_v28 }
  0x3b   : > { %v1470_v34 = vadd.f32 %v1466_v28, %v1451_v31  ;;  %v1469_v35 = vadd.f32 %v1468_v33, %v1450_v32 }
  0x3d   : > { %1471 = vadd.xlane.f32.xlu0 %v1470_v34 }
  0x41   : > { %1479 = vadd.xlane.f32.xlu0 %v1469_v35 }
  0xc6   : > { %v1472_v36 = vpop.xlane.xlu0 %1471 }
  0xc7   : > { %v1473_v37 = vrot.slane %v1472_v36, 4 }
  0xc9   : > { %v1474_v38 = vadd.f32 %v1473_v37, %v1472_v36 }
  0xca   : > { %v1480_v39 = vpop.xlane.xlu0 %1479 }
  0xcb   : > { %v1475_v40 = vrot.slane %v1474_v38, 2  ;;  %v1481_v41 = vrot.slane %v1480_v39, 4 }
  0xcd   : > { %v1482_v42 = vadd.f32 %v1481_v41, %v1480_v39  ;;  %v1476_v43 = vadd.f32 %v1475_v40, %v1474_v38 }
  0xcf   : > { %v1483_v44 = vrot.slane %v1482_v42, 2  ;;  %v1477_v46 = vrot.slane %v1476_v43, 1 }
  0xd1   : > { %v1484_v45 = vadd.f32 %v1483_v44, %v1482_v42  ;;  %v1478_v49 = vadd.f32 %v1477_v46, %v1476_v43 }
  0xd3   : > { %v1485_v47 = vrot.slane %v1484_v45, 1 }
  0xd5   : > { %v1486_v48 = vadd.f32 %v1485_v47, %v1484_v45 }
  0xd7   : > { %1592 = vpush %v1486_v48 }
  0xd8   : > { %1594 = vpush %v1478_v49 }
 0x108   : > { %s1593_s21 = spop %1592 }
 0x109   : > { %s1595_s23 = spop %1594 }
 0x10a   : > { %s1489_s25 = smul.f32 1e-10, %s1595_s23 }
 0x10c   : > { %p1490_p10 = scmp.le.f32.partialorder %s1593_s21, %s1489_s25 }
 0x10d   : > { %s1932_s27 = smov (!%p1490_p10), 0  }
 0x10e   : > { %1493 = sbr.rel (%p1490_p10) target bundleno = 952 (0x3b8), region = 507 }
 0x113 LB: >> { %s1937_s18 = smov 0   ;;  %s1749_s27 = sphi %s1932_s27, %s2199_s27  }
 0x114 LB: >>> { %s482_s17 = smov [#allocation10]  ;;  %v486_v5 = vmov %v1890_v5  ;;  %v489_v6 = vmov %v1892_v6  ;;  %s502_s14 = smov [#allocation11]  ;;  %vm805_vm14 = vcmp.eq.s32.totalorder %v1892_v6, 0  ;;  %vm817_vm15 = vcmp.eq.s32.totalorder %v1892_v6, 4  ;;  %s1753_s18 = sphi %s1937_s18, %s481_s18  }
 0x115   : >>> { %v506_v5 = vmov %v1890_v5  ;;  %v509_v6 = vmov %v1892_v6  ;;  %v490_v50 = vld [vmem:[%s482_s17] sm:$0x1f]  ;;  %vm493_vm5 = vcmp.eq.s32.totalorder %v489_v6, %v486_v5  ;;  %s522_s26 = smov [#allocation13]  ;;  %s483_s29 = smov [#allocation14] }
 0x116   : >>> { %vm513_vm6 = vcmp.eq.s32.totalorder %v509_v6, %v506_v5  ;;  %v526_v5 = vmov %v1890_v5  ;;  %v529_v6 = vmov %v1892_v6  ;;  %v494_v51 = vsel %vm493_vm5, %v490_v50, 0.0  ;;  %v510_v52 = vld [vmem:[%s502_s14] sm:$0x1f]  ;;  %s503_s20 = smov [#allocation15]  ;;  %s523_s21 = smov [#allocation16] }
 0x117   : >>> { %vm533_vm7 = vcmp.eq.s32.totalorder %v529_v6, %v526_v5  ;;  %v495_v53 = vrot.slane %v494_v51, 4  ;;  %v514_v54 = vsel %vm513_vm6, %v510_v52, 0.0  ;;  %v530_v55 = vld [vmem:[%s522_s26] sm:$0x1f]  ;;  %s546_s23 = smov [#allocation15]  ;;  %s544_s25 = smov [#allocation14]  ;;  %v595_v5 = vmov %v1890_v5 }
 0x118   : >>> { %v515_v56 = vrot.slane %v514_v54, 4  ;;  %v534_v57 = vsel %vm533_vm7, %v530_v55, 0.0  ;;  %s548_s17 = smov [#allocation16]  ;;  %s583_s14 = smov [#allocation17]  ;;  %v598_v6 = vmov %v1892_v6  ;;  %v610_v5 = vmov %v1890_v5 }
 0x119   : >>> { %v496_v58 = vadd.f32 %v495_v53, %v494_v51  ;;  %v535_v59 = vrot.slane %v534_v57, 4  ;;  %s585_s26 = smov [#allocation18]  ;;  %v613_v6 = vmov %v1892_v6  ;;  %vm600_vm12 = vcmp.eq.s32.totalorder %v598_v6, %v595_v5  ;;  %s1961_s24 = smov %s1894_s24 }
 0x11a   : >>> { %v516_v60 = vadd.f32 %v515_v56, %v514_v54  ;;  %vm615_vm13 = vcmp.eq.s32.totalorder %v613_v6, %v610_v5  ;;  %s1964_s30 = smov %s1897_s30  ;;  %s1967_s28 = smov %s1900_s28  ;;  %v853_v53 = vld [vmem:[%s1961_s24] sm:$0x1f]  ;;  %v708_v5 = vmov %v1890_v5  ;;  %v711_v6 = vmov %v1892_v6 }
 0x11b   : >>> { %v497_v61 = vrot.slane %v496_v58, 2  ;;  %v536_v62 = vadd.f32 %v535_v59, %v534_v57  ;;  %s1972_s16 = smov %s1903_s16  ;;  %v854_v54 = vld [vmem:[%s1964_s30] sm:$0x1f]  ;;  %s847_s9 = smov [#allocation22]  ;;  %v722_v5 = vmov %v1890_v5  ;;  %v725_v6 = vmov %v1892_v6 }
 0x11c   : >>> { %v517_v63 = vrot.slane %v516_v60, 2  ;;  %v855_v55 = vld [vmem:[%s1967_s28] sm:$0x1f]  ;;  %vm715_vm0 = vcmp.eq.s32.totalorder %v711_v6, %v708_v5  ;;  %v681_v5 = vmov %v1890_v5  ;;  %v684_v6 = vmov %v1892_v6  ;;  %s481_s18 = sadd.s32 1, %s1753_s18  }
 0x11d   : >>> { %v498_v0 = vadd.f32 %v497_v61, %v496_v58  ;;  %v537_v1 = vrot.slane %v536_v62, 2  ;;  %v856_v57 = vld [vmem:[%s1972_s16] sm:$0x1f]  ;;  %v695_v5 = vmov %v1890_v5  ;;  %v698_v6 = vmov %v1892_v6  ;;  %p478_p11 = scmp.ge.s32.totalorder %s481_s18, 9  }
 0x11e   : >>> { %v518_v2 = vadd.f32 %v517_v63, %v516_v60  ;;  %vm730_vm1 = vcmp.eq.s32.totalorder %v725_v6, %v722_v5  ;;  %vm689_vm3 = vcmp.eq.s32.totalorder %v684_v6, %v681_v5  ;;  %vm702_vm4 = vcmp.eq.s32.totalorder %v698_v6, %v695_v5 }
 0x11f   : >>> { %v499_v3 = vrot.slane %v498_v0, 1  ;;  %v538_v4 = vadd.f32 %v537_v1, %v536_v62  ;;  %vm744_vm5 = vcmp.eq.s32.totalorder %v1890_v5, 0  ;;  %vm748_vm6 = vcmp.eq.s32.totalorder %v1890_v5, 1 }
 0x120   : >>> { %v519_v7 = vrot.slane %v518_v2, 1  ;;  %vm761_vm7 = vcmp.eq.s32.totalorder %v1890_v5, 4  ;;  %v382_v5 = vmov (%p478_p11), %v1890_v5  ;;  %v385_v6 = vmov (%p478_p11), %v1892_v6 }
 0x121   : >>> { %v500_v8 = vadd.f32 %v499_v3, %v498_v0  ;;  %v539_v9 = vrot.slane %v538_v4, 1  ;;  %v435_v5 = vmov (%p478_p11), %v1890_v5 }
 0x122   : >>> { %v520_v10 = vadd.f32 %v519_v7, %v518_v2 }
 0x123   : >>> { %501 = vst [vmem:[%s483_s29] sm:$0x1] %v500_v8  ;;  %v540_v11 = vadd.f32 %v539_v9, %v538_v4  ;;  %s542_s29 = smov [#allocation19] }
 0x124   : >>> { %521 = vst [vmem:[%s503_s20] sm:$0x1] %v520_v10  ;;  %s543_s20 = smov [#allocation20]  ;;  %s587_s29 = smov %s542_s29 }
 0x125   : >>> { %541 = vst [vmem:[%s523_s21] sm:$0x1] %v540_v11  ;;  %s589_s20 = smov %s543_s20  ;;  %s591_s21 = smov [#allocation19] }
 0x12a   : >>> { %v545_v14 = vld [vmem:[%s544_s25] sm:$0xff]  ;;  %s604_s25 = smov [#allocation21] }
 0x12b   : >>> { %v547_v12 = vld [vmem:[%s546_s23] sm:$0xff]  ;;  %v568_v29 = vand.u32 2147483647, %v545_v14  ;;  %s606_s23 = smov [#allocation20] }
 0x12c   : >>> { %v551_v13 = vmul.f32 2.0, %v547_v12  ;;  %v549_v15 = vld [vmem:[%s548_s17] sm:$0xff]  ;;  %v569_v32 = vand.u32 2147483647, %v547_v12  ;;  %s621_s17 = smov [#allocation21] }
 0x12d   : >>> { %v550_v16 = vsub.f32 %v549_v15, %v545_v14  ;;  %v570_v30 = vand.u32 2147483647, %v549_v15 }
 0x12e   : >>> { %1675 = vrcp.f32 %v551_v13 }
 0x12f   : >>> { %v571_v31 = vmin.f32 %v568_v29, %v570_v30 }
 0x131   : >>> { %v572_v33 = vmul.f32 1.1920929e-08, %v571_v31 }
 0x133   : >>> { %vm573_vm11 = vcmp.le.f32.partialorder %v569_v32, %v572_v33 }
 0x13b   : >>> { %v1676_v17 = vpop.eup %1675 }
 0x13c   : >>> { %v553_v18 = vmul.f32 %v1676_v17, %v550_v16 }
 0x13e   : >>> { %v555_v19 = vmul.f32 %v553_v18, %v553_v18  ;;  %vm554_vm10 = vcmp.ge.f32.partialorder %v553_v18, 0.0 }
 0x140   : >>> { %v556_v20 = vadd.f32 1.0, %v555_v19 }
 0x142   : >>> { %1677 = vrsqrt.f32 %v556_v20  ;;  %vm559_vm8 = vcmp.eq.f32.partialorder %v556_v20, inf  ;;  %v562_v22 = vand.u32 2147483648, %v556_v20  ;;  %vm561_vm9 = vcmp.eq.f32.partialorder %v556_v20, 0.0 }
 0x14f   : >>> { %v1678_v21 = vpop.eup %1677 }
 0x150   : >>> { %v558_v23 = vmul.f32 %v1678_v21, %v556_v20 }
 0x152   : >>> { %v560_v24 = vsel %vm559_vm8, %v556_v20, %v558_v23  ;;  %vm397_vm8 = vcmp.eq.s32.totalorder (%p478_p11), %v385_v6, %v382_v5  ;;  %v438_v6 = vmov (%p478_p11), %v1892_v6  ;;  %v401_v5 = vmov (%p478_p11), %v1890_v5 }
 0x153   : >>> { %v563_v25 = vsel %vm561_vm9, %v562_v22, %v560_v24  ;;  %v404_v6 = vmov (%p478_p11), %v1892_v6  ;;  %v418_v5 = vmov (%p478_p11), %v1890_v5  ;;  %vm450_vm9 = vcmp.eq.s32.totalorder (%p478_p11), %v438_v6, %v435_v5 }
 0x154   : >>> { %v564_v26 = vxor.u32 2147483648, %v563_v25  ;;  %v421_v6 = vmov (%p478_p11), %v1892_v6 }
 0x156   : >>> { %v565_v27 = vsel %vm554_vm10, %v563_v25, %v564_v26 }
 0x157   : >>> { %v566_v28 = vadd.f32 %v565_v27, %v553_v18 }
 0x159   : >>> { %1679 = vrcp.f32 %v566_v28 }
 0x166   : >>> { %v1680_v34 = vpop.eup %1679 }
 0x167   : >>> { %v574_v35 = vsel %vm573_vm11, 0.0, %v1680_v34 }
 0x168   : >>> { %v575_v36 = vmul.f32 %v574_v35, %v574_v35  ;;  %v579_v37 = vmul.f32 %v574_v35, %v547_v12 }
 0x16a   : >>> { %v576_v38 = vadd.f32 1.0, %v575_v36  ;;  %v580_v39 = vsub.f32 %v545_v14, %v579_v37  ;;  %v582_v40 = vadd.f32 %v579_v37, %v549_v15 }
 0x16c   : >>> { %1681 = vrsqrt.f32 %v576_v38  ;;  %584 = vst [vmem:[%s583_s14] sm:$0xff] %v580_v39  ;;  %586 = vst [vmem:[%s585_s26] sm:$0xff] %v582_v40  ;;  %s1952_s14 = smov [#allocation10]  ;;  %s619_s26 = smov [#allocation22] }
 0x16d   : >>> { %v629_v49 = vld [vmem:[%s1952_s14] sm:$0x1f] }
 0x179   : >>> { %v1682_v41 = vpop.eup %1681 }
 0x17a   : >>> { %588 = vst [vmem:[%s587_s29] sm:$0xff] %v1682_v41  ;;  %v578_v42 = vmul.f32 %v1682_v41, %v574_v35  ;;  %s1954_s29 = smov [#allocation11] }
 0x17b   : >>> { %v630_v50 = vld [vmem:[%s1954_s29] sm:$0x1f] }
 0x17c   : >>> { %590 = vst [vmem:[%s589_s20] sm:$0xff] %v578_v42  ;;  %s1956_s20 = smov [#allocation12] }
 0x17d   : >>> { %v631_v51 = vld [vmem:[%s1956_s20] sm:$0x1f] }
 0x181   : >>> { %v592_v43 = vld [vmem:[%s591_s21] ss:$0 sm:$0xff]  ;;  %s1958_s21 = smov [#allocation13] }
 0x182   : >>> { %v601_v44 = vsel %vm600_vm12, %v592_v43, 0.0  ;;  %v632_v52 = vld [vmem:[%s1958_s21] sm:$0x1f] }
 0x183   : >>> { %602 = vadd.xlane.f32.xlu0 %v601_v44  ;;  %v607_v45 = vld [vmem:[%s606_s23] ss:$0 sm:$0xff]  ;;  %s845_s23 = smov [#allocation21] }
 0x184   : >>> { %v616_v46 = vsel %vm615_vm13, %v607_v45, 0.0 }
 0x187   : >>> { %617 = vadd.xlane.f32.xlu0 %v616_v46 }
 0x20c   : >>> { %v603_v47 = vpop.xlane.xlu0 %602 }
 0x20d   : >>> { %605 = vst [vmem:[%s604_s25] sm:$0xff] %v603_v47  ;;  %s623_s25 = smov [#allocation22] }
 0x210   : >>> { %v618_v48 = vpop.xlane.xlu0 %617 }
 0x211   : >>> { %620 = vst [vmem:[%s619_s26] sm:$0xff] %v618_v48  ;;  %s1988_s26 = smov [#allocation12] }
 0x214   : >>> { %v622_v56 = vld [vmem:[%s621_s17] sm:$0xff]  ;;  %s651_s17 = smov [#allocation20] }
 0x215   : >>> { %v846_v58 = vld [vmem:[%s845_s23] sm:$0xff]  ;;  %v633_v59 = vmul.f32 %v629_v49, %v622_v56  ;;  %v636_v60 = vmul.f32 %v630_v50, %v622_v56  ;;  %v640_v61 = vmul.f32 %v631_v51, %v622_v56  ;;  %v643_v62 = vmul.f32 %v632_v52, %v622_v56  ;;  %s1990_s23 = smov [#allocation13] }
 0x216   : >>> { %v857_v63 = vmul.f32 %v853_v53, %v846_v58  ;;  %v860_v0 = vmul.f32 %v854_v54, %v846_v58  ;;  %v864_v1 = vmul.f32 %v855_v55, %v846_v58  ;;  %v867_v2 = vmul.f32 %v856_v57, %v846_v58  ;;  %v652_v24 = vld [vmem:[%s651_s17] ss:$0 sm:$0xff]  ;;  %s677_s17 = smov [#allocation10] }
 0x218   : >>> { %v624_v3 = vld [vmem:[%s623_s25] sm:$0xff]  ;;  %s1992_s25 = smov [#allocation10] }
 0x219   : >>> { %v848_v4 = vld [vmem:[%s847_s9] sm:$0xff]  ;;  %v634_v7 = vmul.f32 %v631_v51, %v624_v3  ;;  %v637_v8 = vmul.f32 %v632_v52, %v624_v3  ;;  %v639_v9 = vmul.f32 %v629_v49, %v624_v3  ;;  %v642_v10 = vmul.f32 %v630_v50, %v624_v3  ;;  %s649_s9 = smov [#allocation19] }
 0x21a   : >>> { %v858_v11 = vmul.f32 %v855_v55, %v848_v4  ;;  %v861_v12 = vmul.f32 %v856_v57, %v848_v4  ;;  %v863_v13 = vmul.f32 %v853_v53, %v848_v4  ;;  %v866_v14 = vmul.f32 %v854_v54, %v848_v4  ;;  %v650_v23 = vld [vmem:[%s649_s9] ss:$0 sm:$0xff]  ;;  %s678_s9 = smov [#allocation17] }
 0x21b   : >>> { %v635_v15 = vsub.f32 %v633_v59, %v634_v7  ;;  %v638_v16 = vsub.f32 %v636_v60, %v637_v8  ;;  %v641_v17 = vadd.f32 %v640_v61, %v639_v9  ;;  %v644_v18 = vadd.f32 %v643_v62, %v642_v10  ;;  %v685_v59 = vld [vmem:[%s678_s9] ss:$0 sm:$0xff]  ;;  %s797_s9 = smov [#allocation10] }
 0x21c   : >>> { %v859_v19 = vsub.f32 %v857_v63, %v858_v11  ;;  %v862_v20 = vsub.f32 %v860_v0, %v861_v12  ;;  %v865_v21 = vadd.f32 %v864_v1, %v863_v13  ;;  %v868_v22 = vadd.f32 %v867_v2, %v866_v14 }
 0x21d   : >>> { %646 = vst [vmem:[%s1954_s29] sm:$0x1f] %v638_v16  ;;  %648 = vst [vmem:[%s1958_s21] sm:$0x1f] %v644_v18  ;;  %s719_s29 = smov [#allocation18]  ;;  %s718_s21 = smov [#allocation13] }
 0x21e   : >>> { %645 = vst [vmem:[%s1952_s14] sm:$0x1f] %v635_v15  ;;  %647 = vst [vmem:[%s1956_s20] sm:$0x1f] %v641_v17  ;;  %s2005_s14 = smov [#allocation11]  ;;  %s705_s20 = smov [#allocation12]  ;;  %v726_v55 = vld [vmem:[%s719_s29] ss:$0 sm:$0xff] }
 0x21f   : >>> { %869 = vst [vmem:[%s1961_s24] sm:$0x1f] %v859_v19  ;;  %870 = vst [vmem:[%s1964_s30] sm:$0x1f] %v862_v20  ;;  %s1995_s24 = smov %s1894_s24  ;;  %s2003_s30 = smov %s1897_s30 }
 0x220   : >>> { %871 = vst [vmem:[%s1967_s28] sm:$0x1f] %v865_v21  ;;  %872 = vst [vmem:[%s1972_s16] sm:$0x1f] %v868_v22  ;;  %s1998_s28 = smov %s1900_s28  ;;  %s2008_s16 = smov %s1903_s16 }
 0x221   : >>> { %s734_s29 = smov [#allocation11] }
 0x224   : >>> { %v660_v26 = vld [vmem:[%s1990_s23] sm:$0x1f] }
 0x225   : >>> { %v659_v25 = vld [vmem:[%s1988_s26] sm:$0x1f]  ;;  %v668_v32 = vmul.f32 %v660_v26, %v652_v24  ;;  %v671_v38 = vmul.f32 %v660_v26, %v650_v23 }
 0x226   : >>> { %v657_v27 = vld [vmem:[%s1992_s25] sm:$0x1f]  ;;  %v667_v31 = vmul.f32 %v659_v25, %v650_v23  ;;  %v670_v33 = vmul.f32 %v659_v25, %v652_v24 }
 0x227   : >>> { %v875_v28 = vld [vmem:[%s1995_s24] ss:$0 sm:$0xff]  ;;  %v1567_v30 = vld [vmem:[%s1995_s24 + $0x4] ss:$0 sm:$0xff]  ;;  %v661_v44 = vmul.f32 %v657_v27, %v650_v23  ;;  %v664_v45 = vmul.f32 %v657_v27, %v652_v24 }
 0x228   : >>> { %v1566_v29 = vld [vmem:[%s1995_s24 - $0x1] sm:$0x1e]  ;;  %v1571_v41 = vld [vmem:[%s2003_s30 + $0x4] ss:$0 sm:$0xff]  ;;  %v669_v43 = vsub.f32 %v667_v31, %v668_v32  ;;  %v672_v49 = vadd.f32 %v671_v38, %v670_v33 }
 0x229   : >>> { %v882_v34 = vsel %vm805_vm14, %v875_v28, %v1566_v29  ;;  %v886_v35 = vld [vmem:[%s1998_s28] ss:$0 sm:$0xff]  ;;  %v1569_v36 = vld [vmem:[%s1998_s28 + $0x1] sm:$0xf] }
 0x22a   : >>> { %v899_v37 = vld [vmem:[%s2003_s30] ss:$0 sm:$0xff]  ;;  %885 = vst [vmem:[%s1995_s24] sm:$0x1f] %v882_v34  ;;  %v894_v39 = vsel %vm817_vm15, %v1567_v30, %v1569_v36  ;;  %v1573_v47 = vld [vmem:[%s2008_s16 + $0x1] sm:$0xf]  ;;  %675 = vst [vmem:[%s1988_s26] sm:$0x1f] %v669_v43 }
 0x22b   : >>> { %v1570_v40 = vld [vmem:[%s2003_s30 - $0x1] sm:$0x1e]  ;;  %1568 = vst [vmem:[%s1995_s24 + $0x1] sm:$0x1] %v886_v35  ;;  %896 = vst [vmem:[%s1998_s28] sm:$0x1f] %v894_v39  ;;  %v918_v50 = vsel %vm817_vm15, %v1571_v41, %v1573_v47  ;;  %s692_s26 = smov [#allocation11] }
 0x22c   : >>> { %v910_v42 = vld [vmem:[%s2008_s16] ss:$0 sm:$0xff]  ;;  %v906_v46 = vsel %vm805_vm14, %v899_v37, %v1570_v40  ;;  %676 = vst [vmem:[%s1990_s23] sm:$0x1f] %v672_v49  ;;  %s2050_s23 = smov [#allocation12] }
 0x22d   : >>> { %v658_v48 = vld [vmem:[%s2005_s14] sm:$0x1f]  ;;  %909 = vst [vmem:[%s2003_s30] sm:$0x1f] %v906_v46  ;;  %920 = vst [vmem:[%s2008_s16] sm:$0x1f] %v918_v50 }
 0x22e   : >>> { %v662_v51 = vmul.f32 %v658_v48, %v652_v24  ;;  %v665_v52 = vmul.f32 %v658_v48, %v650_v23  ;;  %1572 = vst [vmem:[%s2003_s30 + $0x1] sm:$0x1] %v910_v42 }
 0x230   : >>> { %v663_v53 = vsub.f32 %v661_v44, %v662_v51  ;;  %v666_v54 = vadd.f32 %v665_v52, %v664_v45 }
 0x231   : >>> { %v712_v56 = vld [vmem:[%s705_s20] sm:$0x1f] }
 0x232   : >>> { %673 = vst [vmem:[%s1992_s25] sm:$0x1f] %v663_v53  ;;  %674 = vst [vmem:[%s2005_s14] sm:$0x1f] %v666_v54  ;;  %v716_v57 = vsel %vm715_vm0, 0.0, %v712_v56  ;;  %s1756_s25 = smov 1   ;;  %s733_s14 = smov [#allocation10] }
 0x233   : >>> { %v727_v58 = vld [vmem:[%s718_s21] sm:$0x1f]  ;;  %717 = vst [vmem:[%s705_s20] sm:$0x1f] %v716_v57  ;;  %s1757_s20 = smov 127  }
 0x234   : >>> { %v731_v60 = vsel %vm730_vm1, %v726_v55, %v727_v58 }
 0x235   : >>> { %732 = vst [vmem:[%s718_s21] sm:$0x1f] %v731_v60  ;;  %s2053_s21 = smov [#allocation13] }
 0x239   : >>> { %v686_v61 = vld [vmem:[%s677_s17] sm:$0x1f] }
 0x23a   : >>> { %v699_v62 = vld [vmem:[%s692_s26] sm:$0x1f]  ;;  %v690_v63 = vsel %vm689_vm3, %v685_v59, %v686_v61 }
 0x23b   : >>> { %v703_v0 = vsel %vm702_vm4, 0.0, %v699_v62  ;;  %691 = vst [vmem:[%s677_s17] sm:$0x1f] %v690_v63  ;;  %v771_v1 = vld [vmem:[%s2050_s23] sm:$0x1f]  ;;  %s821_s17 = smov [#allocation11] }
 0x23c   : >>> { %704 = vst [vmem:[%s692_s26] sm:$0x1f] %v703_v0  ;;  %772 = vrot.lane.b32.xlu0 %v771_v1, %s1756_s25  ;;  %v767_v7 = vld [vmem:[%s2053_s21] sm:$0x1f]  ;;  %s798_s26 = smov [#allocation12] }
 0x23d   : >>> { %v788_v8 = vld [vmem:[%s2053_s21] sm:$0x1f] }
 0x23e   : >>> { %v770_v26 = vld [vmem:[%s2050_s23] sm:$0x1f] }
 0x242   : >>> { %v739_v2 = vld [vmem:[%s733_s14] sm:$0x1f] }
 0x243   : >>> { %740 = vrot.lane.b32.xlu1 %v739_v2, %s1756_s25  ;;  %v735_v3 = vld [vmem:[%s734_s29] sm:$0x1f] }
 0x244   : >>> { %v756_v4 = vld [vmem:[%s734_s29] sm:$0x1f] }
 0x245   : >>> { %v738_v14 = vld [vmem:[%s733_s14] sm:$0x1f] }
 0x247   : >>> { %736 = vrot.lane.b32.xlu1 %v735_v3, %s1756_s25 }
 0x24b   : >>> { %757 = vrot.lane.b32.xlu1 %v756_v4, %s1757_s20 }
 0x24f   : >>> { %768 = vrot.lane.b32.xlu1 %v767_v7, %s1756_s25  ;;  %s822_s25 = smov [#allocation13] }
 0x253   : >>> { %789 = vrot.lane.b32.xlu1 %v788_v8, %s1757_s20  ;;  %s422_s20 = smov (%p478_p11), [#allocation12] }
 0x2ae   : >>> { %v773_v16 = vpop.permute.xlu0 %772 }
 0x2af   : >>> { %v777_v18 = vsel %vm744_vm5, %v771_v1, %v773_v16 }
 0x2b5   : >>> { %v741_v9 = vpop.permute.xlu1 %740 }
 0x2b6   : >>> { %v745_v10 = vsel %vm744_vm5, %v739_v2, %v741_v9 }
 0x2b9   : >>> { %v737_v11 = vpop.permute.xlu1 %736 }
 0x2ba   : >>> { %v749_v12 = vsel %vm748_vm6, %v737_v11, %v745_v10 }
 0x2bb   : >>> { %v755_v13 = vsel %vm1411_vm2, %v749_v12, 0.0 }
 0x2bc   : >>> { %763 = vst [vmem:[%s733_s14] sm:$0x1f] %v755_v13  ;;  %s386_s14 = smov (%p478_p11), [#allocation10] }
 0x2bd   : >>> { %v758_v15 = vpop.permute.xlu1 %757 }
 0x2be   : >>> { %v762_v17 = vsel %vm761_vm7, %v738_v14, %v758_v15 }
 0x2bf   : >>> { %764 = vst [vmem:[%s734_s29] sm:$0x1f] %v762_v17  ;;  %s405_s29 = smov (%p478_p11), [#allocation11] }
 0x2c1   : >>> { %v769_v19 = vpop.permute.xlu1 %768 }
 0x2c2   : >>> { %v781_v20 = vsel %vm748_vm6, %v769_v19, %v777_v18 }
 0x2c3   : >>> { %v799_v21 = vld [vmem:[%s797_s9] ss:$0 sm:$0xff]  ;;  %v1559_v23 = vld [vmem:[%s797_s9 + $0x4] ss:$0 sm:$0xff]  ;;  %v787_v25 = vsel %vm1411_vm2, %v781_v20, 0.0 }
 0x2c4   : >>> { %v1558_v22 = vld [vmem:[%s797_s9 - $0x1] sm:$0x1e]  ;;  %795 = vst [vmem:[%s2050_s23] sm:$0x1f] %v787_v25  ;;  %s921_s23 = sadd.s32 (%p478_p11), 1, %s1749_s27  }
 0x2c5   : >>> { %v806_v24 = vsel %vm805_vm14, %v799_v21, %v1558_v22  ;;  %v790_v27 = vpop.permute.xlu1 %789  ;;  %p474_p12 = scmp.ge.s32.totalorder (%p478_p11), %s921_s23, 15  ;;  %s2199_s27 = smov (%p478_p11), %s921_s23 }
 0x2c6   : >>> { %809 = vst [vmem:[%s797_s9] sm:$0x1f] %v806_v24  ;;  %v823_v28 = vld [vmem:[%s821_s17] ss:$0 sm:$0xff]  ;;  %v1563_v30 = vld [vmem:[%s821_s17 + $0x4] ss:$0 sm:$0xff]  ;;  %v794_v31 = vsel %vm761_vm7, %v770_v26, %v790_v27 }
 0x2c7   : >>> { %v1562_v29 = vld [vmem:[%s821_s17 - $0x1] sm:$0x1e]  ;;  %796 = vst [vmem:[%s2053_s21] sm:$0x1f] %v794_v31  ;;  %s439_s21 = smov (%p478_p11), [#allocation13] }
 0x2c8   : >>> { %v830_v32 = vsel %vm805_vm14, %v823_v28, %v1562_v29 }
 0x2c9   : >>> { %833 = vst [vmem:[%s821_s17] sm:$0x1f] %v830_v32 }
 0x2cb   : >>> { %v810_v33 = vld [vmem:[%s798_s26] ss:$0 sm:$0xff]  ;;  %v1561_v34 = vld [vmem:[%s798_s26 + $0x1] sm:$0xf] }
 0x2cc   : >>> { %1560 = vst [vmem:[%s797_s9 + $0x1] sm:$0x1] %v810_v33  ;;  %v818_v35 = vsel %vm817_vm15, %v1559_v23, %v1561_v34 }
 0x2cd   : >>> { %820 = vst [vmem:[%s798_s26] sm:$0x1f] %v818_v35 }
 0x2ce   : >>> { %v834_v36 = vld [vmem:[%s822_s25] ss:$0 sm:$0xff]  ;;  %v1565_v37 = vld [vmem:[%s822_s25 + $0x1] sm:$0xf] }
 0x2cf   : >>> { %1564 = vst [vmem:[%s821_s17 + $0x1] sm:$0x1] %v834_v36  ;;  %v842_v38 = vsel %vm817_vm15, %v1563_v30, %v1565_v37 }
 0x2d0   : >>> { %844 = vst [vmem:[%s822_s25] sm:$0x1f] %v842_v38  ;;  %480 = sbr.rel (!%p478_p11) target bundleno = 276 (0x114), region = 502 }
 0x2d3   : >> { %v392_v39 = vld [vmem:[%s386_s14] sm:$0x1f] (%p478_p11) }
 0x2d4   : >> { %v393_v41 = vsel (%p478_p11), %vm1411_vm2, %v392_v39, 0.0  ;;  %v428_v43 = vld [vmem:[%s422_s20] sm:$0x1f] (%p478_p11) }
 0x2d5   : >> { %v394_v45 = vmul.f32 %v393_v41, %v393_v41  ;;  %v429_v47 = vsel %vm1411_vm2, %v428_v43, 0.0 }
 0x2d6   : >> { %v411_v40 = vld [vmem:[%s405_s29] sm:$0x1f]  ;;  %v430_v49 = vmul.f32 %v429_v47, %v429_v47 }
 0x2d7   : >> { %v412_v42 = vsel %vm1411_vm2, %v411_v40, 0.0  ;;  %v445_v44 = vld [vmem:[%s439_s21] sm:$0x1f]  ;;  %v398_v52 = vsel %vm397_vm8, 0.0, %v394_v45 }
 0x2d8   : >> { %v413_v46 = vmul.f32 %v412_v42, %v412_v42  ;;  %v446_v48 = vsel %vm1411_vm2, %v445_v44, 0.0 }
 0x2d9   : >> { %v447_v51 = vmul.f32 %v446_v48, %v446_v48 }
 0x2da   : >> { %v415_v50 = vadd.f32 %v413_v46, %v394_v45  ;;  %v414_v53 = vadd.f32 %v413_v46, %v398_v52 }
 0x2db   : >> { %v451_v56 = vsel %vm450_vm9, 0.0, %v447_v51 }
 0x2dc   : >> { %v432_v54 = vadd.f32 %v430_v49, %v415_v50  ;;  %v431_v55 = vadd.f32 %v430_v49, %v414_v53 }
 0x2de   : >> { %v453_v57 = vadd.f32 %v447_v51, %v432_v54  ;;  %v452_v58 = vadd.f32 %v451_v56, %v431_v55 }
 0x2e0   : >> { %454 = vadd.xlane.f32.xlu0 %v453_v57 }
 0x2e4   : >> { %462 = vadd.xlane.f32.xlu0 %v452_v58 }
 0x369   : >> { %v455_v59 = vpop.xlane.xlu0 %454 }
 0x36a   : >> { %v456_v60 = vrot.slane %v455_v59, 4 }
 0x36c   : >> { %v457_v61 = vadd.f32 %v456_v60, %v455_v59 }
 0x36d   : >> { %v463_v62 = vpop.xlane.xlu0 %462 }
 0x36e   : >> { %v458_v63 = vrot.slane %v457_v61, 2  ;;  %v464_v0 = vrot.slane %v463_v62, 4 }
 0x370   : >> { %v465_v1 = vadd.f32 %v464_v0, %v463_v62  ;;  %v459_v2 = vadd.f32 %v458_v63, %v457_v61 }
 0x372   : >> { %v466_v3 = vrot.slane %v465_v1, 2  ;;  %v460_v7 = vrot.slane %v459_v2, 1 }
 0x374   : >> { %v467_v4 = vadd.f32 %v466_v3, %v465_v1  ;;  %v461_v10 = vadd.f32 %v460_v7, %v459_v2 }
 0x376   : >> { %v468_v8 = vrot.slane %v467_v4, 1 }
 0x378   : >> { %v469_v9 = vadd.f32 %v468_v8, %v467_v4 }
 0x37a   : >> { %1596 = vpush %v469_v9 }
 0x37b   : >> { %1598 = vpush %v461_v10 }
 0x3ab   : >> { %s1597_s18 = spop %1596 }
 0x3ac   : >> { %s1599_s9 = spop %1598 }
 0x3ad   : >> { %s472_s17 = smul.f32 1e-10, %s1599_s9 }
 0x3af   : >> { %p473_p13 = scmp.le.f32.partialorder %s1597_s18, %s472_s17 }
 0x3b1   : >> { %p475_p0 = por %p474_p12, %p473_p13 }
 0x3b3   : > { %923 = sbr.rel (!%p475_p0) target bundleno = 275 (0x113), region = 513 }
 0x3b8 PF: > { %s928_s26 = smov [#allocation10]  ;;  %v932_v5 = vmov %v1890_v5  ;;  %v935_v6 = vmov %v1892_v6  ;;  %s948_s27 = smov [#allocation13] }
 0x3b9   : > { %v952_v5 = vmov %v1890_v5  ;;  %v955_v6 = vmov %v1892_v6  ;;  %v936_v11 = vld [vmem:[%s928_s26] sm:$0x1f]  ;;  %vm939_vm10 = vcmp.eq.s32.totalorder %v935_v6, %v932_v5  ;;  %s924_s25 = sand.u32 7, %s1729_s11   ;;  %s2200_s14 = scalar_lea.vmem [#allocation5], %s1888_s19 }
 0x3ba   : > { %vm959_vm11 = vcmp.eq.s32.totalorder %v955_v6, %v952_v5  ;;  %v940_v12 = vsel %vm939_vm10, %v936_v11, 0.0  ;;  %v956_v14 = vld [vmem:[%s948_s27] sm:$0x1f]  ;;  %s925_s23 = scalar_lea.vmem %s311_s10, %s924_s25 [#allocation4]  ;;  %s927_s29 = scalar_lea.vmem %s2200_s14, %s924_s25 [#allocation5] }
 0x3bb   : > { %v941_v13 = vrot.slane %v940_v12, 4  ;;  %v960_v15 = vsel %vm959_vm11, %v956_v14, 0.0  ;;  %s929_s23 = smov %s925_s23  ;;  %s949_s29 = smov %s927_s29 }
 0x3bc   : > { %v961_v17 = vrot.slane %v960_v15, 4  ;;  %s995_s20 = sshrl.u32 (%p1857_p4), %s1729_s11, 3 }
 0x3bd   : > { %v942_v16 = vadd.f32 %v941_v13, %v940_v12  ;;  %s996_s21 = sadd.s32 (%p1857_p4), %s1733_s12, %s995_s20 }
 0x3be   : > { %v962_v19 = vadd.f32 %v961_v17, %v960_v15  ;;  %s1580_s18 = sshll.u32 (%p1857_p4), %s996_s21, 3 }
 0x3bf   : > { %v943_v18 = vrot.slane %v942_v16, 2  ;;  %s998_s26 = scalar_lea.vmem (%p1857_p4), %s2180_s4, %s1580_s18 }
 0x3c0   : > { %v963_v21 = vrot.slane %v962_v19, 2 }
 0x3c1   : > { %v944_v20 = vadd.f32 %v943_v18, %v942_v16 }
 0x3c2   : > { %v964_v23 = vadd.f32 %v963_v21, %v962_v19 }
 0x3c3   : > { %v945_v22 = vrot.slane %v944_v20, 1 }
 0x3c4   : > { %v965_v6 = vrot.slane %v964_v23, 1  ;;  %994 = sbr.rel (!%p1857_p4) target bundleno = 976 (0x3d0), region = 174 }
 0x3c5   : > { %v946_v5 = vadd.f32 %v945_v22, %v944_v20 }
 0x3c6   : > { %v966_v24 = vadd.f32 %v965_v6, %v964_v23 }
 0x3c7   : > { %947 = vst [vmem:[%s929_s23] sm:$0x1] %v946_v5 }
 0x3c8   : > { %967 = vst [vmem:[%s949_s29] sm:$0x1] %v966_v24 }
 0x3ce   : > { %v1027_v25 = vld [vmem:[%s311_s10] sm:$0xff] }
 0x3cf   : > { %1028 = vst [vmem:[%s998_s26] sm:$0xff] %v1027_v25 }
 0x3d0 PF: > { %1034 = sbr.rel (!%p1857_p4) target bundleno = 984 (0x3d8), region = 212  ;;  %s1035_s27 = sshrl.u32 (%p1857_p4), %s1729_s11, 3 }
 0x3d1   : > { %s1036_s25 = sadd.s32 (%p1857_p4), %s1733_s12, %s1035_s27  ;;  %s2201_s23 = scalar_lea.vmem (%p1857_p4), [#allocation5], %s1888_s19 }
 0x3d2   : > { %s1581_s14 = sshll.u32 (%p1857_p4), %s1036_s25, 3 }
 0x3d3   : > { %s1038_s20 = scalar_lea.vmem (%p1857_p4), %s2181_s5, %s1581_s14 }
 0x3d6   : > { %v1067_v26 = vld [vmem:[%s2201_s23] sm:$0xff] }
 0x3d7   : > { %1068 = vst [vmem:[%s1038_s20] sm:$0xff] %v1067_v26 }
 0x3d8 PF: > { %s1582_s22 = sshll.u32 %s1733_s12, 3  ;;  %v1104_v27 = vld [vmem:[%s1894_s24] sm:$0xff]  ;;  %v1141_v28 = vld [vmem:[%s1897_s30] sm:$0xff]  ;;  %s2202_s30 = sld [smem:[#allocation28_spill]] }
 0x3d9   : > { %s1073_s21 = sadd.s32 %s1729_s11, %s1582_s22  ;;  %v1178_v29 = vld [vmem:[%s1900_s28] sm:$0xff]  ;;  %v1215_v30 = vld [vmem:[%s1903_s16] sm:$0xff] }
 0x3da   : > { %s1583_s18 = sshll.u32 %s1073_s21, 3 }
 0x3db   : > { %s1075_s17 = scalar_lea.vmem %s2182_s6, %s1583_s18  ;;  %s1112_s25 = scalar_lea.vmem %s2183_s7, %s1583_s18 }
 0x3dc   : > { %1105 = vst [vmem:[%s1075_s17] sm:$0xff] %v1104_v27  ;;  %1142 = vst [vmem:[%s1112_s25] sm:$0xff] %v1141_v28  ;;  %s1149_s12 = scalar_lea.vmem %s2184_s8, %s1583_s18 }
 0x3dd   : > { %1179 = vst [vmem:[%s1149_s12] sm:$0xff] %v1178_v29 }
 0x3de   : > { %s1186_s29 = scalar_lea.vmem %s2202_s30, %s1583_s18 }
 0x3df   : > { %1216 = vst [vmem:[%s1186_s29] sm:$0xff] %v1215_v30 }
 0x3e0 PF: > { %s16_s15 = sadd.s32 1, %s1745_s15   ;;  %s2203_s30 = sld [smem:[#allocation23_spill]] }
 0x3e1   : > { %p13_p1 = scmp.ge.s32.totalorder %s16_s15, 18   ;;  %s2204_s10 = sld [smem:[#allocation27_spill]] }
 0x3e2   : > { %s2205_s12 = sld [smem:[#allocation24_spill]]  ;;  %s2208_s11 = smov %s1737_s13 }
 0x3e3   : > { %s2206_s28 = sld [smem:[#allocation25_spill]] }
 0x3e4   : > { %s2207_s14 = sld [smem:[#allocation26_spill]] }
 0x3e5   :  { %15 = sbr.rel (!%p13_p1) target bundleno = 6 (0x6), region = 524 }
 0x3e9   : > { %s2209_s13 = smov %s2206_s28 }

// kernel: srln_forward.5
= control target key start
LH: loop header
LB: loop body
LE: loop exit
PB: predicated region body
PF: predicated region fallthrough
CT: control target
= control target key end

     0   :  { %v18_v0 = vlaneseq  ;;  %vm137_vm0 = vcmask 64512   ;;  %vm139_vm1 = vcmask 57344   ;;  %s1851_s0 = inlined_call_operand.vmem [shape: f32[9,9,8], index: 0, kind: input, shape index: {}]   ;;  %s1852_s1 = inlined_call_operand.vmem [shape: f32[9,8], index: 1, kind: input, shape index: {}]   ;;  %s1853_s2 = inlined_call_operand.vmem [shape: f32[9,9,8], index: 2, kind: output, shape index: {}]  }
   0x1   :  { %v11_v1 = vld [vmem:[%s1852_s1] sm:$0xff]  ;;  %v12_v2 = vld [vmem:[%s1852_s1 + $0x8] sm:$0x1]  ;;  %v1171_v7 = vld [vmem:[%s1851_s0 + $0x10] sm:$0xff] }
   0x2   :  { %v1160_v3 = vld [vmem:[%s1851_s0] sm:$0xff]  ;;  %v1162_v4 = vmax.f32 %v11_v1, 0.0001  ;;  %v1164_v5 = vshrl.u32 %v18_v0, 7  ;;  %v1166_v6 = vmax.f32 %v12_v2, 0.0001 }
   0x3   :  { %v1176_v8 = vld [vmem:[%s1851_s0 + $0x20] sm:$0xff]  ;;  %v1181_v9 = vld [vmem:[%s1851_s0 + $0x30] sm:$0xff]  ;;  %v16_v39 = vld [vmem:[%s1851_s0 + $0x8] sm:$0x1] }
   0x4   :  { %v17_v10 = vmul.f32 %v1160_v3, %v1162_v4  ;;  %v1186_v11 = vsub.s32 0, %v1164_v5  ;;  %v1189_v12 = vrot.slane %v1162_v4, 1  ;;  %v1192_v13 = vrot.slane %v1162_v4, 2  ;;  %v1197_v14 = vld [vmem:[%s1851_s0 + $0x40] sm:$0xff]  ;;  %v1202_v15 = vld [vmem:[%s1851_s0 + $0x50] sm:$0xff] }
   0x5   :  { %v1207_v16 = vld [vmem:[%s1851_s0 + $0x60] sm:$0xff]  ;;  %v1210_v17 = vrot.slane %v1162_v4, 3  ;;  %v1213_v18 = vrot.slane %v1162_v4, 4  ;;  %v1216_v19 = vrot.slane %v1162_v4, 5  ;;  %v1219_v20 = vrot.slane %v1162_v4, 6  ;;  %v1224_v21 = vld [vmem:[%s1851_s0 + $0x70] sm:$0xff] }
   0x6   :  { %v21_v22 = vrot.slane %v17_v10, %v1186_v11  ;;  %v32_v23 = vmul.f32 %v1171_v7, %v1189_v12  ;;  %v46_v24 = vmul.f32 %v1176_v8, %v1192_v13  ;;  %v1232_v25 = vrot.slane %v1162_v4, 7  ;;  %v1245_v30 = vld [vmem:[%s1851_s0 + $0x80] sm:$0xff]  ;;  %v977_v44 = vld [vmem:[%s1851_s0 + $0x18] sm:$0x1]  ;;  %v979_v45 = vld [vmem:[%s1851_s0 + $0x28] sm:$0x1] }
   0x7   :  { %v60_v26 = vmul.f32 %v1181_v9, %v1210_v17  ;;  %v74_v27 = vmul.f32 %v1197_v14, %v1213_v18  ;;  %v88_v28 = vmul.f32 %v1202_v15, %v1216_v19  ;;  %v102_v29 = vmul.f32 %v1207_v16, %v1219_v20  ;;  %v981_v46 = vld [vmem:[%s1851_s0 + $0x38] sm:$0x1]  ;;  %v983_v50 = vld [vmem:[%s1851_s0 + $0x48] sm:$0x1] }
   0x8   :  { %v22_v31 = vmul.f32 %v21_v22, %v1160_v3  ;;  %v36_v32 = vrot.slane %v32_v23, %v1186_v11  ;;  %v50_v33 = vrot.slane %v46_v24, %v1186_v11  ;;  %v116_v34 = vmul.f32 %v1224_v21, %v1232_v25  ;;  %v985_v51 = vld [vmem:[%s1851_s0 + $0x58] sm:$0x1]  ;;  %v987_v56 = vld [vmem:[%s1851_s0 + $0x68] sm:$0x1] }
   0x9   :  { %v64_v35 = vrot.slane %v60_v26, %v1186_v11  ;;  %v78_v36 = vrot.slane %v74_v27, %v1186_v11  ;;  %v92_v37 = vrot.slane %v88_v28, %v1186_v11  ;;  %v106_v38 = vrot.slane %v102_v29, %v1186_v11  ;;  %v989_v57 = vld [vmem:[%s1851_s0 + $0x78] sm:$0x1]  ;;  %v991_v26 = vld [vmem:[%s1851_s0 + $0x88] sm:$0x1] }
   0xa   :  { %v37_v40 = vmul.f32 %v1171_v7, %v36_v32  ;;  %v51_v41 = vmul.f32 %v1176_v8, %v50_v33  ;;  %v120_v42 = vrot.slane %v116_v34, %v1186_v11  ;;  %v128_v43 = vmul.f32 %v1245_v30, %v1166_v6 }
   0xb   :  { %v65_v47 = vmul.f32 %v1181_v9, %v64_v35  ;;  %v79_v48 = vmul.f32 %v1197_v14, %v78_v36  ;;  %v93_v49 = vmul.f32 %v1202_v15, %v92_v37  ;;  %v107_v53 = vmul.f32 %v1207_v16, %v106_v38 }
   0xc   :  { %v39_v52 = vadd.f32 %v37_v40, %v22_v31  ;;  %v132_v54 = vrot.slane %v128_v43, %v1186_v11  ;;  %v23_v55 = vmul.f32 %v21_v22, %v16_v39  ;;  %v121_v58 = vmul.f32 %v1224_v21, %v120_v42 }
   0xd   :  { %v38_v59 = vmul.f32 %v977_v44, %v36_v32  ;;  %v52_v60 = vmul.f32 %v979_v45, %v50_v33  ;;  %v66_v61 = vmul.f32 %v981_v46, %v64_v35  ;;  %v80_v0 = vmul.f32 %v983_v50, %v78_v36 }
   0xe   :  { %v53_v62 = vadd.f32 %v51_v41, %v39_v52  ;;  %v133_v63 = vmul.f32 %v1245_v30, %v132_v54  ;;  %v94_v1 = vmul.f32 %v985_v51, %v92_v37  ;;  %v108_v10 = vmul.f32 %v987_v56, %v106_v38 }
   0xf   :  { %v40_v2 = vadd.f32 %v38_v59, %v23_v55  ;;  %v122_v22 = vmul.f32 %v989_v57, %v120_v42  ;;  %v143_v23 = vmul.f32 %v1232_v25, %v1160_v3  ;;  %v146_v27 = vsub.s32 1, %v1164_v5  ;;  %v995_v59 = vld [vmem:[%s1851_s0 + $0x28] sm:$0x1] }
  0x10   :  { %v67_v24 = vadd.f32 %v65_v47, %v53_v62  ;;  %v154_v28 = vmul.f32 %v1171_v7, %v1162_v4  ;;  %v165_v29 = vmul.f32 %v1176_v8, %v1189_v12  ;;  %v176_v32 = vmul.f32 %v1181_v9, %v1192_v13  ;;  %v142_v47 = vld [vmem:[%s1851_s0 + $0x8] sm:$0x1] }
  0x11   :  { %v54_v31 = vadd.f32 %v52_v60, %v40_v2  ;;  %v187_v33 = vmul.f32 %v1197_v14, %v1210_v17  ;;  %v198_v34 = vmul.f32 %v1202_v15, %v1213_v18  ;;  %v147_v36 = vrot.slane %v143_v23, %v146_v27 }
  0x12   :  { %v81_v35 = vadd.f32 %v79_v48, %v67_v24  ;;  %v158_v37 = vrot.slane %v154_v28, %v146_v27  ;;  %v169_v38 = vrot.slane %v165_v29, %v146_v27  ;;  %v134_v40 = vmul.f32 %v991_v26, %v132_v54  ;;  %v993_v48 = vld [vmem:[%s1851_s0 + $0x18] sm:$0x1] }
  0x13   :  { %v68_v39 = vadd.f32 %v66_v61, %v54_v31  ;;  %v180_v41 = vrot.slane %v176_v32, %v146_v27  ;;  %v191_v42 = vrot.slane %v187_v33, %v146_v27  ;;  %v148_v44 = vmul.f32 %v147_v36, %v1160_v3  ;;  %v997_v26 = vld [vmem:[%s1851_s0 + $0x38] sm:$0x1] }
  0x14   :  { %v95_v43 = vadd.f32 %v93_v49, %v81_v35  ;;  %v159_v45 = vmul.f32 %v1171_v7, %v158_v37  ;;  %v170_v46 = vmul.f32 %v1176_v8, %v169_v38  ;;  %v202_v52 = vrot.slane %v198_v34, %v146_v27 }
  0x15   :  { %v82_v50 = vadd.f32 %v80_v0, %v68_v39  ;;  %v181_v51 = vmul.f32 %v1181_v9, %v180_v41  ;;  %v192_v49 = vmul.f32 %v1197_v14, %v191_v42  ;;  %v209_v56 = vmul.f32 %v1207_v16, %v1216_v19 }
  0x16   :  { %v109_v54 = vadd.f32 %v107_v53, %v95_v43  ;;  %v161_v55 = vadd.f32 %v159_v45, %v148_v44  ;;  %v220_v57 = vmul.f32 %v1224_v21, %v1219_v20  ;;  %v232_v61 = vrot.slane %v1166_v6, 7  ;;  %v1005_v44 = vld [vmem:[%s1851_s0 + $0x78] sm:$0x1] }
  0x17   :  { %v96_v60 = vadd.f32 %v94_v1, %v82_v50  ;;  %v149_v62 = vmul.f32 %v147_v36, %v142_v47  ;;  %v160_v0 = vmul.f32 %v993_v48, %v158_v37  ;;  %v213_v24 = vrot.slane %v209_v56, %v146_v27  ;;  %v999_v1 = vld [vmem:[%s1851_s0 + $0x48] sm:$0x1] }
  0x18   :  { %v123_v2 = vadd.f32 %v121_v58, %v109_v54  ;;  %v172_v23 = vadd.f32 %v170_v46, %v161_v55  ;;  %v224_v53 = vrot.slane %v220_v57, %v146_v27  ;;  %v234_v29 = vmul.f32 %v1245_v30, %v232_v61  ;;  %v1001_v58 = vld [vmem:[%s1851_s0 + $0x58] sm:$0x1] }
  0x19   :  { %v110_v28 = vadd.f32 %v108_v10, %v96_v60  ;;  %v162_v31 = vadd.f32 %v160_v0, %v149_v62  ;;  %v171_v32 = vmul.f32 %v995_v59, %v169_v38  ;;  %v203_v35 = vmul.f32 %v1202_v15, %v202_v52  ;;  %v1003_v10 = vld [vmem:[%s1851_s0 + $0x68] sm:$0x1] }
  0x1a   :  { %v135_v33 = vadd.f32 %v133_v63, %v123_v2  ;;  %v183_v34 = vadd.f32 %v181_v51, %v172_v23  ;;  %v214_v36 = vmul.f32 %v1207_v16, %v213_v24  ;;  %v238_v38 = vrot.slane %v234_v29, %v146_v27 }
  0x1b   :  { %v124_v37 = vadd.f32 %v122_v22, %v110_v28  ;;  %v173_v39 = vadd.f32 %v171_v32, %v162_v31  ;;  %v182_v43 = vmul.f32 %v997_v26, %v180_v41  ;;  %v225_v45 = vmul.f32 %v1224_v21, %v224_v53 }
  0x1c   :  { %138 = vst.msk [vmem:[%s1853_s2] sm:$0xff] %vm137_vm0, %v135_v33  ;;  %v194_v63 = vadd.f32 %v192_v49, %v183_v34  ;;  %v193_v46 = vmul.f32 %v999_v1, %v191_v42  ;;  %v204_v47 = vmul.f32 %v1001_v58, %v202_v52  ;;  %v239_v22 = vmul.f32 %v1245_v30, %v238_v38  ;;  %v247_v58 = vld [vmem:[%s1851_s0 + $0x8] sm:$0x1]  ;;  %v1011_v33 = vld [vmem:[%s1851_s0 + $0x18] sm:$0x1] }
  0x1d   :  { %v136_v48 = vadd.f32 %v134_v40, %v124_v37  ;;  %v184_v27 = vadd.f32 %v182_v43, %v173_v39  ;;  %v215_v50 = vmul.f32 %v1003_v10, %v213_v24  ;;  %v226_v51 = vmul.f32 %v1005_v44, %v224_v53  ;;  %v1007_v40 = vld [vmem:[%s1851_s0 + $0x88] sm:$0x1] }
  0x1e   :  { %v205_v41 = vadd.f32 %v203_v35, %v194_v63  ;;  %v248_v54 = vmul.f32 %v1219_v20, %v1160_v3  ;;  %v251_v55 = vsub.s32 2, %v1164_v5  ;;  %v259_v42 = vmul.f32 %v1171_v7, %v1232_v25  ;;  %v1013_v34 = vld [vmem:[%s1851_s0 + $0x28] sm:$0x1]  ;;  %v1015_v63 = vld [vmem:[%s1851_s0 + $0x38] sm:$0x1] }
  0x1f   :  { %140 = vst.msk [vmem:[%s1853_s2 + $0x8] sm:$0x1] %vm139_vm1, %v136_v48  ;;  %v195_v49 = vadd.f32 %v193_v46, %v184_v27  ;;  %v270_v52 = vmul.f32 %v1176_v8, %v1162_v4  ;;  %v281_v56 = vmul.f32 %v1181_v9, %v1189_v12  ;;  %v292_v60 = vmul.f32 %v1197_v14, %v1192_v13 }
  0x20   :  { %v216_v57 = vadd.f32 %v214_v36, %v205_v41  ;;  %v252_v59 = vrot.slane %v248_v54, %v251_v55  ;;  %v303_v61 = vmul.f32 %v1202_v15, %v1210_v17  ;;  %v263_v0 = vrot.slane %v259_v42, %v251_v55  ;;  %v1019_v54 = vld [vmem:[%s1851_s0 + $0x58] sm:$0x1] }
  0x21   :  { %v206_v62 = vadd.f32 %v204_v47, %v195_v49  ;;  %v274_v2 = vrot.slane %v270_v52, %v251_v55  ;;  %v285_v23 = vrot.slane %v281_v56, %v251_v55  ;;  %v240_v53 = vmul.f32 %v1007_v40, %v238_v38  ;;  %v1021_v49 = vld [vmem:[%s1851_s0 + $0x68] sm:$0x1] }
  0x22   :  { %v227_v24 = vadd.f32 %v225_v45, %v216_v57  ;;  %v253_v26 = vmul.f32 %v252_v59, %v1160_v3  ;;  %v296_v28 = vrot.slane %v292_v60, %v251_v55  ;;  %v264_v31 = vmul.f32 %v1171_v7, %v263_v0  ;;  %v1023_v57 = vld [vmem:[%s1851_s0 + $0x78] sm:$0x1] }
  0x23   :  { %v217_v29 = vadd.f32 %v215_v50, %v206_v62  ;;  %v275_v32 = vmul.f32 %v1176_v8, %v274_v2  ;;  %v307_v1 = vrot.slane %v303_v61, %v251_v55  ;;  %v286_v36 = vmul.f32 %v1181_v9, %v285_v23 }
  0x24   :  { %v241_v35 = vadd.f32 %v239_v22, %v227_v24  ;;  %v297_v10 = vmul.f32 %v1197_v14, %v296_v28  ;;  %v314_v37 = vmul.f32 %v1207_v16, %v1213_v18  ;;  %v266_v39 = vadd.f32 %v264_v31, %v253_v26  ;;  %v1017_v22 = vld [vmem:[%s1851_s0 + $0x48] sm:$0x1] }
  0x25   :  { %v228_v38 = vadd.f32 %v226_v51, %v217_v29  ;;  %v325_v43 = vmul.f32 %v1224_v21, %v1216_v19  ;;  %v336_v44 = vrot.slane %v1166_v6, 6  ;;  %v254_v46 = vmul.f32 %v252_v59, %v247_v58  ;;  %v1025_v58 = vld [vmem:[%s1851_s0 + $0x88] sm:$0x1] }
  0x26   :  { %1008 = vst.msk [vmem:[%s1853_s2 + $0x10] sm:$0xff] %vm137_vm0, %v241_v35  ;;  %v318_v45 = vrot.slane %v314_v37, %v251_v55  ;;  %v265_v47 = vmul.f32 %v1011_v33, %v263_v0  ;;  %v276_v48 = vmul.f32 %v1013_v34, %v274_v2  ;;  %v277_v50 = vadd.f32 %v275_v32, %v266_v39 }
  0x27   :  { %v242_v27 = vadd.f32 %v240_v53, %v228_v38  ;;  %v329_v41 = vrot.slane %v325_v43, %v251_v55  ;;  %v338_v51 = vmul.f32 %v1245_v30, %v336_v44  ;;  %v308_v40 = vmul.f32 %v1202_v15, %v307_v1 }
  0x28   :  { %v319_v42 = vmul.f32 %v1207_v16, %v318_v45  ;;  %v267_v52 = vadd.f32 %v265_v47, %v254_v46  ;;  %v287_v56 = vmul.f32 %v1015_v63, %v285_v23  ;;  %v288_v59 = vadd.f32 %v286_v36, %v277_v50  ;;  %v1029_v50 = vld [vmem:[%s1851_s0 + $0x18] sm:$0x1] }
  0x29   :  { %1009 = vst.msk [vmem:[%s1853_s2 + $0x18] sm:$0x1] %vm139_vm1, %v242_v27  ;;  %v330_v60 = vmul.f32 %v1224_v21, %v329_v41  ;;  %v342_v61 = vrot.slane %v338_v51, %v251_v55  ;;  %v298_v62 = vmul.f32 %v1017_v22, %v296_v28  ;;  %v309_v2 = vmul.f32 %v1019_v54, %v307_v1  ;;  %v351_v27 = vld [vmem:[%s1851_s0 + $0x8] sm:$0x1] }
  0x2a   :  { %v278_v0 = vadd.f32 %v276_v48, %v267_v52  ;;  %v320_v24 = vmul.f32 %v1021_v49, %v318_v45  ;;  %v352_v23 = vmul.f32 %v1216_v19, %v1160_v3  ;;  %v299_v53 = vadd.f32 %v297_v10, %v288_v59  ;;  %v1033_v59 = vld [vmem:[%s1851_s0 + $0x38] sm:$0x1] }
  0x2b   :  { %v343_v26 = vmul.f32 %v1245_v30, %v342_v61  ;;  %v331_v29 = vmul.f32 %v1023_v57, %v329_v41  ;;  %v355_v31 = vsub.s32 3, %v1164_v5  ;;  %v363_v55 = vmul.f32 %v1171_v7, %v1219_v20  ;;  %v1031_v57 = vld [vmem:[%s1851_s0 + $0x28] sm:$0x1] }
  0x2c   :  { %v289_v32 = vadd.f32 %v287_v56, %v278_v0  ;;  %v374_v28 = vmul.f32 %v1176_v8, %v1232_v25  ;;  %v385_v1 = vmul.f32 %v1181_v9, %v1162_v4  ;;  %v310_v33 = vadd.f32 %v308_v40, %v299_v53 }
  0x2d   :  { %v356_v34 = vrot.slane %v352_v23, %v355_v31  ;;  %v396_v35 = vmul.f32 %v1197_v14, %v1189_v12  ;;  %v407_v36 = vmul.f32 %v1202_v15, %v1192_v13  ;;  %v367_v37 = vrot.slane %v363_v55, %v355_v31 }
  0x2e   :  { %v300_v10 = vadd.f32 %v298_v62, %v289_v32  ;;  %v378_v38 = vrot.slane %v374_v28, %v355_v31  ;;  %v389_v39 = vrot.slane %v385_v1, %v355_v31  ;;  %v321_v43 = vadd.f32 %v319_v42, %v310_v33  ;;  %v1035_v32 = vld [vmem:[%s1851_s0 + $0x48] sm:$0x1]  ;;  %v1041_v33 = vld [vmem:[%s1851_s0 + $0x78] sm:$0x1] }
  0x2f   :  { %v344_v44 = vmul.f32 %v1025_v58, %v342_v61  ;;  %v357_v63 = vmul.f32 %v356_v34, %v1160_v3  ;;  %v400_v45 = vrot.slane %v396_v35, %v355_v31  ;;  %v368_v47 = vmul.f32 %v1171_v7, %v367_v37  ;;  %v1037_v58 = vld [vmem:[%s1851_s0 + $0x58] sm:$0x1]  ;;  %v1039_v1 = vld [vmem:[%s1851_s0 + $0x68] sm:$0x1] }
  0x30   :  { %v311_v46 = vadd.f32 %v309_v2, %v300_v10  ;;  %v379_v48 = vmul.f32 %v1176_v8, %v378_v38  ;;  %v411_v22 = vrot.slane %v407_v36, %v355_v31  ;;  %v332_v41 = vadd.f32 %v330_v60, %v321_v43 }
  0x31   :  { %v390_v51 = vmul.f32 %v1181_v9, %v389_v39  ;;  %v401_v54 = vmul.f32 %v1197_v14, %v400_v45  ;;  %v418_v49 = vmul.f32 %v1207_v16, %v1210_v17  ;;  %v370_v42 = vadd.f32 %v368_v47, %v357_v63 }
  0x32   :  { %v322_v40 = vadd.f32 %v320_v24, %v311_v46  ;;  %v429_v52 = vmul.f32 %v1224_v21, %v1213_v18  ;;  %v440_v56 = vrot.slane %v1166_v6, 5  ;;  %v345_v60 = vadd.f32 %v343_v26, %v332_v41 }
  0x33   :  { %v422_v61 = vrot.slane %v418_v49, %v355_v31  ;;  %v358_v62 = vmul.f32 %v356_v34, %v351_v27  ;;  %v369_v0 = vmul.f32 %v1029_v50, %v367_v37  ;;  %v381_v24 = vadd.f32 %v379_v48, %v370_v42  ;;  %v1043_v50 = vld [vmem:[%s1851_s0 + $0x88] sm:$0x1] }
  0x34   :  { %v333_v2 = vadd.f32 %v331_v29, %v322_v40  ;;  %v433_v23 = vrot.slane %v429_v52, %v355_v31  ;;  %v442_v53 = vmul.f32 %v1245_v30, %v440_v56  ;;  %1026 = vst.msk [vmem:[%s1853_s2 + $0x20] sm:$0xff] %vm137_vm0, %v345_v60  ;;  %v412_v26 = vmul.f32 %v1202_v15, %v411_v22 }
  0x35   :  { %v371_v29 = vadd.f32 %v369_v0, %v358_v62  ;;  %v380_v55 = vmul.f32 %v1031_v57, %v378_v38  ;;  %v391_v28 = vmul.f32 %v1033_v59, %v389_v39  ;;  %v392_v35 = vadd.f32 %v390_v51, %v381_v24  ;;  %v455_v24 = vld [vmem:[%s1851_s0 + $0x8] sm:$0x1] }
  0x36   :  { %v346_v34 = vadd.f32 %v344_v44, %v333_v2  ;;  %v423_v36 = vmul.f32 %v1207_v16, %v422_v61  ;;  %v446_v10 = vrot.slane %v442_v53, %v355_v31  ;;  %v434_v37 = vmul.f32 %v1224_v21, %v433_v23 }
  0x37   :  { %v382_v43 = vadd.f32 %v380_v55, %v371_v29  ;;  %v402_v63 = vmul.f32 %v1035_v32, %v400_v45  ;;  %v413_v46 = vmul.f32 %v1037_v58, %v411_v22  ;;  %v403_v38 = vadd.f32 %v401_v54, %v392_v35 }
  0x38   :  { %1027 = vst.msk [vmem:[%s1853_s2 + $0x28] sm:$0x1] %vm139_vm1, %v346_v34  ;;  %v447_v39 = vmul.f32 %v1245_v30, %v446_v10  ;;  %v424_v47 = vmul.f32 %v1039_v1, %v422_v61  ;;  %v435_v48 = vmul.f32 %v1041_v33, %v433_v23  ;;  %v456_v27 = vmul.f32 %v1213_v18, %v1160_v3  ;;  %v1049_v33 = vld [vmem:[%s1851_s0 + $0x28] sm:$0x1] }
  0x39   :  { %v393_v44 = vadd.f32 %v391_v28, %v382_v43  ;;  %v459_v31 = vsub.s32 4, %v1164_v5  ;;  %v467_v45 = vmul.f32 %v1171_v7, %v1216_v19  ;;  %v414_v22 = vadd.f32 %v412_v26, %v403_v38  ;;  %v1047_v26 = vld [vmem:[%s1851_s0 + $0x18] sm:$0x1] }
  0x3a   :  { %v478_v41 = vmul.f32 %v1176_v8, %v1219_v20  ;;  %v489_v51 = vmul.f32 %v1181_v9, %v1232_v25  ;;  %v500_v54 = vmul.f32 %v1197_v14, %v1162_v4  ;;  %v511_v52 = vmul.f32 %v1202_v15, %v1189_v12 }
  0x3b   :  { %v404_v49 = vadd.f32 %v402_v63, %v393_v44  ;;  %v460_v40 = vrot.slane %v456_v27, %v459_v31  ;;  %v471_v42 = vrot.slane %v467_v45, %v459_v31  ;;  %v425_v56 = vadd.f32 %v423_v36, %v414_v22  ;;  %v1057_v22 = vld [vmem:[%s1851_s0 + $0x68] sm:$0x1] }
  0x3c   :  { %v482_v57 = vrot.slane %v478_v41, %v459_v31  ;;  %v493_v59 = vrot.slane %v489_v51, %v459_v31  ;;  %v504_v60 = vrot.slane %v500_v54, %v459_v31  ;;  %v448_v62 = vmul.f32 %v1043_v50, %v446_v10 }
  0x3d   :  { %v415_v61 = vadd.f32 %v413_v46, %v404_v49  ;;  %v461_v0 = vmul.f32 %v460_v40, %v1160_v3  ;;  %v472_v2 = vmul.f32 %v1171_v7, %v471_v42  ;;  %v436_v23 = vadd.f32 %v434_v37, %v425_v56  ;;  %v1051_v37 = vld [vmem:[%s1851_s0 + $0x38] sm:$0x1] }
  0x3e   :  { %v483_v53 = vmul.f32 %v1176_v8, %v482_v57  ;;  %v494_v32 = vmul.f32 %v1181_v9, %v493_v59  ;;  %v515_v58 = vrot.slane %v511_v52, %v459_v31  ;;  %v505_v28 = vmul.f32 %v1197_v14, %v504_v60  ;;  %v1059_v49 = vld [vmem:[%s1851_s0 + $0x78] sm:$0x1] }
  0x3f   :  { %v426_v29 = vadd.f32 %v424_v47, %v415_v61  ;;  %v474_v55 = vadd.f32 %v472_v2, %v461_v0  ;;  %v522_v1 = vmul.f32 %v1207_v16, %v1192_v13  ;;  %v449_v34 = vadd.f32 %v447_v39, %v436_v23  ;;  %v1053_v47 = vld [vmem:[%s1851_s0 + $0x48] sm:$0x1] }
  0x40   :  { %v533_v35 = vmul.f32 %v1224_v21, %v1210_v17  ;;  %v544_v36 = vrot.slane %v1166_v6, 4  ;;  %v462_v10 = vmul.f32 %v460_v40, %v455_v24  ;;  %v473_v38 = vmul.f32 %v1047_v26, %v471_v42 }
  0x41   :  { %v437_v43 = vadd.f32 %v435_v48, %v426_v29  ;;  %v485_v63 = vadd.f32 %v483_v53, %v474_v55  ;;  %v526_v46 = vrot.slane %v522_v1, %v459_v31  ;;  %1044 = vst.msk [vmem:[%s1853_s2 + $0x30] sm:$0xff] %vm137_vm0, %v449_v34  ;;  %v516_v39 = vmul.f32 %v1202_v15, %v515_v58  ;;  %v1055_v48 = vld [vmem:[%s1851_s0 + $0x58] sm:$0x1] }
  0x42   :  { %v537_v44 = vrot.slane %v533_v35, %v459_v31  ;;  %v546_v27 = vmul.f32 %v1245_v30, %v544_v36  ;;  %v484_v45 = vmul.f32 %v1049_v33, %v482_v57  ;;  %v475_v51 = vadd.f32 %v473_v38, %v462_v10 }
  0x43   :  { %v450_v50 = vadd.f32 %v448_v62, %v437_v43  ;;  %v496_v41 = vadd.f32 %v494_v32, %v485_v63  ;;  %v495_v54 = vmul.f32 %v1051_v37, %v493_v59  ;;  %v527_v40 = vmul.f32 %v1207_v16, %v526_v46 }
  0x44   :  { %v538_v42 = vmul.f32 %v1224_v21, %v537_v44  ;;  %v550_v52 = vrot.slane %v546_v27, %v459_v31  ;;  %v506_v56 = vmul.f32 %v1053_v47, %v504_v60  ;;  %v486_v61 = vadd.f32 %v484_v45, %v475_v51  ;;  %v1061_v60 = vld [vmem:[%s1851_s0 + $0x88] sm:$0x1] }
  0x45   :  { %1045 = vst.msk [vmem:[%s1853_s2 + $0x38] sm:$0x1] %vm139_vm1, %v450_v50  ;;  %v507_v57 = vadd.f32 %v505_v28, %v496_v41  ;;  %v517_v62 = vmul.f32 %v1055_v48, %v515_v58  ;;  %v528_v0 = vmul.f32 %v1057_v22, %v526_v46  ;;  %v539_v2 = vmul.f32 %v1059_v49, %v537_v44  ;;  %v1065_v44 = vld [vmem:[%s1851_s0 + $0x18] sm:$0x1]  ;;  %v1067_v50 = vld [vmem:[%s1851_s0 + $0x28] sm:$0x1] }
  0x46   :  { %v551_v59 = vmul.f32 %v1245_v30, %v550_v52  ;;  %v560_v24 = vmul.f32 %v1210_v17, %v1160_v3  ;;  %v563_v23 = vsub.s32 5, %v1164_v5  ;;  %v497_v31 = vadd.f32 %v495_v54, %v486_v61 }
  0x47   :  { %v518_v53 = vadd.f32 %v516_v39, %v507_v57  ;;  %v571_v32 = vmul.f32 %v1171_v7, %v1213_v18  ;;  %v582_v58 = vmul.f32 %v1176_v8, %v1216_v19  ;;  %v593_v29 = vmul.f32 %v1181_v9, %v1219_v20  ;;  %v559_v39 = vld [vmem:[%s1851_s0 + $0x8] sm:$0x1] }
  0x48   :  { %v564_v26 = vrot.slane %v560_v24, %v563_v23  ;;  %v604_v55 = vmul.f32 %v1197_v14, %v1232_v25  ;;  %v615_v28 = vmul.f32 %v1202_v15, %v1162_v4  ;;  %v508_v33 = vadd.f32 %v506_v56, %v497_v31  ;;  %v1071_v24 = vld [vmem:[%s1851_s0 + $0x48] sm:$0x1] }
  0x49   :  { %v529_v1 = vadd.f32 %v527_v40, %v518_v53  ;;  %v575_v34 = vrot.slane %v571_v32, %v563_v23  ;;  %v586_v35 = vrot.slane %v582_v58, %v563_v23  ;;  %v552_v36 = vmul.f32 %v1061_v60, %v550_v52  ;;  %v1069_v40 = vld [vmem:[%s1851_s0 + $0x38] sm:$0x1] }
  0x4a   :  { %v565_v10 = vmul.f32 %v564_v26, %v1160_v3  ;;  %v597_v37 = vrot.slane %v593_v29, %v563_v23  ;;  %v608_v43 = vrot.slane %v604_v55, %v563_v23  ;;  %v519_v46 = vadd.f32 %v517_v62, %v508_v33  ;;  %v1073_v53 = vld [vmem:[%s1851_s0 + $0x58] sm:$0x1] }
  0x4b   :  { %v540_v63 = vadd.f32 %v538_v42, %v529_v1  ;;  %v576_v38 = vmul.f32 %v1171_v7, %v575_v34  ;;  %v587_v47 = vmul.f32 %v1176_v8, %v586_v35  ;;  %v619_v48 = vrot.slane %v615_v28, %v563_v23  ;;  %v1077_v1 = vld [vmem:[%s1851_s0 + $0x78] sm:$0x1] }
  0x4c   :  { %v598_v27 = vmul.f32 %v1181_v9, %v597_v37  ;;  %v609_v45 = vmul.f32 %v1197_v14, %v608_v43  ;;  %v626_v22 = vmul.f32 %v1207_v16, %v1189_v12  ;;  %v530_v51 = vadd.f32 %v528_v0, %v519_v46 }
  0x4d   :  { %v553_v41 = vadd.f32 %v551_v59, %v540_v63  ;;  %v578_v54 = vadd.f32 %v576_v38, %v565_v10  ;;  %v637_v49 = vmul.f32 %v1224_v21, %v1192_v13  ;;  %v648_v52 = vrot.slane %v1166_v6, 3 }
  0x4e   :  { %v630_v42 = vrot.slane %v626_v22, %v563_v23  ;;  %v566_v56 = vmul.f32 %v564_v26, %v559_v39  ;;  %v577_v57 = vmul.f32 %v1065_v44, %v575_v34  ;;  %v541_v61 = vadd.f32 %v539_v2, %v530_v51  ;;  %v1075_v2 = vld [vmem:[%s1851_s0 + $0x68] sm:$0x1] }
  0x4f   :  { %1062 = vst.msk [vmem:[%s1853_s2 + $0x40] sm:$0xff] %vm137_vm0, %v553_v41  ;;  %v589_v62 = vadd.f32 %v587_v47, %v578_v54  ;;  %v641_v0 = vrot.slane %v637_v49, %v563_v23  ;;  %v588_v59 = vmul.f32 %v1067_v50, %v586_v35  ;;  %v620_v31 = vmul.f32 %v1202_v15, %v619_v48  ;;  %v1079_v44 = vld [vmem:[%s1851_s0 + $0x88] sm:$0x1] }
  0x50   :  { %v650_v60 = vmul.f32 %v1245_v30, %v648_v52  ;;  %v579_v32 = vadd.f32 %v577_v57, %v566_v56  ;;  %v599_v58 = vmul.f32 %v1069_v40, %v597_v37  ;;  %v554_v26 = vadd.f32 %v552_v36, %v541_v61 }
  0x51   :  { %v600_v29 = vadd.f32 %v598_v27, %v589_v62  ;;  %v631_v55 = vmul.f32 %v1207_v16, %v630_v42  ;;  %v642_v28 = vmul.f32 %v1224_v21, %v641_v0  ;;  %v610_v35 = vmul.f32 %v1071_v24, %v608_v43 }
  0x52   :  { %v654_v33 = vrot.slane %v650_v60, %v563_v23  ;;  %v590_v34 = vadd.f32 %v588_v59, %v579_v32  ;;  %v621_v10 = vmul.f32 %v1073_v53, %v619_v48  ;;  %1063 = vst.msk [vmem:[%s1853_s2 + $0x48] sm:$0x1] %vm139_vm1, %v554_v26  ;;  %v632_v36 = vmul.f32 %v1075_v2, %v630_v42  ;;  %v663_v53 = vld [vmem:[%s1851_s0 + $0x8] sm:$0x1] }
  0x53   :  { %v611_v37 = vadd.f32 %v609_v45, %v600_v29  ;;  %v664_v63 = vmul.f32 %v1192_v13, %v1160_v3  ;;  %v667_v46 = vsub.s32 6, %v1164_v5  ;;  %v643_v39 = vmul.f32 %v1077_v1, %v641_v0 }
  0x54   :  { %v655_v38 = vmul.f32 %v1245_v30, %v654_v33  ;;  %v601_v47 = vadd.f32 %v599_v58, %v590_v34  ;;  %v675_v23 = vmul.f32 %v1171_v7, %v1210_v17  ;;  %v686_v45 = vmul.f32 %v1176_v8, %v1213_v18 }
  0x55   :  { %v622_v43 = vadd.f32 %v620_v31, %v611_v37  ;;  %v668_v27 = vrot.slane %v664_v63, %v667_v46  ;;  %v697_v48 = vmul.f32 %v1181_v9, %v1216_v19  ;;  %v708_v41 = vmul.f32 %v1197_v14, %v1219_v20  ;;  %v1093_v63 = vld [vmem:[%s1851_s0 + $0x68] sm:$0x1] }
  0x56   :  { %v612_v22 = vadd.f32 %v610_v35, %v601_v47  ;;  %v679_v50 = vrot.slane %v675_v23, %v667_v46  ;;  %v719_v51 = vmul.f32 %v1202_v15, %v1232_v25  ;;  %v690_v40 = vrot.slane %v686_v45, %v667_v46 }
  0x57   :  { %v633_v54 = vadd.f32 %v631_v55, %v622_v43  ;;  %v669_v49 = vmul.f32 %v668_v27, %v1160_v3  ;;  %v701_v42 = vrot.slane %v697_v48, %v667_v46  ;;  %v656_v56 = vmul.f32 %v1079_v44, %v654_v33  ;;  %v1083_v3 = vld [vmem:[%s1851_s0 + $0x18] sm:$0x1]  ;;  %v1666_v43 = vld [vmem:[%s1851_s0] sm:$0xff] }
  0x58   :  { %v623_v52 = vadd.f32 %v621_v10, %v612_v22  ;;  %v680_v57 = vmul.f32 %v1171_v7, %v679_v50  ;;  %v712_v61 = vrot.slane %v708_v41, %v667_v46  ;;  %v691_v0 = vmul.f32 %v1176_v8, %v690_v40  ;;  %v1085_v8 = vld [vmem:[%s1851_s0 + $0x28] sm:$0x1]  ;;  %v1087_v55 = vld [vmem:[%s1851_s0 + $0x38] sm:$0x1]  ;;  %v1673_v22 = vld [vmem:[%s1851_s0 + $0x10] sm:$0xff] }
  0x59   :  { %v644_v62 = vadd.f32 %v642_v28, %v633_v54  ;;  %v723_v59 = vrot.slane %v719_v51, %v667_v46  ;;  %v730_v24 = vmul.f32 %v1207_v16, %v1162_v4  ;;  %v702_v7 = vmul.f32 %v1181_v9, %v701_v42  ;;  %v1687_v51 = vld [vmem:[%s1851_s0 + $0x30] sm:$0xff]  ;;  %v1692_v54 = vld [vmem:[%s1851_s0 + $0x40] sm:$0xff] }
  0x5a   :  { %v634_v31 = vadd.f32 %v632_v36, %v623_v52  ;;  %v682_v60 = vadd.f32 %v680_v57, %v669_v49  ;;  %v713_v32 = vmul.f32 %v1197_v14, %v712_v61  ;;  %v741_v26 = vmul.f32 %v1224_v21, %v1189_v12  ;;  %v1089_v14 = vld [vmem:[%s1851_s0 + $0x48] sm:$0x1]  ;;  %v1091_v36 = vld [vmem:[%s1851_s0 + $0x58] sm:$0x1]  ;;  %v1697_v49 = vld [vmem:[%s1851_s0 + $0x50] sm:$0xff] }
  0x5b   :  { %v657_v58 = vadd.f32 %v655_v38, %v644_v62  ;;  %v734_v2 = vrot.slane %v730_v24, %v667_v46  ;;  %v752_v29 = vrot.slane %v1166_v6, 2  ;;  %v670_v9 = vmul.f32 %v668_v27, %v663_v53  ;;  %v1097_v62 = vld [vmem:[%s1851_s0 + $0x88] sm:$0x1] }
  0x5c   :  { %v645_v28 = vadd.f32 %v643_v39, %v634_v31  ;;  %v693_v1 = vadd.f32 %v691_v0, %v682_v60  ;;  %v681_v33 = vmul.f32 %v1083_v3, %v679_v50  ;;  %v724_v34 = vmul.f32 %v1202_v15, %v723_v59  ;;  %v1095_v15 = vld [vmem:[%s1851_s0 + $0x78] sm:$0x1]  ;;  %v1678_v50 = vld [vmem:[%s1851_s0 + $0x20] sm:$0xff] }
  0x5d   :  { %1080 = vst.msk [vmem:[%s1853_s2 + $0x50] sm:$0xff] %vm137_vm0, %v657_v58  ;;  %v745_v35 = vrot.slane %v741_v26, %v667_v46  ;;  %v754_v10 = vmul.f32 %v1245_v30, %v752_v29  ;;  %v692_v37 = vmul.f32 %v1085_v8, %v690_v40  ;;  %v703_v23 = vmul.f32 %v1087_v55, %v701_v42  ;;  %v1725_v29 = vld [vmem:[%s1851_s0 + $0x70] sm:$0xff] }
  0x5e   :  { %v658_v38 = vadd.f32 %v656_v56, %v645_v28  ;;  %v704_v47 = vadd.f32 %v702_v7, %v693_v1  ;;  %v683_v39 = vadd.f32 %v681_v33, %v670_v9  ;;  %v735_v44 = vmul.f32 %v1207_v16, %v734_v2  ;;  %v767_v33 = vld [vmem:[%s1851_s0 + $0x8] sm:$0x1] }
  0x5f   :  { %v746_v27 = vmul.f32 %v1224_v21, %v745_v35  ;;  %v758_v45 = vrot.slane %v754_v10, %v667_v46  ;;  %v714_v48 = vmul.f32 %v1089_v14, %v712_v61  ;;  %v725_v21 = vmul.f32 %v1091_v36, %v723_v59  ;;  %v1101_v14 = vld [vmem:[%s1851_s0 + $0x18] sm:$0x1]  ;;  %v1103_v36 = vld [vmem:[%s1851_s0 + $0x28] sm:$0x1] }
  0x60   :  { %1081 = vst.msk [vmem:[%s1853_s2 + $0x58] sm:$0x1] %vm139_vm1, %v658_v38  ;;  %v715_v16 = vadd.f32 %v713_v32, %v704_v47  ;;  %v694_v41 = vadd.f32 %v692_v37, %v683_v39  ;;  %v736_v46 = vmul.f32 %v1093_v63, %v734_v2  ;;  %v747_v42 = vmul.f32 %v1095_v15, %v745_v35  ;;  %v1719_v32 = vld [vmem:[%s1851_s0 + $0x60] sm:$0xff]  ;;  %v1105_v15 = vld [vmem:[%s1851_s0 + $0x38] sm:$0x1] }
  0x61   :  { %v759_v40 = vmul.f32 %v1245_v30, %v758_v45  ;;  %v768_v52 = vmul.f32 %v1666_v43, %v1189_v12  ;;  %v771_v56 = vsub.s32 7, %v1164_v5  ;;  %v779_v0 = vmul.f32 %v1673_v22, %v1192_v13 }
  0x62   :  { %v726_v57 = vadd.f32 %v724_v34, %v715_v16  ;;  %v705_v61 = vadd.f32 %v703_v23, %v694_v41  ;;  %v790_v59 = vmul.f32 %v1678_v50, %v1210_v17  ;;  %v801_v30 = vmul.f32 %v1687_v51, %v1213_v18  ;;  %v1747_v23 = vld [vmem:[%s1851_s0 + $0x80] sm:$0xff] }
  0x63   :  { %v772_v24 = vrot.slane %v768_v52, %v771_v56  ;;  %v812_v53 = vmul.f32 %v1692_v54, %v1216_v19  ;;  %v823_v5 = vmul.f32 %v1697_v49, %v1219_v20  ;;  %v783_v60 = vrot.slane %v779_v0, %v771_v56  ;;  %v1109_v52 = vld [vmem:[%s1851_s0 + $0x58] sm:$0x1] }
  0x64   :  { %v737_v3 = vadd.f32 %v735_v44, %v726_v57  ;;  %v716_v31 = vadd.f32 %v714_v48, %v705_v61  ;;  %v794_v7 = vrot.slane %v790_v59, %v771_v56  ;;  %v760_v8 = vmul.f32 %v1097_v62, %v758_v45  ;;  %v871_v59 = vld [vmem:[%s1851_s0 + $0x8] sm:$0x1] }
  0x65   :  { %v773_v58 = vmul.f32 %v772_v24, %v1666_v43  ;;  %v805_v2 = vrot.slane %v801_v30, %v771_v56  ;;  %v816_v26 = vrot.slane %v812_v53, %v771_v56  ;;  %v784_v1 = vmul.f32 %v1673_v22, %v783_v60 }
  0x66   :  { %v748_v55 = vadd.f32 %v746_v27, %v737_v3  ;;  %v727_v28 = vadd.f32 %v725_v21, %v716_v31  ;;  %v795_v9 = vmul.f32 %v1678_v50, %v794_v7  ;;  %v827_v10 = vrot.slane %v823_v5, %v771_v56  ;;  %v1113_v31 = vld [vmem:[%s1851_s0 + $0x78] sm:$0x1] }
  0x67   :  { %v806_v34 = vmul.f32 %v1687_v51, %v805_v2  ;;  %v817_v35 = vmul.f32 %v1692_v54, %v816_v26  ;;  %v834_v37 = vmul.f32 %v1719_v32, %v1232_v25  ;;  %v786_v47 = vadd.f32 %v784_v1, %v773_v58 }
  0x68   :  { %v761_v63 = vadd.f32 %v759_v40, %v748_v55  ;;  %v738_v38 = vadd.f32 %v736_v46, %v727_v28  ;;  %v845_v39 = vmul.f32 %v1725_v29, %v1162_v4  ;;  %v856_v27 = vrot.slane %v1166_v6, 1  ;;  %v1107_v40 = vld [vmem:[%s1851_s0 + $0x48] sm:$0x1] }
  0x69   :  { %v838_v44 = vrot.slane %v834_v37, %v771_v56  ;;  %v774_v45 = vmul.f32 %v772_v24, %v767_v33  ;;  %v785_v48 = vmul.f32 %v1101_v14, %v783_v60  ;;  %v797_v41 = vadd.f32 %v795_v9, %v786_v47  ;;  %v1119_v24 = vld [vmem:[%s1851_s0 + $0x18] sm:$0x1]  ;;  %v1121_v60 = vld [vmem:[%s1851_s0 + $0x28] sm:$0x1] }
  0x6a   :  { %1098 = vst.msk [vmem:[%s1853_s2 + $0x60] sm:$0xff] %vm137_vm0, %v761_v63  ;;  %v749_v16 = vadd.f32 %v747_v42, %v738_v38  ;;  %v849_v21 = vrot.slane %v845_v39, %v771_v56  ;;  %v796_v46 = vmul.f32 %v1103_v36, %v794_v7  ;;  %v828_v57 = vmul.f32 %v1697_v49, %v827_v10  ;;  %v1111_v42 = vld [vmem:[%s1851_s0 + $0x68] sm:$0x1] }
  0x6b   :  { %v858_v61 = vmul.f32 %v1747_v23, %v856_v27  ;;  %v787_v62 = vadd.f32 %v785_v48, %v774_v45  ;;  %v807_v0 = vmul.f32 %v1105_v15, %v805_v2  ;;  %v808_v53 = vadd.f32 %v806_v34, %v797_v41  ;;  %v1129_v15 = vld [vmem:[%s1851_s0 + $0x68] sm:$0x1] }
  0x6c   :  { %v762_v30 = vadd.f32 %v760_v8, %v749_v16  ;;  %v839_v5 = vmul.f32 %v1719_v32, %v838_v44  ;;  %v850_v3 = vmul.f32 %v1725_v29, %v849_v21  ;;  %v818_v2 = vmul.f32 %v1107_v40, %v816_v26  ;;  %v1123_v8 = vld [vmem:[%s1851_s0 + $0x38] sm:$0x1] }
  0x6d   :  { %v862_v7 = vrot.slane %v858_v61, %v771_v56  ;;  %v798_v58 = vadd.f32 %v796_v46, %v787_v62  ;;  %v829_v55 = vmul.f32 %v1109_v52, %v827_v10  ;;  %v819_v28 = vadd.f32 %v817_v35, %v808_v53  ;;  %v1125_v56 = vld [vmem:[%s1851_s0 + $0x48] sm:$0x1]  ;;  %v1127_v26 = vld [vmem:[%s1851_s0 + $0x58] sm:$0x1] }
  0x6e   :  { %1099 = vst.msk [vmem:[%s1853_s2 + $0x68] sm:$0x1] %vm139_vm1, %v762_v30  ;;  %v840_v1 = vmul.f32 %v1111_v42, %v838_v44  ;;  %v872_v9 = vmul.f32 %v871_v59, %v1162_v4  ;;  %v883_v33 = vmul.f32 %v1119_v24, %v1189_v12  ;;  %v851_v10 = vmul.f32 %v1113_v31, %v849_v21  ;;  %v1133_v21 = vld [vmem:[%s1851_s0 + $0x88] sm:$0x1] }
  0x6f   :  { %v863_v14 = vmul.f32 %v1747_v23, %v862_v7  ;;  %v809_v34 = vadd.f32 %v807_v0, %v798_v58  ;;  %v894_v37 = vmul.f32 %v1121_v60, %v1192_v13  ;;  %v830_v35 = vadd.f32 %v828_v57, %v819_v28  ;;  %v1115_v13 = vld [vmem:[%s1851_s0 + $0x88] sm:$0x1] }
  0x70   :  { %v876_v36 = vrot.slane %v872_v9, %v1186_v11  ;;  %v887_v4 = vrot.slane %v883_v33, %v1186_v11  ;;  %v905_v12 = vmul.f32 %v1123_v8, %v1210_v17  ;;  %v916_v47 = vmul.f32 %v1125_v56, %v1213_v18  ;;  %v1131_v18 = vld [vmem:[%s1851_s0 + $0x78] sm:$0x1] }
  0x71   :  { %v820_v63 = vadd.f32 %v818_v2, %v809_v34  ;;  %v898_v38 = vrot.slane %v894_v37, %v1186_v11  ;;  %v927_v39 = vmul.f32 %v1127_v26, %v1216_v19  ;;  %v841_v44 = vadd.f32 %v839_v5, %v830_v35 }
  0x72   :  { %v877_v27 = vmul.f32 %v876_v36, %v1666_v43  ;;  %v888_v17 = vmul.f32 %v1673_v22, %v887_v4  ;;  %v909_v45 = vrot.slane %v905_v12, %v1186_v11  ;;  %v920_v16 = vrot.slane %v916_v47, %v1186_v11 }
  0x73   :  { %v831_v19 = vadd.f32 %v829_v55, %v820_v63  ;;  %v899_v48 = vmul.f32 %v1678_v50, %v898_v38  ;;  %v931_v41 = vrot.slane %v927_v39, %v1186_v11  ;;  %v852_v43 = vadd.f32 %v850_v3, %v841_v44 }
  0x74   :  { %v890_v46 = vadd.f32 %v888_v17, %v877_v27  ;;  %v910_v22 = vmul.f32 %v1687_v51, %v909_v45  ;;  %v938_v40 = vmul.f32 %v1129_v15, %v1219_v20  ;;  %v864_v57 = vmul.f32 %v1115_v13, %v862_v7 }
  0x75   :  { %v842_v52 = vadd.f32 %v840_v1, %v831_v19  ;;  %v921_v61 = vmul.f32 %v1692_v54, %v920_v16  ;;  %v949_v50 = vmul.f32 %v1131_v18, %v1232_v25  ;;  %v865_v62 = vadd.f32 %v863_v14, %v852_v43 }
  0x76   :  { %v901_v0 = vadd.f32 %v899_v48, %v890_v46  ;;  %v942_v42 = vrot.slane %v938_v40, %v1186_v11  ;;  %v960_v30 = vmul.f32 %v1133_v21, %v1166_v6  ;;  %v878_v5 = vmul.f32 %v876_v36, %v871_v59 }
  0x77   :  { %v853_v53 = vadd.f32 %v851_v10, %v842_v52  ;;  %v889_v3 = vmul.f32 %v1119_v24, %v887_v4  ;;  %1116 = vst.msk [vmem:[%s1853_s2 + $0x70] sm:$0xff] %vm137_vm0, %v865_v62  ;;  %v932_v51 = vmul.f32 %v1697_v49, %v931_v41  ;;  %v953_v54 = vrot.slane %v949_v50, %v1186_v11 }
  0x78   :  { %v912_v20 = vadd.f32 %v910_v22, %v901_v0  ;;  %v900_v25 = vmul.f32 %v1121_v60, %v898_v38  ;;  %v911_v58 = vmul.f32 %v1123_v8, %v909_v45  ;;  %v943_v6 = vmul.f32 %v1719_v32, %v942_v42 }
  0x79   :  { %v866_v31 = vadd.f32 %v864_v57, %v853_v53  ;;  %v891_v7 = vadd.f32 %v889_v3, %v878_v5  ;;  %v964_v59 = vrot.slane %v960_v30, %v1186_v11  ;;  %v922_v55 = vmul.f32 %v1125_v56, %v920_v16 }
  0x7a   :  { %v923_v2 = vadd.f32 %v921_v61, %v912_v20  ;;  %v954_v49 = vmul.f32 %v1725_v29, %v953_v54  ;;  %v933_v60 = vmul.f32 %v1127_v26, %v931_v41  ;;  %v944_v14 = vmul.f32 %v1129_v15, %v942_v42 }
  0x7b   :  { %1117 = vst.msk [vmem:[%s1853_s2 + $0x78] sm:$0x1] %vm139_vm1, %v866_v31  ;;  %v902_v24 = vadd.f32 %v900_v25, %v891_v7  ;;  %v965_v8 = vmul.f32 %v1747_v23, %v964_v59  ;;  %v955_v11 = vmul.f32 %v1131_v18, %v953_v54  ;;  %v966_v35 = vmul.f32 %v1133_v21, %v964_v59 }
  0x7c   :  { %v934_v28 = vadd.f32 %v932_v51, %v923_v2 }
  0x7d   :  { %v913_v1 = vadd.f32 %v911_v58, %v902_v24 }
  0x7e   :  { %v945_v9 = vadd.f32 %v943_v6, %v934_v28 }
  0x7f   :  { %v924_v33 = vadd.f32 %v922_v55, %v913_v1 }
  0x80   :  { %v956_v32 = vadd.f32 %v954_v49, %v945_v9 }
  0x81   :  { %v935_v34 = vadd.f32 %v933_v60, %v924_v33 }
  0x82   :  { %v967_v10 = vadd.f32 %v965_v8, %v956_v32 }
  0x83   :  { %v946_v37 = vadd.f32 %v944_v14, %v935_v34 }
  0x84   :  { %1134 = vst.msk [vmem:[%s1853_s2 + $0x80] sm:$0xff] %vm137_vm0, %v967_v10 }
  0x85   :  { %v957_v56 = vadd.f32 %v955_v11, %v946_v37 }
  0x87   :  { %v968_v29 = vadd.f32 %v966_v35, %v957_v56 }
  0x89   :  { %1135 = vst.msk [vmem:[%s1853_s2 + $0x88] sm:$0x1] %vm139_vm1, %v968_v29 }

// kernel: custom-call.31
= control target key start
LH: loop header
LB: loop body
LE: loop exit
PB: predicated region body
PF: predicated region fallthrough
CT: control target
= control target key end

     0   :  { %5 = vsyncpa [#allocation3], 0  ;;  %s942_s0 = inlined_call_operand.vmem [shape: f32[8,9,9], index: 0, kind: input, shape index: {}]   ;;  %s943_s1 = inlined_call_operand.vmem [shape: f32[8,9,9], index: 1, kind: output, shape index: {0}]   ;;  %s944_s2 = inlined_call_operand.hbm [shape: s32[8,9], index: 2, kind: output, shape index: {1}]   ;;  %s945_s3 = inlined_call_operand.vmem [shape: s32[8,9], index: 3, kind: output, shape index: {2}]  }
   0x1   :  { %7 = vsyncpa [#allocation3 + $0x1], 0  ;;  %s743_s12 = smov 0   ;;  %s745_s13 = smov 0  }
   0x2   :  { %s747_s14 = smov 0   ;;  %s749_s15 = smov 0  }
   0x3 LB: > { %s764_s16 = sadd.s32 4294967295, %s711_s15   ;;  %s555_s17 = sadd.s32 4294967294, %s711_s15   ;;  %s711_s15 = sphi %s749_s15, %s953_s15   ;;  %s707_s14 = sphi %s747_s14, %s952_s14   ;;  %s703_s13 = sphi %s745_s13, %s951_s13   ;;  %s699_s12 = sphi %s743_s12, %s950_s12  }
   0x4   : > { %s768_s18 = sadd.s32 1, %s711_s15   ;;  %s17_s19 = sshrl.u32 %s711_s15, 3 }
   0x5   : > { %s18_s20 = sshrl.u32 %s768_s18, 3  ;;  %s22_s21 = sadd.s32 1, %s707_s14 }
   0x6   : > { %s19_s22 = ssub.s32 %s17_s19, %s18_s20  ;;  %p32_p0 = scmp.ne.s32.totalorder %s707_s14, %s703_s13 }
   0x7   : > { %p20_p1 = scmp.eq.s32.totalorder %s19_s22, 0  ;;  %p33_p2 = scmp.eq.s32.totalorder %s764_s16, 7 }
   0x8   : > { %p38_p3 = scmp.ne.s32.totalorder %s703_s13, %s699_s12  ;;  %p39_p4 = scmp.eq.s32.totalorder %s555_s17, 7 }
   0x9   : > { %s779_s23 = scalar_select %p20_p1, %s707_s14, %s22_s21  }
   0xa   : > { %p781_p5 = por %p33_p2, %p32_p0  ;;  %p785_p6 = por %p39_p4, %p38_p3 }
   0xb   : > { %p557_p7 = scmp.ge.s32.totalorder %s711_s15, 8 }
   0xc   : > { %s85_s26 = sand.u32 (!%p557_p7), 1, %s711_s15   ;;  %s559_s27 = sshll.u32 (!%p557_p7), %s711_s15, 4 }
   0xd   : > { %83 = sbr.rel (%p557_p7) target bundleno = 20 (0x14), region = 16  ;;  %s558_s28 = sshll.u32 (!%p557_p7), %s85_s26, 4 }
   0xe   : > { %s89_s4 = scalar_lea.vmem (!%p557_p7), %s942_s0, %s559_s27  ;;  %s87_s5 = scalar_lea.vmem (!%p557_p7), [#allocation0], %s558_s28 }
  0x12   : > { %v102_v0 = vld [vmem:[%s89_s4] sm:$0xff]  ;;  %v104_v1 = vld [vmem:[%s89_s4 + $0x8] sm:$0xff] }
  0x13   : > { %103 = vst [vmem:[%s87_s5] sm:$0xff] %v102_v0  ;;  %105 = vst [vmem:[%s87_s5 + $0x8] sm:$0xff] %v104_v1 }
  0x14 PF: > { %p560_p8 = scmp.ge.s32.totalorder %s711_s15, 1  ;;  %p110_p9 = scmp.lt.s32.totalorder %s711_s15, 9 }
  0x16   : > { %p111_p10 = pnand %p560_p8, %p110_p9 }
  0x18   : > { %114 = sbr.rel (%p111_p10) target bundleno = 557 (0x22d), region = 39 }
  0x1d   : > { %s117_s6 = sand.u32 1, %s764_s16   ;;  %s132_s7 = sand.u32 1, %s703_s13   ;;  %v154_v2 = vlaneseq  ;;  %v721_v6 = vmov 0  }
  0x1e   : > { %s561_s8 = sshll.u32 %s117_s6, 4  ;;  %s801_s9 = sshll.u32 %s132_s7, 3 }
  0x1f   : > { %v804_v3 = vshrl.u32 %v154_v2, 7  ;;  %s119_s10 = scalar_lea.vmem [#allocation0], %s561_s8  ;;  %s806_s11 = scalar_lea.vmem [#allocation1], %s561_s8 }
  0x20   : > { %v143_v4 = vld [vmem:[%s119_s10] sm:$0xff]  ;;  %v565_v5 = vld [vmem:[%s119_s10 + $0x8] sm:$0xff]  ;;  %s149_s17 = sand.u32 7, %s764_s16   ;;  %s134_s19 = scalar_lea.vmem [#allocation2], %s801_s9 }
  0x21   : > { %144 = vst [vmem:[%s806_s11] sm:$0xff] %v143_v4  ;;  %566 = vst [vmem:[%s806_s11 + $0x8] sm:$0xff] %v565_v5  ;;  %s814_s20 = scalar_lea.vmem %s134_s19, %s149_s17 [#allocation2]  ;;  %s140_s21 = scalar_lea.vmem [#allocation4], %s801_s9 }
  0x22   : > { %s819_s22 = scalar_lea.vmem %s140_s21, %s149_s17 [#allocation4]  ;;  %153 = vst [vmem:[%s814_s20] sm:$0x1] %v721_v6  ;;  %s713_s26 = smov 0  }
  0x23 LB: >> { %s567_s27 = sshll.u32 %s715_s26, 3  ;;  %s162_s26 = sadd.s32 1, %s715_s26   ;;  %s715_s26 = sphi %s713_s26, %s162_s26  }
  0x24   : >> { %v166_v7 = vstv %s567_s27  ;;  %s164_s28 = scalar_lea.vmem [#allocation5], %s567_s27  ;;  %p159_p11 = scmp.ge.s32.totalorder %s162_s26, 2  }
  0x25   : >> { %v167_v8 = vadd.s32 %v166_v7, %v804_v3  ;;  %s823_s29 = smov (%p159_p11), 0  }
  0x26   : > { %161 = sbr.rel (!%p159_p11) target bundleno = 35 (0x23), region = 195 }
  0x27   : >> { %168 = vst [vmem:[%s164_s28] sm:$0xff] %v167_v8 }
  0x2b LB: >> { %v179_v9 = vld [vmem:[%s806_s11] sm:$0xff]  ;;  %v570_v10 = vld [vmem:[%s806_s11 + $0x8] sm:$0xff]  ;;  %v831_v11 = vadd.s32 8, %v804_v3  ;;  %v834_v13 = vstv %s719_s29  ;;  %s237_s30 = ssub.s32 128, %s719_s29  ;;  %v243_v46 = vand.u32 127, %v154_v2  ;;  %s249_s4 = scalar_lea.vmem %s806_s11, %s719_s29 [#allocation1]  ;;  %s719_s29 = sphi %s823_s29, %s174_s29  }
  0x2c   : >> { %v180_v12 = vand.u32 2147483647, %v179_v9  ;;  %v192_v14 = vand.u32 2147483647, %v570_v10  ;;  %vm183_vm1 = vcmp.ge.s32.totalorder %v804_v3, %v834_v13  ;;  %v246_v49 = vld [vmem:[%s814_s20] ss:$0 sm:$0xff] }
  0x2d   : >> { %vm196_vm0 = vcmp.lt.s32.totalorder %v831_v11, 9  ;;  %vm195_vm3 = vcmp.ge.s32.totalorder %v831_v11, %v834_v13  ;;  %vm267_vm15 = vcmp.gt.s32.totalorder %v243_v46, %v834_v13  ;;  %v251_v50 = vld [vmem:[%s249_s4] ss:$0 sm:$0xff]  ;;  %s255_s6 = scalar_lea.vmem [#allocation5], %s719_s29  ;;  %s174_s29 = sadd.s32 1, %s719_s29  }
  0x2e   : >> { %vm569_vm2 = vcmp.gt.f32.partialorder %v180_v12, -inf  ;;  %vm197_vm5 = vmand %vm195_vm3, %vm196_vm0  ;;  %vm290_vm0 = vcmp.gt.s32.totalorder %v831_v11, %v834_v13  ;;  %v257_v51 = vld [vmem:[%s255_s6] ss:$0 sm:$0xff]  ;;  %p171_p12 = scmp.ge.s32.totalorder %s174_s29, 9  }
  0x2f   : >> { %vm187_vm4 = vmand %vm183_vm1, %vm569_vm2  ;;  %vm244_vm1 = vcmp.eq.s32.totalorder %v243_v46, %v834_v13  ;;  %s576_s17 = sshll.u32 (%p171_p12), %s764_s16, 4  ;;  %s395_s29 = sshll.u32 (%p171_p12), %s134_s19, 4  ;;  %s396_s29 = int_to_ptr.vmem [resolvable:$true] %s395_s29 }
  0x30   : >> { %v188_v15 = vsel %vm187_vm4, %v804_v3, %v834_v13  ;;  %v189_v16 = vsel %vm187_vm4, %v180_v12, -inf  ;;  %vm855_vm2 = vmand %vm290_vm0, %vm244_vm1  ;;  %vm275_vm4 = vcmp.gt.s32.totalorder %v804_v3, %v834_v13  ;;  %s365_s28 = scalar_lea.vmem (%p171_p12), %s943_s1, %s576_s17 }
  0x31   : >> { %vm198_vm6 = vcmp.lt.f32.partialorder %v189_v16, %v192_v14 }
  0x32   : >> { %vm199_vm7 = vmand %vm197_vm5, %vm198_vm6 }
  0x33   : >> { %v200_v17 = vsel %vm199_vm7, %v831_v11, %v188_v15  ;;  %v201_v18 = vsel %vm199_vm7, %v192_v14, %v189_v16  ;;  %vm279_vm6 = vmand %vm275_vm4, %vm244_vm1 }
  0x34   : >> { %v202_v19 = vrot.slane %v201_v18, 1  ;;  %v203_v20 = vrot.slane %v200_v17, 1 }
  0x36   : >> { %vm204_vm8 = vcmp.ge.f32.partialorder %v202_v19, %v201_v18  ;;  %v207_v21 = vrot.slane %v202_v19, 1  ;;  %v208_v22 = vrot.slane %v203_v20, 1 }
  0x37   : >> { %v205_v23 = vsel %vm204_vm8, %v202_v19, %v201_v18  ;;  %v206_v24 = vsel %vm204_vm8, %v203_v20, %v200_v17 }
  0x38   : >> { %vm209_vm9 = vcmp.ge.f32.partialorder %v207_v21, %v205_v23  ;;  %v212_v25 = vrot.slane %v207_v21, 1  ;;  %v213_v26 = vrot.slane %v208_v22, 1 }
  0x39   : >> { %v210_v27 = vsel %vm209_vm9, %v207_v21, %v205_v23  ;;  %v211_v28 = vsel %vm209_vm9, %v208_v22, %v206_v24 }
  0x3a   : >> { %vm214_vm10 = vcmp.ge.f32.partialorder %v212_v25, %v210_v27  ;;  %v217_v29 = vrot.slane %v212_v25, 1  ;;  %v218_v30 = vrot.slane %v213_v26, 1 }
  0x3b   : >> { %v215_v31 = vsel %vm214_vm10, %v212_v25, %v210_v27  ;;  %v216_v32 = vsel %vm214_vm10, %v213_v26, %v211_v28 }
  0x3c   : >> { %vm219_vm11 = vcmp.ge.f32.partialorder %v217_v29, %v215_v31  ;;  %v222_v33 = vrot.slane %v217_v29, 1  ;;  %v223_v34 = vrot.slane %v218_v30, 1 }
  0x3d   : >> { %v220_v35 = vsel %vm219_vm11, %v217_v29, %v215_v31  ;;  %v221_v36 = vsel %vm219_vm11, %v218_v30, %v216_v32 }
  0x3e   : >> { %vm224_vm12 = vcmp.ge.f32.partialorder %v222_v33, %v220_v35  ;;  %v227_v37 = vrot.slane %v222_v33, 1  ;;  %v228_v38 = vrot.slane %v223_v34, 1 }
  0x3f   : >> { %v225_v39 = vsel %vm224_vm12, %v222_v33, %v220_v35  ;;  %v226_v40 = vsel %vm224_vm12, %v223_v34, %v221_v36 }
  0x40   : >> { %vm229_vm13 = vcmp.ge.f32.partialorder %v227_v37, %v225_v39  ;;  %v232_v41 = vrot.slane %v227_v37, 1  ;;  %v233_v42 = vrot.slane %v228_v38, 1 }
  0x41   : >> { %v230_v43 = vsel %vm229_vm13, %v227_v37, %v225_v39  ;;  %v231_v44 = vsel %vm229_vm13, %v228_v38, %v226_v40 }
  0x42   : >> { %vm234_vm14 = vcmp.ge.f32.partialorder %v232_v41, %v230_v43 }
  0x43   : >> { %v236_v45 = vsel %vm234_vm14, %v233_v42, %v231_v44 }
  0x44   : >> { %238 = vrot.lane.b32.xlu0 %v236_v45, %s237_s30  ;;  %s388_s30 = sshrl.u32 (%p171_p12), %s764_s16, 3 }
  0xb6   : >> { %v239_v48 = vpop.permute.xlu0 %238 }
  0xb7   : >> { %581 = vpush %v239_v48 }
  0xe8   : >> { %s582_s5 = spop %581 }
  0xe9   : >> { %v245_v52 = vstv %s582_s5  ;;  %s250_s8 = scalar_lea.vmem %s806_s11, %s582_s5 [#allocation1]  ;;  %s256_s10 = scalar_lea.vmem [#allocation5], %s582_s5 }
  0xea   : >> { %v247_v53 = vsel %vm244_vm1, %v245_v52, %v246_v49  ;;  %v252_v54 = vld [vmem:[%s250_s8] ss:$0 sm:$0xff] }
  0xeb   : >> { %v258_v55 = vld [vmem:[%s256_s10] ss:$0 sm:$0xff]  ;;  %248 = vst [vmem:[%s814_s20] sm:$0x1] %v247_v53  ;;  %253 = vst [vmem:[%s250_s8] sm:$0x1] %v251_v50  ;;  %vm261_vm3 = vcmp.ne.f32.partialorder %v252_v54, 0.0  ;;  %v268_v5 = vsel %vm267_vm15, %v252_v54, 0.0 }
  0xec   : >> { %259 = vst [vmem:[%s256_s10] sm:$0x1] %v257_v51  ;;  %254 = vst [vmem:[%s249_s4] sm:$0x1] %v252_v54  ;;  %s577_s20 = sshll.u32 (%p171_p12), %s388_s30, 7  ;;  %s356_s8 = scalar_lea.sflag (%p171_p12), [#allocation3], %s132_s7 }
  0xed   : >> { %260 = vst [vmem:[%s255_s6] sm:$0x1] %v258_v55  ;;  %vm262_vm5 = vmand %vm244_vm1, %vm261_vm3  ;;  %s393_s6 = scalar_lea.hbm (%p171_p12), %s944_s2, %s577_s20  ;;  %s643_s10 = scalar_lea.vmem (%p171_p12), %s396_s29, 128 }
  0xee   : >> { %v263_v56 = vsel %vm262_vm5, %v252_v54, 1.0  ;;  %p644_p13 = scmp.ne.s32.totalorder (%p171_p12), %s396_s29, %s643_s10 }
  0xef   : >> { %v291_v57 = vsel %vm290_vm0, %v263_v56, 1.0  ;;  %v276_v58 = vsel %vm275_vm4, %v263_v56, 1.0 }
  0xf0   : >> { %639 = vrcp.f32 %v291_v57  ;;  %p645_p0 = pnand (%p171_p12), %p644_p13, %p781_p5 }
  0xf1   : >> { %641 = vrcp.f32 %v276_v58 }
  0xf2   : > { %p646_p1 = pneg (%p171_p12), %p645_p0 }
  0xf3   : >> { %v571_v60 = vld [vmem:[%s806_s11 + $0x8] sm:$0xff]  ;;  %v272_v63 = vld [vmem:[%s806_s11] sm:$0xff] }
  0xf4   : > { %v301_v12 = vld [vmem:[#allocation5] sm:$0xff] (%p171_p12)  ;;  %v303_v15 = vld [vmem:[#allocation5 + $0x8] sm:$0xff] (%p171_p12) }
  0xfd   : >> { %v640_v59 = vpop.eup %639 }
  0xfe   : >> { %v642_v61 = vpop.eup %641  ;;  %v293_v62 = vmul.f32 %v640_v59, %v571_v60 }
  0xff   : >> { %v278_v0 = vmul.f32 %v642_v61, %v272_v63 }
 0x100   : >> { %v295_v1 = vsel %vm855_vm2, %v293_v62, 0.0 }
 0x101   : >> { %296 = vadd.xlane.f32.xlu1 %v295_v1  ;;  %v280_v4 = vsel %vm279_vm6, %v278_v0, 0.0 }
 0x102   : >> { %281 = vadd.xlane.f32.xlu0 %v280_v4 }
 0x12f   : > { %318 = vxpose.xlu0.b32.start [1/2] (short) (narrow) (%p171_p12), %v301_v12, 8 }
 0x18a   : >> { %v297_v6 = vpop.xlane.xlu1 %296 }
 0x18b   : >> { %v298_v7 = vmul.f32 %v297_v6, %v268_v5  ;;  %v282_v8 = vpop.xlane.xlu0 %281 }
 0x18c   : >> { %v283_v9 = vmul.f32 %v282_v8, %v268_v5  ;;  %173 = sbr.rel (!%p171_p12) target bundleno = 43 (0x2b), region = 206 }
 0x18d   : >> { %v299_v10 = vsub.f32 %v293_v62, %v298_v7 }
 0x18e   : >> { %v284_v11 = vsub.f32 %v278_v0, %v283_v9 }
 0x18f   : >> { %572 = vst [vmem:[%s806_s11 + $0x8] sm:$0xff] %v299_v10 }
 0x190   : >> { %285 = vst [vmem:[%s806_s11] sm:$0xff] %v284_v11 }
 0x196   : > { %v380_v14 = vld [vmem:[%s806_s11 + $0x8] sm:$0xff] }
 0x197   : > { %v378_v13 = vld [vmem:[%s806_s11] sm:$0xff]  ;;  %381 = vst [vmem:[%s365_s28 + $0x8] sm:$0xff] %v380_v14  ;;  %s722_s11 = smov [#allocation2]  }
 0x198   : > { %379 = vst [vmem:[%s365_s28] sm:$0xff] %v378_v13  ;;  %s647_s17 = sshll.u32 %s722_s11, 4  ;;  %s648_s17 = int_to_ptr.vmem [resolvable:$false] %s647_s17 }
 0x199   : > { %s649_s26 = scalar_lea.vmem %s648_s17, 256  ;;  %p650_p2 = scmp.lt.s32.totalorder %s396_s29, %s648_s17 }
 0x19a   : > { %p651_p3 = scmp.lt.s32.totalorder %s649_s26, %s643_s10 }
 0x19c   : > { %p652_p4 = por %p651_p3, %p650_p2 }
 0x19e   : > { %p653_p7 = pnand %p652_p4, %p646_p1 }
 0x1a0   : > { %656 = shalt.err (!%p653_p7)
}
 0x1a1   : > { %s657_s19 = scalar_lea.hbm %s393_s6, 128  ;;  %s661_s28 = scalar_lea.hbm %s944_s2, 128 }
 0x1a2   : > { %p658_p8 = scmp.ne.s32.totalorder %s393_s6, %s657_s19  ;;  %p662_p11 = scmp.lt.s32.totalorder %s393_s6, %s944_s2 }
 0x1a3   : > { %p663_p12 = scmp.lt.s32.totalorder %s661_s28, %s657_s19 }
 0x1a4   : > { %p659_p9 = pnand %p658_p8, %p781_p5 }
 0x1a5   : > { %p664_p13 = por %p663_p12, %p662_p11 }
 0x1a6   : > { %p660_p10 = pneg %p659_p9 }
 0x1a8   : > { %p665_p0 = pnand %p664_p13, %p660_p10 }
 0x1aa   : > { %668 = shalt.err (!%p665_p0)
}
 0x1ab   : > { %583 = dma.vmem_to_hbm [thread:$0]  (%p781_p5), %s396_s29, 128, %s393_s6, %s356_s8   ;;  %319 = vxpose.xlu0.b32.end [2/2] (short) (narrow) %v303_v15, 8 }
 0x1ac   : > { %s578_s5 = sshll.u32 (%p781_p5), %s388_s30, 3 }
 0x1ad   : > { %s404_s17 = scalar_lea.vmem (%p781_p5), %s945_s3, %s578_s5 }
 0x220   : > { %401 = sbr.rel (!%p781_p5) target bundleno = 557 (0x22d), region = 80 }
 0x223   : > { %v334_v2 = vpop.trf.xlu0 }
 0x224   : > { %350 = vst [vmem:[%s819_s22] sm:$0x1] %v334_v2 }
 0x22b   : > { %v433_v3 = vld [vmem:[%s140_s21] sm:$0xff] }
 0x22c   : > { %434 = vst [vmem:[%s404_s17] sm:$0xff] %v433_v3 }
 0x22d PF: > { %p589_p1 = scmp.ge.s32.totalorder %s711_s15, 2  ;;  %s450_s22 = sand.u32 1, %s699_s12  }
 0x22e   : > { %s451_s16 = scalar_lea.sflag [#allocation3], %s450_s22 }
 0x22f   : > { %p586_p5 = pnand %p589_p1, %p785_p6 }
 0x231   : > { %p587_p2 = pneg %p586_p5 }
 0x233   : > { %694 = dma.done.wait (%p587_p2), %s451_s16, 128  }
 0x234   : > { %696 = vsyncadd (%p587_p2), %s451_s16, 4294967168  ;;  %p10_p3 = scmp.ge.s32.totalorder %s768_s18, 10   ;;  %s950_s12 = smov %s703_s13 }
 0x235   : > { %s951_s13 = smov %s707_s14  ;;  %s952_s14 = smov %s779_s23 }
 0x236   : > { %s953_s15 = smov %s768_s18  ;;  %12 = sbr.rel (!%p10_p3) target bundleno = 3 (0x3), region = 217 }
 0x23b   :  { %463 = vsyncpa [#allocation3], 1 }
 0x23c   :  { %465 = vsyncpa [#allocation3 + $0x1], 1 }

// kernel: custom-call.33
= control target key start
LH: loop header
LB: loop body
LE: loop exit
PB: predicated region body
PF: predicated region fallthrough
CT: control target
= control target key end

     0   :  { %s456_s6 = smov 0   ;;  %s458_s7 = smov 0   ;;  %s530_s0 = inlined_call_operand.vmem [shape: f32[8,1,9,9], index: 0, kind: input, shape index: {}]   ;;  %s531_s1 = inlined_call_operand.vmem [shape: f32[8,1,9,9], index: 1, kind: output, shape index: {}]  }
   0x1   :  { %s460_s8 = smov 0  }
   0x2 LB: > { %s372_s9 = sadd.s32 4294967295, %s442_s8   ;;  %s33_s10 = sadd.s32 1, %s438_s7  ;;  %s442_s8 = sphi %s460_s8, %s7_s8   ;;  %s438_s7 = sphi %s458_s7, %s533_s7   ;;  %s434_s6 = sphi %s456_s6, %s532_s6  }
   0x3   : > { %p35_p0 = scmp.ge.s32.totalorder %s33_s10, 8  ;;  %p374_p1 = scmp.ge.s32.totalorder %s442_s8, 8 }
   0x4   : > { %s49_s11 = sand.u32 (!%p374_p1), 1, %s442_s8   ;;  %s388_s12 = sshll.u32 (!%p374_p1), %s438_s7, 4 }
   0x5   : > { %s535_s10 = smov (%p35_p0, %s33_s10), 0  ;;  %47 = sbr.rel (%p374_p1) target bundleno = 12 (0xc), region = 16 }
   0x6   : > { %s375_s13 = sshll.u32 (!%p374_p1), %s49_s11, 4  ;;  %s58_s16 = scalar_lea.vmem (!%p374_p1), %s530_s0, %s388_s12 }
   0x7   : > { %s51_s17 = scalar_lea.vmem (!%p374_p1), [#allocation0], %s375_s13 }
   0xa   : > { %v89_v0 = vld [vmem:[%s58_s16] sm:$0xff]  ;;  %v91_v1 = vld [vmem:[%s58_s16 + $0x8] sm:$0xff] }
   0xb   : > { %90 = vst [vmem:[%s51_s17] sm:$0xff] %v89_v0  ;;  %92 = vst [vmem:[%s51_s17 + $0x8] sm:$0xff] %v91_v1 }
   0xc PF: > { %p378_p2 = scmp.ge.s32.totalorder %s442_s8, 1  ;;  %p97_p3 = scmp.lt.s32.totalorder %s442_s8, 9 }
   0xe   : > { %p98_p4 = pnand %p378_p2, %p97_p3 }
  0x10   : > { %101 = sbr.rel (%p98_p4) target bundleno = 1323 (0x52b), region = 54 }
  0x15   : > { %s104_s18 = sand.u32 1, %s372_s9   ;;  %v115_v2 = vlaneseq  ;;  %v444_v11 = vmov -1.0   ;;  %v445_v55 = vmov 0.0   ;;  %s389_s21 = sshll.u32 %s434_s6, 4 }
  0x16   : > { %s379_s19 = sshll.u32 %s104_s18, 4  ;;  %s271_s24 = scalar_lea.vmem %s531_s1, %s389_s21 }
  0x17   : > { %v483_v3 = vand.u32 127, %v115_v2  ;;  %v119_v4 = vshrl.u32 %v115_v2, 7  ;;  %s485_s20 = scalar_lea.vmem [#allocation0], %s379_s19 }
  0x18   : > { %v122_v5 = vld [vmem:[%s485_s20] sm:$0xff]  ;;  %v381_v38 = vld [vmem:[%s485_s20 + $0x8] sm:$0xff] }
  0x19   : > { %vm121_vm0 = vcmp.eq.s32.totalorder %v119_v4, %v483_v3  ;;  %vm117_vm1 = vcmp.lt.s32.totalorder %v483_v3, 9  ;;  %vm126_vm2 = vcmp.ge.s32.totalorder %v119_v4, %v483_v3  ;;  %vm156_vm4 = vcmp.eq.s32.totalorder %v483_v3, 0 }
  0x1a   : > { %v123_v6 = vsel %vm121_vm0, %v122_v5, 0.0  ;;  %vm127_vm3 = vmand %vm126_vm2, %vm117_vm1  ;;  %vm153_vm5 = vcmp.eq.s32.totalorder %v483_v3, %v119_v4  ;;  %v157_v12 = vsel %vm156_vm4, 1.0, %v444_v11  ;;  %vm171_vm6 = vcmp.eq.s32.totalorder %v483_v3, 1 }
  0x1b   : > { %124 = vadd.xlane.f32.xlu0 %v123_v6  ;;  %v128_v8 = vsel %vm127_vm3, %v122_v5, 0.0  ;;  %v158_v13 = vsel %vm153_vm5, %v157_v12, 0.0  ;;  %vm181_vm7 = vcmp.eq.s32.totalorder %v483_v3, 2  ;;  %vm191_vm8 = vcmp.eq.s32.totalorder %v483_v3, 3 }
  0x1c   : > { %vm201_vm9 = vcmp.eq.s32.totalorder %v483_v3, 4  ;;  %v136_v33 = vadd.s32 8, %v119_v4  ;;  %vm211_vm11 = vcmp.eq.s32.totalorder %v483_v3, 5  ;;  %vm221_vm14 = vcmp.eq.s32.totalorder %v483_v3, 6 }
  0x1d   : > { %vm231_vm0 = vcmp.eq.s32.totalorder %v483_v3, 7 }
  0x1e   : > { %vm137_vm10 = vcmp.eq.s32.totalorder %v136_v33, %v483_v3  ;;  %vm142_vm12 = vcmp.ge.s32.totalorder %v136_v33, %v483_v3  ;;  %vm164_vm15 = vcmp.eq.s32.totalorder %v483_v3, %v136_v33 }
  0x1f   : > { %v139_v39 = vsel %vm137_vm10, %v381_v38, 0.0  ;;  %vm143_vm13 = vmand %vm142_vm12, %vm117_vm1  ;;  %v165_v56 = vsel %vm164_vm15, -1.0, %v445_v55  ;;  %vm241_vm1 = vcmp.eq.s32.totalorder %v483_v3, 8 }
  0x20   : > { %v144_v46 = vsel %vm143_vm13, %v381_v38, 0.0 }
  0xa4   : > { %v489_v7 = vpop.xlane.xlu0 %124 }
  0xa5   : > { %416 = vrcp.f32 %v489_v7  ;;  %vm252_vm3 = vweird.f32 %v489_v7 }
  0xb2   : > { %v496_v9 = vpop.eup %416 }
  0xb3   : > { %v130_v10 = vmul.f32 %v496_v9, %v128_v8 }
  0xb5   : > { %131 = vst [vmem:[#allocation2] sm:$0xff] %v130_v10 }
  0xbc   : > { %v167_v14 = vld [vmem:[#allocation2 + $0x1] ss:$0 sm:$0xff]  ;;  %v177_v17 = vld [vmem:[#allocation2 + $0x2] ss:$0 sm:$0xff]  ;;  %v187_v22 = vld [vmem:[#allocation2 + $0x3] ss:$0 sm:$0xff] }
  0xbd   : > { %v168_v15 = vxor.u32 2147483648, %v167_v14  ;;  %v178_v19 = vxor.u32 2147483648, %v177_v17  ;;  %v188_v24 = vxor.u32 2147483648, %v187_v22  ;;  %v197_v27 = vld [vmem:[#allocation2 + $0x4] ss:$0 sm:$0xff] }
  0xbe   : > { %v198_v29 = vxor.u32 2147483648, %v197_v27  ;;  %v207_v32 = vld [vmem:[#allocation2 + $0x5] ss:$0 sm:$0xff]  ;;  %v217_v40 = vld [vmem:[#allocation2 + $0x6] ss:$0 sm:$0xff] }
  0xbf   : > { %v172_v16 = vmul.f32 %v168_v15, %v158_v13  ;;  %v208_v35 = vxor.u32 2147483648, %v207_v32  ;;  %v218_v42 = vxor.u32 2147483648, %v217_v40  ;;  %v227_v49 = vld [vmem:[#allocation2 + $0x7] ss:$0 sm:$0xff] }
  0xc0   : > { %v228_v52 = vxor.u32 2147483648, %v227_v49 }
  0xc1   : > { %173 = vadd.xlane.f32.xlu0 %v172_v16 }
 0x14a   : > { %v174_v18 = vpop.xlane.xlu0 %173 }
 0x14b   : > { %v175_v20 = vsel %vm171_vm6, %v174_v18, %v158_v13 }
 0x14c   : > { %v182_v21 = vmul.f32 %v178_v19, %v175_v20 }
 0x14e   : > { %183 = vadd.xlane.f32.xlu1 %v182_v21 }
 0x1d7   : > { %v184_v23 = vpop.xlane.xlu1 %183 }
 0x1d8   : > { %v185_v25 = vsel %vm181_vm7, %v184_v23, %v175_v20 }
 0x1d9   : > { %v192_v26 = vmul.f32 %v188_v24, %v185_v25 }
 0x1db   : > { %193 = vadd.xlane.f32.xlu1 %v192_v26 }
 0x264   : > { %v194_v28 = vpop.xlane.xlu1 %193 }
 0x265   : > { %v195_v30 = vsel %vm191_vm8, %v194_v28, %v185_v25 }
 0x266   : > { %v202_v31 = vmul.f32 %v198_v29, %v195_v30 }
 0x268   : > { %203 = vadd.xlane.f32.xlu0 %v202_v31 }
 0x2f1   : > { %v204_v34 = vpop.xlane.xlu0 %203 }
 0x2f2   : > { %v205_v36 = vsel %vm201_vm9, %v204_v34, %v195_v30 }
 0x2f3   : > { %v212_v37 = vmul.f32 %v208_v35, %v205_v36 }
 0x2f5   : > { %213 = vadd.xlane.f32.xlu1 %v212_v37 }
 0x2f9   : > { %140 = vadd.xlane.f32.xlu1 %v139_v39 }
 0x37e   : > { %v214_v41 = vpop.xlane.xlu1 %213 }
 0x37f   : > { %v215_v43 = vsel %vm211_vm11, %v214_v41, %v205_v36 }
 0x380   : > { %v222_v44 = vmul.f32 %v218_v42, %v215_v43 }
 0x382   : > { %223 = vadd.xlane.f32.xlu0 %v222_v44  ;;  %v141_v45 = vpop.xlane.xlu1 %140 }
 0x383   : > { %418 = vrcp.f32 %v141_v45  ;;  %vm257_vm2 = vweird.f32 %v141_v45 }
 0x390   : > { %v419_v47 = vpop.eup %418 }
 0x391   : > { %v146_v48 = vmul.f32 %v419_v47, %v144_v46 }
 0x393   : > { %147 = vst [vmem:[#allocation2 + $0x8] sm:$0xff] %v146_v48 }
 0x39a   : > { %v237_v50 = vld [vmem:[#allocation2 + $0x8] ss:$0 sm:$0xff] }
 0x39b   : > { %v238_v53 = vxor.u32 2147483648, %v237_v50 }
 0x39d   : > { %v246_v58 = vmul.f32 %v238_v53, %v165_v56 }
 0x40b   : > { %v224_v51 = vpop.xlane.xlu0 %223 }
 0x40c   : > { %v225_v54 = vsel %vm221_vm14, %v224_v51, %v215_v43 }
 0x40d   : > { %v232_v57 = vmul.f32 %v228_v52, %v225_v54 }
 0x40f   : > { %233 = vadd.xlane.f32.xlu0 %v232_v57 }
 0x413   : > { %247 = vadd.xlane.f32.xlu0 %v246_v58 }
 0x498   : > { %v234_v59 = vpop.xlane.xlu0 %233 }
 0x499   : > { %v235_v60 = vsel %vm231_vm0, %v234_v59, %v225_v54 }
 0x49a   : > { %v242_v61 = vmul.f32 %v238_v53, %v235_v60 }
 0x49c   : > { %v248_v62 = vpop.xlane.xlu0 %247  ;;  %243 = vadd.xlane.f32.xlu1 %v242_v61 }
 0x49d   : > { %v249_v63 = vsel %vm241_vm1, %v248_v62, %v165_v56 }
 0x49e   : > { %v256_v0 = vmul.f32 %v419_v47, %v249_v63 }
 0x4a0   : > { %v258_v1 = vsel %vm257_vm2, %v249_v63, %v256_v0 }
 0x4a1   : > { %305 = vst [vmem:[%s271_s24 + $0x8] sm:$0xff] %v258_v1 }
 0x525   : > { %v244_v2 = vpop.xlane.xlu1 %243 }
 0x526   : > { %v245_v4 = vsel %vm241_vm1, %v244_v2, %v235_v60 }
 0x527   : > { %v251_v5 = vmul.f32 %v496_v9, %v245_v4 }
 0x529   : > { %v253_v3 = vsel %vm252_vm3, %v245_v4, %v251_v5 }
 0x52a   : > { %303 = vst [vmem:[%s271_s24] sm:$0xff] %v253_v3 }
 0x52b PF: > { %s7_s8 = sadd.s32 1, %s442_s8   ;;  %s532_s6 = smov %s438_s7 }
 0x52c   : > { %p4_p5 = scmp.ge.s32.totalorder %s7_s8, 10   ;;  %s533_s7 = smov %s535_s10 }
 0x52e   :  { %6 = sbr.rel (!%p4_p5) target bundleno = 2 (0x2), region = 129 }

// kernel: custom-call.32
= control target key start
LH: loop header
LB: loop body
LE: loop exit
PB: predicated region body
PF: predicated region fallthrough
CT: control target
= control target key end

     0   :  { %s483_s6 = smov 0   ;;  %s485_s7 = smov 0   ;;  %s556_s0 = inlined_call_operand.vmem [shape: f32[8,1,9,9], index: 0, kind: input, shape index: {}]   ;;  %s557_s1 = inlined_call_operand.vmem [shape: f32[8,1,9,9], index: 1, kind: output, shape index: {}]  }
   0x1   :  { %s487_s8 = smov 0  }
   0x2 LB: > { %s399_s9 = sadd.s32 4294967295, %s469_s8   ;;  %s33_s10 = sadd.s32 1, %s465_s7  ;;  %s469_s8 = sphi %s487_s8, %s7_s8   ;;  %s465_s7 = sphi %s485_s7, %s559_s7   ;;  %s461_s6 = sphi %s483_s6, %s558_s6  }
   0x3   : > { %p35_p0 = scmp.ge.s32.totalorder %s33_s10, 8  ;;  %p401_p1 = scmp.ge.s32.totalorder %s469_s8, 8 }
   0x4   : > { %s49_s11 = sand.u32 (!%p401_p1), 1, %s469_s8   ;;  %s415_s12 = sshll.u32 (!%p401_p1), %s465_s7, 4 }
   0x5   : > { %s561_s10 = smov (%p35_p0, %s33_s10), 0  ;;  %47 = sbr.rel (%p401_p1) target bundleno = 12 (0xc), region = 16 }
   0x6   : > { %s402_s13 = sshll.u32 (!%p401_p1), %s49_s11, 4  ;;  %s58_s16 = scalar_lea.vmem (!%p401_p1), %s556_s0, %s415_s12 }
   0x7   : > { %s51_s17 = scalar_lea.vmem (!%p401_p1), [#allocation0], %s402_s13 }
   0xa   : > { %v89_v0 = vld [vmem:[%s58_s16] sm:$0xff]  ;;  %v91_v1 = vld [vmem:[%s58_s16 + $0x8] sm:$0xff] }
   0xb   : > { %90 = vst [vmem:[%s51_s17] sm:$0xff] %v89_v0  ;;  %92 = vst [vmem:[%s51_s17 + $0x8] sm:$0xff] %v91_v1 }
   0xc PF: > { %p405_p2 = scmp.ge.s32.totalorder %s469_s8, 1  ;;  %p97_p3 = scmp.lt.s32.totalorder %s469_s8, 9 }
   0xe   : > { %p98_p4 = pnand %p405_p2, %p97_p3 }
  0x10   : > { %101 = sbr.rel (%p98_p4) target bundleno = 1323 (0x52b), region = 54 }
  0x15   : > { %s104_s18 = sand.u32 1, %s399_s9   ;;  %v115_v2 = vlaneseq  ;;  %v471_v12 = vmov -1.0   ;;  %v472_v16 = vmov 0.0   ;;  %s416_s21 = sshll.u32 %s461_s6, 4 }
  0x16   : > { %s406_s19 = sshll.u32 %s104_s18, 4  ;;  %s298_s24 = scalar_lea.vmem %s557_s1, %s416_s21 }
  0x17   : > { %v510_v3 = vand.u32 127, %v115_v2  ;;  %v119_v4 = vshrl.u32 %v115_v2, 7  ;;  %s512_s20 = scalar_lea.vmem [#allocation0], %s406_s19 }
  0x18   : > { %v122_v5 = vld [vmem:[%s512_s20] sm:$0xff] }
  0x19   : > { %vm117_vm0 = vcmp.lt.s32.totalorder %v510_v3, 9  ;;  %vm121_vm1 = vcmp.eq.s32.totalorder %v119_v4, %v510_v3  ;;  %vm126_vm2 = vcmp.le.s32.totalorder %v119_v4, %v510_v3  ;;  %v524_v11 = vadd.s32 8, %v119_v4 }
  0x1a   : > { %v123_v6 = vsel %vm121_vm1, %v122_v5, 0.0  ;;  %vm127_vm3 = vmand %vm126_vm2, %vm117_vm0  ;;  %vm163_vm4 = vcmp.eq.s32.totalorder %v510_v3, 8  ;;  %vm153_vm6 = vcmp.eq.s32.totalorder %v510_v3, %v119_v4  ;;  %vm171_vm7 = vcmp.eq.s32.totalorder %v510_v3, 7 }
  0x1b   : > { %v128_v7 = vsel %vm127_vm3, %v122_v5, 0.0  ;;  %124 = vadd.xlane.f32.xlu0 %v123_v6  ;;  %vm160_vm5 = vcmp.eq.s32.totalorder %v510_v3, %v524_v11  ;;  %v164_v13 = vsel %vm163_vm4, 1.0, %v471_v12  ;;  %v154_v17 = vsel %vm153_vm6, -1.0, %v472_v16  ;;  %v408_v6 = vld [vmem:[%s512_s20 + $0x8] sm:$0xff] }
  0x1c   : > { %v165_v14 = vsel %vm160_vm5, %v164_v13, 0.0  ;;  %vm185_vm8 = vcmp.eq.s32.totalorder %v510_v3, 6  ;;  %vm199_vm9 = vcmp.eq.s32.totalorder %v510_v3, 5  ;;  %vm213_vm10 = vcmp.eq.s32.totalorder %v510_v3, 4 }
  0x1d   : > { %vm227_vm11 = vcmp.eq.s32.totalorder %v510_v3, 3  ;;  %vm241_vm12 = vcmp.eq.s32.totalorder %v510_v3, 2  ;;  %vm137_vm13 = vcmp.eq.s32.totalorder %v524_v11, %v510_v3  ;;  %vm255_vm14 = vcmp.eq.s32.totalorder %v510_v3, 1 }
  0x1e   : > { %vm268_vm15 = vcmp.eq.s32.totalorder %v510_v3, 0 }
  0xa4   : > { %v518_v8 = vpop.xlane.xlu0 %124 }
  0xa5   : > { %443 = vrcp.f32 %v518_v8  ;;  %vm279_vm0 = vweird.f32 %v518_v8 }
  0xb2   : > { %v521_v9 = vpop.eup %443 }
  0xb3   : > { %v130_v10 = vmul.f32 %v521_v9, %v128_v7  ;;  %v139_v7 = vsel %vm137_vm13, %v408_v6, 0.0 }
  0xb5   : > { %131 = vst [vmem:[#allocation2] sm:$0xff] %v130_v10 }
  0xbc   : > { %v167_v15 = vld [vmem:[#allocation2 + $0x7] ss:$0 sm:$0xff]  ;;  %v181_v21 = vld [vmem:[#allocation2 + $0x6] ss:$0 sm:$0xff]  ;;  %v195_v29 = vld [vmem:[#allocation2 + $0x5] ss:$0 sm:$0xff] }
  0xbd   : > { %v168_v18 = vxor.u32 2147483648, %v167_v15  ;;  %v182_v24 = vxor.u32 2147483648, %v181_v21  ;;  %v196_v32 = vxor.u32 2147483648, %v195_v29  ;;  %v209_v37 = vld [vmem:[#allocation2 + $0x4] ss:$0 sm:$0xff] }
  0xbe   : > { %v210_v40 = vxor.u32 2147483648, %v209_v37  ;;  %v223_v45 = vld [vmem:[#allocation2 + $0x3] ss:$0 sm:$0xff]  ;;  %v237_v53 = vld [vmem:[#allocation2 + $0x2] ss:$0 sm:$0xff] }
  0xbf   : > { %v176_v19 = vmul.f32 %v168_v18, %v165_v14  ;;  %v172_v20 = vmul.f32 %v168_v18, %v154_v17  ;;  %v224_v48 = vxor.u32 2147483648, %v223_v45  ;;  %v238_v56 = vxor.u32 2147483648, %v237_v53  ;;  %v251_v61 = vld [vmem:[#allocation2 + $0x1] ss:$0 sm:$0xff]  ;;  %v264_v10 = vld [vmem:[#allocation2] ss:$0 sm:$0xff] }
  0xc0   : > { %v252_v0 = vxor.u32 2147483648, %v251_v61 }
  0xc1   : > { %177 = vadd.xlane.f32.xlu1 %v176_v19  ;;  %173 = vadd.xlane.f32.xlu0 %v172_v20 }
 0x14a   : > { %v178_v22 = vpop.xlane.xlu1 %177  ;;  %v174_v23 = vpop.xlane.xlu0 %173 }
 0x14b   : > { %v179_v25 = vsel %vm171_vm7, %v178_v22, %v165_v14  ;;  %v175_v26 = vsel %vm171_vm7, %v174_v23, %v154_v17  ;;  %v265_v14 = vxor.u32 2147483648, %v264_v10 }
 0x14c   : > { %v190_v27 = vmul.f32 %v182_v24, %v179_v25  ;;  %v186_v28 = vmul.f32 %v182_v24, %v175_v26 }
 0x14e   : > { %191 = vadd.xlane.f32.xlu0 %v190_v27  ;;  %187 = vadd.xlane.f32.xlu1 %v186_v28 }
 0x1d7   : > { %v188_v30 = vpop.xlane.xlu1 %187  ;;  %v192_v31 = vpop.xlane.xlu0 %191 }
 0x1d8   : > { %v189_v33 = vsel %vm185_vm8, %v188_v30, %v175_v26  ;;  %v193_v34 = vsel %vm185_vm8, %v192_v31, %v179_v25 }
 0x1d9   : > { %v200_v35 = vmul.f32 %v196_v32, %v189_v33  ;;  %v204_v36 = vmul.f32 %v196_v32, %v193_v34 }
 0x1db   : > { %201 = vadd.xlane.f32.xlu1 %v200_v35  ;;  %205 = vadd.xlane.f32.xlu0 %v204_v36 }
 0x264   : > { %v202_v38 = vpop.xlane.xlu1 %201  ;;  %v206_v39 = vpop.xlane.xlu0 %205 }
 0x265   : > { %v203_v41 = vsel %vm199_vm9, %v202_v38, %v189_v33  ;;  %v207_v42 = vsel %vm199_vm9, %v206_v39, %v193_v34 }
 0x266   : > { %v214_v43 = vmul.f32 %v210_v40, %v203_v41  ;;  %v218_v44 = vmul.f32 %v210_v40, %v207_v42 }
 0x268   : > { %215 = vadd.xlane.f32.xlu1 %v214_v43  ;;  %219 = vadd.xlane.f32.xlu0 %v218_v44 }
 0x2f1   : > { %v216_v46 = vpop.xlane.xlu1 %215  ;;  %v220_v47 = vpop.xlane.xlu0 %219 }
 0x2f2   : > { %v217_v49 = vsel %vm213_vm10, %v216_v46, %v203_v41  ;;  %v221_v50 = vsel %vm213_vm10, %v220_v47, %v207_v42 }
 0x2f3   : > { %v228_v51 = vmul.f32 %v224_v48, %v217_v49  ;;  %v232_v52 = vmul.f32 %v224_v48, %v221_v50 }
 0x2f5   : > { %229 = vadd.xlane.f32.xlu1 %v228_v51  ;;  %233 = vadd.xlane.f32.xlu0 %v232_v52 }
 0x37e   : > { %v230_v54 = vpop.xlane.xlu1 %229  ;;  %v234_v55 = vpop.xlane.xlu0 %233 }
 0x37f   : > { %v231_v57 = vsel %vm227_vm11, %v230_v54, %v217_v49  ;;  %v235_v58 = vsel %vm227_vm11, %v234_v55, %v221_v50 }
 0x380   : > { %v242_v59 = vmul.f32 %v238_v56, %v231_v57  ;;  %v246_v60 = vmul.f32 %v238_v56, %v235_v58 }
 0x382   : > { %243 = vadd.xlane.f32.xlu1 %v242_v59  ;;  %247 = vadd.xlane.f32.xlu0 %v246_v60 }
 0x40b   : > { %v244_v62 = vpop.xlane.xlu1 %243  ;;  %v248_v63 = vpop.xlane.xlu0 %247 }
 0x40c   : > { %v245_v1 = vsel %vm241_vm12, %v244_v62, %v231_v57  ;;  %v249_v2 = vsel %vm241_vm12, %v248_v63, %v235_v58 }
 0x40d   : > { %v256_v4 = vmul.f32 %v252_v0, %v245_v1  ;;  %v260_v5 = vmul.f32 %v252_v0, %v249_v2 }
 0x40f   : > { %257 = vadd.xlane.f32.xlu1 %v256_v4  ;;  %261 = vadd.xlane.f32.xlu0 %v260_v5 }
 0x413   : > { %140 = vadd.xlane.f32.xlu1 %v139_v7 }
 0x498   : > { %v258_v12 = vpop.xlane.xlu1 %257  ;;  %v262_v13 = vpop.xlane.xlu0 %261 }
 0x499   : > { %v259_v15 = vsel %vm255_vm14, %v258_v12, %v245_v1  ;;  %v263_v16 = vsel %vm255_vm14, %v262_v13, %v249_v2 }
 0x49a   : > { %v269_v17 = vmul.f32 %v265_v14, %v259_v15  ;;  %v273_v18 = vmul.f32 %v265_v14, %v263_v16 }
 0x49c   : > { %270 = vadd.xlane.f32.xlu0 %v269_v17  ;;  %274 = vadd.xlane.f32.xlu1 %v273_v18  ;;  %v141_v19 = vpop.xlane.xlu1 %140 }
 0x49d   : > { %445 = vrcp.f32 %v141_v19  ;;  %vm284_vm1 = vweird.f32 %v141_v19 }
 0x4aa   : > { %v446_v11 = vpop.eup %445 }
 0x525   : > { %v275_v20 = vpop.xlane.xlu1 %274  ;;  %v271_v21 = vpop.xlane.xlu0 %270 }
 0x526   : > { %v276_v22 = vsel %vm268_vm15, %v275_v20, %v263_v16  ;;  %v272_v23 = vsel %vm268_vm15, %v271_v21, %v259_v15 }
 0x527   : > { %v283_v24 = vmul.f32 %v446_v11, %v276_v22  ;;  %v278_v25 = vmul.f32 %v521_v9, %v272_v23 }
 0x529   : > { %v285_v26 = vsel %vm284_vm1, %v276_v22, %v283_v24  ;;  %v280_v27 = vsel %vm279_vm0, %v272_v23, %v278_v25 }
 0x52a   : > { %332 = vst [vmem:[%s298_s24 + $0x8] sm:$0xff] %v285_v26  ;;  %330 = vst [vmem:[%s298_s24] sm:$0xff] %v280_v27 }
 0x52b PF: > { %s7_s8 = sadd.s32 1, %s469_s8   ;;  %s558_s6 = smov %s465_s7 }
 0x52c   : > { %p4_p5 = scmp.ge.s32.totalorder %s7_s8, 10   ;;  %s559_s7 = smov %s561_s10 }
 0x52e   :  { %6 = sbr.rel (!%p4_p5) target bundleno = 2 (0x2), region = 128 }

// kernel: custom-call.28
= control target key start
LH: loop header
LB: loop body
LE: loop exit
PB: predicated region body
PF: predicated region fallthrough
CT: control target
= control target key end

     0   :  { %5 = vsyncpa [#allocation4], 0  ;;  %s961_s0 = inlined_call_operand.vmem [shape: f32[2,9,9], index: 0, kind: input, shape index: {}]   ;;  %s962_s1 = inlined_call_operand.vmem [shape: f32[2,9,9], index: 1, kind: output, shape index: {0}]   ;;  %s963_s2 = inlined_call_operand.hbm [shape: s32[2,9], index: 2, kind: output, shape index: {1}]   ;;  %s964_s3 = inlined_call_operand.vmem [shape: s32[2,9], index: 3, kind: output, shape index: {2}]  }
   0x1   :  { %7 = vsyncpa [#allocation4 + $0x1], 0  ;;  %s759_s12 = smov 0   ;;  %s761_s13 = smov 0  }
   0x2   :  { %s763_s14 = smov 0   ;;  %s765_s15 = smov 0  }
   0x3 LB: > { %s780_s16 = sadd.s32 4294967295, %s727_s15   ;;  %s571_s17 = sadd.s32 4294967294, %s727_s15   ;;  %s727_s15 = sphi %s765_s15, %s974_s15   ;;  %s723_s14 = sphi %s763_s14, %s973_s14   ;;  %s719_s13 = sphi %s761_s13, %s972_s13   ;;  %s715_s12 = sphi %s759_s12, %s971_s12  }
   0x4   : > { %s784_s18 = sadd.s32 1, %s727_s15   ;;  %s17_s19 = sshrl.u32 %s727_s15, 3 }
   0x5   : > { %s18_s20 = sshrl.u32 %s784_s18, 3  ;;  %s22_s21 = sadd.s32 1, %s723_s14 }
   0x6   : > { %s19_s22 = ssub.s32 %s17_s19, %s18_s20  ;;  %p32_p0 = scmp.ne.s32.totalorder %s723_s14, %s719_s13 }
   0x7   : > { %p20_p1 = scmp.eq.s32.totalorder %s19_s22, 0  ;;  %p33_p2 = scmp.eq.s32.totalorder %s780_s16, 1 }
   0x8   : > { %p38_p3 = scmp.ne.s32.totalorder %s719_s13, %s715_s12  ;;  %p39_p4 = scmp.eq.s32.totalorder %s571_s17, 1 }
   0x9   : > { %s795_s23 = scalar_select %p20_p1, %s723_s14, %s22_s21  }
   0xa   : > { %p797_p5 = por %p33_p2, %p32_p0  ;;  %p801_p6 = por %p39_p4, %p38_p3 }
   0xb   : > { %p965_p7 = scmp.ge.s32.totalorder %s727_s15, 2 }
   0xc   : > { %s85_s26 = sand.u32 (!%p965_p7), 1, %s727_s15   ;;  %s575_s27 = sshll.u32 (!%p965_p7), %s727_s15, 4 }
   0xd   : > { %83 = sbr.rel (%p965_p7) target bundleno = 20 (0x14), region = 16  ;;  %s574_s28 = sshll.u32 (!%p965_p7), %s85_s26, 4 }
   0xe   : > { %s89_s4 = scalar_lea.vmem (!%p965_p7), %s961_s0, %s575_s27  ;;  %s87_s5 = scalar_lea.vmem (!%p965_p7), [#allocation0], %s574_s28 }
  0x12   : > { %v102_v0 = vld [vmem:[%s89_s4] sm:$0xff]  ;;  %v104_v1 = vld [vmem:[%s89_s4 + $0x8] sm:$0xff] }
  0x13   : > { %103 = vst [vmem:[%s87_s5] sm:$0xff] %v102_v0  ;;  %105 = vst [vmem:[%s87_s5 + $0x8] sm:$0xff] %v104_v1 }
  0x14 PF: > { %p576_p8 = scmp.ge.s32.totalorder %s727_s15, 1  ;;  %p110_p9 = scmp.lt.s32.totalorder %s727_s15, 3 }
  0x16   : > { %p111_p10 = pnand %p576_p8, %p110_p9 }
  0x18   : > { %114 = sbr.rel (%p111_p10) target bundleno = 445 (0x1bd), region = 39 }
  0x1d   : > { %s117_s6 = sand.u32 1, %s780_s16   ;;  %s132_s7 = sand.u32 1, %s719_s13   ;;  %v154_v2 = vlaneseq  ;;  %v737_v6 = vmov 0  }
  0x1e   : > { %s577_s8 = sshll.u32 %s117_s6, 4  ;;  %s819_s9 = sshll.u32 %s132_s7, 1 }
  0x1f   : > { %v822_v3 = vshrl.u32 %v154_v2, 7  ;;  %s119_s10 = scalar_lea.vmem [#allocation0], %s577_s8  ;;  %s824_s11 = scalar_lea.vmem [#allocation1], %s577_s8 }
  0x20   : > { %v143_v4 = vld [vmem:[%s119_s10] sm:$0xff]  ;;  %v581_v5 = vld [vmem:[%s119_s10 + $0x8] sm:$0xff]  ;;  %s149_s17 = sand.u32 7, %s780_s16   ;;  %s134_s20 = scalar_lea.vmem [#allocation3], %s819_s9 }
  0x21   : > { %144 = vst [vmem:[%s824_s11] sm:$0xff] %v143_v4  ;;  %582 = vst [vmem:[%s824_s11 + $0x8] sm:$0xff] %v581_v5  ;;  %s829_s19 = scalar_lea.vmem [#allocation2], %s149_s17  ;;  %s140_s21 = scalar_lea.vmem [#allocation6], %s819_s9 }
  0x22   : > { %153 = vst [vmem:[%s829_s19] sm:$0x1] %v737_v6  ;;  %s834_s22 = scalar_lea.vmem [#allocation5], %s149_s17  ;;  %s729_s26 = smov 0  }
  0x23 LB: >> { %s583_s27 = sshll.u32 %s731_s26, 3  ;;  %s162_s26 = sadd.s32 1, %s731_s26   ;;  %s731_s26 = sphi %s729_s26, %s162_s26  }
  0x24   : >> { %v166_v7 = vstv %s583_s27  ;;  %s164_s28 = scalar_lea.vmem [#allocation7], %s583_s27  ;;  %p159_p11 = scmp.ge.s32.totalorder %s162_s26, 2  }
  0x25   : >> { %v167_v8 = vadd.s32 %v166_v7, %v822_v3  ;;  %s837_s29 = smov (%p159_p11), 0  }
  0x26   : > { %161 = sbr.rel (!%p159_p11) target bundleno = 35 (0x23), region = 191 }
  0x27   : >> { %168 = vst [vmem:[%s164_s28] sm:$0xff] %v167_v8 }
  0x2b LB: >> { %v179_v9 = vld [vmem:[%s824_s11] sm:$0xff]  ;;  %v586_v10 = vld [vmem:[%s824_s11 + $0x8] sm:$0xff]  ;;  %v845_v11 = vadd.s32 8, %v822_v3  ;;  %v848_v13 = vstv %s735_s29  ;;  %s237_s30 = ssub.s32 128, %s735_s29  ;;  %v243_v46 = vand.u32 127, %v154_v2  ;;  %s249_s4 = scalar_lea.vmem %s824_s11, %s735_s29 [#allocation1]  ;;  %s735_s29 = sphi %s837_s29, %s174_s29  }
  0x2c   : >> { %v180_v12 = vand.u32 2147483647, %v179_v9  ;;  %v192_v14 = vand.u32 2147483647, %v586_v10  ;;  %vm183_vm1 = vcmp.ge.s32.totalorder %v822_v3, %v848_v13  ;;  %v246_v49 = vld [vmem:[%s829_s19] ss:$0 sm:$0xff] }
  0x2d   : >> { %vm196_vm0 = vcmp.lt.s32.totalorder %v845_v11, 9  ;;  %vm195_vm3 = vcmp.ge.s32.totalorder %v845_v11, %v848_v13  ;;  %vm267_vm15 = vcmp.gt.s32.totalorder %v243_v46, %v848_v13  ;;  %v251_v50 = vld [vmem:[%s249_s4] ss:$0 sm:$0xff]  ;;  %s255_s6 = scalar_lea.vmem [#allocation7], %s735_s29  ;;  %s174_s29 = sadd.s32 1, %s735_s29  }
  0x2e   : >> { %vm585_vm2 = vcmp.gt.f32.partialorder %v180_v12, -inf  ;;  %vm197_vm5 = vmand %vm195_vm3, %vm196_vm0  ;;  %vm290_vm0 = vcmp.gt.s32.totalorder %v845_v11, %v848_v13  ;;  %v257_v51 = vld [vmem:[%s255_s6] ss:$0 sm:$0xff]  ;;  %p171_p12 = scmp.ge.s32.totalorder %s174_s29, 9  }
  0x2f   : >> { %vm187_vm4 = vmand %vm183_vm1, %vm585_vm2  ;;  %vm244_vm1 = vcmp.eq.s32.totalorder %v243_v46, %v848_v13  ;;  %s404_s17 = sshrl.u32 (%p171_p12), %s780_s16, 3  ;;  %s592_s26 = sshll.u32 (%p171_p12), %s780_s16, 4 }
  0x30   : >> { %v188_v15 = vsel %vm187_vm4, %v822_v3, %v848_v13  ;;  %v189_v16 = vsel %vm187_vm4, %v180_v12, -inf  ;;  %vm869_vm2 = vmand %vm290_vm0, %vm244_vm1  ;;  %vm275_vm4 = vcmp.gt.s32.totalorder %v822_v3, %v848_v13  ;;  %s593_s27 = sshll.u32 (%p171_p12), %s404_s17, 5  ;;  %s381_s29 = scalar_lea.vmem (%p171_p12), %s962_s1, %s592_s26 }
  0x31   : >> { %vm198_vm6 = vcmp.lt.f32.partialorder %v189_v16, %v192_v14 }
  0x32   : >> { %vm199_vm7 = vmand %vm197_vm5, %vm198_vm6 }
  0x33   : >> { %v200_v17 = vsel %vm199_vm7, %v845_v11, %v188_v15  ;;  %v201_v18 = vsel %vm199_vm7, %v192_v14, %v189_v16  ;;  %vm279_vm6 = vmand %vm275_vm4, %vm244_vm1 }
  0x34   : >> { %v202_v19 = vrot.slane %v201_v18, 1  ;;  %v203_v20 = vrot.slane %v200_v17, 1 }
  0x36   : >> { %vm204_vm8 = vcmp.ge.f32.partialorder %v202_v19, %v201_v18  ;;  %v207_v21 = vrot.slane %v202_v19, 1  ;;  %v208_v22 = vrot.slane %v203_v20, 1 }
  0x37   : >> { %v205_v23 = vsel %vm204_vm8, %v202_v19, %v201_v18  ;;  %v206_v24 = vsel %vm204_vm8, %v203_v20, %v200_v17 }
  0x38   : >> { %vm209_vm9 = vcmp.ge.f32.partialorder %v207_v21, %v205_v23  ;;  %v212_v25 = vrot.slane %v207_v21, 1  ;;  %v213_v26 = vrot.slane %v208_v22, 1 }
  0x39   : >> { %v210_v27 = vsel %vm209_vm9, %v207_v21, %v205_v23  ;;  %v211_v28 = vsel %vm209_vm9, %v208_v22, %v206_v24 }
  0x3a   : >> { %vm214_vm10 = vcmp.ge.f32.partialorder %v212_v25, %v210_v27  ;;  %v217_v29 = vrot.slane %v212_v25, 1  ;;  %v218_v30 = vrot.slane %v213_v26, 1 }
  0x3b   : >> { %v215_v31 = vsel %vm214_vm10, %v212_v25, %v210_v27  ;;  %v216_v32 = vsel %vm214_vm10, %v213_v26, %v211_v28 }
  0x3c   : >> { %vm219_vm11 = vcmp.ge.f32.partialorder %v217_v29, %v215_v31  ;;  %v222_v33 = vrot.slane %v217_v29, 1  ;;  %v223_v34 = vrot.slane %v218_v30, 1 }
  0x3d   : >> { %v220_v35 = vsel %vm219_vm11, %v217_v29, %v215_v31  ;;  %v221_v36 = vsel %vm219_vm11, %v218_v30, %v216_v32 }
  0x3e   : >> { %vm224_vm12 = vcmp.ge.f32.partialorder %v222_v33, %v220_v35  ;;  %v227_v37 = vrot.slane %v222_v33, 1  ;;  %v228_v38 = vrot.slane %v223_v34, 1 }
  0x3f   : >> { %v225_v39 = vsel %vm224_vm12, %v222_v33, %v220_v35  ;;  %v226_v40 = vsel %vm224_vm12, %v223_v34, %v221_v36 }
  0x40   : >> { %vm229_vm13 = vcmp.ge.f32.partialorder %v227_v37, %v225_v39  ;;  %v232_v41 = vrot.slane %v227_v37, 1  ;;  %v233_v42 = vrot.slane %v228_v38, 1 }
  0x41   : >> { %v230_v43 = vsel %vm229_vm13, %v227_v37, %v225_v39  ;;  %v231_v44 = vsel %vm229_vm13, %v228_v38, %v226_v40 }
  0x42   : >> { %vm234_vm14 = vcmp.ge.f32.partialorder %v232_v41, %v230_v43 }
  0x43   : >> { %v236_v45 = vsel %vm234_vm14, %v233_v42, %v231_v44 }
  0x44   : >> { %238 = vrot.lane.b32.xlu0 %v236_v45, %s237_s30 }
  0xb6   : >> { %v239_v48 = vpop.permute.xlu0 %238 }
  0xb7   : >> { %597 = vpush %v239_v48 }
  0xe8   : >> { %s598_s5 = spop %597 }
  0xe9   : >> { %v245_v52 = vstv %s598_s5  ;;  %s250_s8 = scalar_lea.vmem %s824_s11, %s598_s5 [#allocation1]  ;;  %s256_s10 = scalar_lea.vmem [#allocation7], %s598_s5 }
  0xea   : >> { %v247_v53 = vsel %vm244_vm1, %v245_v52, %v246_v49  ;;  %v252_v54 = vld [vmem:[%s250_s8] ss:$0 sm:$0xff]  ;;  %s409_s5 = scalar_lea.hbm (%p171_p12), %s963_s2, %s593_s27 }
  0xeb   : >> { %v258_v55 = vld [vmem:[%s256_s10] ss:$0 sm:$0xff]  ;;  %248 = vst [vmem:[%s829_s19] sm:$0x1] %v247_v53  ;;  %253 = vst [vmem:[%s250_s8] sm:$0x1] %v251_v50  ;;  %vm261_vm3 = vcmp.ne.f32.partialorder %v252_v54, 0.0  ;;  %v268_v5 = vsel %vm267_vm15, %v252_v54, 0.0 }
  0xec   : >> { %259 = vst [vmem:[%s256_s10] sm:$0x1] %v257_v51  ;;  %254 = vst [vmem:[%s249_s4] sm:$0x1] %v252_v54  ;;  %s372_s8 = scalar_lea.sflag (%p171_p12), [#allocation4], %s132_s7  ;;  %s738_s19 = smov (%p171_p12), [#allocation3]  }
  0xed   : >> { %260 = vst [vmem:[%s255_s6] sm:$0x1] %v258_v55  ;;  %vm262_vm5 = vmand %vm244_vm1, %vm261_vm3  ;;  %s411_s6 = sshll.u32 (%p171_p12), %s134_s20, 4  ;;  %s663_s26 = sshll.u32 (%p171_p12), %s738_s19, 4  ;;  %s412_s6 = int_to_ptr.vmem [resolvable:$true] %s411_s6  ;;  %s664_s26 = int_to_ptr.vmem [resolvable:$false] %s663_s26 }
  0xee   : >> { %v263_v56 = vsel %vm262_vm5, %v252_v54, 1.0  ;;  %s659_s10 = scalar_lea.vmem (%p171_p12), %s412_s6, 32  ;;  %p666_p2 = scmp.lt.s32.totalorder (%p171_p12), %s412_s6, %s664_s26 }
  0xef   : >> { %v291_v57 = vsel %vm290_vm0, %v263_v56, 1.0  ;;  %v276_v58 = vsel %vm275_vm4, %v263_v56, 1.0  ;;  %p660_p13 = scmp.ne.s32.totalorder (%p171_p12), %s412_s6, %s659_s10 }
  0xf0   : >> { %655 = vrcp.f32 %v291_v57 }
  0xf1   : >> { %657 = vrcp.f32 %v276_v58  ;;  %p661_p0 = pnand (%p171_p12), %p660_p13, %p797_p5 }
  0xf2   : > { %v355_v14 = vld [vmem:[#allocation2] sm:$0x3] (%p171_p12) }
  0xf3   : >> { %v587_v60 = vld [vmem:[%s824_s11 + $0x8] sm:$0xff]  ;;  %v272_v63 = vld [vmem:[%s824_s11] sm:$0xff]  ;;  %358 = vst [vmem:[%s134_s20] sm:$0x3] (%p171_p12), %v355_v14  ;;  %p662_p1 = pneg (%p171_p12), %p661_p0 }
  0xf4   : > { %v301_v12 = vld [vmem:[#allocation7] sm:$0xff] (%p171_p12)  ;;  %v303_v13 = vld [vmem:[#allocation7 + $0x8] sm:$0xff] (%p171_p12) }
  0xfd   : >> { %v656_v59 = vpop.eup %655 }
  0xfe   : >> { %v658_v61 = vpop.eup %657  ;;  %v293_v62 = vmul.f32 %v656_v59, %v587_v60 }
  0xff   : >> { %v278_v0 = vmul.f32 %v658_v61, %v272_v63 }
 0x100   : >> { %v295_v1 = vsel %vm869_vm2, %v293_v62, 0.0 }
 0x101   : >> { %296 = vadd.xlane.f32.xlu1 %v295_v1  ;;  %v280_v4 = vsel %vm279_vm6, %v278_v0, 0.0 }
 0x102   : >> { %281 = vadd.xlane.f32.xlu0 %v280_v4 }
 0x12f   : > { %318 = vxpose.xlu0.b32.start [1/2] (short) (narrow) (%p171_p12), %v301_v12, 8 }
 0x133   : > { %319 = vxpose.xlu0.b32.end [2/2] (short) (narrow) (%p171_p12), %v303_v13, 8 }
 0x18a   : >> { %v297_v6 = vpop.xlane.xlu1 %296 }
 0x18b   : >> { %v298_v7 = vmul.f32 %v297_v6, %v268_v5  ;;  %v282_v8 = vpop.xlane.xlu0 %281 }
 0x18c   : >> { %v283_v9 = vmul.f32 %v282_v8, %v268_v5  ;;  %173 = sbr.rel (!%p171_p12) target bundleno = 43 (0x2b), region = 202 }
 0x18d   : >> { %v299_v10 = vsub.f32 %v293_v62, %v298_v7 }
 0x18e   : >> { %v284_v11 = vsub.f32 %v278_v0, %v283_v9 }
 0x18f   : >> { %588 = vst [vmem:[%s824_s11 + $0x8] sm:$0xff] %v299_v10 }
 0x190   : >> { %285 = vst [vmem:[%s824_s11] sm:$0xff] %v284_v11 }
 0x196   : > { %v396_v3 = vld [vmem:[%s824_s11 + $0x8] sm:$0xff] }
 0x197   : > { %v394_v2 = vld [vmem:[%s824_s11] sm:$0xff]  ;;  %397 = vst [vmem:[%s381_s29 + $0x8] sm:$0xff] %v396_v3  ;;  %s665_s11 = scalar_lea.vmem %s664_s26, 64 }
 0x198   : > { %395 = vst [vmem:[%s381_s29] sm:$0xff] %v394_v2  ;;  %p667_p3 = scmp.lt.s32.totalorder %s665_s11, %s659_s10 }
 0x19a   : > { %p668_p4 = por %p667_p3, %p666_p2 }
 0x19c   : > { %p669_p8 = pnand %p668_p4, %p662_p1 }
 0x19e   : > { %672 = shalt.err (!%p669_p8)
}
 0x19f   : > { %s673_s27 = scalar_lea.hbm %s409_s5, 32  ;;  %s677_s28 = scalar_lea.hbm %s963_s2, 32 }
 0x1a0   : > { %p674_p9 = scmp.ne.s32.totalorder %s409_s5, %s673_s27  ;;  %p678_p12 = scmp.lt.s32.totalorder %s409_s5, %s963_s2 }
 0x1a1   : > { %p679_p13 = scmp.lt.s32.totalorder %s677_s28, %s673_s27 }
 0x1a2   : > { %p675_p10 = pnand %p674_p9, %p797_p5 }
 0x1a3   : > { %p680_p0 = por %p679_p13, %p678_p12 }
 0x1a4   : > { %p676_p11 = pneg %p675_p10 }
 0x1a6   : > { %p681_p7 = pnand %p680_p0, %p676_p11 }
 0x1a8   : > { %684 = shalt.err (!%p681_p7)
}
 0x1a9   : > { %599 = dma.vmem_to_hbm [thread:$0]  (%p797_p5), %s412_s6, 32, %s409_s5, %s372_s8  }
 0x1aa   : > { %s594_s4 = sshll.u32 (%p797_p5), %s404_s17, 1 }
 0x1ab   : > { %v334_v15 = vpop.trf.xlu0  ;;  %s420_s26 = scalar_lea.vmem (%p797_p5), %s964_s3, %s594_s4 }
 0x1ac   : > { %350 = vst [vmem:[%s834_s22] sm:$0x1] %v334_v15 }
 0x1b0   : > { %417 = sbr.rel (!%p797_p5) target bundleno = 445 (0x1bd), region = 80 }
 0x1b3   : > { %v363_v16 = vld [vmem:[#allocation5] sm:$0x3] }
 0x1b4   : > { %366 = vst [vmem:[%s140_s21] sm:$0x3] %v363_v16 }
 0x1bb   : > { %v437_v17 = vld [vmem:[%s140_s21] sm:$0x3] }
 0x1bc   : > { %438 = vst [vmem:[%s420_s26] sm:$0x3] %v437_v17 }
 0x1bd PF: > { %s466_s22 = sand.u32 1, %s715_s12   ;;  %p970_p7 = scmp.ge.s32.totalorder %s727_s15, 2 }
 0x1be   : > { %s467_s16 = scalar_lea.sflag [#allocation4], %s466_s22 }
 0x1bf   : > { %p602_p5 = pnand %p970_p7, %p801_p6 }
 0x1c1   : > { %p603_p1 = pneg %p602_p5 }
 0x1c3   : > { %710 = dma.done.wait (%p603_p1), %s467_s16, 32  }
 0x1c4   : > { %712 = vsyncadd (%p603_p1), %s467_s16, 4294967264  ;;  %p10_p2 = scmp.ge.s32.totalorder %s784_s18, 4   ;;  %s971_s12 = smov %s719_s13 }
 0x1c5   : > { %s972_s13 = smov %s723_s14  ;;  %s973_s14 = smov %s795_s23 }
 0x1c6   : > { %s974_s15 = smov %s784_s18  ;;  %12 = sbr.rel (!%p10_p2) target bundleno = 3 (0x3), region = 213 }
 0x1cb   :  { %479 = vsyncpa [#allocation4], 1 }
 0x1cc   :  { %481 = vsyncpa [#allocation4 + $0x1], 1 }

// kernel: custom-call.30
= control target key start
LH: loop header
LB: loop body
LE: loop exit
PB: predicated region body
PF: predicated region fallthrough
CT: control target
= control target key end

     0   :  { %s456_s6 = smov 0   ;;  %s458_s7 = smov 0   ;;  %s530_s0 = inlined_call_operand.vmem [shape: f32[2,1,9,9], index: 0, kind: input, shape index: {}]   ;;  %s531_s1 = inlined_call_operand.vmem [shape: f32[2,1,9,9], index: 1, kind: output, shape index: {}]  }
   0x1   :  { %s460_s8 = smov 0  }
   0x2 LB: > { %s372_s9 = sadd.s32 4294967295, %s442_s8   ;;  %s33_s10 = sadd.s32 1, %s438_s7  ;;  %s442_s8 = sphi %s460_s8, %s7_s8   ;;  %s438_s7 = sphi %s458_s7, %s533_s7   ;;  %s434_s6 = sphi %s456_s6, %s532_s6  }
   0x3   : > { %p35_p0 = scmp.ge.s32.totalorder %s33_s10, 2  ;;  %p374_p1 = scmp.ge.s32.totalorder %s442_s8, 2 }
   0x4   : > { %s49_s11 = sand.u32 (!%p374_p1), 1, %s442_s8   ;;  %s388_s12 = sshll.u32 (!%p374_p1), %s438_s7, 4 }
   0x5   : > { %s535_s10 = smov (%p35_p0, %s33_s10), 0  ;;  %47 = sbr.rel (%p374_p1) target bundleno = 12 (0xc), region = 16 }
   0x6   : > { %s375_s13 = sshll.u32 (!%p374_p1), %s49_s11, 4  ;;  %s58_s16 = scalar_lea.vmem (!%p374_p1), %s530_s0, %s388_s12 }
   0x7   : > { %s51_s17 = scalar_lea.vmem (!%p374_p1), [#allocation0], %s375_s13 }
   0xa   : > { %v89_v0 = vld [vmem:[%s58_s16] sm:$0xff]  ;;  %v91_v1 = vld [vmem:[%s58_s16 + $0x8] sm:$0xff] }
   0xb   : > { %90 = vst [vmem:[%s51_s17] sm:$0xff] %v89_v0  ;;  %92 = vst [vmem:[%s51_s17 + $0x8] sm:$0xff] %v91_v1 }
   0xc PF: > { %p378_p2 = scmp.ge.s32.totalorder %s442_s8, 1  ;;  %p97_p3 = scmp.lt.s32.totalorder %s442_s8, 3 }
   0xe   : > { %p98_p4 = pnand %p378_p2, %p97_p3 }
  0x10   : > { %101 = sbr.rel (%p98_p4) target bundleno = 1323 (0x52b), region = 54 }
  0x15   : > { %s104_s18 = sand.u32 1, %s372_s9   ;;  %v115_v2 = vlaneseq  ;;  %v444_v11 = vmov -1.0   ;;  %v445_v55 = vmov 0.0   ;;  %s389_s21 = sshll.u32 %s434_s6, 4 }
  0x16   : > { %s379_s19 = sshll.u32 %s104_s18, 4  ;;  %s271_s24 = scalar_lea.vmem %s531_s1, %s389_s21 }
  0x17   : > { %v483_v3 = vand.u32 127, %v115_v2  ;;  %v119_v4 = vshrl.u32 %v115_v2, 7  ;;  %s485_s20 = scalar_lea.vmem [#allocation0], %s379_s19 }
  0x18   : > { %v122_v5 = vld [vmem:[%s485_s20] sm:$0xff]  ;;  %v381_v38 = vld [vmem:[%s485_s20 + $0x8] sm:$0xff] }
  0x19   : > { %vm121_vm0 = vcmp.eq.s32.totalorder %v119_v4, %v483_v3  ;;  %vm117_vm1 = vcmp.lt.s32.totalorder %v483_v3, 9  ;;  %vm126_vm2 = vcmp.ge.s32.totalorder %v119_v4, %v483_v3  ;;  %vm156_vm4 = vcmp.eq.s32.totalorder %v483_v3, 0 }
  0x1a   : > { %v123_v6 = vsel %vm121_vm0, %v122_v5, 0.0  ;;  %vm127_vm3 = vmand %vm126_vm2, %vm117_vm1  ;;  %vm153_vm5 = vcmp.eq.s32.totalorder %v483_v3, %v119_v4  ;;  %v157_v12 = vsel %vm156_vm4, 1.0, %v444_v11  ;;  %vm171_vm6 = vcmp.eq.s32.totalorder %v483_v3, 1 }
  0x1b   : > { %124 = vadd.xlane.f32.xlu0 %v123_v6  ;;  %v128_v8 = vsel %vm127_vm3, %v122_v5, 0.0  ;;  %v158_v13 = vsel %vm153_vm5, %v157_v12, 0.0  ;;  %vm181_vm7 = vcmp.eq.s32.totalorder %v483_v3, 2  ;;  %vm191_vm8 = vcmp.eq.s32.totalorder %v483_v3, 3 }
  0x1c   : > { %vm201_vm9 = vcmp.eq.s32.totalorder %v483_v3, 4  ;;  %v136_v33 = vadd.s32 8, %v119_v4  ;;  %vm211_vm11 = vcmp.eq.s32.totalorder %v483_v3, 5  ;;  %vm221_vm14 = vcmp.eq.s32.totalorder %v483_v3, 6 }
  0x1d   : > { %vm231_vm0 = vcmp.eq.s32.totalorder %v483_v3, 7 }
  0x1e   : > { %vm137_vm10 = vcmp.eq.s32.totalorder %v136_v33, %v483_v3  ;;  %vm142_vm12 = vcmp.ge.s32.totalorder %v136_v33, %v483_v3  ;;  %vm164_vm15 = vcmp.eq.s32.totalorder %v483_v3, %v136_v33 }
  0x1f   : > { %v139_v39 = vsel %vm137_vm10, %v381_v38, 0.0  ;;  %vm143_vm13 = vmand %vm142_vm12, %vm117_vm1  ;;  %v165_v56 = vsel %vm164_vm15, -1.0, %v445_v55  ;;  %vm241_vm1 = vcmp.eq.s32.totalorder %v483_v3, 8 }
  0x20   : > { %v144_v46 = vsel %vm143_vm13, %v381_v38, 0.0 }
  0xa4   : > { %v489_v7 = vpop.xlane.xlu0 %124 }
  0xa5   : > { %416 = vrcp.f32 %v489_v7  ;;  %vm252_vm3 = vweird.f32 %v489_v7 }
  0xb2   : > { %v496_v9 = vpop.eup %416 }
  0xb3   : > { %v130_v10 = vmul.f32 %v496_v9, %v128_v8 }
  0xb5   : > { %131 = vst [vmem:[#allocation2] sm:$0xff] %v130_v10 }
  0xbc   : > { %v167_v14 = vld [vmem:[#allocation2 + $0x1] ss:$0 sm:$0xff]  ;;  %v177_v17 = vld [vmem:[#allocation2 + $0x2] ss:$0 sm:$0xff]  ;;  %v187_v22 = vld [vmem:[#allocation2 + $0x3] ss:$0 sm:$0xff] }
  0xbd   : > { %v168_v15 = vxor.u32 2147483648, %v167_v14  ;;  %v178_v19 = vxor.u32 2147483648, %v177_v17  ;;  %v188_v24 = vxor.u32 2147483648, %v187_v22  ;;  %v197_v27 = vld [vmem:[#allocation2 + $0x4] ss:$0 sm:$0xff] }
  0xbe   : > { %v198_v29 = vxor.u32 2147483648, %v197_v27  ;;  %v207_v32 = vld [vmem:[#allocation2 + $0x5] ss:$0 sm:$0xff]  ;;  %v217_v40 = vld [vmem:[#allocation2 + $0x6] ss:$0 sm:$0xff] }
  0xbf   : > { %v172_v16 = vmul.f32 %v168_v15, %v158_v13  ;;  %v208_v35 = vxor.u32 2147483648, %v207_v32  ;;  %v218_v42 = vxor.u32 2147483648, %v217_v40  ;;  %v227_v49 = vld [vmem:[#allocation2 + $0x7] ss:$0 sm:$0xff] }
  0xc0   : > { %v228_v52 = vxor.u32 2147483648, %v227_v49 }
  0xc1   : > { %173 = vadd.xlane.f32.xlu0 %v172_v16 }
 0x14a   : > { %v174_v18 = vpop.xlane.xlu0 %173 }
 0x14b   : > { %v175_v20 = vsel %vm171_vm6, %v174_v18, %v158_v13 }
 0x14c   : > { %v182_v21 = vmul.f32 %v178_v19, %v175_v20 }
 0x14e   : > { %183 = vadd.xlane.f32.xlu1 %v182_v21 }
 0x1d7   : > { %v184_v23 = vpop.xlane.xlu1 %183 }
 0x1d8   : > { %v185_v25 = vsel %vm181_vm7, %v184_v23, %v175_v20 }
 0x1d9   : > { %v192_v26 = vmul.f32 %v188_v24, %v185_v25 }
 0x1db   : > { %193 = vadd.xlane.f32.xlu1 %v192_v26 }
 0x264   : > { %v194_v28 = vpop.xlane.xlu1 %193 }
 0x265   : > { %v195_v30 = vsel %vm191_vm8, %v194_v28, %v185_v25 }
 0x266   : > { %v202_v31 = vmul.f32 %v198_v29, %v195_v30 }
 0x268   : > { %203 = vadd.xlane.f32.xlu0 %v202_v31 }
 0x2f1   : > { %v204_v34 = vpop.xlane.xlu0 %203 }
 0x2f2   : > { %v205_v36 = vsel %vm201_vm9, %v204_v34, %v195_v30 }
 0x2f3   : > { %v212_v37 = vmul.f32 %v208_v35, %v205_v36 }
 0x2f5   : > { %213 = vadd.xlane.f32.xlu1 %v212_v37 }
 0x2f9   : > { %140 = vadd.xlane.f32.xlu1 %v139_v39 }
 0x37e   : > { %v214_v41 = vpop.xlane.xlu1 %213 }
 0x37f   : > { %v215_v43 = vsel %vm211_vm11, %v214_v41, %v205_v36 }
 0x380   : > { %v222_v44 = vmul.f32 %v218_v42, %v215_v43 }
 0x382   : > { %223 = vadd.xlane.f32.xlu0 %v222_v44  ;;  %v141_v45 = vpop.xlane.xlu1 %140 }
 0x383   : > { %418 = vrcp.f32 %v141_v45  ;;  %vm257_vm2 = vweird.f32 %v141_v45 }
 0x390   : > { %v419_v47 = vpop.eup %418 }
 0x391   : > { %v146_v48 = vmul.f32 %v419_v47, %v144_v46 }
 0x393   : > { %147 = vst [vmem:[#allocation2 + $0x8] sm:$0xff] %v146_v48 }
 0x39a   : > { %v237_v50 = vld [vmem:[#allocation2 + $0x8] ss:$0 sm:$0xff] }
 0x39b   : > { %v238_v53 = vxor.u32 2147483648, %v237_v50 }
 0x39d   : > { %v246_v58 = vmul.f32 %v238_v53, %v165_v56 }
 0x40b   : > { %v224_v51 = vpop.xlane.xlu0 %223 }
 0x40c   : > { %v225_v54 = vsel %vm221_vm14, %v224_v51, %v215_v43 }
 0x40d   : > { %v232_v57 = vmul.f32 %v228_v52, %v225_v54 }
 0x40f   : > { %233 = vadd.xlane.f32.xlu0 %v232_v57 }
 0x413   : > { %247 = vadd.xlane.f32.xlu0 %v246_v58 }
 0x498   : > { %v234_v59 = vpop.xlane.xlu0 %233 }
 0x499   : > { %v235_v60 = vsel %vm231_vm0, %v234_v59, %v225_v54 }
 0x49a   : > { %v242_v61 = vmul.f32 %v238_v53, %v235_v60 }
 0x49c   : > { %v248_v62 = vpop.xlane.xlu0 %247  ;;  %243 = vadd.xlane.f32.xlu1 %v242_v61 }
 0x49d   : > { %v249_v63 = vsel %vm241_vm1, %v248_v62, %v165_v56 }
 0x49e   : > { %v256_v0 = vmul.f32 %v419_v47, %v249_v63 }
 0x4a0   : > { %v258_v1 = vsel %vm257_vm2, %v249_v63, %v256_v0 }
 0x4a1   : > { %305 = vst [vmem:[%s271_s24 + $0x8] sm:$0xff] %v258_v1 }
 0x525   : > { %v244_v2 = vpop.xlane.xlu1 %243 }
 0x526   : > { %v245_v4 = vsel %vm241_vm1, %v244_v2, %v235_v60 }
 0x527   : > { %v251_v5 = vmul.f32 %v496_v9, %v245_v4 }
 0x529   : > { %v253_v3 = vsel %vm252_vm3, %v245_v4, %v251_v5 }
 0x52a   : > { %303 = vst [vmem:[%s271_s24] sm:$0xff] %v253_v3 }
 0x52b PF: > { %s7_s8 = sadd.s32 1, %s442_s8   ;;  %s532_s6 = smov %s438_s7 }
 0x52c   : > { %p4_p5 = scmp.ge.s32.totalorder %s7_s8, 4   ;;  %s533_s7 = smov %s535_s10 }
 0x52e   :  { %6 = sbr.rel (!%p4_p5) target bundleno = 2 (0x2), region = 129 }

// kernel: custom-call.29
= control target key start
LH: loop header
LB: loop body
LE: loop exit
PB: predicated region body
PF: predicated region fallthrough
CT: control target
= control target key end

     0   :  { %s483_s6 = smov 0   ;;  %s485_s7 = smov 0   ;;  %s556_s0 = inlined_call_operand.vmem [shape: f32[2,1,9,9], index: 0, kind: input, shape index: {}]   ;;  %s557_s1 = inlined_call_operand.vmem [shape: f32[2,1,9,9], index: 1, kind: output, shape index: {}]  }
   0x1   :  { %s487_s8 = smov 0  }
   0x2 LB: > { %s399_s9 = sadd.s32 4294967295, %s469_s8   ;;  %s33_s10 = sadd.s32 1, %s465_s7  ;;  %s469_s8 = sphi %s487_s8, %s7_s8   ;;  %s465_s7 = sphi %s485_s7, %s559_s7   ;;  %s461_s6 = sphi %s483_s6, %s558_s6  }
   0x3   : > { %p35_p0 = scmp.ge.s32.totalorder %s33_s10, 2  ;;  %p401_p1 = scmp.ge.s32.totalorder %s469_s8, 2 }
   0x4   : > { %s49_s11 = sand.u32 (!%p401_p1), 1, %s469_s8   ;;  %s415_s12 = sshll.u32 (!%p401_p1), %s465_s7, 4 }
   0x5   : > { %s561_s10 = smov (%p35_p0, %s33_s10), 0  ;;  %47 = sbr.rel (%p401_p1) target bundleno = 12 (0xc), region = 16 }
   0x6   : > { %s402_s13 = sshll.u32 (!%p401_p1), %s49_s11, 4  ;;  %s58_s16 = scalar_lea.vmem (!%p401_p1), %s556_s0, %s415_s12 }
   0x7   : > { %s51_s17 = scalar_lea.vmem (!%p401_p1), [#allocation0], %s402_s13 }
   0xa   : > { %v89_v0 = vld [vmem:[%s58_s16] sm:$0xff]  ;;  %v91_v1 = vld [vmem:[%s58_s16 + $0x8] sm:$0xff] }
   0xb   : > { %90 = vst [vmem:[%s51_s17] sm:$0xff] %v89_v0  ;;  %92 = vst [vmem:[%s51_s17 + $0x8] sm:$0xff] %v91_v1 }
   0xc PF: > { %p405_p2 = scmp.ge.s32.totalorder %s469_s8, 1  ;;  %p97_p3 = scmp.lt.s32.totalorder %s469_s8, 3 }
   0xe   : > { %p98_p4 = pnand %p405_p2, %p97_p3 }
  0x10   : > { %101 = sbr.rel (%p98_p4) target bundleno = 1323 (0x52b), region = 54 }
  0x15   : > { %s104_s18 = sand.u32 1, %s399_s9   ;;  %v115_v2 = vlaneseq  ;;  %v471_v12 = vmov -1.0   ;;  %v472_v16 = vmov 0.0   ;;  %s416_s21 = sshll.u32 %s461_s6, 4 }
  0x16   : > { %s406_s19 = sshll.u32 %s104_s18, 4  ;;  %s298_s24 = scalar_lea.vmem %s557_s1, %s416_s21 }
  0x17   : > { %v510_v3 = vand.u32 127, %v115_v2  ;;  %v119_v4 = vshrl.u32 %v115_v2, 7  ;;  %s512_s20 = scalar_lea.vmem [#allocation0], %s406_s19 }
  0x18   : > { %v122_v5 = vld [vmem:[%s512_s20] sm:$0xff] }
  0x19   : > { %vm117_vm0 = vcmp.lt.s32.totalorder %v510_v3, 9  ;;  %vm121_vm1 = vcmp.eq.s32.totalorder %v119_v4, %v510_v3  ;;  %vm126_vm2 = vcmp.le.s32.totalorder %v119_v4, %v510_v3  ;;  %v524_v11 = vadd.s32 8, %v119_v4 }
  0x1a   : > { %v123_v6 = vsel %vm121_vm1, %v122_v5, 0.0  ;;  %vm127_vm3 = vmand %vm126_vm2, %vm117_vm0  ;;  %vm163_vm4 = vcmp.eq.s32.totalorder %v510_v3, 8  ;;  %vm153_vm6 = vcmp.eq.s32.totalorder %v510_v3, %v119_v4  ;;  %vm171_vm7 = vcmp.eq.s32.totalorder %v510_v3, 7 }
  0x1b   : > { %v128_v7 = vsel %vm127_vm3, %v122_v5, 0.0  ;;  %124 = vadd.xlane.f32.xlu0 %v123_v6  ;;  %vm160_vm5 = vcmp.eq.s32.totalorder %v510_v3, %v524_v11  ;;  %v164_v13 = vsel %vm163_vm4, 1.0, %v471_v12  ;;  %v154_v17 = vsel %vm153_vm6, -1.0, %v472_v16  ;;  %v408_v6 = vld [vmem:[%s512_s20 + $0x8] sm:$0xff] }
  0x1c   : > { %v165_v14 = vsel %vm160_vm5, %v164_v13, 0.0  ;;  %vm185_vm8 = vcmp.eq.s32.totalorder %v510_v3, 6  ;;  %vm199_vm9 = vcmp.eq.s32.totalorder %v510_v3, 5  ;;  %vm213_vm10 = vcmp.eq.s32.totalorder %v510_v3, 4 }
  0x1d   : > { %vm227_vm11 = vcmp.eq.s32.totalorder %v510_v3, 3  ;;  %vm241_vm12 = vcmp.eq.s32.totalorder %v510_v3, 2  ;;  %vm137_vm13 = vcmp.eq.s32.totalorder %v524_v11, %v510_v3  ;;  %vm255_vm14 = vcmp.eq.s32.totalorder %v510_v3, 1 }
  0x1e   : > { %vm268_vm15 = vcmp.eq.s32.totalorder %v510_v3, 0 }
  0xa4   : > { %v518_v8 = vpop.xlane.xlu0 %124 }
  0xa5   : > { %443 = vrcp.f32 %v518_v8  ;;  %vm279_vm0 = vweird.f32 %v518_v8 }
  0xb2   : > { %v521_v9 = vpop.eup %443 }
  0xb3   : > { %v130_v10 = vmul.f32 %v521_v9, %v128_v7  ;;  %v139_v7 = vsel %vm137_vm13, %v408_v6, 0.0 }
  0xb5   : > { %131 = vst [vmem:[#allocation2] sm:$0xff] %v130_v10 }
  0xbc   : > { %v167_v15 = vld [vmem:[#allocation2 + $0x7] ss:$0 sm:$0xff]  ;;  %v181_v21 = vld [vmem:[#allocation2 + $0x6] ss:$0 sm:$0xff]  ;;  %v195_v29 = vld [vmem:[#allocation2 + $0x5] ss:$0 sm:$0xff] }
  0xbd   : > { %v168_v18 = vxor.u32 2147483648, %v167_v15  ;;  %v182_v24 = vxor.u32 2147483648, %v181_v21  ;;  %v196_v32 = vxor.u32 2147483648, %v195_v29  ;;  %v209_v37 = vld [vmem:[#allocation2 + $0x4] ss:$0 sm:$0xff] }
  0xbe   : > { %v210_v40 = vxor.u32 2147483648, %v209_v37  ;;  %v223_v45 = vld [vmem:[#allocation2 + $0x3] ss:$0 sm:$0xff]  ;;  %v237_v53 = vld [vmem:[#allocation2 + $0x2] ss:$0 sm:$0xff] }
  0xbf   : > { %v176_v19 = vmul.f32 %v168_v18, %v165_v14  ;;  %v172_v20 = vmul.f32 %v168_v18, %v154_v17  ;;  %v224_v48 = vxor.u32 2147483648, %v223_v45  ;;  %v238_v56 = vxor.u32 2147483648, %v237_v53  ;;  %v251_v61 = vld [vmem:[#allocation2 + $0x1] ss:$0 sm:$0xff]  ;;  %v264_v10 = vld [vmem:[#allocation2] ss:$0 sm:$0xff] }
  0xc0   : > { %v252_v0 = vxor.u32 2147483648, %v251_v61 }
  0xc1   : > { %177 = vadd.xlane.f32.xlu1 %v176_v19  ;;  %173 = vadd.xlane.f32.xlu0 %v172_v20 }
 0x14a   : > { %v178_v22 = vpop.xlane.xlu1 %177  ;;  %v174_v23 = vpop.xlane.xlu0 %173 }
 0x14b   : > { %v179_v25 = vsel %vm171_vm7, %v178_v22, %v165_v14  ;;  %v175_v26 = vsel %vm171_vm7, %v174_v23, %v154_v17  ;;  %v265_v14 = vxor.u32 2147483648, %v264_v10 }
 0x14c   : > { %v190_v27 = vmul.f32 %v182_v24, %v179_v25  ;;  %v186_v28 = vmul.f32 %v182_v24, %v175_v26 }
 0x14e   : > { %191 = vadd.xlane.f32.xlu0 %v190_v27  ;;  %187 = vadd.xlane.f32.xlu1 %v186_v28 }
 0x1d7   : > { %v188_v30 = vpop.xlane.xlu1 %187  ;;  %v192_v31 = vpop.xlane.xlu0 %191 }
 0x1d8   : > { %v189_v33 = vsel %vm185_vm8, %v188_v30, %v175_v26  ;;  %v193_v34 = vsel %vm185_vm8, %v192_v31, %v179_v25 }
 0x1d9   : > { %v200_v35 = vmul.f32 %v196_v32, %v189_v33  ;;  %v204_v36 = vmul.f32 %v196_v32, %v193_v34 }
 0x1db   : > { %201 = vadd.xlane.f32.xlu1 %v200_v35  ;;  %205 = vadd.xlane.f32.xlu0 %v204_v36 }
 0x264   : > { %v202_v38 = vpop.xlane.xlu1 %201  ;;  %v206_v39 = vpop.xlane.xlu0 %205 }
 0x265   : > { %v203_v41 = vsel %vm199_vm9, %v202_v38, %v189_v33  ;;  %v207_v42 = vsel %vm199_vm9, %v206_v39, %v193_v34 }
 0x266   : > { %v214_v43 = vmul.f32 %v210_v40, %v203_v41  ;;  %v218_v44 = vmul.f32 %v210_v40, %v207_v42 }
 0x268   : > { %215 = vadd.xlane.f32.xlu1 %v214_v43  ;;  %219 = vadd.xlane.f32.xlu0 %v218_v44 }
 0x2f1   : > { %v216_v46 = vpop.xlane.xlu1 %215  ;;  %v220_v47 = vpop.xlane.xlu0 %219 }
 0x2f2   : > { %v217_v49 = vsel %vm213_vm10, %v216_v46, %v203_v41  ;;  %v221_v50 = vsel %vm213_vm10, %v220_v47, %v207_v42 }
 0x2f3   : > { %v228_v51 = vmul.f32 %v224_v48, %v217_v49  ;;  %v232_v52 = vmul.f32 %v224_v48, %v221_v50 }
 0x2f5   : > { %229 = vadd.xlane.f32.xlu1 %v228_v51  ;;  %233 = vadd.xlane.f32.xlu0 %v232_v52 }
 0x37e   : > { %v230_v54 = vpop.xlane.xlu1 %229  ;;  %v234_v55 = vpop.xlane.xlu0 %233 }
 0x37f   : > { %v231_v57 = vsel %vm227_vm11, %v230_v54, %v217_v49  ;;  %v235_v58 = vsel %vm227_vm11, %v234_v55, %v221_v50 }
 0x380   : > { %v242_v59 = vmul.f32 %v238_v56, %v231_v57  ;;  %v246_v60 = vmul.f32 %v238_v56, %v235_v58 }
 0x382   : > { %243 = vadd.xlane.f32.xlu1 %v242_v59  ;;  %247 = vadd.xlane.f32.xlu0 %v246_v60 }
 0x40b   : > { %v244_v62 = vpop.xlane.xlu1 %243  ;;  %v248_v63 = vpop.xlane.xlu0 %247 }
 0x40c   : > { %v245_v1 = vsel %vm241_vm12, %v244_v62, %v231_v57  ;;  %v249_v2 = vsel %vm241_vm12, %v248_v63, %v235_v58 }
 0x40d   : > { %v256_v4 = vmul.f32 %v252_v0, %v245_v1  ;;  %v260_v5 = vmul.f32 %v252_v0, %v249_v2 }
 0x40f   : > { %257 = vadd.xlane.f32.xlu1 %v256_v4  ;;  %261 = vadd.xlane.f32.xlu0 %v260_v5 }
 0x413   : > { %140 = vadd.xlane.f32.xlu1 %v139_v7 }
 0x498   : > { %v258_v12 = vpop.xlane.xlu1 %257  ;;  %v262_v13 = vpop.xlane.xlu0 %261 }
 0x499   : > { %v259_v15 = vsel %vm255_vm14, %v258_v12, %v245_v1  ;;  %v263_v16 = vsel %vm255_vm14, %v262_v13, %v249_v2 }
 0x49a   : > { %v269_v17 = vmul.f32 %v265_v14, %v259_v15  ;;  %v273_v18 = vmul.f32 %v265_v14, %v263_v16 }
 0x49c   : > { %270 = vadd.xlane.f32.xlu0 %v269_v17  ;;  %274 = vadd.xlane.f32.xlu1 %v273_v18  ;;  %v141_v19 = vpop.xlane.xlu1 %140 }
 0x49d   : > { %445 = vrcp.f32 %v141_v19  ;;  %vm284_vm1 = vweird.f32 %v141_v19 }
 0x4aa   : > { %v446_v11 = vpop.eup %445 }
 0x525   : > { %v275_v20 = vpop.xlane.xlu1 %274  ;;  %v271_v21 = vpop.xlane.xlu0 %270 }
 0x526   : > { %v276_v22 = vsel %vm268_vm15, %v275_v20, %v263_v16  ;;  %v272_v23 = vsel %vm268_vm15, %v271_v21, %v259_v15 }
 0x527   : > { %v283_v24 = vmul.f32 %v446_v11, %v276_v22  ;;  %v278_v25 = vmul.f32 %v521_v9, %v272_v23 }
 0x529   : > { %v285_v26 = vsel %vm284_vm1, %v276_v22, %v283_v24  ;;  %v280_v27 = vsel %vm279_vm0, %v272_v23, %v278_v25 }
 0x52a   : > { %332 = vst [vmem:[%s298_s24 + $0x8] sm:$0xff] %v285_v26  ;;  %330 = vst [vmem:[%s298_s24] sm:$0xff] %v280_v27 }
 0x52b PF: > { %s7_s8 = sadd.s32 1, %s469_s8   ;;  %s558_s6 = smov %s465_s7 }
 0x52c   : > { %p4_p5 = scmp.ge.s32.totalorder %s7_s8, 4   ;;  %s559_s7 = smov %s561_s10 }
 0x52e   :  { %6 = sbr.rel (!%p4_p5) target bundleno = 2 (0x2), region = 128 }

// kernel: srln_forward.7
= control target key start
LH: loop header
LB: loop body
LE: loop exit
PB: predicated region body
PF: predicated region fallthrough
CT: control target
= control target key end

     0   :  { %v22_v4 = vlaneseq  ;;  %vm141_vm0 = vcmask 64512   ;;  %vm143_vm1 = vcmask 57344   ;;  %s1925_s1 = inlined_call_operand.vmem [shape: f32[9,8], index: 1, kind: input, shape index: {}]   ;;  %s1926_s0 = inlined_call_operand.vmem [shape: f32[9,9,8], index: 0, kind: input, shape index: {}]   ;;  %s1927_s2 = inlined_call_operand.vmem [shape: f32[9,9,8], index: 2, kind: output, shape index: {}]  }
   0x1   :  { %v11_v0 = vld [vmem:[%s1925_s1] sm:$0xff]  ;;  %v12_v1 = vld [vmem:[%s1925_s1 + $0x8] sm:$0x1]  ;;  %v1175_v8 = vld [vmem:[%s1926_s0 + $0x10] sm:$0xff] }
   0x2   :  { %v13_v2 = vmax.f32 %v11_v0, 1e-12  ;;  %v14_v3 = vmax.f32 %v12_v1, 1e-12  ;;  %v1165_v5 = vshrl.u32 %v22_v4, 7  ;;  %v1170_v7 = vld [vmem:[%s1926_s0] sm:$0xff] }
   0x3   :  { %v1185_v12 = vld [vmem:[%s1926_s0 + $0x20] sm:$0xff]  ;;  %v1190_v13 = vld [vmem:[%s1926_s0 + $0x30] sm:$0xff]  ;;  %v20_v48 = vld [vmem:[%s1926_s0 + $0x8] sm:$0x1] }
   0x4   :  { %1140 = vlog2.f32 %v13_v2  ;;  %v1180_v11 = vsub.s32 0, %v1165_v5  ;;  %v1193_v14 = vsub.s32 1, %v1165_v5  ;;  %v1200_v16 = vld [vmem:[%s1926_s0 + $0x40] sm:$0xff]  ;;  %v1203_v17 = vsub.s32 2, %v1165_v5  ;;  %v1225_v24 = vld [vmem:[%s1926_s0 + $0x50] sm:$0xff] }
   0x5   :  { %1142 = vlog2.f32 %v14_v3  ;;  %v1206_v18 = vsub.s32 3, %v1165_v5  ;;  %v1209_v19 = vsub.s32 4, %v1165_v5  ;;  %v1230_v25 = vld [vmem:[%s1926_s0 + $0x60] sm:$0xff]  ;;  %v1235_v26 = vld [vmem:[%s1926_s0 + $0x70] sm:$0xff]  ;;  %v981_v49 = vld [vmem:[%s1926_s0 + $0x18] sm:$0x1] }
   0x6   :  { %v1267_v39 = vld [vmem:[%s1926_s0 + $0x80] sm:$0xff]  ;;  %v983_v50 = vld [vmem:[%s1926_s0 + $0x28] sm:$0x1]  ;;  %v985_v54 = vld [vmem:[%s1926_s0 + $0x38] sm:$0x1]  ;;  %v1297_v56 = vsub.s32 5, %v1165_v5 }
   0x7   :  { %v987_v55 = vld [vmem:[%s1926_s0 + $0x48] sm:$0x1]  ;;  %v989_v61 = vld [vmem:[%s1926_s0 + $0x58] sm:$0x1] }
   0x8   :  { %v991_v2 = vld [vmem:[%s1926_s0 + $0x68] sm:$0x1]  ;;  %v993_v3 = vld [vmem:[%s1926_s0 + $0x78] sm:$0x1] }
  0x11   :  { %v1141_v6 = vpop.eup %1140 }
  0x12   :  { %v1143_v9 = vpop.eup %1142  ;;  %v1177_v10 = vmul.f32 0.6931472, %v1141_v6 }
  0x13   :  { %v1195_v15 = vmul.f32 0.6931472, %v1143_v9 }
  0x14   :  { %v21_v20 = vmul.f32 %v1170_v7, %v1177_v10  ;;  %v1214_v21 = vrot.slane %v1177_v10, 1  ;;  %v1217_v22 = vrot.slane %v1177_v10, 2  ;;  %v1220_v23 = vrot.slane %v1177_v10, 3 }
  0x15   :  { %v1238_v27 = vrot.slane %v1177_v10, 4  ;;  %v1241_v28 = vrot.slane %v1177_v10, 5  ;;  %v1244_v29 = vrot.slane %v1177_v10, 6  ;;  %v1247_v30 = vrot.slane %v1177_v10, 7 }
  0x16   :  { %v25_v31 = vrot.slane %v21_v20, %v1180_v11  ;;  %v36_v32 = vmul.f32 %v1175_v8, %v1214_v21  ;;  %v50_v33 = vmul.f32 %v1185_v12, %v1217_v22  ;;  %v64_v34 = vmul.f32 %v1190_v13, %v1220_v23 }
  0x17   :  { %v78_v35 = vmul.f32 %v1200_v16, %v1238_v27  ;;  %v92_v36 = vmul.f32 %v1225_v24, %v1241_v28  ;;  %v106_v37 = vmul.f32 %v1230_v25, %v1244_v29  ;;  %v120_v38 = vmul.f32 %v1235_v26, %v1247_v30 }
  0x18   :  { %v26_v40 = vmul.f32 %v25_v31, %v1170_v7  ;;  %v40_v41 = vrot.slane %v36_v32, %v1180_v11  ;;  %v54_v42 = vrot.slane %v50_v33, %v1180_v11  ;;  %v68_v43 = vrot.slane %v64_v34, %v1180_v11 }
  0x19   :  { %v82_v44 = vrot.slane %v78_v35, %v1180_v11  ;;  %v96_v45 = vrot.slane %v92_v36, %v1180_v11  ;;  %v110_v46 = vrot.slane %v106_v37, %v1180_v11  ;;  %v124_v47 = vrot.slane %v120_v38, %v1180_v11 }
  0x1a   :  { %v41_v51 = vmul.f32 %v1175_v8, %v40_v41  ;;  %v55_v52 = vmul.f32 %v1185_v12, %v54_v42  ;;  %v132_v53 = vmul.f32 %v1267_v39, %v1195_v15  ;;  %v69_v57 = vmul.f32 %v1190_v13, %v68_v43 }
  0x1b   :  { %v83_v58 = vmul.f32 %v1200_v16, %v82_v44  ;;  %v97_v59 = vmul.f32 %v1225_v24, %v96_v45  ;;  %v111_v60 = vmul.f32 %v1230_v25, %v110_v46  ;;  %v27_v0 = vmul.f32 %v25_v31, %v20_v48 }
  0x1c   :  { %v43_v62 = vadd.f32 %v41_v51, %v26_v40  ;;  %v136_v63 = vrot.slane %v132_v53, %v1180_v11  ;;  %v42_v1 = vmul.f32 %v981_v49, %v40_v41  ;;  %v125_v4 = vmul.f32 %v1235_v26, %v124_v47 }
  0x1d   :  { %v56_v6 = vmul.f32 %v983_v50, %v54_v42  ;;  %v70_v9 = vmul.f32 %v985_v54, %v68_v43  ;;  %v84_v20 = vmul.f32 %v987_v55, %v82_v44  ;;  %v98_v35 = vmul.f32 %v989_v61, %v96_v45  ;;  %v995_v42 = vld [vmem:[%s1926_s0 + $0x88] sm:$0x1] }
  0x1e   :  { %v57_v32 = vadd.f32 %v55_v52, %v43_v62  ;;  %v137_v33 = vmul.f32 %v1267_v39, %v136_v63  ;;  %v44_v34 = vadd.f32 %v42_v1, %v27_v0  ;;  %v112_v31 = vmul.f32 %v991_v2, %v110_v46 }
  0x1f   :  { %v126_v36 = vmul.f32 %v993_v3, %v124_v47  ;;  %v147_v37 = vmul.f32 %v1247_v30, %v1170_v7  ;;  %v158_v38 = vmul.f32 %v1175_v8, %v1177_v10  ;;  %v169_v43 = vmul.f32 %v1185_v12, %v1214_v21 }
  0x20   :  { %v71_v40 = vadd.f32 %v69_v57, %v57_v32  ;;  %v58_v41 = vadd.f32 %v56_v6, %v44_v34  ;;  %v180_v44 = vmul.f32 %v1190_v13, %v1217_v22  ;;  %v191_v47 = vmul.f32 %v1200_v16, %v1220_v23 }
  0x21   :  { %v151_v45 = vrot.slane %v147_v37, %v1193_v14  ;;  %v162_v46 = vrot.slane %v158_v38, %v1193_v14  ;;  %v202_v48 = vmul.f32 %v1225_v24, %v1238_v27  ;;  %v173_v51 = vrot.slane %v169_v43, %v1193_v14  ;;  %v999_v37 = vld [vmem:[%s1926_s0 + $0x28] sm:$0x1] }
  0x22   :  { %v85_v49 = vadd.f32 %v83_v58, %v71_v40  ;;  %v72_v50 = vadd.f32 %v70_v9, %v58_v41  ;;  %v184_v52 = vrot.slane %v180_v44, %v1193_v14  ;;  %v138_v53 = vmul.f32 %v995_v42, %v136_v63  ;;  %v146_v58 = vld [vmem:[%s1926_s0 + $0x8] sm:$0x1]  ;;  %v997_v63 = vld [vmem:[%s1926_s0 + $0x18] sm:$0x1] }
  0x23   :  { %v152_v54 = vmul.f32 %v151_v45, %v1170_v7  ;;  %v163_v55 = vmul.f32 %v1175_v8, %v162_v46  ;;  %v195_v57 = vrot.slane %v191_v47, %v1193_v14  ;;  %v174_v0 = vmul.f32 %v1185_v12, %v173_v51 }
  0x24   :  { %v99_v61 = vadd.f32 %v97_v59, %v85_v49  ;;  %v86_v62 = vadd.f32 %v84_v20, %v72_v50  ;;  %v206_v1 = vrot.slane %v202_v48, %v1193_v14  ;;  %v185_v3 = vmul.f32 %v1190_v13, %v184_v52  ;;  %v1003_v48 = vld [vmem:[%s1926_s0 + $0x48] sm:$0x1] }
  0x25   :  { %v165_v2 = vadd.f32 %v163_v55, %v152_v54  ;;  %v196_v6 = vmul.f32 %v1200_v16, %v195_v57  ;;  %v213_v59 = vmul.f32 %v1230_v25, %v1241_v28  ;;  %v224_v32 = vmul.f32 %v1235_v26, %v1244_v29 }
  0x26   :  { %v113_v9 = vadd.f32 %v111_v60, %v99_v61  ;;  %v100_v20 = vadd.f32 %v98_v35, %v86_v62  ;;  %v236_v34 = vrot.slane %v1195_v15, 7  ;;  %v153_v41 = vmul.f32 %v151_v45, %v146_v58  ;;  %v1001_v35 = vld [vmem:[%s1926_s0 + $0x38] sm:$0x1]  ;;  %v1007_v62 = vld [vmem:[%s1926_s0 + $0x68] sm:$0x1] }
  0x27   :  { %v176_v38 = vadd.f32 %v174_v0, %v165_v2  ;;  %v217_v40 = vrot.slane %v213_v59, %v1193_v14  ;;  %v164_v42 = vmul.f32 %v997_v63, %v162_v46  ;;  %v228_v47 = vrot.slane %v224_v32, %v1193_v14  ;;  %v1009_v0 = vld [vmem:[%s1926_s0 + $0x78] sm:$0x1] }
  0x28   :  { %v127_v43 = vadd.f32 %v125_v4, %v113_v9  ;;  %v114_v44 = vadd.f32 %v112_v31, %v100_v20  ;;  %v238_v60 = vmul.f32 %v1267_v39, %v236_v34  ;;  %v207_v50 = vmul.f32 %v1225_v24, %v206_v1  ;;  %v1005_v4 = vld [vmem:[%s1926_s0 + $0x58] sm:$0x1] }
  0x29   :  { %v187_v49 = vadd.f32 %v185_v3, %v176_v38  ;;  %v166_v54 = vadd.f32 %v164_v42, %v153_v41  ;;  %v175_v45 = vmul.f32 %v999_v37, %v173_v51  ;;  %v218_v55 = vmul.f32 %v1230_v25, %v217_v40 }
  0x2a   :  { %v139_v31 = vadd.f32 %v137_v33, %v127_v43  ;;  %v128_v46 = vadd.f32 %v126_v36, %v114_v44  ;;  %v242_v61 = vrot.slane %v238_v60, %v1193_v14  ;;  %v186_v63 = vmul.f32 %v1001_v35, %v184_v52  ;;  %v1011_v52 = vld [vmem:[%s1926_s0 + $0x88] sm:$0x1] }
  0x2b   :  { %v198_v58 = vadd.f32 %v196_v6, %v187_v49  ;;  %v177_v51 = vadd.f32 %v175_v45, %v166_v54  ;;  %v197_v2 = vmul.f32 %v1003_v48, %v195_v57  ;;  %v229_v14 = vmul.f32 %v1235_v26, %v228_v47 }
  0x2c   :  { %142 = vst.msk [vmem:[%s1927_s2] sm:$0xff] %vm141_vm0, %v139_v31  ;;  %v140_v33 = vadd.f32 %v138_v53, %v128_v46  ;;  %v243_v36 = vmul.f32 %v1267_v39, %v242_v61  ;;  %v208_v3 = vmul.f32 %v1005_v4, %v206_v1  ;;  %v219_v20 = vmul.f32 %v1007_v62, %v217_v40  ;;  %v251_v4 = vld [vmem:[%s1926_s0 + $0x8] sm:$0x1]  ;;  %v1015_v31 = vld [vmem:[%s1926_s0 + $0x18] sm:$0x1] }
  0x2d   :  { %v209_v59 = vadd.f32 %v207_v50, %v198_v58  ;;  %v188_v9 = vadd.f32 %v186_v63, %v177_v51  ;;  %v230_v32 = vmul.f32 %v1009_v0, %v228_v47  ;;  %v252_v53 = vmul.f32 %v1244_v29, %v1170_v7  ;;  %v1017_v46 = vld [vmem:[%s1926_s0 + $0x28] sm:$0x1] }
  0x2e   :  { %144 = vst.msk [vmem:[%s1927_s2 + $0x8] sm:$0x1] %vm143_vm1, %v140_v33  ;;  %v263_v57 = vmul.f32 %v1175_v8, %v1247_v30  ;;  %v274_v1 = vmul.f32 %v1185_v12, %v1177_v10  ;;  %v285_v6 = vmul.f32 %v1190_v13, %v1214_v21  ;;  %v296_v38 = vmul.f32 %v1200_v16, %v1217_v22  ;;  %v1019_v33 = vld [vmem:[%s1926_s0 + $0x38] sm:$0x1] }
  0x2f   :  { %v220_v34 = vadd.f32 %v218_v55, %v209_v59  ;;  %v199_v37 = vadd.f32 %v197_v2, %v188_v9  ;;  %v307_v40 = vmul.f32 %v1225_v24, %v1220_v23  ;;  %v256_v41 = vrot.slane %v252_v53, %v1203_v17  ;;  %v1021_v9 = vld [vmem:[%s1926_s0 + $0x48] sm:$0x1] }
  0x30   :  { %v267_v42 = vrot.slane %v263_v57, %v1203_v17  ;;  %v278_v43 = vrot.slane %v274_v1, %v1203_v17  ;;  %v289_v44 = vrot.slane %v285_v6, %v1203_v17  ;;  %v244_v35 = vmul.f32 %v1011_v52, %v242_v61  ;;  %v1023_v1 = vld [vmem:[%s1926_s0 + $0x58] sm:$0x1] }
  0x31   :  { %v231_v47 = vadd.f32 %v229_v14, %v220_v34  ;;  %v210_v60 = vadd.f32 %v208_v3, %v199_v37  ;;  %v300_v48 = vrot.slane %v296_v38, %v1203_v17  ;;  %v257_v49 = vmul.f32 %v256_v41, %v1170_v7 }
  0x32   :  { %v268_v50 = vmul.f32 %v1175_v8, %v267_v42  ;;  %v279_v54 = vmul.f32 %v1185_v12, %v278_v43  ;;  %v311_v45 = vrot.slane %v307_v40, %v1203_v17  ;;  %v290_v62 = vmul.f32 %v1190_v13, %v289_v44  ;;  %v1027_v40 = vld [vmem:[%s1926_s0 + $0x78] sm:$0x1] }
  0x33   :  { %v245_v55 = vadd.f32 %v243_v36, %v231_v47  ;;  %v221_v61 = vadd.f32 %v219_v20, %v210_v60  ;;  %v301_v0 = vmul.f32 %v1200_v16, %v300_v48  ;;  %v318_v51 = vmul.f32 %v1230_v25, %v1238_v27 }
  0x34   :  { %v270_v58 = vadd.f32 %v268_v50, %v257_v49  ;;  %v329_v63 = vmul.f32 %v1235_v26, %v1241_v28  ;;  %v340_v2 = vrot.slane %v1195_v15, 6  ;;  %v258_v36 = vmul.f32 %v256_v41, %v251_v4 }
  0x35   :  { %1012 = vst.msk [vmem:[%s1927_s2 + $0x10] sm:$0xff] %vm141_vm0, %v245_v55  ;;  %v232_v14 = vadd.f32 %v230_v32, %v221_v61  ;;  %v269_v3 = vmul.f32 %v1015_v31, %v267_v42  ;;  %v280_v59 = vmul.f32 %v1017_v46, %v278_v43  ;;  %v322_v52 = vrot.slane %v318_v51, %v1203_v17  ;;  %v1025_v32 = vld [vmem:[%s1926_s0 + $0x68] sm:$0x1] }
  0x36   :  { %v281_v20 = vadd.f32 %v279_v54, %v270_v58  ;;  %v333_v53 = vrot.slane %v329_v63, %v1203_v17  ;;  %v342_v57 = vmul.f32 %v1267_v39, %v340_v2  ;;  %v312_v34 = vmul.f32 %v1225_v24, %v311_v45 }
  0x37   :  { %v246_v6 = vadd.f32 %v244_v35, %v232_v14  ;;  %v271_v37 = vadd.f32 %v269_v3, %v258_v36  ;;  %v291_v38 = vmul.f32 %v1019_v33, %v289_v44  ;;  %v323_v42 = vmul.f32 %v1230_v25, %v322_v52 }
  0x38   :  { %v292_v41 = vadd.f32 %v290_v62, %v281_v20  ;;  %v346_v43 = vrot.slane %v342_v57, %v1203_v17  ;;  %v302_v47 = vmul.f32 %v1021_v9, %v300_v48  ;;  %v334_v60 = vmul.f32 %v1235_v26, %v333_v53  ;;  %v1029_v17 = vld [vmem:[%s1926_s0 + $0x88] sm:$0x1] }
  0x39   :  { %1013 = vst.msk [vmem:[%s1927_s2 + $0x18] sm:$0x1] %vm143_vm1, %v246_v6  ;;  %v282_v35 = vadd.f32 %v280_v59, %v271_v37  ;;  %v313_v49 = vmul.f32 %v1023_v1, %v311_v45  ;;  %v324_v44 = vmul.f32 %v1025_v32, %v322_v52  ;;  %v335_v4 = vmul.f32 %v1027_v40, %v333_v53  ;;  %v355_v57 = vld [vmem:[%s1926_s0 + $0x8] sm:$0x1]  ;;  %v1033_v1 = vld [vmem:[%s1926_s0 + $0x18] sm:$0x1] }
  0x3a   :  { %v303_v50 = vadd.f32 %v301_v0, %v292_v41  ;;  %v347_v54 = vmul.f32 %v1267_v39, %v346_v43  ;;  %v356_v31 = vmul.f32 %v1241_v28, %v1170_v7  ;;  %v367_v48 = vmul.f32 %v1175_v8, %v1244_v29 }
  0x3b   :  { %v293_v46 = vadd.f32 %v291_v38, %v282_v35  ;;  %v378_v55 = vmul.f32 %v1185_v12, %v1247_v30  ;;  %v389_v45 = vmul.f32 %v1190_v13, %v1177_v10  ;;  %v400_v0 = vmul.f32 %v1200_v16, %v1214_v21 }
  0x3c   :  { %v314_v61 = vadd.f32 %v312_v34, %v303_v50  ;;  %v360_v62 = vrot.slane %v356_v31, %v1206_v18  ;;  %v411_v58 = vmul.f32 %v1225_v24, %v1217_v22  ;;  %v371_v63 = vrot.slane %v367_v48, %v1206_v18  ;;  %v1039_v48 = vld [vmem:[%s1926_s0 + $0x48] sm:$0x1] }
  0x3d   :  { %v304_v51 = vadd.f32 %v302_v47, %v293_v46  ;;  %v382_v2 = vrot.slane %v378_v55, %v1206_v18  ;;  %v393_v33 = vrot.slane %v389_v45, %v1206_v18  ;;  %v348_v36 = vmul.f32 %v1029_v17, %v346_v43  ;;  %v1035_v43 = vld [vmem:[%s1926_s0 + $0x28] sm:$0x1]  ;;  %v1037_v47 = vld [vmem:[%s1926_s0 + $0x38] sm:$0x1] }
  0x3e   :  { %v325_v14 = vadd.f32 %v323_v42, %v314_v61  ;;  %v361_v3 = vmul.f32 %v360_v62, %v1170_v7  ;;  %v404_v59 = vrot.slane %v400_v0, %v1206_v18  ;;  %v372_v20 = vmul.f32 %v1175_v8, %v371_v63  ;;  %v1041_v55 = vld [vmem:[%s1926_s0 + $0x58] sm:$0x1] }
  0x3f   :  { %v315_v9 = vadd.f32 %v313_v49, %v304_v51  ;;  %v383_v52 = vmul.f32 %v1185_v12, %v382_v2  ;;  %v415_v53 = vrot.slane %v411_v58, %v1206_v18  ;;  %v394_v6 = vmul.f32 %v1190_v13, %v393_v33  ;;  %v1045_v0 = vld [vmem:[%s1926_s0 + $0x78] sm:$0x1] }
  0x40   :  { %v336_v32 = vadd.f32 %v334_v60, %v325_v14  ;;  %v405_v34 = vmul.f32 %v1200_v16, %v404_v59  ;;  %v422_v37 = vmul.f32 %v1230_v25, %v1220_v23  ;;  %v374_v40 = vadd.f32 %v372_v20, %v361_v3 }
  0x41   :  { %v326_v38 = vadd.f32 %v324_v44, %v315_v9  ;;  %v433_v41 = vmul.f32 %v1235_v26, %v1238_v27  ;;  %v444_v42 = vrot.slane %v1195_v15, 5  ;;  %v362_v49 = vmul.f32 %v360_v62, %v355_v57  ;;  %v1043_v62 = vld [vmem:[%s1926_s0 + $0x68] sm:$0x1] }
  0x42   :  { %v349_v60 = vadd.f32 %v347_v54, %v336_v32  ;;  %v426_v35 = vrot.slane %v422_v37, %v1206_v18  ;;  %v373_v50 = vmul.f32 %v1033_v1, %v371_v63  ;;  %v385_v31 = vadd.f32 %v383_v52, %v374_v40 }
  0x43   :  { %v337_v44 = vadd.f32 %v335_v4, %v326_v38  ;;  %v437_v46 = vrot.slane %v433_v41, %v1206_v18  ;;  %v446_v17 = vmul.f32 %v1267_v39, %v444_v42  ;;  %v416_v54 = vmul.f32 %v1225_v24, %v415_v53 }
  0x44   :  { %1030 = vst.msk [vmem:[%s1927_s2 + $0x20] sm:$0xff] %vm141_vm0, %v349_v60  ;;  %v375_v4 = vadd.f32 %v373_v50, %v362_v49  ;;  %v384_v45 = vmul.f32 %v1035_v43, %v382_v2  ;;  %v395_v61 = vmul.f32 %v1037_v47, %v393_v33  ;;  %v396_v51 = vadd.f32 %v394_v6, %v385_v31 }
  0x45   :  { %v350_v58 = vadd.f32 %v348_v36, %v337_v44  ;;  %v427_v63 = vmul.f32 %v1230_v25, %v426_v35  ;;  %v450_v14 = vrot.slane %v446_v17, %v1206_v18  ;;  %v438_v3 = vmul.f32 %v1235_v26, %v437_v46  ;;  %v1047_v18 = vld [vmem:[%s1926_s0 + $0x88] sm:$0x1] }
  0x46   :  { %v386_v9 = vadd.f32 %v384_v45, %v375_v4  ;;  %v406_v20 = vmul.f32 %v1039_v48, %v404_v59  ;;  %v417_v2 = vmul.f32 %v1041_v55, %v415_v53  ;;  %v407_v33 = vadd.f32 %v405_v34, %v396_v51  ;;  %v459_v17 = vld [vmem:[%s1926_s0 + $0x8] sm:$0x1]  ;;  %v1051_v48 = vld [vmem:[%s1926_s0 + $0x18] sm:$0x1] }
  0x47   :  { %1031 = vst.msk [vmem:[%s1927_s2 + $0x28] sm:$0x1] %vm143_vm1, %v350_v58  ;;  %v451_v52 = vmul.f32 %v1267_v39, %v450_v14  ;;  %v428_v57 = vmul.f32 %v1043_v62, %v426_v35  ;;  %v439_v36 = vmul.f32 %v1045_v0, %v437_v46  ;;  %v460_v32 = vmul.f32 %v1238_v27, %v1170_v7  ;;  %v1053_v51 = vld [vmem:[%s1926_s0 + $0x28] sm:$0x1] }
  0x48   :  { %v397_v1 = vadd.f32 %v395_v61, %v386_v9  ;;  %v471_v59 = vmul.f32 %v1175_v8, %v1241_v28  ;;  %v482_v53 = vmul.f32 %v1185_v12, %v1244_v29  ;;  %v418_v6 = vadd.f32 %v416_v54, %v407_v33 }
  0x49   :  { %v493_v34 = vmul.f32 %v1190_v13, %v1247_v30  ;;  %v504_v37 = vmul.f32 %v1200_v16, %v1177_v10  ;;  %v515_v38 = vmul.f32 %v1225_v24, %v1214_v21  ;;  %v464_v41 = vrot.slane %v460_v32, %v1209_v19 }
  0x4a   :  { %v408_v40 = vadd.f32 %v406_v20, %v397_v1  ;;  %v475_v42 = vrot.slane %v471_v59, %v1209_v19  ;;  %v486_v43 = vrot.slane %v482_v53, %v1209_v19  ;;  %v429_v47 = vadd.f32 %v427_v63, %v418_v6  ;;  %v1055_v63 = vld [vmem:[%s1926_s0 + $0x38] sm:$0x1]  ;;  %v1061_v6 = vld [vmem:[%s1926_s0 + $0x68] sm:$0x1] }
  0x4b   :  { %v452_v60 = vmul.f32 %v1047_v18, %v450_v14  ;;  %v497_v35 = vrot.slane %v493_v34, %v1209_v19  ;;  %v508_v49 = vrot.slane %v504_v37, %v1209_v19  ;;  %v465_v44 = vmul.f32 %v464_v41, %v1170_v7  ;;  %v1057_v18 = vld [vmem:[%s1926_s0 + $0x48] sm:$0x1] }
  0x4c   :  { %v419_v50 = vadd.f32 %v417_v2, %v408_v40  ;;  %v476_v31 = vmul.f32 %v1175_v8, %v475_v42  ;;  %v487_v46 = vmul.f32 %v1185_v12, %v486_v43  ;;  %v440_v55 = vadd.f32 %v438_v3, %v429_v47 }
  0x4d   :  { %v498_v54 = vmul.f32 %v1190_v13, %v497_v35  ;;  %v509_v4 = vmul.f32 %v1200_v16, %v508_v49  ;;  %v519_v45 = vrot.slane %v515_v38, %v1209_v19  ;;  %v526_v0 = vmul.f32 %v1230_v25, %v1217_v22 }
  0x4e   :  { %v430_v61 = vadd.f32 %v428_v57, %v419_v50  ;;  %v478_v62 = vadd.f32 %v476_v31, %v465_v44  ;;  %v537_v58 = vmul.f32 %v1235_v26, %v1220_v23  ;;  %v453_v14 = vadd.f32 %v451_v52, %v440_v55 }
  0x4f   :  { %v548_v3 = vrot.slane %v1195_v15, 4  ;;  %v466_v9 = vmul.f32 %v464_v41, %v459_v17  ;;  %v477_v20 = vmul.f32 %v1051_v48, %v475_v42  ;;  %v530_v57 = vrot.slane %v526_v0, %v1209_v19  ;;  %v1063_v41 = vld [vmem:[%s1926_s0 + $0x78] sm:$0x1] }
  0x50   :  { %v441_v2 = vadd.f32 %v439_v36, %v430_v61  ;;  %v489_v33 = vadd.f32 %v487_v46, %v478_v62  ;;  %v541_v1 = vrot.slane %v537_v58, %v1209_v19  ;;  %1048 = vst.msk [vmem:[%s1927_s2 + $0x30] sm:$0xff] %vm141_vm0, %v453_v14  ;;  %v488_v59 = vmul.f32 %v1053_v51, %v486_v43  ;;  %v1059_v36 = vld [vmem:[%s1926_s0 + $0x58] sm:$0x1] }
  0x51   :  { %v550_v52 = vmul.f32 %v1267_v39, %v548_v3  ;;  %v479_v32 = vadd.f32 %v477_v20, %v466_v9  ;;  %v499_v53 = vmul.f32 %v1055_v63, %v497_v35  ;;  %v520_v38 = vmul.f32 %v1225_v24, %v519_v45 }
  0x52   :  { %v454_v34 = vadd.f32 %v452_v60, %v441_v2  ;;  %v500_v37 = vadd.f32 %v498_v54, %v489_v33  ;;  %v531_v40 = vmul.f32 %v1230_v25, %v530_v57  ;;  %v542_v42 = vmul.f32 %v1235_v26, %v541_v1 }
  0x53   :  { %v554_v43 = vrot.slane %v550_v52, %v1209_v19  ;;  %v490_v47 = vadd.f32 %v488_v59, %v479_v32  ;;  %v510_v35 = vmul.f32 %v1057_v18, %v508_v49  ;;  %v521_v50 = vmul.f32 %v1059_v36, %v519_v45  ;;  %v1065_v49 = vld [vmem:[%s1926_s0 + $0x88] sm:$0x1]  ;;  %v1069_v59 = vld [vmem:[%s1926_s0 + $0x18] sm:$0x1] }
  0x54   :  { %1049 = vst.msk [vmem:[%s1927_s2 + $0x38] sm:$0x1] %vm143_vm1, %v454_v34  ;;  %v511_v60 = vadd.f32 %v509_v4, %v500_v37  ;;  %v532_v44 = vmul.f32 %v1061_v6, %v530_v57  ;;  %v564_v31 = vmul.f32 %v1220_v23, %v1170_v7  ;;  %v543_v48 = vmul.f32 %v1063_v41, %v541_v1  ;;  %v563_v32 = vld [vmem:[%s1926_s0 + $0x8] sm:$0x1] }
  0x55   :  { %v555_v46 = vmul.f32 %v1267_v39, %v554_v43  ;;  %v501_v17 = vadd.f32 %v499_v53, %v490_v47  ;;  %v575_v19 = vmul.f32 %v1175_v8, %v1238_v27  ;;  %v586_v4 = vmul.f32 %v1185_v12, %v1241_v28  ;;  %v1071_v37 = vld [vmem:[%s1926_s0 + $0x28] sm:$0x1] }
  0x56   :  { %v522_v55 = vadd.f32 %v520_v38, %v511_v60  ;;  %v568_v54 = vrot.slane %v564_v31, %v1297_v56  ;;  %v597_v45 = vmul.f32 %v1190_v13, %v1244_v29  ;;  %v608_v0 = vmul.f32 %v1200_v16, %v1247_v30 }
  0x57   :  { %v512_v61 = vadd.f32 %v510_v35, %v501_v17  ;;  %v579_v62 = vrot.slane %v575_v19, %v1297_v56  ;;  %v619_v58 = vmul.f32 %v1225_v24, %v1177_v10  ;;  %v590_v14 = vrot.slane %v586_v4, %v1297_v56 }
  0x58   :  { %v533_v51 = vadd.f32 %v531_v40, %v522_v55  ;;  %v569_v63 = vmul.f32 %v568_v54, %v1170_v7  ;;  %v601_v3 = vrot.slane %v597_v45, %v1297_v56  ;;  %v556_v20 = vmul.f32 %v1065_v49, %v554_v43  ;;  %v1073_v43 = vld [vmem:[%s1926_s0 + $0x38] sm:$0x1]  ;;  %v1079_v55 = vld [vmem:[%s1926_s0 + $0x68] sm:$0x1] }
  0x59   :  { %v523_v9 = vadd.f32 %v521_v50, %v512_v61  ;;  %v580_v2 = vmul.f32 %v1175_v8, %v579_v62  ;;  %v612_v33 = vrot.slane %v608_v0, %v1297_v56  ;;  %v591_v1 = vmul.f32 %v1185_v12, %v590_v14  ;;  %v1081_v61 = vld [vmem:[%s1926_s0 + $0x78] sm:$0x1] }
  0x5a   :  { %v544_v57 = vadd.f32 %v542_v42, %v533_v51  ;;  %v623_v18 = vrot.slane %v619_v58, %v1297_v56  ;;  %v630_v52 = vmul.f32 %v1230_v25, %v1214_v21  ;;  %v602_v6 = vmul.f32 %v1190_v13, %v601_v3 }
  0x5b   :  { %v534_v53 = vadd.f32 %v532_v44, %v523_v9  ;;  %v582_v36 = vadd.f32 %v580_v2, %v569_v63  ;;  %v613_v34 = vmul.f32 %v1200_v16, %v612_v33  ;;  %v641_v41 = vmul.f32 %v1235_v26, %v1217_v22  ;;  %v1075_v44 = vld [vmem:[%s1926_s0 + $0x48] sm:$0x1] }
  0x5c   :  { %v557_v38 = vadd.f32 %v555_v46, %v544_v57  ;;  %v634_v40 = vrot.slane %v630_v52, %v1297_v56  ;;  %v652_v42 = vrot.slane %v1195_v15, 3  ;;  %v570_v60 = vmul.f32 %v568_v54, %v563_v32 }
  0x5d   :  { %v545_v47 = vadd.f32 %v543_v48, %v534_v53  ;;  %v593_v35 = vadd.f32 %v591_v1, %v582_v36  ;;  %v581_v50 = vmul.f32 %v1069_v59, %v579_v62  ;;  %v624_v31 = vmul.f32 %v1225_v24, %v623_v18  ;;  %v1077_v48 = vld [vmem:[%s1926_s0 + $0x58] sm:$0x1] }
  0x5e   :  { %1066 = vst.msk [vmem:[%s1927_s2 + $0x40] sm:$0xff] %vm141_vm0, %v557_v38  ;;  %v645_v46 = vrot.slane %v641_v41, %v1297_v56  ;;  %v654_v17 = vmul.f32 %v1267_v39, %v652_v42  ;;  %v592_v19 = vmul.f32 %v1071_v37, %v590_v14  ;;  %v603_v45 = vmul.f32 %v1073_v43, %v601_v3 }
  0x5f   :  { %v558_v49 = vadd.f32 %v556_v20, %v545_v47  ;;  %v604_v54 = vadd.f32 %v602_v6, %v593_v35  ;;  %v583_v4 = vadd.f32 %v581_v50, %v570_v60  ;;  %v635_v62 = vmul.f32 %v1230_v25, %v634_v40 }
  0x60   :  { %v646_v0 = vmul.f32 %v1235_v26, %v645_v46  ;;  %v658_v58 = vrot.slane %v654_v17, %v1297_v56  ;;  %v614_v51 = vmul.f32 %v1075_v44, %v612_v33  ;;  %v625_v9 = vmul.f32 %v1077_v48, %v623_v18  ;;  %v1083_v33 = vld [vmem:[%s1926_s0 + $0x88] sm:$0x1] }
  0x61   :  { %1067 = vst.msk [vmem:[%s1927_s2 + $0x48] sm:$0x1] %vm143_vm1, %v558_v49  ;;  %v615_v63 = vadd.f32 %v613_v34, %v604_v54  ;;  %v594_v14 = vadd.f32 %v592_v19, %v583_v4  ;;  %v636_v3 = vmul.f32 %v1079_v55, %v634_v40  ;;  %v647_v2 = vmul.f32 %v1081_v61, %v645_v46  ;;  %v1087_v46 = vld [vmem:[%s1926_s0 + $0x18] sm:$0x1] }
  0x62   :  { %v659_v20 = vmul.f32 %v1267_v39, %v658_v58  ;;  %v668_v57 = vmul.f32 %v1217_v22, %v1170_v7  ;;  %v671_v1 = vsub.s32 6, %v1165_v5  ;;  %v679_v32 = vmul.f32 %v1175_v8, %v1220_v23 }
  0x63   :  { %v626_v52 = vadd.f32 %v624_v31, %v615_v63  ;;  %v605_v56 = vadd.f32 %v603_v45, %v594_v14  ;;  %v690_v18 = vmul.f32 %v1185_v12, %v1238_v27  ;;  %v701_v53 = vmul.f32 %v1190_v13, %v1241_v28  ;;  %v667_v31 = vld [vmem:[%s1926_s0 + $0x8] sm:$0x1]  ;;  %v1095_v14 = vld [vmem:[%s1926_s0 + $0x58] sm:$0x1] }
  0x64   :  { %v672_v59 = vrot.slane %v668_v57, %v671_v1  ;;  %v712_v36 = vmul.f32 %v1200_v16, %v1244_v29  ;;  %v723_v6 = vmul.f32 %v1225_v24, %v1247_v30  ;;  %v683_v38 = vrot.slane %v679_v32, %v671_v1  ;;  %v1093_v63 = vld [vmem:[%s1926_s0 + $0x48] sm:$0x1] }
  0x65   :  { %v637_v34 = vadd.f32 %v635_v62, %v626_v52  ;;  %v616_v37 = vadd.f32 %v614_v51, %v605_v56  ;;  %v694_v40 = vrot.slane %v690_v18, %v671_v1  ;;  %v660_v41 = vmul.f32 %v1083_v33, %v658_v58  ;;  %v1726_v52 = vld [vmem:[%s1926_s0] sm:$0xff] }
  0x66   :  { %v673_v42 = vmul.f32 %v672_v59, %v1170_v7  ;;  %v705_v43 = vrot.slane %v701_v53, %v671_v1  ;;  %v716_v47 = vrot.slane %v712_v36, %v671_v1  ;;  %v684_v50 = vmul.f32 %v1175_v8, %v683_v38  ;;  %v1089_v8 = vld [vmem:[%s1926_s0 + $0x28] sm:$0x1] }
  0x67   :  { %v648_v35 = vadd.f32 %v646_v0, %v637_v34  ;;  %v627_v60 = vadd.f32 %v625_v9, %v616_v37  ;;  %v695_v44 = vmul.f32 %v1185_v12, %v694_v40  ;;  %v727_v19 = vrot.slane %v723_v6, %v671_v1  ;;  %v1741_v37 = vld [vmem:[%s1926_s0 + $0x20] sm:$0xff] }
  0x68   :  { %v706_v17 = vmul.f32 %v1190_v13, %v705_v43  ;;  %v717_v7 = vmul.f32 %v1200_v16, %v716_v47  ;;  %v734_v48 = vmul.f32 %v1230_v25, %v1177_v10  ;;  %v686_v49 = vadd.f32 %v684_v50, %v673_v42  ;;  %v1091_v13 = vld [vmem:[%s1926_s0 + $0x38] sm:$0x1]  ;;  %v1765_v42 = vld [vmem:[%s1926_s0 + $0x50] sm:$0xff] }
  0x69   :  { %v661_v12 = vadd.f32 %v659_v20, %v648_v35  ;;  %v638_v55 = vadd.f32 %v636_v3, %v627_v60  ;;  %v745_v54 = vmul.f32 %v1235_v26, %v1214_v21  ;;  %v756_v16 = vrot.slane %v1195_v15, 2 }
  0x6a   :  { %v738_v4 = vrot.slane %v734_v48, %v671_v1  ;;  %v674_v45 = vmul.f32 %v672_v59, %v667_v31  ;;  %v685_v61 = vmul.f32 %v1087_v46, %v683_v38  ;;  %v697_v0 = vadd.f32 %v695_v44, %v686_v49  ;;  %v1736_v59 = vld [vmem:[%s1926_s0 + $0x10] sm:$0xff]  ;;  %v1786_v48 = vld [vmem:[%s1926_s0 + $0x60] sm:$0xff] }
  0x6b   :  { %1084 = vst.msk [vmem:[%s1927_s2 + $0x50] sm:$0xff] %vm141_vm0, %v661_v12  ;;  %v649_v62 = vadd.f32 %v647_v2, %v638_v55  ;;  %v749_v58 = vrot.slane %v745_v54, %v671_v1  ;;  %v696_v51 = vmul.f32 %v1089_v8, %v694_v40  ;;  %v728_v9 = vmul.f32 %v1225_v24, %v727_v19  ;;  %v1097_v2 = vld [vmem:[%s1926_s0 + $0x68] sm:$0x1]  ;;  %v1099_v24 = vld [vmem:[%s1926_s0 + $0x78] sm:$0x1] }
  0x6c   :  { %v758_v3 = vmul.f32 %v1267_v39, %v756_v16  ;;  %v687_v20 = vadd.f32 %v685_v61, %v674_v45  ;;  %v707_v57 = vmul.f32 %v1091_v13, %v705_v43  ;;  %v708_v33 = vadd.f32 %v706_v17, %v697_v0  ;;  %v1796_v45 = vld [vmem:[%s1926_s0 + $0x70] sm:$0xff] }
  0x6d   :  { %v662_v56 = vadd.f32 %v660_v41, %v649_v62  ;;  %v739_v32 = vmul.f32 %v1230_v25, %v738_v4  ;;  %v750_v18 = vmul.f32 %v1235_v26, %v749_v58  ;;  %v718_v6 = vmul.f32 %v1093_v63, %v716_v47  ;;  %v1746_v25 = vld [vmem:[%s1926_s0 + $0x30] sm:$0xff]  ;;  %v1760_v41 = vld [vmem:[%s1926_s0 + $0x40] sm:$0xff]  ;;  %v1105_v63 = vld [vmem:[%s1926_s0 + $0x18] sm:$0x1] }
  0x6e   :  { %v762_v53 = vrot.slane %v758_v3, %v671_v1  ;;  %v698_v36 = vadd.f32 %v696_v51, %v687_v20  ;;  %v729_v34 = vmul.f32 %v1095_v14, %v727_v19  ;;  %v719_v26 = vadd.f32 %v717_v7, %v708_v33  ;;  %v771_v51 = vld [vmem:[%s1926_s0 + $0x8] sm:$0x1] }
  0x6f   :  { %1085 = vst.msk [vmem:[%s1927_s2 + $0x58] sm:$0x1] %vm143_vm1, %v662_v56  ;;  %v740_v1 = vmul.f32 %v1097_v2, %v738_v4  ;;  %v772_v38 = vmul.f32 %v1726_v52, %v1214_v21  ;;  %v1755_v40 = vsub.s32 7, %v1165_v5  ;;  %v751_v35 = vmul.f32 %v1099_v24, %v749_v58  ;;  %v1101_v5 = vld [vmem:[%s1926_s0 + $0x88] sm:$0x1] }
  0x70   :  { %v763_v43 = vmul.f32 %v1267_v39, %v762_v53  ;;  %v709_v47 = vadd.f32 %v707_v57, %v698_v36  ;;  %v783_v60 = vmul.f32 %v1736_v59, %v1217_v22  ;;  %v730_v50 = vadd.f32 %v728_v9, %v719_v26  ;;  %v1813_v57 = vld [vmem:[%s1926_s0 + $0x80] sm:$0xff]  ;;  %v1107_v2 = vld [vmem:[%s1926_s0 + $0x28] sm:$0x1]  ;;  %v1109_v24 = vld [vmem:[%s1926_s0 + $0x38] sm:$0x1] }
  0x71   :  { %v776_v44 = vrot.slane %v772_v38, %v1755_v40  ;;  %v794_v31 = vmul.f32 %v1741_v37, %v1220_v23  ;;  %v805_v46 = vmul.f32 %v1746_v25, %v1238_v27  ;;  %v816_v7 = vmul.f32 %v1760_v41, %v1241_v28  ;;  %v1111_v26 = vld [vmem:[%s1926_s0 + $0x48] sm:$0x1] }
  0x72   :  { %v720_v17 = vadd.f32 %v718_v6, %v709_v47  ;;  %v787_v39 = vrot.slane %v783_v60, %v1755_v40  ;;  %v827_v19 = vmul.f32 %v1765_v42, %v1244_v29  ;;  %v741_v8 = vadd.f32 %v739_v32, %v730_v50  ;;  %v1115_v60 = vld [vmem:[%s1926_s0 + $0x68] sm:$0x1] }
  0x73   :  { %v777_v12 = vmul.f32 %v776_v44, %v1726_v52  ;;  %v798_v55 = vrot.slane %v794_v31, %v1755_v40  ;;  %v809_v49 = vrot.slane %v805_v46, %v1755_v40  ;;  %v764_v13 = vmul.f32 %v1101_v5, %v762_v53  ;;  %v1117_v46 = vld [vmem:[%s1926_s0 + $0x78] sm:$0x1] }
  0x74   :  { %v731_v54 = vadd.f32 %v729_v34, %v720_v17  ;;  %v788_v4 = vmul.f32 %v1736_v59, %v787_v39  ;;  %v820_v16 = vrot.slane %v816_v7, %v1755_v40  ;;  %v752_v61 = vadd.f32 %v750_v18, %v741_v8  ;;  %v875_v17 = vld [vmem:[%s1926_s0 + $0x8] sm:$0x1] }
  0x75   :  { %v799_v62 = vmul.f32 %v1741_v37, %v798_v55  ;;  %v831_v0 = vrot.slane %v827_v19, %v1755_v40  ;;  %v838_v58 = vmul.f32 %v1786_v48, %v1247_v30  ;;  %v810_v3 = vmul.f32 %v1746_v25, %v809_v49 }
  0x76   :  { %v742_v14 = vadd.f32 %v740_v1, %v731_v54  ;;  %v790_v9 = vadd.f32 %v788_v4, %v777_v12  ;;  %v821_v20 = vmul.f32 %v1760_v41, %v820_v16  ;;  %v765_v56 = vadd.f32 %v763_v43, %v752_v61 }
  0x77   :  { %v842_v33 = vrot.slane %v838_v58, %v1755_v40  ;;  %v849_v32 = vmul.f32 %v1796_v45, %v1177_v10  ;;  %v860_v18 = vrot.slane %v1195_v15, 1  ;;  %v778_v6 = vmul.f32 %v776_v44, %v771_v51 }
  0x78   :  { %v753_v53 = vadd.f32 %v751_v35, %v742_v14  ;;  %v801_v36 = vadd.f32 %v799_v62, %v790_v9  ;;  %v789_v34 = vmul.f32 %v1105_v63, %v787_v39  ;;  %1102 = vst.msk [vmem:[%s1927_s2 + $0x60] sm:$0xff] %vm141_vm0, %v765_v56  ;;  %v832_v1 = vmul.f32 %v1765_v42, %v831_v0  ;;  %v1113_v35 = vld [vmem:[%s1926_s0 + $0x58] sm:$0x1] }
  0x79   :  { %v853_v38 = vrot.slane %v849_v32, %v1755_v40  ;;  %v862_v43 = vmul.f32 %v1813_v57, %v860_v18  ;;  %v800_v47 = vmul.f32 %v1107_v2, %v798_v55  ;;  %v811_v31 = vmul.f32 %v1109_v24, %v809_v49  ;;  %v1123_v39 = vld [vmem:[%s1926_s0 + $0x18] sm:$0x1]  ;;  %v1125_v55 = vld [vmem:[%s1926_s0 + $0x28] sm:$0x1] }
  0x7a   :  { %v766_v50 = vadd.f32 %v764_v13, %v753_v53  ;;  %v812_v5 = vadd.f32 %v810_v3, %v801_v36  ;;  %v791_v44 = vadd.f32 %v789_v34, %v778_v6  ;;  %v843_v7 = vmul.f32 %v1786_v48, %v842_v33  ;;  %v1127_v49 = vld [vmem:[%s1926_s0 + $0x38] sm:$0x1] }
  0x7b   :  { %v854_v19 = vmul.f32 %v1796_v45, %v853_v38  ;;  %v866_v8 = vrot.slane %v862_v43, %v1755_v40  ;;  %v822_v12 = vmul.f32 %v1111_v26, %v820_v16  ;;  %v833_v4 = vmul.f32 %v1113_v35, %v831_v0  ;;  %v1129_v40 = vld [vmem:[%s1926_s0 + $0x48] sm:$0x1]  ;;  %v1131_v16 = vld [vmem:[%s1926_s0 + $0x58] sm:$0x1] }
  0x7c   :  { %1103 = vst.msk [vmem:[%s1927_s2 + $0x68] sm:$0x1] %vm143_vm1, %v766_v50  ;;  %v823_v54 = vadd.f32 %v821_v20, %v812_v5  ;;  %v802_v13 = vadd.f32 %v800_v47, %v791_v44  ;;  %v844_v61 = vmul.f32 %v1115_v60, %v842_v33  ;;  %v855_v58 = vmul.f32 %v1117_v46, %v853_v38  ;;  %v1119_v0 = vld [vmem:[%s1926_s0 + $0x88] sm:$0x1] }
  0x7d   :  { %v867_v62 = vmul.f32 %v1813_v57, %v866_v8  ;;  %v876_v51 = vmul.f32 %v875_v17, %v1177_v10  ;;  %v887_v63 = vmul.f32 %v1123_v39, %v1214_v21  ;;  %v898_v3 = vmul.f32 %v1125_v55, %v1217_v22  ;;  %v1133_v22 = vld [vmem:[%s1926_s0 + $0x68] sm:$0x1] }
  0x7e   :  { %v834_v14 = vadd.f32 %v832_v1, %v823_v54  ;;  %v813_v9 = vadd.f32 %v811_v31, %v802_v13  ;;  %v909_v20 = vmul.f32 %v1127_v49, %v1220_v23  ;;  %v920_v33 = vmul.f32 %v1129_v40, %v1238_v27  ;;  %v1135_v27 = vld [vmem:[%s1926_s0 + $0x78] sm:$0x1] }
  0x7f   :  { %v880_v2 = vrot.slane %v876_v51, %v1180_v11  ;;  %v891_v56 = vrot.slane %v887_v63, %v1180_v11  ;;  %v931_v10 = vmul.f32 %v1131_v16, %v1241_v28  ;;  %v902_v18 = vrot.slane %v898_v3, %v1180_v11  ;;  %v1137_v28 = vld [vmem:[%s1926_s0 + $0x88] sm:$0x1] }
  0x80   :  { %v845_v32 = vadd.f32 %v843_v7, %v834_v14  ;;  %v824_v21 = vadd.f32 %v822_v12, %v813_v9  ;;  %v913_v24 = vrot.slane %v909_v20, %v1180_v11  ;;  %v868_v53 = vmul.f32 %v1119_v0, %v866_v8 }
  0x81   :  { %v881_v23 = vmul.f32 %v880_v2, %v1726_v52  ;;  %v892_v36 = vmul.f32 %v1736_v59, %v891_v56  ;;  %v924_v6 = vrot.slane %v920_v33, %v1180_v11  ;;  %v903_v1 = vmul.f32 %v1741_v37, %v902_v18 }
  0x82   :  { %v856_v34 = vadd.f32 %v854_v19, %v845_v32  ;;  %v835_v26 = vadd.f32 %v833_v4, %v824_v21  ;;  %v935_v38 = vrot.slane %v931_v10, %v1180_v11  ;;  %v914_v52 = vmul.f32 %v1746_v25, %v913_v24 }
  0x83   :  { %v894_v43 = vadd.f32 %v892_v36, %v881_v23  ;;  %v925_v59 = vmul.f32 %v1760_v41, %v924_v6  ;;  %v942_v47 = vmul.f32 %v1133_v22, %v1244_v29  ;;  %v953_v50 = vmul.f32 %v1135_v27, %v1247_v30 }
  0x84   :  { %v869_v35 = vadd.f32 %v867_v62, %v856_v34  ;;  %v846_v60 = vadd.f32 %v844_v61, %v835_v26  ;;  %v964_v5 = vmul.f32 %v1137_v28, %v1195_v15  ;;  %v882_v46 = vmul.f32 %v880_v2, %v875_v17 }
  0x85   :  { %v905_v44 = vadd.f32 %v903_v1, %v894_v43  ;;  %v946_v31 = vrot.slane %v942_v47, %v1180_v11  ;;  %v893_v37 = vmul.f32 %v1123_v39, %v891_v56  ;;  %v936_v41 = vmul.f32 %v1765_v42, %v935_v38 }
  0x86   :  { %1120 = vst.msk [vmem:[%s1927_s2 + $0x70] sm:$0xff] %vm141_vm0, %v869_v35  ;;  %v857_v25 = vadd.f32 %v855_v58, %v846_v60  ;;  %v904_v29 = vmul.f32 %v1125_v55, %v902_v18  ;;  %v957_v19 = vrot.slane %v953_v50, %v1180_v11  ;;  %v915_v8 = vmul.f32 %v1127_v49, %v913_v24 }
  0x87   :  { %v916_v7 = vadd.f32 %v914_v52, %v905_v44  ;;  %v895_v30 = vadd.f32 %v893_v37, %v882_v46  ;;  %v968_v12 = vrot.slane %v964_v5, %v1180_v11  ;;  %v947_v17 = vmul.f32 %v1786_v48, %v946_v31 }
  0x88   :  { %v870_v15 = vadd.f32 %v868_v53, %v857_v25  ;;  %v926_v13 = vmul.f32 %v1129_v40, %v924_v6  ;;  %v958_v55 = vmul.f32 %v1796_v45, %v957_v19  ;;  %v937_v61 = vmul.f32 %v1131_v16, %v935_v38 }
  0x89   :  { %v927_v54 = vadd.f32 %v925_v59, %v916_v7  ;;  %v906_v39 = vadd.f32 %v904_v29, %v895_v30  ;;  %v969_v49 = vmul.f32 %v1813_v57, %v968_v12  ;;  %v948_v11 = vmul.f32 %v1133_v22, %v946_v31 }
  0x8a   :  { %1121 = vst.msk [vmem:[%s1927_s2 + $0x78] sm:$0x1] %vm143_vm1, %v870_v15  ;;  %v959_v48 = vmul.f32 %v1135_v27, %v957_v19  ;;  %v970_v9 = vmul.f32 %v1137_v28, %v968_v12 }
  0x8b   :  { %v938_v42 = vadd.f32 %v936_v41, %v927_v54  ;;  %v917_v4 = vadd.f32 %v915_v8, %v906_v39 }
  0x8d   :  { %v949_v62 = vadd.f32 %v947_v17, %v938_v42  ;;  %v928_v58 = vadd.f32 %v926_v13, %v917_v4 }
  0x8f   :  { %v960_v51 = vadd.f32 %v958_v55, %v949_v62  ;;  %v939_v63 = vadd.f32 %v937_v61, %v928_v58 }
  0x91   :  { %v971_v14 = vadd.f32 %v969_v49, %v960_v51  ;;  %v950_v40 = vadd.f32 %v948_v11, %v939_v63 }
  0x93   :  { %1138 = vst.msk [vmem:[%s1927_s2 + $0x80] sm:$0xff] %vm141_vm0, %v971_v14  ;;  %v961_v0 = vadd.f32 %v959_v48, %v950_v40 }
  0x95   :  { %v972_v45 = vadd.f32 %v970_v9, %v961_v0 }
  0x97   :  { %1139 = vst.msk [vmem:[%s1927_s2 + $0x88] sm:$0x1] %vm143_vm1, %v972_v45 }

</bundles_post_ra>
